<compile_context>
chip_gen: v6e
topology: v6e:2x2x1
jax: 0.10.0
libtpu: 0.0.40
codegen_flags: <defaults>
</compile_context>

<pallas_src>
import math
from functools import partial

import jax
import jax.numpy as jnp
from jax.experimental import pallas as pl
from jax.experimental.pallas import tpu as pltpu


# ----------------------------------------------------------- kernel 1: QKV --
def _qkv_proj_kernel(x_ref, wqv_ref, wk_ref, bqv_ref, bk_ref, qv_ref, k_ref):
    """Fused QKV projection for one sample's rows.

    qv_ref : (rows, 2C)  -> [Q | V] columns (what the attention kernel reads)
    k_ref  : (rows,  C)  -> K columns (relayouted in JAX before call 2)
    """
    x = x_ref[...]
    qv = jnp.dot(x, wqv_ref[...], preferred_element_type=jnp.float32)
    k = jnp.dot(x, wk_ref[...], preferred_element_type=jnp.float32)
    qv_ref[...] = (qv + bqv_ref[...]).astype(qv_ref.dtype)
    k_ref[...] = (k + bk_ref[...]).astype(k_ref.dtype)


# ----------------------------------------- kernel 2: cross-frame attention --
def _cross_frame_attn_kernel(qv_ref, kt_ref, o_ref, *,
                             num_heads, video_len, C, hd, S, scale):
    """One grid step == one `batch_size` sample (all frames, all heads).

    qv_ref : (video_len*S, 2C)  [Q | V] projection rows of this sample
    kt_ref : (video_len*num_heads, S, hd)  K blocks, already re-interpreted so
             that kt[j, h, w] == k_flat[j][w*S + h] (the module's reshape)
    o_ref  : (S, video_len*C)   lane-dense output slab
    """
    nh = num_heads
    pieces = []
    # Output columns are ordered (frame f', head n') -> col f'*C + n'*hd, so we
    # iterate in that order and assemble one full-width row-slab in registers.
    for fp in range(video_len):                    # output frame slot f'
        for np_ in range(nh):                      # output head slot  n'
            rem = np_ * video_len + fp                         # '(b n f)' remainder
            rem_r = np_ * video_len + ((fp - 1) % video_len)   # rolled k/v slot
            fl, hq = rem // nh, rem % nh           # (input frame, proj head) for q
            fl_r, hk = rem_r // nh, rem_r % nh     # (input frame, proj head) for k,v

            q = qv_ref[fl * S:(fl + 1) * S, hq * hd:(hq + 1) * hd]          # (S, hd)
            v = qv_ref[fl_r * S:(fl_r + 1) * S,
                       C + hk * hd:C + (hk + 1) * hd]                        # (S, hd)
            kt = kt_ref[rem_r]                                               # (S, hd)

            a = q * kt * scale                      # elementwise "einsum"
            a = a - jnp.max(a, axis=-1, keepdims=True)
            e = jnp.exp(a)
            inv = pl.reciprocal(jnp.sum(e, axis=-1, keepdims=True), approx=True)
            pieces.append((e * inv) * v)            # softmax(hd) * v (elementwise)

    # Single unmasked lane-dense store (last dim = video_len*C, e.g. 128).
    o_ref[...] = jnp.concatenate(pieces, axis=-1).astype(o_ref.dtype)


# -------------------------------------------------------------- entry point --
def cross_frame_attention(x, w_qkv, b_qkv, *, num_heads, batch_size):
    """x: (B, H, W, C) with B = batch_size * video_length. Returns (B, H, W, C)."""
    B, H, W, C = x.shape
    assert B % batch_size == 0 and C % num_heads == 0
    F = B // batch_size                      # video_length
    S = H * W
    hd = C // num_heads
    assert S % 8 == 0 and (F * S) % 8 == 0   # TPU sublane tiling of the blocks
    scale = float(hd) ** -0.5

    x2d = x.reshape(B * S, C)                # free row-major reshape

    # Split the fused (C, 3C) weight into the [Q|V] part and the K part (tiny
    # one-time XLA slices; torch column order is [Q | K | V]).
    w_qv = jnp.concatenate([w_qkv[:, :C], w_qkv[:, 2 * C:]], axis=1)   # (C, 2C)
    w_k = w_qkv[:, C:2 * C]                                            # (C,  C)
    b_qv = jnp.concatenate([b_qkv[:C], b_qkv[2 * C:]]).reshape(1, 2 * C)
    b_k = b_qkv[C:2 * C].reshape(1, C)

    # ---- call 1: fused QKV projection, weights resident in VMEM ------------
    qv2d, k2d = pl.pallas_call(
        _qkv_proj_kernel,
        out_shape=(jax.ShapeDtypeStruct((B * S, 2 * C), jnp.float32),
                   jax.ShapeDtypeStruct((B * S, C), jnp.float32)),
        grid=(batch_size,),
        in_specs=[
            pl.BlockSpec((F * S, C), lambda i: (i, 0)),
            pl.BlockSpec((C, 2 * C), lambda i: (0, 0)),     # weights: resident
            pl.BlockSpec((C, C), lambda i: (0, 0)),
            pl.BlockSpec((1, 2 * C), lambda i: (0, 0)),     # biases:  resident
            pl.BlockSpec((1, C), lambda i: (0, 0)),
        ],
        out_specs=(pl.BlockSpec((F * S, 2 * C), lambda i: (i, 0)),
                   pl.BlockSpec((F * S, C), lambda i: (i, 0))),
        compiler_params=pltpu.CompilerParams(dimension_semantics=("parallel",)),
    )(x2d, w_qv, w_k, b_qv, b_k)

    # ---- the module's flat reinterpretation of the K block -----------------
    # torch: k.reshape(bs, nh, F, -1, H*W) re-reads each per-(frame,head)
    # (S, hd) buffer as (hd, S).  We additionally transpose so the kernel can
    # consume it with spatial on sublanes / hd on lanes:
    #   kt_all[bn, h, w] == k_flat[bn][w*S + h]
    # TODO(synk): this relayout stays at the JAX/XLA level (tiny array); Mosaic
    # has no reliable in-kernel reshape for this cross-lane reinterpretation.
    k_heads = k2d.reshape(B, S, num_heads, hd).transpose(0, 2, 1, 3)       # (B, nh, S, hd)
    kt_all = k_heads.reshape(B * num_heads, hd, S).transpose(0, 2, 1)      # (B*nh, S, hd)

    # ---- call 2: fused attention + output assembly --------------------------
    out2d = pl.pallas_call(
        partial(_cross_frame_attn_kernel, num_heads=num_heads, video_len=F,
                C=C, hd=hd, S=S, scale=scale),
        out_shape=jax.ShapeDtypeStruct((batch_size * S, F * C), jnp.float32),
        grid=(batch_size,),
        in_specs=[
            pl.BlockSpec((F * S, 2 * C), lambda i: (i, 0)),
            pl.BlockSpec((F * num_heads, S, hd), lambda i: (i, 0, 0)),
        ],
        out_specs=pl.BlockSpec((S, F * C), lambda i: (i, 0)),
        compiler_params=pltpu.CompilerParams(dimension_semantics=("parallel",)),
    )(qv2d, kt_all)

    # (bs*S, F*C) flat order coincides exactly with the module's .view +
    # 'b n f h w c -> (b f) h w (n c)' output layout -> one free reshape.
    return out2d.reshape(B, H, W, C)


# --------------------------------------------- pure-jnp (XLA) reference path --
def cross_frame_attention_ref(x, w_qkv, b_qkv, num_heads, batch_size):
    """Direct transcription of the PyTorch forward (einops rearrange == reshape)."""
    B, H, W, C = x.shape
    F = B // batch_size
    S = H * W
    hd = C // num_heads
    scale = hd ** -0.5

    qkv = x.reshape(B, S, C) @ w_qkv + b_qkv                               # (B, S, 3C)
    qkv = qkv.reshape(B, S, 3, num_heads, hd).transpose(2, 0, 3, 1, 4)
    qkv = qkv.reshape(3, B * num_heads, S, hd)
    q, k, v = qkv[0], qkv[1], qkv[2]

    q = q.reshape(batch_size, num_heads, F, H, W, hd)
    k = k.reshape(batch_size, num_heads, F, H, W, hd)
    v = v.reshape(batch_size, num_heads, F, H, W, hd)
    # q: cat of [:1] and [1:] is identity; k, v: roll last frame to the front
    k = jnp.roll(k, shift=1, axis=2)
    v = jnp.roll(v, shift=1, axis=2)

    q = q.reshape(batch_size, num_heads, F, S, hd)
    k = k.reshape(batch_size, num_heads, F, hd, S)        # flat reinterpretation
    v = v.reshape(batch_size, num_heads, F, S, hd)

    attn = jnp.einsum('bnfhw,bnfwh->bnhfw', q * scale, k)  # no contraction
    attn = jax.nn.softmax(attn, axis=-1)
    xo = jnp.einsum('bnhfw,bnfhw->bnhfw', attn, v)          # no contraction
    xo = xo.reshape(batch_size, num_heads, F, H, W, hd)     # torch .view
    # rearrange 'b n f h w c -> (b f) h w (n c)'
    xo = xo.transpose(0, 2, 3, 4, 1, 5).reshape(batch_size * F, H, W, num_heads * hd)
    return xo


# ------------------------------------------------------------------ params --
def init_params(key, input_dim):
    # torch nn.Linear(input_dim, 3*input_dim): weight stored here as (in, out).
    k1, k2 = jax.random.split(key)
    lim = 1.0 / math.sqrt(input_dim)
    w_qkv = jax.random.uniform(k1, (input_dim, 3 * input_dim), jnp.float32, -lim, lim)
    b_qkv = jax.random.uniform(k2, (3 * input_dim,), jnp.float32, -lim, lim)
    return w_qkv, b_qkv


if __name__ == "__main__":
    # Small shapes consistent with the module: input_dim=32, 4 heads,
    # batch_size=2, video_length=4 (B=8), 8x8 spatial -> S=64, F*C=128 lanes.
    INPUT_DIM, NUM_HEADS, BATCH_SIZE, MAX_FR = 32, 4, 2, 4
    H = W = 8
    B = BATCH_SIZE * MAX_FR

    key = jax.random.PRNGKey(0)
    kx, kp = jax.random.split(key)
    x = jax.random.normal(kx, (B, H, W, INPUT_DIM), jnp.float32)
    w_qkv, b_qkv = init_params(kp, INPUT_DIM)

    fwd = jax.jit(cross_frame_attention, static_argnames=("num_heads", "batch_size"))
    out = fwd(x, w_qkv, b_qkv, num_heads=NUM_HEADS, batch_size=BATCH_SIZE)
    out = jax.block_until_ready(out)
    assert out.shape == (B, H, W, INPUT_DIM) and out.dtype == jnp.float32

    # Validate the fused Pallas path against the straight XLA transcription.
    ref = jax.block_until_ready(
        cross_frame_attention_ref(x, w_qkv, b_qkv, NUM_HEADS, BATCH_SIZE))
    # loose tolerance only because of pl.reciprocal(approx=True) in the softmax
    assert jnp.allclose(out, ref, rtol=5e-2, atol=5e-2), \
        float(jnp.max(jnp.abs(out - ref)))

    print("KERNEL_OK")
</pallas_src>

<mosaic_0001>
module attributes {stable_mosaic.version = 11 : i64} {
  func.func @_qkv_proj_kernel(%arg0: i32, %arg1: memref<256x32xf32, #tpu.memory_space<vmem>>, %arg2: memref<32x64xf32, #tpu.memory_space<vmem>>, %arg3: memref<32x32xf32, #tpu.memory_space<vmem>>, %arg4: memref<1x64xf32, #tpu.memory_space<vmem>>, %arg5: memref<1x32xf32, #tpu.memory_space<vmem>>, %arg6: memref<256x64xf32, #tpu.memory_space<vmem>>, %arg7: memref<256x32xf32, #tpu.memory_space<vmem>>) attributes {dimension_semantics = [#tpu.dimension_semantics<parallel>], iteration_bounds = array<i64: 2>, scalar_prefetch = 0 : i64, scratch_operands = 0 : i64, tpu.core_type = #tpu.core_type<tc>, window_params = [{transform_indices = @transform_0, window_bounds = array<i64: 256, 32>}, {pipeline_mode = #tpu.pipeline_mode<synchronous>, transform_indices = @transform_1, window_bounds = array<i64: 32, 64>}, {pipeline_mode = #tpu.pipeline_mode<synchronous>, transform_indices = @transform_2, window_bounds = array<i64: 32, 32>}, {pipeline_mode = #tpu.pipeline_mode<synchronous>, transform_indices = @transform_3, window_bounds = array<i64: 1, 64>}, {pipeline_mode = #tpu.pipeline_mode<synchronous>, transform_indices = @transform_4, window_bounds = array<i64: 1, 32>}, {transform_indices = @transform_5, window_bounds = array<i64: 256, 64>}, {transform_indices = @transform_6, window_bounds = array<i64: 256, 32>}]} {
    %c0 = arith.constant 0 : index
    %c0_0 = arith.constant 0 : index
    %0 = vector.load %arg1[%c0, %c0_0] : memref<256x32xf32, #tpu.memory_space<vmem>>, vector<256x32xf32>
    %c0_1 = arith.constant 0 : index
    %c0_2 = arith.constant 0 : index
    %1 = vector.load %arg2[%c0_1, %c0_2] : memref<32x64xf32, #tpu.memory_space<vmem>>, vector<32x64xf32>
    %cst = arith.constant dense<0.000000e+00> : vector<256x64xf32>
    %2 = tpu.matmul %0, %1, %cst {dimension_numbers = #tpu.dot_dimension_numbers<[1], [0], [0], [1], [0, 0, 1, 1], [], []>} : vector<256x32xf32>, vector<32x64xf32>, vector<256x64xf32> -> vector<256x64xf32>
    %c0_3 = arith.constant 0 : index
    %c0_4 = arith.constant 0 : index
    %3 = vector.load %arg3[%c0_3, %c0_4] : memref<32x32xf32, #tpu.memory_space<vmem>>, vector<32x32xf32>
    %cst_5 = arith.constant dense<0.000000e+00> : vector<256x32xf32>
    %4 = tpu.matmul %0, %3, %cst_5 {dimension_numbers = #tpu.dot_dimension_numbers<[1], [0], [0], [1], [0, 0, 1, 1], [], []>} : vector<256x32xf32>, vector<32x32xf32>, vector<256x32xf32> -> vector<256x32xf32>
    %c0_6 = arith.constant 0 : index
    %c0_7 = arith.constant 0 : index
    %5 = vector.load %arg4[%c0_6, %c0_7] : memref<1x64xf32, #tpu.memory_space<vmem>>, vector<1x64xf32>
    %6 = vector.broadcast %5 : vector<1x64xf32> to vector<256x64xf32>
    %7 = arith.addf %2, %6 : vector<256x64xf32>
    %c0_8 = arith.constant 0 : index
    %c0_9 = arith.constant 0 : index
    %8 = vector.load %arg6[%c0_8, %c0_9] : memref<256x64xf32, #tpu.memory_space<vmem>>, vector<256x64xf32>
    tpu.vector_store %arg6[%c0_8, %c0_9], %7 {strides = array<i32>} : memref<256x64xf32, #tpu.memory_space<vmem>>, vector<256x64xf32>,
    %c0_10 = arith.constant 0 : index
    %c0_11 = arith.constant 0 : index
    %9 = vector.load %arg5[%c0_10, %c0_11] : memref<1x32xf32, #tpu.memory_space<vmem>>, vector<1x32xf32>
    %10 = vector.broadcast %9 : vector<1x32xf32> to vector<256x32xf32>
    %11 = arith.addf %4, %10 : vector<256x32xf32>
    %c0_12 = arith.constant 0 : index
    %c0_13 = arith.constant 0 : index
    %12 = vector.load %arg7[%c0_12, %c0_13] : memref<256x32xf32, #tpu.memory_space<vmem>>, vector<256x32xf32>
    tpu.vector_store %arg7[%c0_12, %c0_13], %11 {strides = array<i32>} : memref<256x32xf32, #tpu.memory_space<vmem>>, vector<256x32xf32>,
    return
  }
  func.func @transform_0(%arg0: i32) -> (i32, i32) {
    %c0_i32 = arith.constant 0 : i32
    %c0_i32_0 = arith.constant 0 : i32
    return %arg0, %c0_i32 : i32, i32
  }
  func.func @transform_1(%arg0: i32) -> (i32, i32) {
    %c0_i32 = arith.constant 0 : i32
    %c0_i32_0 = arith.constant 0 : i32
    %c0_i32_1 = arith.constant 0 : i32
    return %c0_i32, %c0_i32_0 : i32, i32
  }
  func.func @transform_2(%arg0: i32) -> (i32, i32) {
    %c0_i32 = arith.constant 0 : i32
    %c0_i32_0 = arith.constant 0 : i32
    %c0_i32_1 = arith.constant 0 : i32
    return %c0_i32, %c0_i32_0 : i32, i32
  }
  func.func @transform_3(%arg0: i32) -> (i32, i32) {
    %c0_i32 = arith.constant 0 : i32
    %c0_i32_0 = arith.constant 0 : i32
    %c0_i32_1 = arith.constant 0 : i32
    return %c0_i32, %c0_i32_0 : i32, i32
  }
  func.func @transform_4(%arg0: i32) -> (i32, i32) {
    %c0_i32 = arith.constant 0 : i32
    %c0_i32_0 = arith.constant 0 : i32
    %c0_i32_1 = arith.constant 0 : i32
    return %c0_i32, %c0_i32_0 : i32, i32
  }
  func.func @transform_5(%arg0: i32) -> (i32, i32) {
    %c0_i32 = arith.constant 0 : i32
    %c0_i32_0 = arith.constant 0 : i32
    return %arg0, %c0_i32 : i32, i32
  }
  func.func @transform_6(%arg0: i32) -> (i32, i32) {
    %c0_i32 = arith.constant 0 : i32
    %c0_i32_0 = arith.constant 0 : i32
    return %arg0, %c0_i32 : i32, i32
  }
}

module attributes {stable_mosaic.version = 11 : i64} {
  func.func @_cross_frame_attn_kernel(%arg0: i32, %arg1: memref<256x64xf32, #tpu.memory_space<vmem>>, %arg2: memref<16x64x8xf32, #tpu.memory_space<vmem>>, %arg3: memref<64x128xf32, #tpu.memory_space<vmem>>) attributes {dimension_semantics = [#tpu.dimension_semantics<parallel>], iteration_bounds = array<i64: 2>, scalar_prefetch = 0 : i64, scratch_operands = 0 : i64, tpu.core_type = #tpu.core_type<tc>, window_params = [{transform_indices = @transform_0, window_bounds = array<i64: 256, 64>}, {transform_indices = @transform_1, window_bounds = array<i64: 16, 64, 8>}, {transform_indices = @transform_2, window_bounds = array<i64: 64, 128>}]} {
    %c0 = arith.constant 0 : index
    %c0_0 = arith.constant 0 : index
    %0 = vector.load %arg1[%c0, %c0_0] : memref<256x64xf32, #tpu.memory_space<vmem>>, vector<64x8xf32>
    %c0_1 = arith.constant 0 : index
    %c56 = arith.constant 56 : index
    %1 = vector.load %arg1[%c0_1, %c56] : memref<256x64xf32, #tpu.memory_space<vmem>>, vector<64x8xf32>
    %c3 = arith.constant 3 : index
    %c0_2 = arith.constant 0 : index
    %c0_3 = arith.constant 0 : index
    %2 = vector.load %arg2[%c3, %c0_2, %c0_3] : memref<16x64x8xf32, #tpu.memory_space<vmem>>, vector<1x64x8xf32>
    %3 = vector.shape_cast %2 : vector<1x64x8xf32> to vector<64x8xf32>
    %4 = arith.mulf %0, %3 : vector<64x8xf32>
    %cst = arith.constant 0.353553385 : f32
    %5 = vector.broadcast %cst : f32 to vector<64x8xf32>
    %6 = arith.mulf %4, %5 : vector<64x8xf32>
    %cst_4 = arith.constant dense<0xFF800000> : vector<64xf32>
    %7 = vector.multi_reduction <maximumf>, %6, %cst_4 [1] : vector<64x8xf32> to vector<64xf32>
    %8 = vector.shape_cast %7 : vector<64xf32> to vector<64x1xf32>
    %9 = vector.broadcast %8 : vector<64x1xf32> to vector<64x8xf32>
    %10 = arith.subf %6, %9 : vector<64x8xf32>
    %11 = math.exp %10 : vector<64x8xf32>
    %cst_5 = arith.constant dense<0.000000e+00> : vector<64xf32>
    %12 = vector.multi_reduction <add>, %11, %cst_5 [1] : vector<64x8xf32> to vector<64xf32>
    %13 = vector.shape_cast %12 : vector<64xf32> to vector<64x1xf32>
    %14 = tpu.reciprocal %13 {approx = true} : vector<64x1xf32> -> vector<64x1xf32>
    %15 = vector.broadcast %14 : vector<64x1xf32> to vector<64x8xf32>
    %16 = arith.mulf %11, %15 : vector<64x8xf32>
    %17 = arith.mulf %16, %1 : vector<64x8xf32>
    %c64 = arith.constant 64 : index
    %c0_6 = arith.constant 0 : index
    %18 = vector.load %arg1[%c64, %c0_6] : memref<256x64xf32, #tpu.memory_space<vmem>>, vector<64x8xf32>
    %c64_7 = arith.constant 64 : index
    %c56_8 = arith.constant 56 : index
    %19 = vector.load %arg1[%c64_7, %c56_8] : memref<256x64xf32, #tpu.memory_space<vmem>>, vector<64x8xf32>
    %c7 = arith.constant 7 : index
    %c0_9 = arith.constant 0 : index
    %c0_10 = arith.constant 0 : index
    %20 = vector.load %arg2[%c7, %c0_9, %c0_10] : memref<16x64x8xf32, #tpu.memory_space<vmem>>, vector<1x64x8xf32>
    %21 = vector.shape_cast %20 : vector<1x64x8xf32> to vector<64x8xf32>
    %22 = arith.mulf %18, %21 : vector<64x8xf32>
    %cst_11 = arith.constant 0.353553385 : f32
    %23 = vector.broadcast %cst_11 : f32 to vector<64x8xf32>
    %24 = arith.mulf %22, %23 : vector<64x8xf32>
    %cst_12 = arith.constant dense<0xFF800000> : vector<64xf32>
    %25 = vector.multi_reduction <maximumf>, %24, %cst_12 [1] : vector<64x8xf32> to vector<64xf32>
    %26 = vector.shape_cast %25 : vector<64xf32> to vector<64x1xf32>
    %27 = vector.broadcast %26 : vector<64x1xf32> to vector<64x8xf32>
    %28 = arith.subf %24, %27 : vector<64x8xf32>
    %29 = math.exp %28 : vector<64x8xf32>
    %cst_13 = arith.constant dense<0.000000e+00> : vector<64xf32>
    %30 = vector.multi_reduction <add>, %29, %cst_13 [1] : vector<64x8xf32> to vector<64xf32>
    %31 = vector.shape_cast %30 : vector<64xf32> to vector<64x1xf32>
    %32 = tpu.reciprocal %31 {approx = true} : vector<64x1xf32> -> vector<64x1xf32>
    %33 = vector.broadcast %32 : vector<64x1xf32> to vector<64x8xf32>
    %34 = arith.mulf %29, %33 : vector<64x8xf32>
    %35 = arith.mulf %34, %19 : vector<64x8xf32>
    %c128 = arith.constant 128 : index
    %c0_14 = arith.constant 0 : index
    %36 = vector.load %arg1[%c128, %c0_14] : memref<256x64xf32, #tpu.memory_space<vmem>>, vector<64x8xf32>
    %c128_15 = arith.constant 128 : index
    %c56_16 = arith.constant 56 : index
    %37 = vector.load %arg1[%c128_15, %c56_16] : memref<256x64xf32, #tpu.memory_space<vmem>>, vector<64x8xf32>
    %c11 = arith.constant 11 : index
    %c0_17 = arith.constant 0 : index
    %c0_18 = arith.constant 0 : index
    %38 = vector.load %arg2[%c11, %c0_17, %c0_18] : memref<16x64x8xf32, #tpu.memory_space<vmem>>, vector<1x64x8xf32>
    %39 = vector.shape_cast %38 : vector<1x64x8xf32> to vector<64x8xf32>
    %40 = arith.mulf %36, %39 : vector<64x8xf32>
    %cst_19 = arith.constant 0.353553385 : f32
    %41 = vector.broadcast %cst_19 : f32 to vector<64x8xf32>
    %42 = arith.mulf %40, %41 : vector<64x8xf32>
    %cst_20 = arith.constant dense<0xFF800000> : vector<64xf32>
    %43 = vector.multi_reduction <maximumf>, %42, %cst_20 [1] : vector<64x8xf32> to vector<64xf32>
    %44 = vector.shape_cast %43 : vector<64xf32> to vector<64x1xf32>
    %45 = vector.broadcast %44 : vector<64x1xf32> to vector<64x8xf32>
    %46 = arith.subf %42, %45 : vector<64x8xf32>
    %47 = math.exp %46 : vector<64x8xf32>
    %cst_21 = arith.constant dense<0.000000e+00> : vector<64xf32>
    %48 = vector.multi_reduction <add>, %47, %cst_21 [1] : vector<64x8xf32> to vector<64xf32>
    %49 = vector.shape_cast %48 : vector<64xf32> to vector<64x1xf32>
    %50 = tpu.reciprocal %49 {approx = true} : vector<64x1xf32> -> vector<64x1xf32>
    %51 = vector.broadcast %50 : vector<64x1xf32> to vector<64x8xf32>
    %52 = arith.mulf %47, %51 : vector<64x8xf32>
    %53 = arith.mulf %52, %37 : vector<64x8xf32>
    %c192 = arith.constant 192 : index
    %c0_22 = arith.constant 0 : index
    %54 = vector.load %arg1[%c192, %c0_22] : memref<256x64xf32, #tpu.memory_space<vmem>>, vector<64x8xf32>
    %c192_23 = arith.constant 192 : index
    %c56_24 = arith.constant 56 : index
    %55 = vector.load %arg1[%c192_23, %c56_24] : memref<256x64xf32, #tpu.memory_space<vmem>>, vector<64x8xf32>
    %c15 = arith.constant 15 : index
    %c0_25 = arith.constant 0 : index
    %c0_26 = arith.constant 0 : index
    %56 = vector.load %arg2[%c15, %c0_25, %c0_26] : memref<16x64x8xf32, #tpu.memory_space<vmem>>, vector<1x64x8xf32>
    %57 = vector.shape_cast %56 : vector<1x64x8xf32> to vector<64x8xf32>
    %58 = arith.mulf %54, %57 : vector<64x8xf32>
    %cst_27 = arith.constant 0.353553385 : f32
    %59 = vector.broadcast %cst_27 : f32 to vector<64x8xf32>
    %60 = arith.mulf %58, %59 : vector<64x8xf32>
    %cst_28 = arith.constant dense<0xFF800000> : vector<64xf32>
    %61 = vector.multi_reduction <maximumf>, %60, %cst_28 [1] : vector<64x8xf32> to vector<64xf32>
    %62 = vector.shape_cast %61 : vector<64xf32> to vector<64x1xf32>
    %63 = vector.broadcast %62 : vector<64x1xf32> to vector<64x8xf32>
    %64 = arith.subf %60, %63 : vector<64x8xf32>
    %65 = math.exp %64 : vector<64x8xf32>
    %cst_29 = arith.constant dense<0.000000e+00> : vector<64xf32>
    %66 = vector.multi_reduction <add>, %65, %cst_29 [1] : vector<64x8xf32> to vector<64xf32>
    %67 = vector.shape_cast %66 : vector<64xf32> to vector<64x1xf32>
    %68 = tpu.reciprocal %67 {approx = true} : vector<64x1xf32> -> vector<64x1xf32>
    %69 = vector.broadcast %68 : vector<64x1xf32> to vector<64x8xf32>
    %70 = arith.mulf %65, %69 : vector<64x8xf32>
    %71 = arith.mulf %70, %55 : vector<64x8xf32>
    %c0_30 = arith.constant 0 : index
    %c8 = arith.constant 8 : index
    %72 = vector.load %arg1[%c0_30, %c8] : memref<256x64xf32, #tpu.memory_space<vmem>>, vector<64x8xf32>
    %c0_31 = arith.constant 0 : index
    %c32 = arith.constant 32 : index
    %73 = vector.load %arg1[%c0_31, %c32] : memref<256x64xf32, #tpu.memory_space<vmem>>, vector<64x8xf32>
    %c0_32 = arith.constant 0 : index
    %c0_33 = arith.constant 0 : index
    %c0_34 = arith.constant 0 : index
    %74 = vector.load %arg2[%c0_32, %c0_33, %c0_34] : memref<16x64x8xf32, #tpu.memory_space<vmem>>, vector<1x64x8xf32>
    %75 = vector.shape_cast %74 : vector<1x64x8xf32> to vector<64x8xf32>
    %76 = arith.mulf %72, %75 : vector<64x8xf32>
    %cst_35 = arith.constant 0.353553385 : f32
    %77 = vector.broadcast %cst_35 : f32 to vector<64x8xf32>
    %78 = arith.mulf %76, %77 : vector<64x8xf32>
    %cst_36 = arith.constant dense<0xFF800000> : vector<64xf32>
    %79 = vector.multi_reduction <maximumf>, %78, %cst_36 [1] : vector<64x8xf32> to vector<64xf32>
    %80 = vector.shape_cast %79 : vector<64xf32> to vector<64x1xf32>
    %81 = vector.broadcast %80 : vector<64x1xf32> to vector<64x8xf32>
    %82 = arith.subf %78, %81 : vector<64x8xf32>
    %83 = math.exp %82 : vector<64x8xf32>
    %cst_37 = arith.constant dense<0.000000e+00> : vector<64xf32>
    %84 = vector.multi_reduction <add>, %83, %cst_37 [1] : vector<64x8xf32> to vector<64xf32>
    %85 = vector.shape_cast %84 : vector<64xf32> to vector<64x1xf32>
    %86 = tpu.reciprocal %85 {approx = true} : vector<64x1xf32> -> vector<64x1xf32>
    %87 = vector.broadcast %86 : vector<64x1xf32> to vector<64x8xf32>
    %88 = arith.mulf %83, %87 : vector<64x8xf32>
    %89 = arith.mulf %88, %73 : vector<64x8xf32>
    %c64_38 = arith.constant 64 : index
    %c8_39 = arith.constant 8 : index
    %90 = vector.load %arg1[%c64_38, %c8_39] : memref<256x64xf32, #tpu.memory_space<vmem>>, vector<64x8xf32>
    %c64_40 = arith.constant 64 : index
    %c32_41 = arith.constant 32 : index
    %91 = vector.load %arg1[%c64_40, %c32_41] : memref<256x64xf32, #tpu.memory_space<vmem>>, vector<64x8xf32>
    %c4 = arith.constant 4 : index
    %c0_42 = arith.constant 0 : index
    %c0_43 = arith.constant 0 : index
    %92 = vector.load %arg2[%c4, %c0_42, %c0_43] : memref<16x64x8xf32, #tpu.memory_space<vmem>>, vector<1x64x8xf32>
    %93 = vector.shape_cast %92 : vector<1x64x8xf32> to vector<64x8xf32>
    %94 = arith.mulf %90, %93 : vector<64x8xf32>
    %cst_44 = arith.constant 0.353553385 : f32
    %95 = vector.broadcast %cst_44 : f32 to vector<64x8xf32>
    %96 = arith.mulf %94, %95 : vector<64x8xf32>
    %cst_45 = arith.constant dense<0xFF800000> : vector<64xf32>
    %97 = vector.multi_reduction <maximumf>, %96, %cst_45 [1] : vector<64x8xf32> to vector<64xf32>
    %98 = vector.shape_cast %97 : vector<64xf32> to vector<64x1xf32>
    %99 = vector.broadcast %98 : vector<64x1xf32> to vector<64x8xf32>
    %100 = arith.subf %96, %99 : vector<64x8xf32>
    %101 = math.exp %100 : vector<64x8xf32>
    %cst_46 = arith.constant dense<0.000000e+00> : vector<64xf32>
    %102 = vector.multi_reduction <add>, %101, %cst_46 [1] : vector<64x8xf32> to vector<64xf32>
    %103 = vector.shape_cast %102 : vector<64xf32> to vector<64x1xf32>
    %104 = tpu.reciprocal %103 {approx = true} : vector<64x1xf32> -> vector<64x1xf32>
    %105 = vector.broadcast %104 : vector<64x1xf32> to vector<64x8xf32>
    %106 = arith.mulf %101, %105 : vector<64x8xf32>
    %107 = arith.mulf %106, %91 : vector<64x8xf32>
    %c128_47 = arith.constant 128 : index
    %c8_48 = arith.constant 8 : index
    %108 = vector.load %arg1[%c128_47, %c8_48] : memref<256x64xf32, #tpu.memory_space<vmem>>, vector<64x8xf32>
    %c128_49 = arith.constant 128 : index
    %c32_50 = arith.constant 32 : index
    %109 = vector.load %arg1[%c128_49, %c32_50] : memref<256x64xf32, #tpu.memory_space<vmem>>, vector<64x8xf32>
    %c8_51 = arith.constant 8 : index
    %c0_52 = arith.constant 0 : index
    %c0_53 = arith.constant 0 : index
    %110 = vector.load %arg2[%c8_51, %c0_52, %c0_53] : memref<16x64x8xf32, #tpu.memory_space<vmem>>, vector<1x64x8xf32>
    %111 = vector.shape_cast %110 : vector<1x64x8xf32> to vector<64x8xf32>
    %112 = arith.mulf %108, %111 : vector<64x8xf32>
    %cst_54 = arith.constant 0.353553385 : f32
    %113 = vector.broadcast %cst_54 : f32 to vector<64x8xf32>
    %114 = arith.mulf %112, %113 : vector<64x8xf32>
    %cst_55 = arith.constant dense<0xFF800000> : vector<64xf32>
    %115 = vector.multi_reduction <maximumf>, %114, %cst_55 [1] : vector<64x8xf32> to vector<64xf32>
    %116 = vector.shape_cast %115 : vector<64xf32> to vector<64x1xf32>
    %117 = vector.broadcast %116 : vector<64x1xf32> to vector<64x8xf32>
    %118 = arith.subf %114, %117 : vector<64x8xf32>
    %119 = math.exp %118 : vector<64x8xf32>
    %cst_56 = arith.constant dense<0.000000e+00> : vector<64xf32>
    %120 = vector.multi_reduction <add>, %119, %cst_56 [1] : vector<64x8xf32> to vector<64xf32>
    %121 = vector.shape_cast %120 : vector<64xf32> to vector<64x1xf32>
    %122 = tpu.reciprocal %121 {approx = true} : vector<64x1xf32> -> vector<64x1xf32>
    %123 = vector.broadcast %122 : vector<64x1xf32> to vector<64x8xf32>
    %124 = arith.mulf %119, %123 : vector<64x8xf32>
    %125 = arith.mulf %124, %109 : vector<64x8xf32>
    %c192_57 = arith.constant 192 : index
    %c8_58 = arith.constant 8 : index
    %126 = vector.load %arg1[%c192_57, %c8_58] : memref<256x64xf32, #tpu.memory_space<vmem>>, vector<64x8xf32>
    %c192_59 = arith.constant 192 : index
    %c32_60 = arith.constant 32 : index
    %127 = vector.load %arg1[%c192_59, %c32_60] : memref<256x64xf32, #tpu.memory_space<vmem>>, vector<64x8xf32>
    %c12 = arith.constant 12 : index
    %c0_61 = arith.constant 0 : index
    %c0_62 = arith.constant 0 : index
    %128 = vector.load %arg2[%c12, %c0_61, %c0_62] : memref<16x64x8xf32, #tpu.memory_space<vmem>>, vector<1x64x8xf32>
    %129 = vector.shape_cast %128 : vector<1x64x8xf32> to vector<64x8xf32>
    %130 = arith.mulf %126, %129 : vector<64x8xf32>
    %cst_63 = arith.constant 0.353553385 : f32
    %131 = vector.broadcast %cst_63 : f32 to vector<64x8xf32>
    %132 = arith.mulf %130, %131 : vector<64x8xf32>
    %cst_64 = arith.constant dense<0xFF800000> : vector<64xf32>
    %133 = vector.multi_reduction <maximumf>, %132, %cst_64 [1] : vector<64x8xf32> to vector<64xf32>
    %134 = vector.shape_cast %133 : vector<64xf32> to vector<64x1xf32>
    %135 = vector.broadcast %134 : vector<64x1xf32> to vector<64x8xf32>
    %136 = arith.subf %132, %135 : vector<64x8xf32>
    %137 = math.exp %136 : vector<64x8xf32>
    %cst_65 = arith.constant dense<0.000000e+00> : vector<64xf32>
    %138 = vector.multi_reduction <add>, %137, %cst_65 [1] : vector<64x8xf32> to vector<64xf32>
    %139 = vector.shape_cast %138 : vector<64xf32> to vector<64x1xf32>
    %140 = tpu.reciprocal %139 {approx = true} : vector<64x1xf32> -> vector<64x1xf32>
    %141 = vector.broadcast %140 : vector<64x1xf32> to vector<64x8xf32>
    %142 = arith.mulf %137, %141 : vector<64x8xf32>
    %143 = arith.mulf %142, %127 : vector<64x8xf32>
    %c0_66 = arith.constant 0 : index
    %c16 = arith.constant 16 : index
    %144 = vector.load %arg1[%c0_66, %c16] : memref<256x64xf32, #tpu.memory_space<vmem>>, vector<64x8xf32>
    %c0_67 = arith.constant 0 : index
    %c40 = arith.constant 40 : index
    %145 = vector.load %arg1[%c0_67, %c40] : memref<256x64xf32, #tpu.memory_space<vmem>>, vector<64x8xf32>
    %c1 = arith.constant 1 : index
    %c0_68 = arith.constant 0 : index
    %c0_69 = arith.constant 0 : index
    %146 = vector.load %arg2[%c1, %c0_68, %c0_69] : memref<16x64x8xf32, #tpu.memory_space<vmem>>, vector<1x64x8xf32>
    %147 = vector.shape_cast %146 : vector<1x64x8xf32> to vector<64x8xf32>
    %148 = arith.mulf %144, %147 : vector<64x8xf32>
    %cst_70 = arith.constant 0.353553385 : f32
    %149 = vector.broadcast %cst_70 : f32 to vector<64x8xf32>
    %150 = arith.mulf %148, %149 : vector<64x8xf32>
    %cst_71 = arith.constant dense<0xFF800000> : vector<64xf32>
    %151 = vector.multi_reduction <maximumf>, %150, %cst_71 [1] : vector<64x8xf32> to vector<64xf32>
    %152 = vector.shape_cast %151 : vector<64xf32> to vector<64x1xf32>
    %153 = vector.broadcast %152 : vector<64x1xf32> to vector<64x8xf32>
    %154 = arith.subf %150, %153 : vector<64x8xf32>
    %155 = math.exp %154 : vector<64x8xf32>
    %cst_72 = arith.constant dense<0.000000e+00> : vector<64xf32>
    %156 = vector.multi_reduction <add>, %155, %cst_72 [1] : vector<64x8xf32> to vector<64xf32>
    %157 = vector.shape_cast %156 : vector<64xf32> to vector<64x1xf32>
    %158 = tpu.reciprocal %157 {approx = true} : vector<64x1xf32> -> vector<64x1xf32>
    %159 = vector.broadcast %158 : vector<64x1xf32> to vector<64x8xf32>
    %160 = arith.mulf %155, %159 : vector<64x8xf32>
    %161 = arith.mulf %160, %145 : vector<64x8xf32>
    %c64_73 = arith.constant 64 : index
    %c16_74 = arith.constant 16 : index
    %162 = vector.load %arg1[%c64_73, %c16_74] : memref<256x64xf32, #tpu.memory_space<vmem>>, vector<64x8xf32>
    %c64_75 = arith.constant 64 : index
    %c40_76 = arith.constant 40 : index
    %163 = vector.load %arg1[%c64_75, %c40_76] : memref<256x64xf32, #tpu.memory_space<vmem>>, vector<64x8xf32>
    %c5 = arith.constant 5 : index
    %c0_77 = arith.constant 0 : index
    %c0_78 = arith.constant 0 : index
    %164 = vector.load %arg2[%c5, %c0_77, %c0_78] : memref<16x64x8xf32, #tpu.memory_space<vmem>>, vector<1x64x8xf32>
    %165 = vector.shape_cast %164 : vector<1x64x8xf32> to vector<64x8xf32>
    %166 = arith.mulf %162, %165 : vector<64x8xf32>
    %cst_79 = arith.constant 0.353553385 : f32
    %167 = vector.broadcast %cst_79 : f32 to vector<64x8xf32>
    %168 = arith.mulf %166, %167 : vector<64x8xf32>
    %cst_80 = arith.constant dense<0xFF800000> : vector<64xf32>
    %169 = vector.multi_reduction <maximumf>, %168, %cst_80 [1] : vector<64x8xf32> to vector<64xf32>
    %170 = vector.shape_cast %169 : vector<64xf32> to vector<64x1xf32>
    %171 = vector.broadcast %170 : vector<64x1xf32> to vector<64x8xf32>
    %172 = arith.subf %168, %171 : vector<64x8xf32>
    %173 = math.exp %172 : vector<64x8xf32>
    %cst_81 = arith.constant dense<0.000000e+00> : vector<64xf32>
    %174 = vector.multi_reduction <add>, %173, %cst_81 [1] : vector<64x8xf32> to vector<64xf32>
    %175 = vector.shape_cast %174 : vector<64xf32> to vector<64x1xf32>
    %176 = tpu.reciprocal %175 {approx = true} : vector<64x1xf32> -> vector<64x1xf32>
    %177 = vector.broadcast %176 : vector<64x1xf32> to vector<64x8xf32>
    %178 = arith.mulf %173, %177 : vector<64x8xf32>
    %179 = arith.mulf %178, %163 : vector<64x8xf32>
    %c128_82 = arith.constant 128 : index
    %c16_83 = arith.constant 16 : index
    %180 = vector.load %arg1[%c128_82, %c16_83] : memref<256x64xf32, #tpu.memory_space<vmem>>, vector<64x8xf32>
    %c128_84 = arith.constant 128 : index
    %c40_85 = arith.constant 40 : index
    %181 = vector.load %arg1[%c128_84, %c40_85] : memref<256x64xf32, #tpu.memory_space<vmem>>, vector<64x8xf32>
    %c9 = arith.constant 9 : index
    %c0_86 = arith.constant 0 : index
    %c0_87 = arith.constant 0 : index
    %182 = vector.load %arg2[%c9, %c0_86, %c0_87] : memref<16x64x8xf32, #tpu.memory_space<vmem>>, vector<1x64x8xf32>
    %183 = vector.shape_cast %182 : vector<1x64x8xf32> to vector<64x8xf32>
    %184 = arith.mulf %180, %183 : vector<64x8xf32>
    %cst_88 = arith.constant 0.353553385 : f32
    %185 = vector.broadcast %cst_88 : f32 to vector<64x8xf32>
    %186 = arith.mulf %184, %185 : vector<64x8xf32>
    %cst_89 = arith.constant dense<0xFF800000> : vector<64xf32>
    %187 = vector.multi_reduction <maximumf>, %186, %cst_89 [1] : vector<64x8xf32> to vector<64xf32>
    %188 = vector.shape_cast %187 : vector<64xf32> to vector<64x1xf32>
    %189 = vector.broadcast %188 : vector<64x1xf32> to vector<64x8xf32>
    %190 = arith.subf %186, %189 : vector<64x8xf32>
    %191 = math.exp %190 : vector<64x8xf32>
    %cst_90 = arith.constant dense<0.000000e+00> : vector<64xf32>
    %192 = vector.multi_reduction <add>, %191, %cst_90 [1] : vector<64x8xf32> to vector<64xf32>
    %193 = vector.shape_cast %192 : vector<64xf32> to vector<64x1xf32>
    %194 = tpu.reciprocal %193 {approx = true} : vector<64x1xf32> -> vector<64x1xf32>
    %195 = vector.broadcast %194 : vector<64x1xf32> to vector<64x8xf32>
    %196 = arith.mulf %191, %195 : vector<64x8xf32>
    %197 = arith.mulf %196, %181 : vector<64x8xf32>
    %c192_91 = arith.constant 192 : index
    %c16_92 = arith.constant 16 : index
    %198 = vector.load %arg1[%c192_91, %c16_92] : memref<256x64xf32, #tpu.memory_space<vmem>>, vector<64x8xf32>
    %c192_93 = arith.constant 192 : index
    %c40_94 = arith.constant 40 : index
    %199 = vector.load %arg1[%c192_93, %c40_94] : memref<256x64xf32, #tpu.memory_space<vmem>>, vector<64x8xf32>
    %c13 = arith.constant 13 : index
    %c0_95 = arith.constant 0 : index
    %c0_96 = arith.constant 0 : index
    %200 = vector.load %arg2[%c13, %c0_95, %c0_96] : memref<16x64x8xf32, #tpu.memory_space<vmem>>, vector<1x64x8xf32>
    %201 = vector.shape_cast %200 : vector<1x64x8xf32> to vector<64x8xf32>
    %202 = arith.mulf %198, %201 : vector<64x8xf32>
    %cst_97 = arith.constant 0.353553385 : f32
    %203 = vector.broadcast %cst_97 : f32 to vector<64x8xf32>
    %204 = arith.mulf %202, %203 : vector<64x8xf32>
    %cst_98 = arith.constant dense<0xFF800000> : vector<64xf32>
    %205 = vector.multi_reduction <maximumf>, %204, %cst_98 [1] : vector<64x8xf32> to vector<64xf32>
    %206 = vector.shape_cast %205 : vector<64xf32> to vector<64x1xf32>
    %207 = vector.broadcast %206 : vector<64x1xf32> to vector<64x8xf32>
    %208 = arith.subf %204, %207 : vector<64x8xf32>
    %209 = math.exp %208 : vector<64x8xf32>
    %cst_99 = arith.constant dense<0.000000e+00> : vector<64xf32>
    %210 = vector.multi_reduction <add>, %209, %cst_99 [1] : vector<64x8xf32> to vector<64xf32>
    %211 = vector.shape_cast %210 : vector<64xf32> to vector<64x1xf32>
    %212 = tpu.reciprocal %211 {approx = true} : vector<64x1xf32> -> vector<64x1xf32>
    %213 = vector.broadcast %212 : vector<64x1xf32> to vector<64x8xf32>
    %214 = arith.mulf %209, %213 : vector<64x8xf32>
    %215 = arith.mulf %214, %199 : vector<64x8xf32>
    %c0_100 = arith.constant 0 : index
    %c24 = arith.constant 24 : index
    %216 = vector.load %arg1[%c0_100, %c24] : memref<256x64xf32, #tpu.memory_space<vmem>>, vector<64x8xf32>
    %c0_101 = arith.constant 0 : index
    %c48 = arith.constant 48 : index
    %217 = vector.load %arg1[%c0_101, %c48] : memref<256x64xf32, #tpu.memory_space<vmem>>, vector<64x8xf32>
    %c2 = arith.constant 2 : index
    %c0_102 = arith.constant 0 : index
    %c0_103 = arith.constant 0 : index
    %218 = vector.load %arg2[%c2, %c0_102, %c0_103] : memref<16x64x8xf32, #tpu.memory_space<vmem>>, vector<1x64x8xf32>
    %219 = vector.shape_cast %218 : vector<1x64x8xf32> to vector<64x8xf32>
    %220 = arith.mulf %216, %219 : vector<64x8xf32>
    %cst_104 = arith.constant 0.353553385 : f32
    %221 = vector.broadcast %cst_104 : f32 to vector<64x8xf32>
    %222 = arith.mulf %220, %221 : vector<64x8xf32>
    %cst_105 = arith.constant dense<0xFF800000> : vector<64xf32>
    %223 = vector.multi_reduction <maximumf>, %222, %cst_105 [1] : vector<64x8xf32> to vector<64xf32>
    %224 = vector.shape_cast %223 : vector<64xf32> to vector<64x1xf32>
    %225 = vector.broadcast %224 : vector<64x1xf32> to vector<64x8xf32>
    %226 = arith.subf %222, %225 : vector<64x8xf32>
    %227 = math.exp %226 : vector<64x8xf32>
    %cst_106 = arith.constant dense<0.000000e+00> : vector<64xf32>
    %228 = vector.multi_reduction <add>, %227, %cst_106 [1] : vector<64x8xf32> to vector<64xf32>
    %229 = vector.shape_cast %228 : vector<64xf32> to vector<64x1xf32>
    %230 = tpu.reciprocal %229 {approx = true} : vector<64x1xf32> -> vector<64x1xf32>
    %231 = vector.broadcast %230 : vector<64x1xf32> to vector<64x8xf32>
    %232 = arith.mulf %227, %231 : vector<64x8xf32>
    %233 = arith.mulf %232, %217 : vector<64x8xf32>
    %c64_107 = arith.constant 64 : index
    %c24_108 = arith.constant 24 : index
    %234 = vector.load %arg1[%c64_107, %c24_108] : memref<256x64xf32, #tpu.memory_space<vmem>>, vector<64x8xf32>
    %c64_109 = arith.constant 64 : index
    %c48_110 = arith.constant 48 : index
    %235 = vector.load %arg1[%c64_109, %c48_110] : memref<256x64xf32, #tpu.memory_space<vmem>>, vector<64x8xf32>
    %c6 = arith.constant 6 : index
    %c0_111 = arith.constant 0 : index
    %c0_112 = arith.constant 0 : index
    %236 = vector.load %arg2[%c6, %c0_111, %c0_112] : memref<16x64x8xf32, #tpu.memory_space<vmem>>, vector<1x64x8xf32>
    %237 = vector.shape_cast %236 : vector<1x64x8xf32> to vector<64x8xf32>
    %238 = arith.mulf %234, %237 : vector<64x8xf32>
    %cst_113 = arith.constant 0.353553385 : f32
    %239 = vector.broadcast %cst_113 : f32 to vector<64x8xf32>
    %240 = arith.mulf %238, %239 : vector<64x8xf32>
    %cst_114 = arith.constant dense<0xFF800000> : vector<64xf32>
    %241 = vector.multi_reduction <maximumf>, %240, %cst_114 [1] : vector<64x8xf32> to vector<64xf32>
    %242 = vector.shape_cast %241 : vector<64xf32> to vector<64x1xf32>
    %243 = vector.broadcast %242 : vector<64x1xf32> to vector<64x8xf32>
    %244 = arith.subf %240, %243 : vector<64x8xf32>
    %245 = math.exp %244 : vector<64x8xf32>
    %cst_115 = arith.constant dense<0.000000e+00> : vector<64xf32>
    %246 = vector.multi_reduction <add>, %245, %cst_115 [1] : vector<64x8xf32> to vector<64xf32>
    %247 = vector.shape_cast %246 : vector<64xf32> to vector<64x1xf32>
    %248 = tpu.reciprocal %247 {approx = true} : vector<64x1xf32> -> vector<64x1xf32>
    %249 = vector.broadcast %248 : vector<64x1xf32> to vector<64x8xf32>
    %250 = arith.mulf %245, %249 : vector<64x8xf32>
    %251 = arith.mulf %250, %235 : vector<64x8xf32>
    %c128_116 = arith.constant 128 : index
    %c24_117 = arith.constant 24 : index
    %252 = vector.load %arg1[%c128_116, %c24_117] : memref<256x64xf32, #tpu.memory_space<vmem>>, vector<64x8xf32>
    %c128_118 = arith.constant 128 : index
    %c48_119 = arith.constant 48 : index
    %253 = vector.load %arg1[%c128_118, %c48_119] : memref<256x64xf32, #tpu.memory_space<vmem>>, vector<64x8xf32>
    %c10 = arith.constant 10 : index
    %c0_120 = arith.constant 0 : index
    %c0_121 = arith.constant 0 : index
    %254 = vector.load %arg2[%c10, %c0_120, %c0_121] : memref<16x64x8xf32, #tpu.memory_space<vmem>>, vector<1x64x8xf32>
    %255 = vector.shape_cast %254 : vector<1x64x8xf32> to vector<64x8xf32>
    %256 = arith.mulf %252, %255 : vector<64x8xf32>
    %cst_122 = arith.constant 0.353553385 : f32
    %257 = vector.broadcast %cst_122 : f32 to vector<64x8xf32>
    %258 = arith.mulf %256, %257 : vector<64x8xf32>
    %cst_123 = arith.constant dense<0xFF800000> : vector<64xf32>
    %259 = vector.multi_reduction <maximumf>, %258, %cst_123 [1] : vector<64x8xf32> to vector<64xf32>
    %260 = vector.shape_cast %259 : vector<64xf32> to vector<64x1xf32>
    %261 = vector.broadcast %260 : vector<64x1xf32> to vector<64x8xf32>
    %262 = arith.subf %258, %261 : vector<64x8xf32>
    %263 = math.exp %262 : vector<64x8xf32>
    %cst_124 = arith.constant dense<0.000000e+00> : vector<64xf32>
    %264 = vector.multi_reduction <add>, %263, %cst_124 [1] : vector<64x8xf32> to vector<64xf32>
    %265 = vector.shape_cast %264 : vector<64xf32> to vector<64x1xf32>
    %266 = tpu.reciprocal %265 {approx = true} : vector<64x1xf32> -> vector<64x1xf32>
    %267 = vector.broadcast %266 : vector<64x1xf32> to vector<64x8xf32>
    %268 = arith.mulf %263, %267 : vector<64x8xf32>
    %269 = arith.mulf %268, %253 : vector<64x8xf32>
    %c192_125 = arith.constant 192 : index
    %c24_126 = arith.constant 24 : index
    %270 = vector.load %arg1[%c192_125, %c24_126] : memref<256x64xf32, #tpu.memory_space<vmem>>, vector<64x8xf32>
    %c192_127 = arith.constant 192 : index
    %c48_128 = arith.constant 48 : index
    %271 = vector.load %arg1[%c192_127, %c48_128] : memref<256x64xf32, #tpu.memory_space<vmem>>, vector<64x8xf32>
    %c14 = arith.constant 14 : index
    %c0_129 = arith.constant 0 : index
    %c0_130 = arith.constant 0 : index
    %272 = vector.load %arg2[%c14, %c0_129, %c0_130] : memref<16x64x8xf32, #tpu.memory_space<vmem>>, vector<1x64x8xf32>
    %273 = vector.shape_cast %272 : vector<1x64x8xf32> to vector<64x8xf32>
    %274 = arith.mulf %270, %273 : vector<64x8xf32>
    %cst_131 = arith.constant 0.353553385 : f32
    %275 = vector.broadcast %cst_131 : f32 to vector<64x8xf32>
    %276 = arith.mulf %274, %275 : vector<64x8xf32>
    %cst_132 = arith.constant dense<0xFF800000> : vector<64xf32>
    %277 = vector.multi_reduction <maximumf>, %276, %cst_132 [1] : vector<64x8xf32> to vector<64xf32>
    %278 = vector.shape_cast %277 : vector<64xf32> to vector<64x1xf32>
    %279 = vector.broadcast %278 : vector<64x1xf32> to vector<64x8xf32>
    %280 = arith.subf %276, %279 : vector<64x8xf32>
    %281 = math.exp %280 : vector<64x8xf32>
    %cst_133 = arith.constant dense<0.000000e+00> : vector<64xf32>
    %282 = vector.multi_reduction <add>, %281, %cst_133 [1] : vector<64x8xf32> to vector<64xf32>
    %283 = vector.shape_cast %282 : vector<64xf32> to vector<64x1xf32>
    %284 = tpu.reciprocal %283 {approx = true} : vector<64x1xf32> -> vector<64x1xf32>
    %285 = vector.broadcast %284 : vector<64x1xf32> to vector<64x8xf32>
    %286 = arith.mulf %281, %285 : vector<64x8xf32>
    %287 = arith.mulf %286, %271 : vector<64x8xf32>
    %288 = tpu.concatenate %17, %35, %53, %71, %89, %107, %125, %143, %161, %179, %197, %215, %233, %251, %269, %287 in 1 : vector<64x8xf32>, vector<64x8xf32>, vector<64x8xf32>, vector<64x8xf32>, vector<64x8xf32>, vector<64x8xf32>, vector<64x8xf32>, vector<64x8xf32>, vector<64x8xf32>, vector<64x8xf32>, vector<64x8xf32>, vector<64x8xf32>, vector<64x8xf32>, vector<64x8xf32>, vector<64x8xf32>, vector<64x8xf32> -> vector<64x128xf32>
    %c0_134 = arith.constant 0 : index
    %c0_135 = arith.constant 0 : index
    %289 = vector.load %arg3[%c0_134, %c0_135] : memref<64x128xf32, #tpu.memory_space<vmem>>, vector<64x128xf32>
    tpu.vector_store %arg3[%c0_134, %c0_135], %288 {strides = array<i32>} : memref<64x128xf32, #tpu.memory_space<vmem>>, vector<64x128xf32>,
    return
  }
  func.func @transform_0(%arg0: i32) -> (i32, i32) {
    %c0_i32 = arith.constant 0 : i32
    %c0_i32_0 = arith.constant 0 : i32
    return %arg0, %c0_i32 : i32, i32
  }
  func.func @transform_1(%arg0: i32) -> (i32, i32, i32) {
    %c0_i32 = arith.constant 0 : i32
    %c0_i32_0 = arith.constant 0 : i32
    %c0_i32_1 = arith.constant 0 : i32
    return %arg0, %c0_i32, %c0_i32_0 : i32, i32, i32
  }
  func.func @transform_2(%arg0: i32) -> (i32, i32) {
    %c0_i32 = arith.constant 0 : i32
    %c0_i32_0 = arith.constant 0 : i32
    return %arg0, %c0_i32 : i32, i32
  }
}

</mosaic_0001>

<bundles_post_ra>
// kernel: cross_frame_attention.2
= control target key start
LH: loop header
LB: loop body
LE: loop exit
PB: predicated region body
PF: predicated region fallthrough
CT: control target
= control target key end

     0   :  { %12 = vsyncpa [#allocation3], 0  ;;  %s1895_s0 = inlined_call_operand.hbm [shape: f32[512,32], index: 0, kind: input, shape index: {}]   ;;  %s1896_s1 = inlined_call_operand.vmem [shape: f32[32,64], index: 1, kind: input, shape index: {}]   ;;  %s1897_s2 = inlined_call_operand.vmem [shape: f32[32,32], index: 2, kind: input, shape index: {}]   ;;  %s1898_s3 = inlined_call_operand.vmem [shape: f32[1,64], index: 3, kind: input, shape index: {}]   ;;  %s1899_s4 = inlined_call_operand.vmem [shape: f32[1,32], index: 4, kind: input, shape index: {}]   ;;  %s1900_s5 = inlined_call_operand.vmem [shape: f32[512,64], index: 5, kind: output, shape index: {0}]   ;;  %s1901_s6 = inlined_call_operand.vmem [shape: f32[512,32], index: 6, kind: output, shape index: {1}]  }
   0x1   :  { %14 = vsyncpa [#allocation3 + $0x1], 0  ;;  %s1464_s21 = smov 0   ;;  %s1466_s22 = smov 0  }
   0x2   :  { %s1468_s23 = smov 0   ;;  %s1470_s24 = smov 0  }
   0x3 LB: > { %s1055_s25 = sadd.s32 4294967295, %s1424_s24   ;;  %s1484_s26 = sadd.s32 1, %s1424_s24   ;;  %s1424_s24 = sphi %s1470_s24, %s1910_s24   ;;  %s1420_s23 = sphi %s1468_s23, %s1909_s23   ;;  %s1416_s22 = sphi %s1466_s22, %s1908_s22   ;;  %s1412_s21 = sphi %s1464_s21, %s1907_s21  }
   0x4   : > { %s24_s27 = ssub.s32 %s1424_s24, %s1484_s26  ;;  %s27_s28 = sadd.s32 1, %s1420_s23 }
   0x5   : > { %p25_p0 = scmp.eq.s32.totalorder %s24_s27, 0  ;;  %p34_p1 = scmp.ne.s32.totalorder %s1420_s23, %s1416_s22 }
   0x6   : > { %p35_p2 = scmp.eq.s32.totalorder %s1424_s24, 0  ;;  %p40_p3 = scmp.ne.s32.totalorder %s1416_s22, %s1412_s21 }
   0x7   : > { %s1494_s29 = scalar_select %p25_p0, %s1420_s23, %s27_s28  }
   0x8   : > { %p36_p4 = por %p35_p2, %p34_p1  ;;  %p41_p5 = scmp.eq.s32.totalorder %s1055_s25, 0 }
   0x9   : > { %p1327_p6 = scmp.lt.s32.totalorder %s1424_s24, 2  ;;  %s212_s7 = sand.u32 1, %s1420_s23  }
   0xa   : > { %p1499_p7 = por %p41_p5, %p40_p3  ;;  %s1059_s8 = sshll.u32 %s212_s7, 8 }
   0xb   : > { %s1136_s9 = sshll.u32 %s1424_s24, 12  ;;  %s216_s13 = scalar_lea.vmem [#allocation2], %s1059_s8 }
   0xc   : > { %s1903_s30 = scalar_select %p1499_p7, 1, 0 }
   0xd   : > { %s1508_s12 = scalar_lea.hbm %s1895_s0, %s1136_s9  ;;  %s223_s14 = sshll.u32 %s216_s13, 4  ;;  %s1510_s14 = int_to_ptr.vmem [resolvable:$true] %s223_s14 }
   0xe   : > { %p1512_p8 = pnand %p1327_p6, %p36_p4  ;;  %s1517_s16 = scalar_lea.sflag [#allocation3], %s212_s7 }
   0xf   : > { %s1362_s17 = scalar_lea.hbm %s1508_s12, 4096  ;;  %s1367_s20 = scalar_lea.hbm %s1895_s0, 8192 }
  0x10   : > { %p1363_p10 = scmp.ne.s32.totalorder %s1508_s12, %s1362_s17  ;;  %p1364_p11 = pneg %p1512_p8 }
  0x11   : > { %p1368_p0 = scmp.lt.s32.totalorder %s1508_s12, %s1895_s0  ;;  %p1369_p1 = scmp.lt.s32.totalorder %s1367_s20, %s1362_s17 }
  0x12   : > { %p1365_p12 = pnand %p1364_p11, %p1363_p10 }
  0x13   : > { %p1370_p2 = por %p1369_p1, %p1368_p0 }
  0x14   : > { %p1366_p13 = pneg %p1365_p12 }
  0x16   : > { %p1371_p3 = pnand %p1370_p2, %p1366_p13 }
  0x18   : > { %1374 = shalt.err (!%p1371_p3)
}
  0x19   : > { %s1375_s28 = scalar_lea.vmem %s1510_s14, 4096  ;;  %s1426_s7 = smov [#allocation2]  }
  0x1a   : > { %p1376_p4 = scmp.ne.s32.totalorder %s1510_s14, %s1375_s28  ;;  %s1380_s8 = sshll.u32 %s1426_s7, 4  ;;  %s1381_s8 = int_to_ptr.vmem [resolvable:$false] %s1380_s8 }
  0x1b   : > { %s1382_s9 = scalar_lea.vmem %s1381_s8, 8192  ;;  %p1383_p10 = scmp.lt.s32.totalorder %s1510_s14, %s1381_s8 }
  0x1c   : > { %p1378_p5 = pnand %p1376_p4, %p1364_p11  ;;  %p1384_p12 = scmp.lt.s32.totalorder %s1382_s9, %s1375_s28 }
  0x1e   : > { %p1379_p6 = pneg %p1378_p5  ;;  %p1385_p9 = por %p1384_p12, %p1383_p10 }
  0x20   : > { %p1386_p7 = pnand %p1385_p9, %p1379_p6 }
  0x22   : > { %1389 = shalt.err (!%p1386_p7)
}
  0x23   : > { %s1427_s10 = smov 128   ;;  %s1428_s11 = smov 8  }
  0x24   : > { %1326 = dma.hbm_to_vmem [thread:$0]  (!%p1512_p8), %s1508_s12, 4096, %s1510_s14, %s1517_s16, %s1427_s10, %s1427_s10, %s1428_s11  }
  0x25   : > { %p231_p11 = scmp.lt.s32.totalorder %s1424_s24, 3  ;;  %p1905_p13 = scmp.ge.s32.totalorder %s1424_s24, 1 }
  0x27   : > { %p232_p0 = pnand %p1905_p13, %p231_p11 }
  0x28   : > { %s237_s13 = sand.u32 (!%p232_p0), 1, %s1416_s22   ;;  %p1906_p7 = scmp.ne.s32.totalorder (!%p232_p0), %s1903_s30, 0 }
  0x29   : > { %235 = sbr.rel (%p232_p0) target bundleno = 316 (0x13c), region = 40  ;;  %s1063_s17 = sshll.u32 (!%p232_p0), %s237_s13, 8 }
  0x2a   : > { %s238_s18 = scalar_lea.sflag (!%p232_p0), [#allocation3], %s237_s13  ;;  %s1542_s19 = scalar_lea.vmem (!%p232_p0), [#allocation2], %s1063_s17 }
  0x2e   : > { %1407 = dma.done.wait (%p1906_p7), %s238_s18, 4096  }
  0x2f   : > { %1409 = vsyncadd (%p1906_p7), %s238_s18, 4294963200  ;;  %v323_v0 = vld [vmem:[%s1896_s1 + $0x18] sm:$0xff]  ;;  %v322_v2 = vld [vmem:[%s1896_s1 + $0x10] sm:$0xff]  ;;  %vm335_vm0 = vcmask 261120   ;;  %s1064_s18 = sshll.u32 %s1055_s25, 5  ;;  %vm657_vm1 = vcmask 523264  }
  0x30   : > { %v327_v1 = vld [vmem:[%s1897_s2 + $0x18] sm:$0xff]  ;;  %1209 = vmatprep.subr.mxu0 %v323_v0  ;;  %v326_v3 = vld [vmem:[%s1897_s2 + $0x10] sm:$0xff]  ;;  %v321_v4 = vld [vmem:[%s1896_s1 + $0x8] sm:$0xff]  ;;  %p277_p8 = scmp.lt.s32.totalorder %s1064_s18, 63 }
  0x31   : > { %1265 = vmatprep.subr.mxu1 %v327_v1  ;;  %1210 = vmatpush3.msra.mxu0 %v323_v0  ;;  %v325_v5 = vld [vmem:[%s1897_s2 + $0x8] sm:$0xff]  ;;  %v320_v6 = vld [vmem:[%s1896_s1] sm:$0xff]  ;;  %v290_v10 = vld [vmem:[%s1542_s19 + $0x10] sm:$0xff] }
  0x32   : > { %1266 = vmatpush3.msra.mxu1 %v327_v1  ;;  %1211 = vmatprep.subr.mxu0 %v322_v2  ;;  %v324_v7 = vld [vmem:[%s1897_s2] sm:$0xff]  ;;  %v289_v9 = vld [vmem:[%s1542_s19 + $0x8] sm:$0xff]  ;;  %v291_v11 = vld [vmem:[%s1542_s19 + $0x18] sm:$0xff]  ;;  %s1912_s18 = smov (!%p277_p8, %s1064_s18), 63 }
  0x33   : > { %1267 = vmatprep.subr.mxu1 %v326_v3  ;;  %1212 = vmatpush3.msra.mxu0 %v322_v2  ;;  %v288_v8 = vld [vmem:[%s1542_s19] sm:$0xff]  ;;  %v293_v13 = vld [vmem:[%s1542_s19 + $0x28] sm:$0xff]  ;;  %v294_v14 = vld [vmem:[%s1542_s19 + $0x30] sm:$0xff]  ;;  %s1065_s20 = sshll.u32 %s1912_s18, 3 }
  0x34   : > { %1268 = vmatpush3.msra.mxu1 %v326_v3  ;;  %1213 = vmatprep.subr.mxu0 %v321_v4  ;;  %v292_v12 = vld [vmem:[%s1542_s19 + $0x20] sm:$0xff]  ;;  %v295_v15 = vld [vmem:[%s1542_s19 + $0x38] sm:$0xff]  ;;  %v297_v17 = vld [vmem:[%s1542_s19 + $0x48] sm:$0xff]  ;;  %s1683_s27 = scalar_lea.vmem %s1900_s5, %s1065_s20  ;;  %s1688_s28 = scalar_lea.vmem %s1901_s6, %s1065_s20 }
  0x35   : > { %1269 = vmatprep.subr.mxu1 %v325_v5  ;;  %1214 = vmatpush3.msra.mxu0 %v321_v4  ;;  %v296_v16 = vld [vmem:[%s1542_s19 + $0x40] sm:$0xff]  ;;  %v298_v18 = vld [vmem:[%s1542_s19 + $0x50] sm:$0xff]  ;;  %v299_v19 = vld [vmem:[%s1542_s19 + $0x58] sm:$0xff] }
  0x36   : > { %1270 = vmatpush3.msra.mxu1 %v325_v5  ;;  %1215 = vmatprep.subr.mxu0 %v320_v6  ;;  %v300_v20 = vld [vmem:[%s1542_s19 + $0x60] sm:$0xff]  ;;  %v301_v21 = vld [vmem:[%s1542_s19 + $0x68] sm:$0xff]  ;;  %v302_v22 = vld [vmem:[%s1542_s19 + $0x70] sm:$0xff] }
  0x37   : > { %1271 = vmatprep.subr.mxu1 %v324_v7  ;;  %1216 = vmatpush3.msra.mxu0 %v320_v6  ;;  %v303_v23 = vld [vmem:[%s1542_s19 + $0x78] sm:$0xff]  ;;  %v304_v24 = vld [vmem:[%s1542_s19 + $0x80] sm:$0xff]  ;;  %v305_v25 = vld [vmem:[%s1542_s19 + $0x88] sm:$0xff] }
  0x38   : > { %1217 = vmatprep.mubr.msk.f32.mxu0 %vm335_vm0, %v288_v8  ;;  %1272 = vmatpush3.msra.mxu1 %v324_v7  ;;  %v306_v26 = vld [vmem:[%s1542_s19 + $0x90] sm:$0xff]  ;;  %v307_v27 = vld [vmem:[%s1542_s19 + $0x98] sm:$0xff]  ;;  %v308_v28 = vld [vmem:[%s1542_s19 + $0xa0] sm:$0xff] }
  0x39   : > { %1273 = vmatprep.mubr.msk.f32.mxu1 %vm335_vm0, %v288_v8  ;;  %1218 = vmatmul.mubr.msk.f32.vlgmr.msra.gmra.mxu0 %vm335_vm0, %v289_v9  ;;  %v309_v29 = vld [vmem:[%s1542_s19 + $0xa8] sm:$0xff]  ;;  %v310_v30 = vld [vmem:[%s1542_s19 + $0xb0] sm:$0xff]  ;;  %v311_v31 = vld [vmem:[%s1542_s19 + $0xb8] sm:$0xff] }
  0x3a   : > { %1274 = vmatmul.mubr.msk.f32.vlgmr.msra.gmra.mxu1 %vm335_vm0, %v289_v9  ;;  %1220 = vmatprep.mubr.msk.f32.mxu0 %vm335_vm0, %v290_v10  ;;  %v312_v32 = vld [vmem:[%s1542_s19 + $0xc0] sm:$0xff]  ;;  %v313_v33 = vld [vmem:[%s1542_s19 + $0xc8] sm:$0xff]  ;;  %v314_v34 = vld [vmem:[%s1542_s19 + $0xd0] sm:$0xff] }
  0x3b   : > { %1276 = vmatprep.mubr.msk.f32.mxu1 %vm335_vm0, %v290_v10  ;;  %v315_v35 = vld [vmem:[%s1542_s19 + $0xd8] sm:$0xff]  ;;  %v316_v36 = vld [vmem:[%s1542_s19 + $0xe0] sm:$0xff]  ;;  %v317_v37 = vld [vmem:[%s1542_s19 + $0xe8] sm:$0xff] }
  0x3c   : > { %v318_v38 = vld [vmem:[%s1542_s19 + $0xf0] sm:$0xff]  ;;  %v319_v39 = vld [vmem:[%s1542_s19 + $0xf8] sm:$0xff]  ;;  %v1673_v40 = vld [vmem:[%s1898_s3] ss:$0 sm:$0xff] }
  0x3d   : > { %1221 = vmatmul.mubr.msk.f32.gmra.mxu0 %vm335_vm0, %v291_v11  ;;  %v1678_v41 = vld [vmem:[%s1899_s4] ss:$0 sm:$0xff] }
  0x3e   : > { %1277 = vmatmul.mubr.msk.f32.gmra.mxu1 %vm335_vm0, %v291_v11  ;;  %1223 = vmatprep.mubr.msk.f32.mxu0 %vm335_vm0, %v292_v12 }
  0x3f   : > { %1279 = vmatprep.mubr.msk.f32.mxu1 %vm335_vm0, %v292_v12 }
  0x41   : > { %1224 = vmatmul.mubr.msk.f32.gmra.mxu0 %vm335_vm0, %v293_v13 }
  0x42   : > { %1280 = vmatmul.mubr.msk.f32.gmra.mxu1 %vm335_vm0, %v293_v13  ;;  %1226 = vmatprep.mubr.msk.f32.mxu0 %vm335_vm0, %v294_v14 }
  0x43   : > { %1282 = vmatprep.mubr.msk.f32.mxu1 %vm335_vm0, %v294_v14 }
  0x45   : > { %1227 = vmatmul.mubr.msk.f32.gmra.mxu0 %vm335_vm0, %v295_v15 }
  0x46   : > { %1283 = vmatmul.mubr.msk.f32.gmra.mxu1 %vm335_vm0, %v295_v15  ;;  %1229 = vmatprep.mubr.msk.f32.mxu0 %vm335_vm0, %v296_v16 }
  0x47   : > { %1285 = vmatprep.mubr.msk.f32.mxu1 %vm335_vm0, %v296_v16 }
  0x49   : > { %1230 = vmatmul.mubr.msk.f32.gmra.mxu0 %vm335_vm0, %v297_v17 }
  0x4a   : > { %1286 = vmatmul.mubr.msk.f32.gmra.mxu1 %vm335_vm0, %v297_v17  ;;  %1232 = vmatprep.mubr.msk.f32.mxu0 %vm335_vm0, %v298_v18 }
  0x4b   : > { %1288 = vmatprep.mubr.msk.f32.mxu1 %vm335_vm0, %v298_v18 }
  0x4d   : > { %1233 = vmatmul.mubr.msk.f32.gmra.mxu0 %vm335_vm0, %v299_v19 }
  0x4e   : > { %1289 = vmatmul.mubr.msk.f32.gmra.mxu1 %vm335_vm0, %v299_v19  ;;  %1235 = vmatprep.mubr.msk.f32.mxu0 %vm335_vm0, %v300_v20 }
  0x4f   : > { %1291 = vmatprep.mubr.msk.f32.mxu1 %vm335_vm0, %v300_v20 }
  0x51   : > { %1236 = vmatmul.mubr.msk.f32.gmra.mxu0 %vm335_vm0, %v301_v21 }
  0x52   : > { %1292 = vmatmul.mubr.msk.f32.gmra.mxu1 %vm335_vm0, %v301_v21  ;;  %1238 = vmatprep.mubr.msk.f32.mxu0 %vm335_vm0, %v302_v22 }
  0x53   : > { %1294 = vmatprep.mubr.msk.f32.mxu1 %vm335_vm0, %v302_v22 }
  0x55   : > { %1239 = vmatmul.mubr.msk.f32.gmra.mxu0 %vm335_vm0, %v303_v23 }
  0x56   : > { %1295 = vmatmul.mubr.msk.f32.gmra.mxu1 %vm335_vm0, %v303_v23  ;;  %1241 = vmatprep.mubr.msk.f32.mxu0 %vm335_vm0, %v304_v24 }
  0x57   : > { %1297 = vmatprep.mubr.msk.f32.mxu1 %vm335_vm0, %v304_v24 }
  0x59   : > { %1242 = vmatmul.mubr.msk.f32.gmra.mxu0 %vm335_vm0, %v305_v25 }
  0x5a   : > { %1298 = vmatmul.mubr.msk.f32.gmra.mxu1 %vm335_vm0, %v305_v25  ;;  %1244 = vmatprep.mubr.msk.f32.mxu0 %vm335_vm0, %v306_v26 }
  0x5b   : > { %1300 = vmatprep.mubr.msk.f32.mxu1 %vm335_vm0, %v306_v26 }
  0x5d   : > { %1245 = vmatmul.mubr.msk.f32.gmra.mxu0 %vm335_vm0, %v307_v27 }
  0x5e   : > { %1301 = vmatmul.mubr.msk.f32.gmra.mxu1 %vm335_vm0, %v307_v27  ;;  %1247 = vmatprep.mubr.msk.f32.mxu0 %vm335_vm0, %v308_v28 }
  0x5f   : > { %1303 = vmatprep.mubr.msk.f32.mxu1 %vm335_vm0, %v308_v28 }
  0x61   : > { %1248 = vmatmul.mubr.msk.f32.gmra.mxu0 %vm335_vm0, %v309_v29 }
  0x62   : > { %1304 = vmatmul.mubr.msk.f32.gmra.mxu1 %vm335_vm0, %v309_v29  ;;  %1250 = vmatprep.mubr.msk.f32.mxu0 %vm335_vm0, %v310_v30 }
  0x63   : > { %1306 = vmatprep.mubr.msk.f32.mxu1 %vm335_vm0, %v310_v30 }
  0x65   : > { %1251 = vmatmul.mubr.msk.f32.gmra.mxu0 %vm335_vm0, %v311_v31 }
  0x66   : > { %1307 = vmatmul.mubr.msk.f32.gmra.mxu1 %vm335_vm0, %v311_v31  ;;  %1253 = vmatprep.mubr.msk.f32.mxu0 %vm335_vm0, %v312_v32 }
  0x67   : > { %1309 = vmatprep.mubr.msk.f32.mxu1 %vm335_vm0, %v312_v32 }
  0x69   : > { %1254 = vmatmul.mubr.msk.f32.gmra.mxu0 %vm335_vm0, %v313_v33 }
  0x6a   : > { %1310 = vmatmul.mubr.msk.f32.gmra.mxu1 %vm335_vm0, %v313_v33  ;;  %1256 = vmatprep.mubr.msk.f32.mxu0 %vm335_vm0, %v314_v34 }
  0x6b   : > { %1312 = vmatprep.mubr.msk.f32.mxu1 %vm335_vm0, %v314_v34 }
  0x6d   : > { %1257 = vmatmul.mubr.msk.f32.gmra.mxu0 %vm335_vm0, %v315_v35 }
  0x6e   : > { %1313 = vmatmul.mubr.msk.f32.gmra.mxu1 %vm335_vm0, %v315_v35  ;;  %1259 = vmatprep.mubr.msk.f32.mxu0 %vm335_vm0, %v316_v36 }
  0x6f   : > { %1315 = vmatprep.mubr.msk.f32.mxu1 %vm335_vm0, %v316_v36 }
  0x71   : > { %1260 = vmatmul.mubr.msk.f32.gmra.mxu0 %vm335_vm0, %v317_v37 }
  0x72   : > { %1316 = vmatmul.mubr.msk.f32.gmra.mxu1 %vm335_vm0, %v317_v37  ;;  %1262 = vmatprep.mubr.msk.f32.mxu0 %vm335_vm0, %v318_v38 }
  0x73   : > { %1318 = vmatprep.mubr.msk.f32.mxu1 %vm335_vm0, %v318_v38 }
  0x75   : > { %1263 = vmatmul.mubr.msk.f32.gmra.mxu0 %vm335_vm0, %v319_v39 }
  0x76   : > { %1319 = vmatmul.mubr.msk.f32.gmra.mxu1 %vm335_vm0, %v319_v39 }
  0xf9   : > { %v1219_v42 = vpop.f32.mrf.mxu0 }
  0xfa   : > { %v1275_v43 = vpop.f32.mrf.mxu1  ;;  %v504_v44 = vadd.f32 %v1219_v42, %v1673_v40 }
  0xfb   : > { %v769_v45 = vadd.f32 %v1275_v43, %v1678_v41  ;;  %v498_v46 = vpop.f32.mrf.mxu0 }
  0xfc   : > { %v763_v47 = vpop.f32.mrf.mxu1  ;;  %659 = vst.msk [vmem:[%s1683_s27 + $0x8] sm:$0xff] %vm657_vm1, %v504_v44  ;;  %v499_v48 = vadd.f32 %v1673_v40, %v498_v46 }
  0xfd   : > { %923 = vst.msk [vmem:[%s1688_s28 + $0x8] sm:$0xff] %vm335_vm0, %v769_v45  ;;  %v764_v49 = vadd.f32 %v1678_v41, %v763_v47  ;;  %v1222_v50 = vpop.f32.mrf.mxu0 }
  0xfe   : > { %v1278_v51 = vpop.f32.mrf.mxu1  ;;  %658 = vst.msk [vmem:[%s1683_s27] sm:$0xff] %vm657_vm1, %v499_v48  ;;  %v514_v52 = vadd.f32 %v1222_v50, %v1673_v40 }
  0xff   : > { %922 = vst.msk [vmem:[%s1688_s28] sm:$0xff] %vm335_vm0, %v764_v49  ;;  %v779_v53 = vadd.f32 %v1278_v51, %v1678_v41  ;;  %v508_v54 = vpop.f32.mrf.mxu0 }
 0x100   : > { %v773_v55 = vpop.f32.mrf.mxu1  ;;  %661 = vst.msk [vmem:[%s1683_s27 + $0x18] sm:$0xff] %vm657_vm1, %v514_v52  ;;  %v509_v56 = vadd.f32 %v1673_v40, %v508_v54 }
 0x101   : > { %925 = vst.msk [vmem:[%s1688_s28 + $0x18] sm:$0xff] %vm335_vm0, %v779_v53  ;;  %v774_v57 = vadd.f32 %v1678_v41, %v773_v55  ;;  %v1225_v58 = vpop.f32.mrf.mxu0 }
 0x102   : > { %v1281_v59 = vpop.f32.mrf.mxu1  ;;  %660 = vst.msk [vmem:[%s1683_s27 + $0x10] sm:$0xff] %vm657_vm1, %v509_v56  ;;  %v524_v60 = vadd.f32 %v1225_v58, %v1673_v40 }
 0x103   : > { %924 = vst.msk [vmem:[%s1688_s28 + $0x10] sm:$0xff] %vm335_vm0, %v774_v57  ;;  %v789_v61 = vadd.f32 %v1281_v59, %v1678_v41  ;;  %v518_v62 = vpop.f32.mrf.mxu0 }
 0x104   : > { %v783_v63 = vpop.f32.mrf.mxu1  ;;  %663 = vst.msk [vmem:[%s1683_s27 + $0x28] sm:$0xff] %vm657_vm1, %v524_v60  ;;  %v519_v0 = vadd.f32 %v1673_v40, %v518_v62 }
 0x105   : > { %927 = vst.msk [vmem:[%s1688_s28 + $0x28] sm:$0xff] %vm335_vm0, %v789_v61  ;;  %v784_v1 = vadd.f32 %v1678_v41, %v783_v63  ;;  %v1228_v2 = vpop.f32.mrf.mxu0 }
 0x106   : > { %v1284_v3 = vpop.f32.mrf.mxu1  ;;  %662 = vst.msk [vmem:[%s1683_s27 + $0x20] sm:$0xff] %vm657_vm1, %v519_v0  ;;  %v534_v4 = vadd.f32 %v1228_v2, %v1673_v40 }
 0x107   : > { %926 = vst.msk [vmem:[%s1688_s28 + $0x20] sm:$0xff] %vm335_vm0, %v784_v1  ;;  %v799_v5 = vadd.f32 %v1284_v3, %v1678_v41  ;;  %v528_v6 = vpop.f32.mrf.mxu0 }
 0x108   : > { %v793_v7 = vpop.f32.mrf.mxu1  ;;  %665 = vst.msk [vmem:[%s1683_s27 + $0x38] sm:$0xff] %vm657_vm1, %v534_v4  ;;  %v529_v8 = vadd.f32 %v1673_v40, %v528_v6 }
 0x109   : > { %929 = vst.msk [vmem:[%s1688_s28 + $0x38] sm:$0xff] %vm335_vm0, %v799_v5  ;;  %v794_v9 = vadd.f32 %v1678_v41, %v793_v7  ;;  %v1231_v10 = vpop.f32.mrf.mxu0 }
 0x10a   : > { %v1287_v11 = vpop.f32.mrf.mxu1  ;;  %664 = vst.msk [vmem:[%s1683_s27 + $0x30] sm:$0xff] %vm657_vm1, %v529_v8  ;;  %v544_v12 = vadd.f32 %v1231_v10, %v1673_v40 }
 0x10b   : > { %928 = vst.msk [vmem:[%s1688_s28 + $0x30] sm:$0xff] %vm335_vm0, %v794_v9  ;;  %v809_v13 = vadd.f32 %v1287_v11, %v1678_v41  ;;  %v538_v14 = vpop.f32.mrf.mxu0 }
 0x10c   : > { %v803_v15 = vpop.f32.mrf.mxu1  ;;  %667 = vst.msk [vmem:[%s1683_s27 + $0x48] sm:$0xff] %vm657_vm1, %v544_v12  ;;  %v539_v16 = vadd.f32 %v1673_v40, %v538_v14 }
 0x10d   : > { %931 = vst.msk [vmem:[%s1688_s28 + $0x48] sm:$0xff] %vm335_vm0, %v809_v13  ;;  %v804_v17 = vadd.f32 %v1678_v41, %v803_v15  ;;  %v1234_v18 = vpop.f32.mrf.mxu0 }
 0x10e   : > { %v1290_v19 = vpop.f32.mrf.mxu1  ;;  %666 = vst.msk [vmem:[%s1683_s27 + $0x40] sm:$0xff] %vm657_vm1, %v539_v16  ;;  %v554_v20 = vadd.f32 %v1234_v18, %v1673_v40 }
 0x10f   : > { %930 = vst.msk [vmem:[%s1688_s28 + $0x40] sm:$0xff] %vm335_vm0, %v804_v17  ;;  %v819_v21 = vadd.f32 %v1290_v19, %v1678_v41  ;;  %v548_v22 = vpop.f32.mrf.mxu0 }
 0x110   : > { %v813_v23 = vpop.f32.mrf.mxu1  ;;  %669 = vst.msk [vmem:[%s1683_s27 + $0x58] sm:$0xff] %vm657_vm1, %v554_v20  ;;  %v549_v24 = vadd.f32 %v1673_v40, %v548_v22 }
 0x111   : > { %933 = vst.msk [vmem:[%s1688_s28 + $0x58] sm:$0xff] %vm335_vm0, %v819_v21  ;;  %v814_v25 = vadd.f32 %v1678_v41, %v813_v23  ;;  %v1237_v26 = vpop.f32.mrf.mxu0 }
 0x112   : > { %v1293_v27 = vpop.f32.mrf.mxu1  ;;  %668 = vst.msk [vmem:[%s1683_s27 + $0x50] sm:$0xff] %vm657_vm1, %v549_v24  ;;  %v564_v28 = vadd.f32 %v1237_v26, %v1673_v40 }
 0x113   : > { %932 = vst.msk [vmem:[%s1688_s28 + $0x50] sm:$0xff] %vm335_vm0, %v814_v25  ;;  %v829_v29 = vadd.f32 %v1293_v27, %v1678_v41  ;;  %v558_v30 = vpop.f32.mrf.mxu0 }
 0x114   : > { %v823_v31 = vpop.f32.mrf.mxu1  ;;  %671 = vst.msk [vmem:[%s1683_s27 + $0x68] sm:$0xff] %vm657_vm1, %v564_v28  ;;  %v559_v32 = vadd.f32 %v1673_v40, %v558_v30 }
 0x115   : > { %935 = vst.msk [vmem:[%s1688_s28 + $0x68] sm:$0xff] %vm335_vm0, %v829_v29  ;;  %v824_v33 = vadd.f32 %v1678_v41, %v823_v31  ;;  %v1240_v34 = vpop.f32.mrf.mxu0 }
 0x116   : > { %v1296_v35 = vpop.f32.mrf.mxu1  ;;  %670 = vst.msk [vmem:[%s1683_s27 + $0x60] sm:$0xff] %vm657_vm1, %v559_v32  ;;  %v574_v36 = vadd.f32 %v1240_v34, %v1673_v40 }
 0x117   : > { %934 = vst.msk [vmem:[%s1688_s28 + $0x60] sm:$0xff] %vm335_vm0, %v824_v33  ;;  %v839_v37 = vadd.f32 %v1296_v35, %v1678_v41  ;;  %v568_v38 = vpop.f32.mrf.mxu0 }
 0x118   : > { %v833_v39 = vpop.f32.mrf.mxu1  ;;  %673 = vst.msk [vmem:[%s1683_s27 + $0x78] sm:$0xff] %vm657_vm1, %v574_v36  ;;  %v569_v42 = vadd.f32 %v1673_v40, %v568_v38 }
 0x119   : > { %937 = vst.msk [vmem:[%s1688_s28 + $0x78] sm:$0xff] %vm335_vm0, %v839_v37  ;;  %v834_v43 = vadd.f32 %v1678_v41, %v833_v39  ;;  %v1243_v44 = vpop.f32.mrf.mxu0 }
 0x11a   : > { %v1299_v45 = vpop.f32.mrf.mxu1  ;;  %672 = vst.msk [vmem:[%s1683_s27 + $0x70] sm:$0xff] %vm657_vm1, %v569_v42  ;;  %v584_v46 = vadd.f32 %v1243_v44, %v1673_v40 }
 0x11b   : > { %936 = vst.msk [vmem:[%s1688_s28 + $0x70] sm:$0xff] %vm335_vm0, %v834_v43  ;;  %v849_v47 = vadd.f32 %v1299_v45, %v1678_v41  ;;  %v578_v48 = vpop.f32.mrf.mxu0 }
 0x11c   : > { %v843_v49 = vpop.f32.mrf.mxu1  ;;  %675 = vst.msk [vmem:[%s1683_s27 + $0x88] sm:$0xff] %vm657_vm1, %v584_v46  ;;  %v579_v50 = vadd.f32 %v1673_v40, %v578_v48 }
 0x11d   : > { %939 = vst.msk [vmem:[%s1688_s28 + $0x88] sm:$0xff] %vm335_vm0, %v849_v47  ;;  %v844_v51 = vadd.f32 %v1678_v41, %v843_v49  ;;  %v1246_v52 = vpop.f32.mrf.mxu0 }
 0x11e   : > { %v1302_v53 = vpop.f32.mrf.mxu1  ;;  %674 = vst.msk [vmem:[%s1683_s27 + $0x80] sm:$0xff] %vm657_vm1, %v579_v50  ;;  %v594_v54 = vadd.f32 %v1246_v52, %v1673_v40 }
 0x11f   : > { %938 = vst.msk [vmem:[%s1688_s28 + $0x80] sm:$0xff] %vm335_vm0, %v844_v51  ;;  %v859_v55 = vadd.f32 %v1302_v53, %v1678_v41  ;;  %v588_v56 = vpop.f32.mrf.mxu0 }
 0x120   : > { %v853_v57 = vpop.f32.mrf.mxu1  ;;  %677 = vst.msk [vmem:[%s1683_s27 + $0x98] sm:$0xff] %vm657_vm1, %v594_v54  ;;  %v589_v58 = vadd.f32 %v1673_v40, %v588_v56 }
 0x121   : > { %941 = vst.msk [vmem:[%s1688_s28 + $0x98] sm:$0xff] %vm335_vm0, %v859_v55  ;;  %v854_v59 = vadd.f32 %v1678_v41, %v853_v57  ;;  %v1249_v60 = vpop.f32.mrf.mxu0 }
 0x122   : > { %v1305_v61 = vpop.f32.mrf.mxu1  ;;  %676 = vst.msk [vmem:[%s1683_s27 + $0x90] sm:$0xff] %vm657_vm1, %v589_v58  ;;  %v604_v62 = vadd.f32 %v1249_v60, %v1673_v40 }
 0x123   : > { %940 = vst.msk [vmem:[%s1688_s28 + $0x90] sm:$0xff] %vm335_vm0, %v854_v59  ;;  %v869_v63 = vadd.f32 %v1305_v61, %v1678_v41  ;;  %v598_v0 = vpop.f32.mrf.mxu0 }
 0x124   : > { %v863_v1 = vpop.f32.mrf.mxu1  ;;  %679 = vst.msk [vmem:[%s1683_s27 + $0xa8] sm:$0xff] %vm657_vm1, %v604_v62  ;;  %v599_v2 = vadd.f32 %v1673_v40, %v598_v0 }
 0x125   : > { %943 = vst.msk [vmem:[%s1688_s28 + $0xa8] sm:$0xff] %vm335_vm0, %v869_v63  ;;  %v864_v3 = vadd.f32 %v1678_v41, %v863_v1  ;;  %v1252_v4 = vpop.f32.mrf.mxu0 }
 0x126   : > { %v1308_v5 = vpop.f32.mrf.mxu1  ;;  %678 = vst.msk [vmem:[%s1683_s27 + $0xa0] sm:$0xff] %vm657_vm1, %v599_v2  ;;  %v614_v6 = vadd.f32 %v1252_v4, %v1673_v40 }
 0x127   : > { %942 = vst.msk [vmem:[%s1688_s28 + $0xa0] sm:$0xff] %vm335_vm0, %v864_v3  ;;  %v879_v7 = vadd.f32 %v1308_v5, %v1678_v41  ;;  %v608_v8 = vpop.f32.mrf.mxu0 }
 0x128   : > { %v873_v9 = vpop.f32.mrf.mxu1  ;;  %681 = vst.msk [vmem:[%s1683_s27 + $0xb8] sm:$0xff] %vm657_vm1, %v614_v6  ;;  %v609_v10 = vadd.f32 %v1673_v40, %v608_v8 }
 0x129   : > { %945 = vst.msk [vmem:[%s1688_s28 + $0xb8] sm:$0xff] %vm335_vm0, %v879_v7  ;;  %v874_v11 = vadd.f32 %v1678_v41, %v873_v9  ;;  %v1255_v12 = vpop.f32.mrf.mxu0 }
 0x12a   : > { %v1311_v13 = vpop.f32.mrf.mxu1  ;;  %680 = vst.msk [vmem:[%s1683_s27 + $0xb0] sm:$0xff] %vm657_vm1, %v609_v10  ;;  %v624_v14 = vadd.f32 %v1255_v12, %v1673_v40 }
 0x12b   : > { %944 = vst.msk [vmem:[%s1688_s28 + $0xb0] sm:$0xff] %vm335_vm0, %v874_v11  ;;  %v889_v15 = vadd.f32 %v1311_v13, %v1678_v41  ;;  %v618_v16 = vpop.f32.mrf.mxu0 }
 0x12c   : > { %v883_v17 = vpop.f32.mrf.mxu1  ;;  %683 = vst.msk [vmem:[%s1683_s27 + $0xc8] sm:$0xff] %vm657_vm1, %v624_v14  ;;  %v619_v18 = vadd.f32 %v1673_v40, %v618_v16 }
 0x12d   : > { %947 = vst.msk [vmem:[%s1688_s28 + $0xc8] sm:$0xff] %vm335_vm0, %v889_v15  ;;  %v884_v19 = vadd.f32 %v1678_v41, %v883_v17  ;;  %v1258_v20 = vpop.f32.mrf.mxu0 }
 0x12e   : > { %v1314_v21 = vpop.f32.mrf.mxu1  ;;  %682 = vst.msk [vmem:[%s1683_s27 + $0xc0] sm:$0xff] %vm657_vm1, %v619_v18  ;;  %v634_v22 = vadd.f32 %v1258_v20, %v1673_v40 }
 0x12f   : > { %946 = vst.msk [vmem:[%s1688_s28 + $0xc0] sm:$0xff] %vm335_vm0, %v884_v19  ;;  %v899_v23 = vadd.f32 %v1314_v21, %v1678_v41  ;;  %v628_v24 = vpop.f32.mrf.mxu0 }
 0x130   : > { %v893_v25 = vpop.f32.mrf.mxu1  ;;  %685 = vst.msk [vmem:[%s1683_s27 + $0xd8] sm:$0xff] %vm657_vm1, %v634_v22  ;;  %v629_v26 = vadd.f32 %v1673_v40, %v628_v24 }
 0x131   : > { %949 = vst.msk [vmem:[%s1688_s28 + $0xd8] sm:$0xff] %vm335_vm0, %v899_v23  ;;  %v894_v27 = vadd.f32 %v1678_v41, %v893_v25  ;;  %v1261_v28 = vpop.f32.mrf.mxu0 }
 0x132   : > { %v1317_v29 = vpop.f32.mrf.mxu1  ;;  %684 = vst.msk [vmem:[%s1683_s27 + $0xd0] sm:$0xff] %vm657_vm1, %v629_v26  ;;  %v644_v30 = vadd.f32 %v1261_v28, %v1673_v40 }
 0x133   : > { %948 = vst.msk [vmem:[%s1688_s28 + $0xd0] sm:$0xff] %vm335_vm0, %v894_v27  ;;  %v909_v31 = vadd.f32 %v1317_v29, %v1678_v41  ;;  %v638_v32 = vpop.f32.mrf.mxu0 }
 0x134   : > { %v903_v33 = vpop.f32.mrf.mxu1  ;;  %687 = vst.msk [vmem:[%s1683_s27 + $0xe8] sm:$0xff] %vm657_vm1, %v644_v30  ;;  %v639_v34 = vadd.f32 %v1673_v40, %v638_v32 }
 0x135   : > { %951 = vst.msk [vmem:[%s1688_s28 + $0xe8] sm:$0xff] %vm335_vm0, %v909_v31  ;;  %v904_v35 = vadd.f32 %v1678_v41, %v903_v33  ;;  %v1264_v36 = vpop.f32.mrf.mxu0 }
 0x136   : > { %v1320_v37 = vpop.f32.mrf.mxu1  ;;  %686 = vst.msk [vmem:[%s1683_s27 + $0xe0] sm:$0xff] %vm657_vm1, %v639_v34  ;;  %v654_v38 = vadd.f32 %v1264_v36, %v1673_v40 }
 0x137   : > { %950 = vst.msk [vmem:[%s1688_s28 + $0xe0] sm:$0xff] %vm335_vm0, %v904_v35  ;;  %v919_v39 = vadd.f32 %v1320_v37, %v1678_v41  ;;  %v648_v42 = vpop.f32.mrf.mxu0 }
 0x138   : > { %v913_v43 = vpop.f32.mrf.mxu1  ;;  %689 = vst.msk [vmem:[%s1683_s27 + $0xf8] sm:$0xff] %vm657_vm1, %v654_v38  ;;  %v649_v44 = vadd.f32 %v1673_v40, %v648_v42 }
 0x139   : > { %953 = vst.msk [vmem:[%s1688_s28 + $0xf8] sm:$0xff] %vm335_vm0, %v919_v39  ;;  %v914_v45 = vadd.f32 %v1678_v41, %v913_v43 }
 0x13a   : > { %688 = vst.msk [vmem:[%s1683_s27 + $0xf0] sm:$0xff] %vm657_vm1, %v649_v44 }
 0x13b   : > { %952 = vst.msk [vmem:[%s1688_s28 + $0xf0] sm:$0xff] %vm335_vm0, %v914_v45 }
 0x13c PF: > { %p17_p9 = scmp.ge.s32.totalorder %s1484_s26, 4   ;;  %s1907_s21 = smov %s1416_s22 }
 0x13d   : > { %s1908_s22 = smov %s1420_s23  ;;  %s1909_s23 = smov %s1494_s29 }
 0x13e   : > { %s1910_s24 = smov %s1484_s26  ;;  %19 = sbr.rel (!%p17_p9) target bundleno = 3 (0x3), region = 92 }
 0x143   :  { %993 = vsyncpa [#allocation3], 1 }
 0x144   :  { %995 = vsyncpa [#allocation3 + $0x1], 1 }

// kernel: cross_frame_attention.3
= control target key start
LH: loop header
LB: loop body
LE: loop exit
PB: predicated region body
PF: predicated region fallthrough
CT: control target
= control target key end

     0   :  { %s4629_s9 = smov 0   ;;  %s7250_s0 = inlined_call_operand.vmem [shape: f32[512,64], index: 0, kind: input, shape index: {}]   ;;  %s7251_s1 = inlined_call_operand.vmem [shape: f32[32,64,8], index: 1, kind: input, shape index: {}]   ;;  %s7252_s2 = inlined_call_operand.vmem [shape: f32[128,128], index: 2, kind: output, shape index: {}]  }
   0x1 LB: > { %s4635_s10 = sadd.s32 4294967295, %s4597_s9   ;;  %p3829_p0 = scmp.ge.s32.totalorder %s4597_s9, 1  ;;  %s4597_s9 = sphi %s4629_s9, %s12_s9  }
   0x2   : > { %p125_p1 = scmp.lt.s32.totalorder %s4597_s9, 3 }
   0x4   : > { %p126_p2 = pnand %p3829_p0, %p125_p1 }
   0x6   : > { %129 = sbr.rel (%p126_p2) target bundleno = 6392 (0x18f8), region = 28 }
   0xb   : > { %s3830_s11 = sshll.u32 %s4635_s10, 5  ;;  %s3832_s12 = sshll.u32 %s4635_s10, 4  ;;  %vm205_vm0 = vcmask 64512   ;;  %vm873_vm1 = vcmask 130112   ;;  %vm1710_vm2 = vcmask 195712   ;;  %vm2451_vm3 = vcmask 261312  }
   0xc   : > { %p154_p3 = scmp.lt.s32.totalorder %s3830_s11, 63  ;;  %p160_p4 = scmp.lt.s32.totalorder %s3832_s12, 31  ;;  %vm3623_vm4 = vcmask 130048   ;;  %vm3632_vm5 = vcmask 195584   ;;  %vm3641_vm6 = vcmask 261120   ;;  %vm3650_vm7 = vcmask 326656  }
   0xd   : > { %s4599_s21 = smov 72   ;;  %s4600_s22 = smov 8   ;;  %vm3659_vm8 = vcmask 392192   ;;  %vm3668_vm9 = vcmask 457728   ;;  %vm3677_vm10 = vcmask 523264   ;;  %vm3686_vm11 = vcmask 588800  }
   0xe   : > { %s8012_s11 = smov (!%p154_p3, %s3830_s11), 63  ;;  %s8014_s12 = smov (!%p160_p4, %s3832_s12), 31  ;;  %vm3695_vm12 = vcmask 654336   ;;  %vm3704_vm13 = vcmask 719872   ;;  %vm3713_vm14 = vcmask 785408   ;;  %vm3722_vm15 = vcmask 850944  }
   0xf   : > { %s3831_s13 = sshll.u32 %s8012_s11, 3  ;;  %s3959_s17 = sshll.u32 %s8014_s12, 6 }
  0x10   : > { %s4644_s16 = scalar_lea.vmem %s7250_s0, %s3831_s13  ;;  %s4649_s20 = scalar_lea.vmem %s7251_s1, %s3959_s17 }
  0x11   : > { %v174_v0 = vld [vmem:[%s4644_s16 + $0x10] sm:$0xff]  ;;  %v172_v1 = vld [vmem:[%s4644_s16] sm:$0xff]  ;;  %v175_v2 = vld [vmem:[%s4644_s16 + $0x18] sm:$0xff]  ;;  %s4601_s23 = smov 120   ;;  %s4602_s24 = smov 104  }
  0x12   : > { %v3839_v3 = vld [vmem:[%s4649_s20 + $0xd0] sm:$0xff]  ;;  %v3837_v4 = vld [vmem:[%s4649_s20 + $0xc0] sm:$0xff]  ;;  %v3840_v5 = vld [vmem:[%s4649_s20 + $0xd8] sm:$0xff]  ;;  %s4603_s25 = smov 16   ;;  %s4604_s26 = smov 112  }
  0x13   : > { %v191_v6 = vmul.f32 %v3839_v3, %v174_v0  ;;  %v189_v7 = vmul.f32 %v3837_v4, %v172_v1  ;;  %v192_v8 = vmul.f32 %v3840_v5, %v175_v2  ;;  %v173_v9 = vld [vmem:[%s4644_s16 + $0x8] sm:$0xff]  ;;  %v176_v14 = vld [vmem:[%s4644_s16 + $0x20] sm:$0xff]  ;;  %v179_v22 = vld [vmem:[%s4644_s16 + $0x38] sm:$0xff]  ;;  %s4605_s27 = smov 24   ;;  %s4606_s28 = smov 32  }
  0x14   : > { %v3838_v10 = vld [vmem:[%s4649_s20 + $0xc8] sm:$0xff]  ;;  %v3841_v15 = vld [vmem:[%s4649_s20 + $0xe0] sm:$0xff]  ;;  %v3844_v23 = vld [vmem:[%s4649_s20 + $0xf8] sm:$0xff]  ;;  %s4607_s29 = smov 40   ;;  %s4608_s30 = smov 48  }
  0x15   : > { %v177_v11 = vld [vmem:[%s4644_s16 + $0x28] sm:$0xff]  ;;  %v190_v12 = vmul.f32 %v3838_v10, %v173_v9  ;;  %v4663_v16 = vmul.f32 0.35355338, %v191_v6  ;;  %v4665_v17 = vmul.f32 0.35355338, %v189_v7  ;;  %v193_v21 = vmul.f32 %v3841_v15, %v176_v14  ;;  %v178_v24 = vld [vmem:[%s4644_s16 + $0x30] sm:$0xff] }
  0x16   : > { %v3842_v13 = vld [vmem:[%s4649_s20 + $0xe8] sm:$0xff]  ;;  %v4667_v18 = vmul.f32 0.35355338, %v192_v8  ;;  %v3843_v27 = vld [vmem:[%s4649_s20 + $0xf0] sm:$0xff]  ;;  %v196_v32 = vmul.f32 %v3844_v23, %v179_v22  ;;  %v334_v40 = vld [vmem:[%s4644_s16 + $0x40] sm:$0xff]  ;;  %s4609_s3 = smov 56  }
  0x17   : > { %v194_v19 = vmul.f32 %v3842_v13, %v177_v11  ;;  %v4669_v20 = vmul.f32 0.35355338, %v190_v12  ;;  %v212_v25 = vsel %vm205_vm0, %v4663_v16, -inf  ;;  %v206_v26 = vsel %vm205_vm0, %v4665_v17, -inf  ;;  %v3845_v41 = vld [vmem:[%s4649_s20 + $0x1c0] sm:$0xff]  ;;  %v336_v43 = vld [vmem:[%s4644_s16 + $0x50] sm:$0xff] }
  0x18   : > { %213 = vmax.xlane.f32.xlu1 %v212_v25  ;;  %207 = vmax.xlane.f32.xlu0 %v206_v26  ;;  %v215_v28 = vsel %vm205_vm0, %v4667_v18, -inf  ;;  %v4685_v31 = vmul.f32 0.35355338, %v193_v21  ;;  %v195_v33 = vmul.f32 %v3843_v27, %v178_v24  ;;  %v4691_v36 = vmul.f32 0.35355338, %v196_v32  ;;  %v3847_v44 = vld [vmem:[%s4649_s20 + $0x1d0] sm:$0xff] }
  0x19   : > { %v4681_v29 = vmul.f32 0.35355338, %v194_v19  ;;  %v209_v30 = vsel %vm205_vm0, %v4669_v20, -inf  ;;  %v351_v42 = vmul.f32 %v3845_v41, %v334_v40  ;;  %v353_v46 = vmul.f32 %v3847_v44, %v336_v43  ;;  %v335_v47 = vld [vmem:[%s4644_s16 + $0x48] sm:$0xff]  ;;  %v337_v49 = vld [vmem:[%s4644_s16 + $0x58] sm:$0xff]  ;;  %v338_v55 = vld [vmem:[%s4644_s16 + $0x60] sm:$0xff] }
  0x1a   : > { %v218_v35 = vsel %vm205_vm0, %v4685_v31, -inf  ;;  %v4693_v37 = vmul.f32 0.35355338, %v195_v33  ;;  %v227_v38 = vsel %vm205_vm0, %v4691_v36, -inf  ;;  %v3846_v48 = vld [vmem:[%s4649_s20 + $0x1c8] sm:$0xff]  ;;  %v3848_v50 = vld [vmem:[%s4649_s20 + $0x1d8] sm:$0xff] }
  0x1b   : > { %v221_v34 = vsel %vm205_vm0, %v4681_v29, -inf  ;;  %v4711_v45 = vmul.f32 0.35355338, %v351_v42  ;;  %v352_v51 = vmul.f32 %v3846_v48, %v335_v47  ;;  %v4719_v53 = vmul.f32 0.35355338, %v353_v46  ;;  %v3849_v56 = vld [vmem:[%s4649_s20 + $0x1e0] sm:$0xff] }
  0x1c   : > { %216 = vmax.xlane.f32.xlu1 %v215_v28  ;;  %210 = vmax.xlane.f32.xlu0 %v209_v30  ;;  %v224_v39 = vsel %vm205_vm0, %v4693_v37, -inf  ;;  %v354_v54 = vmul.f32 %v3848_v50, %v337_v49  ;;  %v339_v57 = vld [vmem:[%s4644_s16 + $0x68] sm:$0xff]  ;;  %v355_v62 = vmul.f32 %v3849_v56, %v338_v55  ;;  %v3852_v3 = vld [vmem:[%s4649_s20 + $0x1f8] sm:$0xff]  ;;  %s4610_s4 = smov 64   ;;  %s4611_s5 = smov 80  }
  0x1d   : > { %v367_v52 = vsel %vm205_vm0, %v4711_v45, -inf  ;;  %v3850_v58 = vld [vmem:[%s4649_s20 + $0x1e8] sm:$0xff]  ;;  %v4725_v59 = vmul.f32 0.35355338, %v352_v51  ;;  %v373_v60 = vsel %vm205_vm0, %v4719_v53, -inf  ;;  %s4612_s6 = smov 88  }
  0x1e   : > { %v4729_v61 = vmul.f32 0.35355338, %v354_v54  ;;  %v356_v63 = vmul.f32 %v3850_v58, %v339_v57  ;;  %v4739_v7 = vmul.f32 0.35355338, %v355_v62  ;;  %s4613_s7 = smov 96   ;;  %s3835_s8 = sshll.u32 %s4635_s10, 3 }
  0x1f   : > { %v370_v4 = vsel %vm205_vm0, %v4725_v59, -inf  ;;  %p167_p5 = scmp.lt.s32.totalorder %s3835_s8, 15 }
  0x20   : > { %222 = vmax.xlane.f32.xlu1 %v221_v34  ;;  %219 = vmax.xlane.f32.xlu0 %v218_v35  ;;  %v376_v6 = vsel %vm205_vm0, %v4729_v61, -inf  ;;  %v4741_v8 = vmul.f32 0.35355338, %v356_v63  ;;  %v379_v10 = vsel %vm205_vm0, %v4739_v7, -inf }
  0x21   : > { %s8016_s8 = smov (!%p167_p5, %s3835_s8), 15 }
  0x22   : > { %s3836_s11 = sshll.u32 %s8016_s8, 3 }
  0x23   : > { %s7187_s13 = scalar_lea.vmem %s7252_s2, %s3836_s11 }
  0x24   : > { %228 = vmax.xlane.f32.xlu1 %v227_v38  ;;  %225 = vmax.xlane.f32.xlu0 %v224_v39 }
  0x35   : > { %304 = vrot.lane.b32.xlu1 %v173_v9, %s4599_s21 }
  0x39   : > { %306 = vrot.lane.b32.xlu1 %v174_v0, %s4599_s21  ;;  %v340_v0 = vld [vmem:[%s4644_s16 + $0x70] sm:$0xff] }
  0x3a   : > { %302 = vrot.lane.b32.xlu0 %v172_v1, %s4599_s21  ;;  %v3851_v1 = vld [vmem:[%s4649_s20 + $0x1f0] sm:$0xff] }
  0x3b   : > { %v357_v5 = vmul.f32 %v3851_v1, %v340_v0 }
  0x3d   : > { %308 = vrot.lane.b32.xlu1 %v175_v2, %s4599_s21  ;;  %v341_v2 = vld [vmem:[%s4644_s16 + $0x78] sm:$0xff]  ;;  %v4747_v12 = vmul.f32 0.35355338, %v357_v5 }
  0x3e   : > { %310 = vrot.lane.b32.xlu0 %v176_v14, %s4599_s21  ;;  %v358_v9 = vmul.f32 %v3852_v3, %v341_v2 }
  0x3f   : > { %v385_v14 = vsel %vm205_vm0, %v4747_v12, -inf }
  0x40   : > { %v4749_v13 = vmul.f32 0.35355338, %v358_v9 }
  0x41   : > { %312 = vrot.lane.b32.xlu1 %v177_v11, %s4599_s21  ;;  %v382_v11 = vsel %vm205_vm0, %v4741_v8, -inf }
  0x42   : > { %314 = vrot.lane.b32.xlu0 %v178_v24, %s4599_s21  ;;  %v388_v15 = vsel %vm205_vm0, %v4749_v13, -inf }
  0x45   : > { %316 = vrot.lane.b32.xlu1 %v179_v22, %s4599_s21 }
  0x61   : > { %368 = vmax.xlane.f32.xlu0 %v367_v52 }
  0x65   : > { %374 = vmax.xlane.f32.xlu0 %v373_v60 }
  0x69   : > { %371 = vmax.xlane.f32.xlu1 %v370_v4  ;;  %377 = vmax.xlane.f32.xlu0 %v376_v6 }
  0x6d   : > { %380 = vmax.xlane.f32.xlu0 %v379_v10  ;;  %383 = vmax.xlane.f32.xlu1 %v382_v11 }
  0x71   : > { %386 = vmax.xlane.f32.xlu0 %v385_v14  ;;  %389 = vmax.xlane.f32.xlu1 %v388_v15 }
  0x82   : > { %465 = vrot.lane.b32.xlu1 %v335_v47, %s4599_s21 }
  0x86   : > { %467 = vrot.lane.b32.xlu1 %v336_v43, %s4599_s21 }
  0x87   : > { %463 = vrot.lane.b32.xlu0 %v334_v40, %s4599_s21 }
  0x8a   : > { %469 = vrot.lane.b32.xlu1 %v337_v49, %s4599_s21 }
  0x8b   : > { %471 = vrot.lane.b32.xlu0 %v338_v55, %s4599_s21 }
  0x8e   : > { %473 = vrot.lane.b32.xlu1 %v339_v57, %s4599_s21 }
  0x8f   : > { %475 = vrot.lane.b32.xlu0 %v340_v0, %s4599_s21 }
  0x92   : > { %477 = vrot.lane.b32.xlu1 %v341_v2, %s4599_s21 }
  0xa1   : > { %v214_v19 = vpop.xlane.xlu1 %213  ;;  %v208_v21 = vpop.xlane.xlu0 %207 }
  0xa2   : > { %v232_v22 = vsub.f32 %v4663_v16, %v214_v19  ;;  %v230_v23 = vsub.f32 %v4665_v17, %v208_v21 }
  0xa4   : > { %v238_v24 = vmul.f32 1.442695, %v230_v23  ;;  %v242_v25 = vmul.f32 1.442695, %v232_v22 }
  0xa5   : > { %v217_v26 = vpop.xlane.xlu1 %216  ;;  %v211_v27 = vpop.xlane.xlu0 %210 }
  0xa6   : > { %v233_v28 = vsub.f32 %v4667_v18, %v217_v26  ;;  %v231_v30 = vsub.f32 %v4669_v20, %v211_v27  ;;  %3983 = vpow2.f32 %v238_v24 }
  0xa7   : > { %3985 = vpow2.f32 %v242_v25 }
  0xa8   : > { %v240_v32 = vmul.f32 1.442695, %v231_v30  ;;  %v244_v33 = vmul.f32 1.442695, %v233_v28 }
  0xa9   : > { %v223_v34 = vpop.xlane.xlu1 %222  ;;  %v220_v35 = vpop.xlane.xlu0 %219 }
  0xaa   : > { %v235_v38 = vsub.f32 %v4681_v29, %v223_v34  ;;  %v234_v16 = vsub.f32 %v4685_v31, %v220_v35  ;;  %3987 = vpow2.f32 %v240_v32  ;;  %v4838_v35 = vld [vmem:[%s4644_s16 + $0x80] sm:$0xff] }
  0xab   : > { %3989 = vpow2.f32 %v244_v33 }
  0xac   : > { %v246_v17 = vmul.f32 1.442695, %v234_v16  ;;  %v248_v39 = vmul.f32 1.442695, %v235_v38  ;;  %v3853_v38 = vld [vmem:[%s4649_s20 + $0x2c0] sm:$0xff] }
  0xad   : > { %v229_v40 = vpop.xlane.xlu1 %228  ;;  %v226_v41 = vpop.xlane.xlu0 %225 }
  0xae   : > { %v237_v18 = vsub.f32 %v4691_v36, %v229_v40  ;;  %v236_v20 = vsub.f32 %v4693_v37, %v226_v41  ;;  %3991 = vpow2.f32 %v246_v17  ;;  %v4847_v40 = vld [vmem:[%s4644_s16 + $0x88] sm:$0xff] }
  0xaf   : > { %3993 = vpow2.f32 %v248_v39  ;;  %v512_v39 = vmul.f32 %v3853_v38, %v4838_v35  ;;  %v3854_v41 = vld [vmem:[%s4649_s20 + $0x2c8] sm:$0xff] }
  0xb0   : > { %v250_v42 = vmul.f32 1.442695, %v236_v20  ;;  %v252_v43 = vmul.f32 1.442695, %v237_v18  ;;  %v4853_v20 = vld [vmem:[%s4644_s16 + $0x90] sm:$0xff] }
  0xb1   : > { %v4803_v58 = vpop.permute.xlu1 %304  ;;  %v4805_v60 = vpop.permute.xlu0 %302 }
  0xb2   : > { %3995 = vpow2.f32 %v250_v42  ;;  %7433 = vst [vmem:[#allocation10_spill] sm:$0xff] %v4803_v58  ;;  %7434 = vst [vmem:[#allocation11_spill] sm:$0xff] %v4805_v60  ;;  %v3855_v42 = vld [vmem:[%s4649_s20 + $0x2d0] sm:$0xff] }
  0xb3   : > { %v4771_v44 = vpop.eup %3983  ;;  %3997 = vpow2.f32 %v252_v43 }
  0xb4   : > { %7425 = vst [vmem:[#allocation2_spill] sm:$0xff] %v4771_v44  ;;  %v254_v29 = vsel %vm205_vm0, %v4771_v44, 0.0  ;;  %v4775_v31 = vpop.eup %3985 }
  0xb5   : > { %7426 = vst [vmem:[#allocation3_spill] sm:$0xff] %v4775_v31  ;;  %255 = vadd.xlane.f32.xlu0 %v254_v29  ;;  %v260_v36 = vsel %vm205_vm0, %v4775_v31, 0.0  ;;  %v4807_v62 = vpop.permute.xlu1 %306  ;;  %v4809_v63 = vpop.permute.xlu0 %310 }
  0xb6   : > { %7435 = vst [vmem:[#allocation12_spill] sm:$0xff] %v4807_v62  ;;  %7436 = vst [vmem:[#allocation13_spill] sm:$0xff] %v4809_v63 }
  0xb7   : > { %v4777_v46 = vpop.eup %3987 }
  0xb8   : > { %7427 = vst [vmem:[#allocation4_spill] sm:$0xff] %v4777_v46  ;;  %v257_v37 = vsel %vm205_vm0, %v4777_v46, 0.0  ;;  %v4783_v47 = vpop.eup %3989 }
  0xb9   : > { %7428 = vst [vmem:[#allocation5_spill] sm:$0xff] %v4783_v47  ;;  %261 = vadd.xlane.f32.xlu0 %v260_v36  ;;  %258 = vadd.xlane.f32.xlu1 %v257_v37  ;;  %v263_v49 = vsel %vm205_vm0, %v4783_v47, 0.0  ;;  %v4811_v0 = vpop.permute.xlu1 %308  ;;  %v4813_v1 = vpop.permute.xlu0 %314  ;;  %v513_v37 = vmul.f32 %v3854_v41, %v4847_v40 }
  0xba   : > { %7437 = vst [vmem:[#allocation14_spill] sm:$0xff] %v4811_v0  ;;  %7438 = vst [vmem:[#allocation15_spill] sm:$0xff] %v4813_v1 }
  0xbb   : > { %v4785_v48 = vpop.eup %3991 }
  0xbc   : > { %7429 = vst [vmem:[#allocation6_spill] sm:$0xff] %v4785_v48  ;;  %v266_v50 = vsel %vm205_vm0, %v4785_v48, 0.0  ;;  %v4791_v51 = vpop.eup %3993 }
  0xbd   : > { %7430 = vst [vmem:[#allocation7_spill] sm:$0xff] %v4791_v51  ;;  %264 = vadd.xlane.f32.xlu1 %v263_v49  ;;  %267 = vadd.xlane.f32.xlu0 %v266_v50  ;;  %v269_v54 = vsel %vm205_vm0, %v4791_v51, 0.0  ;;  %v4815_v2 = vpop.permute.xlu1 %312  ;;  %v4865_v50 = vmul.f32 0.35355338, %v512_v39 }
  0xbe   : > { %7439 = vst [vmem:[#allocation16_spill] sm:$0xff] %v4815_v2 }
  0xbf   : > { %v4793_v52 = vpop.eup %3995 }
  0xc0   : > { %7431 = vst [vmem:[#allocation8_spill] sm:$0xff] %v4793_v52  ;;  %v272_v55 = vsel %vm205_vm0, %v4793_v52, 0.0  ;;  %v4799_v56 = vpop.eup %3997 }
  0xc1   : > { %7432 = vst [vmem:[#allocation9_spill] sm:$0xff] %v4799_v56  ;;  %270 = vadd.xlane.f32.xlu1 %v269_v54  ;;  %273 = vadd.xlane.f32.xlu0 %v272_v55  ;;  %v275_v57 = vsel %vm205_vm0, %v4799_v56, 0.0  ;;  %v4818_v6 = vpop.permute.xlu1 %316  ;;  %v514_v54 = vmul.f32 %v3855_v42, %v4853_v20  ;;  %v4869_v55 = vld [vmem:[%s4644_s16 + $0x98] sm:$0xff] }
  0xc2   : > { %7440 = vst [vmem:[#allocation17_spill] sm:$0xff] %v4818_v6 }
  0xc5   : > { %276 = vadd.xlane.f32.xlu1 %v275_v57  ;;  %v3856_v57 = vld [vmem:[%s4649_s20 + $0x2d8] sm:$0xff] }
  0xea   : > { %v369_v3 = vpop.xlane.xlu0 %368 }
  0xeb   : > { %v391_v4 = vsub.f32 %v4711_v45, %v369_v3 }
  0xed   : > { %v399_v5 = vmul.f32 1.442695, %v391_v4  ;;  %v4875_v4 = vld [vmem:[%s4644_s16 + $0xa8] sm:$0xff] }
  0xee   : > { %v375_v9 = vpop.xlane.xlu0 %374 }
  0xef   : > { %3999 = vpow2.f32 %v399_v5  ;;  %v393_v10 = vsub.f32 %v4719_v53, %v375_v9  ;;  %v3858_v5 = vld [vmem:[%s4649_s20 + $0x2e8] sm:$0xff] }
  0xf1   : > { %v403_v11 = vmul.f32 1.442695, %v393_v10 }
  0xf2   : > { %v372_v14 = vpop.xlane.xlu1 %371  ;;  %v378_v15 = vpop.xlane.xlu0 %377 }
  0xf3   : > { %4001 = vpow2.f32 %v403_v11  ;;  %v392_v19 = vsub.f32 %v4725_v59, %v372_v14  ;;  %v394_v21 = vsub.f32 %v4729_v61, %v378_v15  ;;  %v4882_v11 = vmul.f32 0.35355338, %v513_v37 }
  0xf4   : > { %v515_v14 = vmul.f32 %v3856_v57, %v4869_v55 }
  0xf5   : > { %v401_v22 = vmul.f32 1.442695, %v392_v19  ;;  %v405_v23 = vmul.f32 1.442695, %v394_v21  ;;  %v528_v19 = vsel %vm205_vm0, %v4865_v50, -inf }
  0xf6   : > { %v381_v24 = vpop.xlane.xlu0 %380  ;;  %v384_v25 = vpop.xlane.xlu1 %383  ;;  %v4889_v21 = vmul.f32 0.35355338, %v514_v54 }
  0xf7   : > { %4003 = vpow2.f32 %v401_v22  ;;  %v395_v45 = vsub.f32 %v4739_v7, %v381_v24  ;;  %v396_v26 = vsub.f32 %v4741_v8, %v384_v25  ;;  %v517_v22 = vmul.f32 %v3858_v5, %v4875_v4  ;;  %v3857_v24 = vld [vmem:[%s4649_s20 + $0x2e0] sm:$0xff]  ;;  %v4897_v25 = vld [vmem:[%s4644_s16 + $0xb8] sm:$0xff] }
  0xf8   : > { %4005 = vpow2.f32 %v405_v23  ;;  %v4893_v23 = vld [vmem:[%s4644_s16 + $0xa0] sm:$0xff] }
  0xf9   : > { %v407_v27 = vmul.f32 1.442695, %v395_v45  ;;  %v409_v53 = vmul.f32 1.442695, %v396_v26  ;;  %v3860_v45 = vld [vmem:[%s4649_s20 + $0x2f8] sm:$0xff]  ;;  %v531_v26 = vsel %vm205_vm0, %v4882_v11, -inf }
  0xfa   : > { %v387_v28 = vpop.xlane.xlu0 %386  ;;  %v390_v30 = vpop.xlane.xlu1 %389 }
  0xfb   : > { %4007 = vpow2.f32 %v407_v27  ;;  %v397_v59 = vsub.f32 %v4747_v12, %v387_v28  ;;  %v398_v61 = vsub.f32 %v4749_v13, %v390_v30  ;;  %v4902_v27 = vmul.f32 0.35355338, %v515_v14 }
  0xfc   : > { %v4827_v32 = vpop.eup %3999  ;;  %4009 = vpow2.f32 %v409_v53  ;;  %v534_v53 = vsel %vm205_vm0, %v4889_v21, -inf  ;;  %v525_v28 = vmul.f32 0.35355338, %v517_v22  ;;  %v516_v30 = vmul.f32 %v3857_v24, %v4893_v23 }
  0xfd   : > { %v411_v33 = vmul.f32 1.442695, %v397_v59  ;;  %v413_v7 = vmul.f32 1.442695, %v398_v61  ;;  %v415_v8 = vsel %vm205_vm0, %v4827_v32, 0.0  ;;  %v519_v59 = vmul.f32 %v3860_v45, %v4897_v25  ;;  %v4909_v61 = vld [vmem:[%s4644_s16 + $0xb0] sm:$0xff] }
  0xfe   : > { %416 = vadd.xlane.f32.xlu0 %v415_v8  ;;  %v543_v8 = vsel %vm205_vm0, %v525_v28, -inf }
  0xff   : > { %4011 = vpow2.f32 %v411_v33  ;;  %v3859_v33 = vld [vmem:[%s4649_s20 + $0x2f0] sm:$0xff]  ;;  %v527_v38 = vmul.f32 0.35355338, %v519_v59 }
 0x100   : > { %v4831_v34 = vpop.eup %4001  ;;  %4013 = vpow2.f32 %v413_v7  ;;  %v537_v7 = vsel %vm205_vm0, %v4902_v27, -inf }
 0x101   : > { %v421_v12 = vsel %vm205_vm0, %v4831_v34, 0.0  ;;  %v549_v41 = vsel %vm205_vm0, %v527_v38, -inf }
 0x102   : > { %422 = vadd.xlane.f32.xlu0 %v421_v12  ;;  %v524_v12 = vmul.f32 0.35355338, %v516_v30 }
 0x104   : > { %v4835_v13 = vpop.eup %4003  ;;  %v540_v39 = vsel %vm205_vm0, %v524_v12, -inf }
 0x105   : > { %v418_v16 = vsel %vm205_vm0, %v4835_v13, 0.0  ;;  %v4843_v17 = vpop.eup %4005 }
 0x106   : > { %419 = vadd.xlane.f32.xlu1 %v418_v16  ;;  %v424_v29 = vsel %vm205_vm0, %v4843_v17, 0.0  ;;  %v518_v16 = vmul.f32 %v3859_v33, %v4909_v61 }
 0x108   : > { %v4850_v18 = vpop.eup %4007  ;;  %v526_v42 = vmul.f32 0.35355338, %v518_v16 }
 0x109   : > { %v4856_v43 = vpop.eup %4009  ;;  %v427_v36 = vsel %vm205_vm0, %v4850_v18, 0.0 }
 0x10a   : > { %425 = vadd.xlane.f32.xlu1 %v424_v29  ;;  %428 = vadd.xlane.f32.xlu0 %v427_v36  ;;  %v430_v49 = vsel %vm205_vm0, %v4856_v43, 0.0  ;;  %v546_v29 = vsel %vm205_vm0, %v526_v42, -inf  ;;  %v4919_v36 = vpop.permute.xlu1 %465 }
 0x10c   : > { %v4872_v3 = vpop.eup %4011 }
 0x10d   : > { %v4878_v9 = vpop.eup %4013  ;;  %v433_v10 = vsel %vm205_vm0, %v4872_v3, 0.0 }
 0x10e   : > { %431 = vadd.xlane.f32.xlu1 %v430_v49  ;;  %434 = vadd.xlane.f32.xlu0 %v433_v10  ;;  %v436_v15 = vsel %vm205_vm0, %v4878_v9, 0.0  ;;  %v4921_v37 = vpop.permute.xlu1 %467  ;;  %v4923_v49 = vpop.permute.xlu0 %463 }
 0x112   : > { %437 = vadd.xlane.f32.xlu1 %v436_v15  ;;  %529 = vmax.xlane.f32.xlu0 %v528_v19  ;;  %v4925_v54 = vpop.permute.xlu1 %469  ;;  %v4927_v57 = vpop.permute.xlu0 %471 }
 0x116   : > { %532 = vmax.xlane.f32.xlu1 %v531_v26  ;;  %535 = vmax.xlane.f32.xlu0 %v534_v53  ;;  %v4929_v5 = vpop.permute.xlu1 %473  ;;  %v4931_v10 = vpop.permute.xlu0 %475 }
 0x11a   : > { %538 = vmax.xlane.f32.xlu0 %v537_v7  ;;  %544 = vmax.xlane.f32.xlu1 %v543_v8  ;;  %v4933_v14 = vpop.permute.xlu1 %477 }
 0x11b   : > { %7441 = vst [vmem:[#allocation18_spill] sm:$0xff] %v4933_v14 }
 0x11e   : > { %541 = vmax.xlane.f32.xlu0 %v540_v39  ;;  %550 = vmax.xlane.f32.xlu1 %v549_v41 }
 0x122   : > { %547 = vmax.xlane.f32.xlu0 %v546_v29 }
 0x13e   : > { %v4935_v15 = vpop.xlane.xlu0 %255 }
 0x13f   : > { %7442 = vst [vmem:[#allocation19_spill] sm:$0xff] %v4935_v15 }
 0x142   : > { %v4937_v19 = vpop.xlane.xlu1 %258  ;;  %v4939_v22 = vpop.xlane.xlu0 %261 }
 0x143   : > { %7443 = vst [vmem:[#allocation20_spill] sm:$0xff] %v4937_v19  ;;  %7444 = vst [vmem:[#allocation21_spill] sm:$0xff] %v4939_v22 }
 0x146   : > { %v4941_v24 = vpop.xlane.xlu1 %264  ;;  %v4943_v45 = vpop.xlane.xlu0 %267 }
 0x147   : > { %7445 = vst [vmem:[#allocation22_spill] sm:$0xff] %v4941_v24  ;;  %7446 = vst [vmem:[#allocation23_spill] sm:$0xff] %v4943_v45 }
 0x14a   : > { %v4945_v26 = vpop.xlane.xlu1 %270  ;;  %v4947_v53 = vpop.xlane.xlu0 %273 }
 0x14b   : > { %7447 = vst [vmem:[#allocation24_spill] sm:$0xff] %v4945_v26  ;;  %7448 = vst [vmem:[#allocation25_spill] sm:$0xff] %v4947_v53 }
 0x14e   : > { %v4951_v59 = vpop.xlane.xlu1 %276 }
 0x14f   : > { %7449 = vst [vmem:[#allocation26_spill] sm:$0xff] %v4951_v59 }
 0x187   : > { %v4949_v30 = vpop.xlane.xlu0 %416 }
 0x18b   : > { %v4953_v33 = vpop.xlane.xlu0 %422 }
 0x18f   : > { %v4955_v7 = vpop.xlane.xlu1 %419 }
 0x193   : > { %v4957_v8 = vpop.xlane.xlu1 %425  ;;  %v4959_v16 = vpop.xlane.xlu0 %428 }
 0x197   : > { %v4961_v39 = vpop.xlane.xlu1 %431  ;;  %v4963_v41 = vpop.xlane.xlu0 %434 }
 0x19b   : > { %v4965_v29 = vpop.xlane.xlu1 %437  ;;  %v530_v2 = vpop.xlane.xlu0 %529 }
 0x19c   : > { %v552_v51 = vsub.f32 %v4865_v50, %v530_v2 }
 0x19e   : > { %v560_v0 = vmul.f32 1.442695, %v552_v51 }
 0x19f   : > { %v533_v63 = vpop.xlane.xlu1 %532  ;;  %v536_v6 = vpop.xlane.xlu0 %535 }
 0x1a0   : > { %4015 = vpow2.f32 %v560_v0  ;;  %v553_v48 = vsub.f32 %v4882_v11, %v533_v63  ;;  %v554_v56 = vsub.f32 %v4889_v21, %v536_v6 }
 0x1a2   : > { %v562_v47 = vmul.f32 1.442695, %v553_v48  ;;  %v564_v62 = vmul.f32 1.442695, %v554_v56 }
 0x1a3   : > { %v539_v1 = vpop.xlane.xlu0 %538  ;;  %v545_v60 = vpop.xlane.xlu1 %544 }
 0x1a4   : > { %4017 = vpow2.f32 %v562_v47  ;;  %v555_v58 = vsub.f32 %v4902_v27, %v539_v1  ;;  %v557_v26 = vsub.f32 %v525_v28, %v545_v60 }
 0x1a5   : > { %4019 = vpow2.f32 %v564_v62 }
 0x1a6   : > { %v566_v31 = vmul.f32 1.442695, %v555_v58  ;;  %v570_v52 = vmul.f32 1.442695, %v557_v26 }
 0x1a7   : > { %v542_v2 = vpop.xlane.xlu0 %541  ;;  %v551_v51 = vpop.xlane.xlu1 %550 }
 0x1a8   : > { %4021 = vpow2.f32 %v566_v31  ;;  %v556_v50 = vsub.f32 %v524_v12, %v542_v2  ;;  %v559_v0 = vsub.f32 %v527_v38, %v551_v51 }
 0x1a9   : > { %4023 = vpow2.f32 %v570_v52 }
 0x1aa   : > { %v568_v63 = vmul.f32 1.442695, %v556_v50  ;;  %v574_v11 = vmul.f32 1.442695, %v559_v0  ;;  %v5029_v50 = vld [vmem:[%s4644_s16 + $0xc8] sm:$0xff] }
 0x1ab   : > { %v548_v6 = vpop.xlane.xlu0 %547  ;;  %v3862_v0 = vld [vmem:[%s4649_s20 + $0x3c8] sm:$0xff] }
 0x1ac   : > { %4025 = vpow2.f32 %v568_v63  ;;  %v558_v48 = vsub.f32 %v526_v42, %v548_v6  ;;  %v5034_v63 = vld [vmem:[%s4644_s16 + $0xd8] sm:$0xff] }
 0x1ad   : > { %v4971_v56 = vpop.eup %4015  ;;  %4027 = vpow2.f32 %v574_v11  ;;  %v674_v11 = vmul.f32 %v3862_v0, %v5029_v50  ;;  %v5056_v0 = vld [vmem:[%s4644_s16 + $0xf8] sm:$0xff] }
 0x1ae   : > { %7450 = vst [vmem:[#allocation27_spill] sm:$0xff] %v4971_v56  ;;  %v572_v47 = vmul.f32 1.442695, %v558_v48  ;;  %v576_v60 = vsel %vm205_vm0, %v4971_v56, 0.0 }
 0x1af   : > { %577 = vadd.xlane.f32.xlu0 %v576_v60  ;;  %v5041_v60 = vld [vmem:[%s4644_s16 + $0xe0] sm:$0xff] }
 0x1b0   : > { %4029 = vpow2.f32 %v572_v47 }
 0x1b1   : > { %v4975_v58 = vpop.eup %4017 }
 0x1b2   : > { %7451 = vst [vmem:[#allocation28_spill] sm:$0xff] %v4975_v58  ;;  %v4977_v31 = vpop.eup %4019  ;;  %v579_v52 = vsel %vm205_vm0, %v4975_v58, 0.0 }
 0x1b3   : > { %7452 = vst [vmem:[#allocation29_spill] sm:$0xff] %v4977_v31  ;;  %580 = vadd.xlane.f32.xlu1 %v579_v52  ;;  %v582_v62 = vsel %vm205_vm0, %v4977_v31, 0.0  ;;  %v3865_v52 = vld [vmem:[%s4649_s20 + $0x3e0] sm:$0xff] }
 0x1b4   : > { %583 = vadd.xlane.f32.xlu0 %v582_v62  ;;  %v5045_v62 = vld [vmem:[%s4644_s16 + $0xe8] sm:$0xff] }
 0x1b5   : > { %v4983_v1 = vpop.eup %4021 }
 0x1b6   : > { %7453 = vst [vmem:[#allocation30_spill] sm:$0xff] %v4983_v1  ;;  %v4985_v21 = vpop.eup %4023  ;;  %v585_v27 = vsel %vm205_vm0, %v4983_v1, 0.0 }
 0x1b7   : > { %7454 = vst [vmem:[#allocation31_spill] sm:$0xff] %v4985_v21  ;;  %586 = vadd.xlane.f32.xlu1 %v585_v27  ;;  %v591_v28 = vsel %vm205_vm0, %v4985_v21, 0.0  ;;  %v3866_v27 = vld [vmem:[%s4649_s20 + $0x3e8] sm:$0xff] }
 0x1b9   : > { %v4991_v12 = vpop.eup %4025 }
 0x1ba   : > { %7455 = vst [vmem:[#allocation32_spill] sm:$0xff] %v4991_v12  ;;  %v4993_v38 = vpop.eup %4027  ;;  %v588_v42 = vsel %vm205_vm0, %v4991_v12, 0.0 }
 0x1bb   : > { %7456 = vst [vmem:[#allocation33_spill] sm:$0xff] %v4993_v38  ;;  %592 = vadd.xlane.f32.xlu1 %v591_v28  ;;  %589 = vadd.xlane.f32.xlu0 %v588_v42  ;;  %v597_v26 = vsel %vm205_vm0, %v4993_v38, 0.0  ;;  %v682_v28 = vmul.f32 0.35355338, %v674_v11 }
 0x1bd   : > { %v4999_v2 = vpop.eup %4029 }
 0x1be   : > { %7457 = vst [vmem:[#allocation34_spill] sm:$0xff] %v4999_v2  ;;  %v594_v51 = vsel %vm205_vm0, %v4999_v2, 0.0 }
 0x1bf   : > { %598 = vadd.xlane.f32.xlu1 %v597_v26  ;;  %595 = vadd.xlane.f32.xlu0 %v594_v51  ;;  %v677_v51 = vmul.f32 %v3865_v52, %v5041_v60 }
 0x1d0   : > { %626 = vrot.lane.b32.xlu1 %v4847_v40, %s4599_s21  ;;  %v5020_v40 = vld [vmem:[%s4644_s16 + $0xc0] sm:$0xff] }
 0x1d4   : > { %628 = vrot.lane.b32.xlu1 %v4853_v20, %s4599_s21 }
 0x1d5   : > { %624 = vrot.lane.b32.xlu0 %v4838_v35, %s4599_s21  ;;  %v3861_v35 = vld [vmem:[%s4649_s20 + $0x3c0] sm:$0xff] }
 0x1d6   : > { %v673_v20 = vmul.f32 %v3861_v35, %v5020_v40  ;;  %v678_v35 = vmul.f32 %v3866_v27, %v5045_v62 }
 0x1d8   : > { %630 = vrot.lane.b32.xlu1 %v4869_v55, %s4599_s21  ;;  %v5025_v55 = vld [vmem:[%s4644_s16 + $0xd0] sm:$0xff]  ;;  %v686_v11 = vmul.f32 0.35355338, %v678_v35 }
 0x1d9   : > { %632 = vrot.lane.b32.xlu0 %v4893_v23, %s4599_s21  ;;  %v3863_v23 = vld [vmem:[%s4649_s20 + $0x3d0] sm:$0xff] }
 0x1da   : > { %v704_v27 = vsel %vm205_vm0, %v686_v11, -inf }
 0x1dc   : > { %634 = vrot.lane.b32.xlu1 %v4875_v4, %s4599_s21  ;;  %v681_v4 = vmul.f32 0.35355338, %v673_v20  ;;  %v5052_v20 = vld [vmem:[%s4644_s16 + $0xf0] sm:$0xff] }
 0x1dd   : > { %636 = vrot.lane.b32.xlu0 %v4909_v61, %s4599_s21  ;;  %v675_v61 = vmul.f32 %v3863_v23, %v5025_v55  ;;  %v3867_v23 = vld [vmem:[%s4649_s20 + $0x3f0] sm:$0xff] }
 0x1de   : > { %v689_v48 = vsel %vm205_vm0, %v681_v4, -inf }
 0x1df   : > { %v683_v47 = vmul.f32 0.35355338, %v675_v61  ;;  %v3868_v61 = vld [vmem:[%s4649_s20 + $0x3f8] sm:$0xff] }
 0x1e0   : > { %638 = vrot.lane.b32.xlu1 %v4897_v25, %s4599_s21  ;;  %v3864_v25 = vld [vmem:[%s4649_s20 + $0x3d8] sm:$0xff]  ;;  %v680_v46 = vmul.f32 %v3868_v61, %v5056_v0 }
 0x1e1   : > { %v676_v6 = vmul.f32 %v3864_v25, %v5034_v63  ;;  %v695_v26 = vsel %vm205_vm0, %v683_v47, -inf  ;;  %v692_v25 = vsel %vm205_vm0, %v682_v28, -inf }
 0x1e2   : > { %v688_v45 = vmul.f32 0.35355338, %v680_v46 }
 0x1e3   : > { %v684_v42 = vmul.f32 0.35355338, %v676_v6  ;;  %v679_v6 = vmul.f32 %v3867_v23, %v5052_v20 }
 0x1e4   : > { %v710_v24 = vsel %vm205_vm0, %v688_v45, -inf }
 0x1e5   : > { %v698_v44 = vsel %vm205_vm0, %v684_v42, -inf  ;;  %v687_v59 = vmul.f32 0.35355338, %v679_v6 }
 0x1fc   : > { %690 = vmax.xlane.f32.xlu0 %v689_v48  ;;  %v685_v48 = vmul.f32 0.35355338, %v677_v51 }
 0x1fe   : > { %v701_v52 = vsel %vm205_vm0, %v685_v48, -inf }
 0x200   : > { %696 = vmax.xlane.f32.xlu0 %v695_v26  ;;  %v707_v26 = vsel %vm205_vm0, %v687_v59, -inf }
 0x204   : > { %693 = vmax.xlane.f32.xlu1 %v692_v25  ;;  %699 = vmax.xlane.f32.xlu0 %v698_v44 }
 0x208   : > { %702 = vmax.xlane.f32.xlu0 %v701_v52  ;;  %705 = vmax.xlane.f32.xlu1 %v704_v27 }
 0x20c   : > { %708 = vmax.xlane.f32.xlu0 %v707_v26  ;;  %711 = vmax.xlane.f32.xlu1 %v710_v24 }
 0x238   : > { %v5069_v35 = vpop.xlane.xlu0 %577 }
 0x23c   : > { %v5067_v51 = vpop.xlane.xlu1 %580 }
 0x23d   : > { %v5073_v44 = vpop.xlane.xlu0 %583 }
 0x240   : > { %v5071_v23 = vpop.xlane.xlu1 %586 }
 0x244   : > { %v5075_v61 = vpop.xlane.xlu1 %592  ;;  %v5077_v25 = vpop.xlane.xlu0 %589 }
 0x248   : > { %v5079_v46 = vpop.xlane.xlu1 %598  ;;  %v5081_v6 = vpop.xlane.xlu0 %595 }
 0x24c   : > { %v5083_v52 = vpop.permute.xlu1 %626  ;;  %v5085_v27 = vpop.permute.xlu0 %624 }
 0x24d   : > { %7458 = vst [vmem:[#allocation35_spill] sm:$0xff] %v5083_v52  ;;  %7459 = vst [vmem:[#allocation36_spill] sm:$0xff] %v5085_v27 }
 0x250   : > { %v5087_v24 = vpop.permute.xlu1 %628  ;;  %v5089_v26 = vpop.permute.xlu0 %632 }
 0x251   : > { %7460 = vst [vmem:[#allocation37_spill] sm:$0xff] %v5087_v24  ;;  %7461 = vst [vmem:[#allocation38_spill] sm:$0xff] %v5089_v26 }
 0x254   : > { %v5091_v53 = vpop.permute.xlu1 %630  ;;  %v5093_v22 = vpop.permute.xlu0 %636 }
 0x255   : > { %7462 = vst [vmem:[#allocation39_spill] sm:$0xff] %v5091_v53  ;;  %7463 = vst [vmem:[#allocation40_spill] sm:$0xff] %v5093_v22 }
 0x258   : > { %v5095_v19 = vpop.permute.xlu1 %634 }
 0x259   : > { %7464 = vst [vmem:[#allocation41_spill] sm:$0xff] %v5095_v19 }
 0x25c   : > { %v5097_v2 = vpop.permute.xlu1 %638 }
 0x25d   : > { %7465 = vst [vmem:[#allocation42_spill] sm:$0xff] %v5097_v2 }
 0x285   : > { %v691_v15 = vpop.xlane.xlu0 %690 }
 0x286   : > { %v713_v38 = vsub.f32 %v681_v4, %v691_v15 }
 0x288   : > { %v721_v21 = vmul.f32 1.442695, %v713_v38 }
 0x289   : > { %v697_v1 = vpop.xlane.xlu0 %696 }
 0x28a   : > { %4031 = vpow2.f32 %v721_v21  ;;  %v715_v12 = vsub.f32 %v683_v47, %v697_v1 }
 0x28c   : > { %v725_v31 = vmul.f32 1.442695, %v715_v12 }
 0x28d   : > { %v694_v52 = vpop.xlane.xlu1 %693  ;;  %v700_v27 = vpop.xlane.xlu0 %699 }
 0x28e   : > { %4033 = vpow2.f32 %v725_v31  ;;  %v714_v24 = vsub.f32 %v682_v28, %v694_v52  ;;  %v716_v26 = vsub.f32 %v684_v42, %v700_v27 }
 0x290   : > { %v723_v14 = vmul.f32 1.442695, %v714_v24  ;;  %v727_v53 = vmul.f32 1.442695, %v716_v26  ;;  %v817_v24 = vld [vmem:[%s4649_s20] sm:$0xff] }
 0x291   : > { %v703_v56 = vpop.xlane.xlu0 %702  ;;  %v706_v22 = vpop.xlane.xlu1 %705 }
 0x292   : > { %4035 = vpow2.f32 %v723_v14  ;;  %v717_v19 = vsub.f32 %v685_v48, %v703_v56  ;;  %v718_v58 = vsub.f32 %v686_v11, %v706_v22 }
 0x293   : > { %4037 = vpow2.f32 %v727_v53 }
 0x294   : > { %v729_v15 = vmul.f32 1.442695, %v717_v19  ;;  %v731_v38 = vmul.f32 1.442695, %v718_v58 }
 0x295   : > { %v709_v4 = vpop.xlane.xlu0 %708  ;;  %v712_v2 = vpop.xlane.xlu1 %711 }
 0x296   : > { %4039 = vpow2.f32 %v729_v15  ;;  %v719_v1 = vsub.f32 %v687_v59, %v709_v4  ;;  %v720_v21 = vsub.f32 %v688_v45, %v712_v2 }
 0x297   : > { %v5099_v12 = vpop.eup %4031  ;;  %4041 = vpow2.f32 %v731_v38 }
 0x298   : > { %7466 = vst [vmem:[#allocation43_spill] sm:$0xff] %v5099_v12  ;;  %v733_v31 = vmul.f32 1.442695, %v719_v1  ;;  %v735_v47 = vmul.f32 1.442695, %v720_v21  ;;  %v737_v28 = vsel %vm205_vm0, %v5099_v12, 0.0 }
 0x299   : > { %738 = vadd.xlane.f32.xlu0 %v737_v28 }
 0x29a   : > { %4043 = vpow2.f32 %v733_v31 }
 0x29b   : > { %v5103_v14 = vpop.eup %4033  ;;  %4045 = vpow2.f32 %v735_v47 }
 0x29c   : > { %7467 = vst [vmem:[#allocation44_spill] sm:$0xff] %v5103_v14  ;;  %v743_v19 = vsel %vm205_vm0, %v5103_v14, 0.0 }
 0x29d   : > { %744 = vadd.xlane.f32.xlu0 %v743_v19 }
 0x29f   : > { %v5107_v22 = vpop.eup %4035 }
 0x2a0   : > { %7468 = vst [vmem:[#allocation45_spill] sm:$0xff] %v5107_v22  ;;  %v5109_v45 = vpop.eup %4037  ;;  %v740_v53 = vsel %vm205_vm0, %v5107_v22, 0.0 }
 0x2a1   : > { %7469 = vst [vmem:[#allocation46_spill] sm:$0xff] %v5109_v45  ;;  %741 = vadd.xlane.f32.xlu1 %v740_v53  ;;  %v746_v59 = vsel %vm205_vm0, %v5109_v45, 0.0 }
 0x2a3   : > { %v5115_v56 = vpop.eup %4039 }
 0x2a4   : > { %7470 = vst [vmem:[#allocation47_spill] sm:$0xff] %v5115_v56  ;;  %v5117_v58 = vpop.eup %4041  ;;  %v749_v2 = vsel %vm205_vm0, %v5115_v56, 0.0  ;;  %v5223_v56 = vld [vmem:[%s4644_s16 + $0x28] sm:$0xff] }
 0x2a5   : > { %7471 = vst [vmem:[#allocation48_spill] sm:$0xff] %v5117_v58  ;;  %747 = vadd.xlane.f32.xlu1 %v746_v59  ;;  %750 = vadd.xlane.f32.xlu0 %v749_v2  ;;  %v752_v42 = vsel %vm205_vm0, %v5117_v58, 0.0 }
 0x2a7   : > { %v5123_v48 = vpop.eup %4043 }
 0x2a8   : > { %7472 = vst [vmem:[#allocation49_spill] sm:$0xff] %v5123_v48  ;;  %v5125_v11 = vpop.eup %4045  ;;  %v755_v52 = vsel %vm205_vm0, %v5123_v48, 0.0 }
 0x2a9   : > { %7473 = vst [vmem:[#allocation50_spill] sm:$0xff] %v5125_v11  ;;  %753 = vadd.xlane.f32.xlu1 %v752_v42  ;;  %756 = vadd.xlane.f32.xlu0 %v755_v52  ;;  %v758_v27 = vsel %vm205_vm0, %v5125_v11, 0.0  ;;  %v5192_v52 = vld [vmem:[%s4644_s16] sm:$0xff] }
 0x2ad   : > { %759 = vadd.xlane.f32.xlu1 %v758_v27 }
 0x2be   : > { %787 = vrot.lane.b32.xlu1 %v5029_v50, %s4599_s21  ;;  %v821_v50 = vld [vmem:[%s4649_s20 + $0x20] sm:$0xff] }
 0x2bf   : > { %785 = vrot.lane.b32.xlu0 %v5020_v40, %s4599_s21  ;;  %v819_v40 = vld [vmem:[%s4649_s20 + $0x10] sm:$0xff] }
 0x2c2   : > { %789 = vrot.lane.b32.xlu1 %v5025_v55, %s4599_s21  ;;  %v818_v55 = vld [vmem:[%s4649_s20 + $0x8] sm:$0xff] }
 0x2c3   : > { %793 = vrot.lane.b32.xlu0 %v5041_v60, %s4599_s21  ;;  %v823_v60 = vld [vmem:[%s4649_s20 + $0x30] sm:$0xff] }
 0x2c6   : > { %791 = vrot.lane.b32.xlu1 %v5034_v63, %s4599_s21  ;;  %v820_v63 = vld [vmem:[%s4649_s20 + $0x18] sm:$0xff] }
 0x2c7   : > { %797 = vrot.lane.b32.xlu0 %v5052_v20, %s4599_s21  ;;  %v824_v20 = vld [vmem:[%s4649_s20 + $0x38] sm:$0xff] }
 0x2ca   : > { %795 = vrot.lane.b32.xlu1 %v5045_v62, %s4599_s21  ;;  %v822_v62 = vld [vmem:[%s4649_s20 + $0x28] sm:$0xff] }
 0x2cb   : > { %833 = vrot.lane.b32.xlu0 %v817_v24, %s4600_s22 }
 0x2ce   : > { %799 = vrot.lane.b32.xlu1 %v5056_v0, %s4599_s21 }
 0x2cf   : > { %837 = vrot.lane.b32.xlu0 %v819_v40, %s4600_s22 }
 0x2d2   : > { %835 = vrot.lane.b32.xlu1 %v818_v55, %s4600_s22 }
 0x2d3   : > { %841 = vrot.lane.b32.xlu0 %v821_v50, %s4600_s22  ;;  %v5198_v50 = vld [vmem:[%s4644_s16 + $0x10] sm:$0xff] }
 0x2d6   : > { %839 = vrot.lane.b32.xlu1 %v820_v63, %s4600_s22 }
 0x2d7   : > { %845 = vrot.lane.b32.xlu0 %v823_v60, %s4600_s22 }
 0x2da   : > { %843 = vrot.lane.b32.xlu1 %v822_v62, %s4600_s22 }
 0x2de   : > { %847 = vrot.lane.b32.xlu1 %v824_v20, %s4600_s22 }
 0x322   : > { %v5163_v0 = vpop.xlane.xlu0 %738 }
 0x323   : > { %7474 = vst [vmem:[#allocation51_spill] sm:$0xff] %v5163_v0 }
 0x326   : > { %v5165_v26 = vpop.xlane.xlu0 %744 }
 0x327   : > { %7475 = vst [vmem:[#allocation52_spill] sm:$0xff] %v5165_v26 }
 0x32a   : > { %v5167_v15 = vpop.xlane.xlu1 %741 }
 0x32b   : > { %7476 = vst [vmem:[#allocation53_spill] sm:$0xff] %v5167_v15 }
 0x32e   : > { %v5169_v38 = vpop.xlane.xlu1 %747  ;;  %v5171_v4 = vpop.xlane.xlu0 %750 }
 0x32f   : > { %7477 = vst [vmem:[#allocation54_spill] sm:$0xff] %v5169_v38  ;;  %7478 = vst [vmem:[#allocation55_spill] sm:$0xff] %v5171_v4 }
 0x332   : > { %v5173_v1 = vpop.xlane.xlu1 %753  ;;  %v5175_v21 = vpop.xlane.xlu0 %756 }
 0x333   : > { %7479 = vst [vmem:[#allocation56_spill] sm:$0xff] %v5173_v1  ;;  %7480 = vst [vmem:[#allocation57_spill] sm:$0xff] %v5175_v21 }
 0x336   : > { %v5177_v31 = vpop.xlane.xlu1 %759  ;;  %v5179_v47 = vpop.permute.xlu0 %785 }
 0x337   : > { %7481 = vst [vmem:[#allocation58_spill] sm:$0xff] %v5177_v31  ;;  %7482 = vst [vmem:[#allocation59_spill] sm:$0xff] %v5179_v47 }
 0x33a   : > { %v5181_v28 = vpop.permute.xlu1 %787  ;;  %v5183_v19 = vpop.permute.xlu0 %793 }
 0x33b   : > { %7483 = vst [vmem:[#allocation60_spill] sm:$0xff] %v5181_v28  ;;  %7484 = vst [vmem:[#allocation61_spill] sm:$0xff] %v5183_v19  ;;  %v5214_v19 = vld [vmem:[%s4644_s16 + $0x18] sm:$0xff] }
 0x33e   : > { %v5185_v53 = vpop.permute.xlu1 %789  ;;  %v5187_v59 = vpop.permute.xlu0 %797 }
 0x33f   : > { %7485 = vst [vmem:[#allocation62_spill] sm:$0xff] %v5185_v53  ;;  %7486 = vst [vmem:[#allocation63_spill] sm:$0xff] %v5187_v59  ;;  %v5206_v59 = vld [vmem:[%s4644_s16 + $0x8] sm:$0xff]  ;;  %v5219_v53 = vld [vmem:[%s4644_s16 + $0x30] sm:$0xff] }
 0x342   : > { %v5189_v2 = vpop.permute.xlu1 %791  ;;  %v834_v42 = vpop.permute.xlu0 %833 }
 0x343   : > { %7487 = vst [vmem:[#allocation64_spill] sm:$0xff] %v5189_v2  ;;  %v857_v27 = vmul.f32 %v5192_v52, %v834_v42 }
 0x345   : > { %v865_v24 = vmul.f32 0.35355338, %v857_v27 }
 0x346   : > { %v5195_v40 = vpop.permute.xlu1 %795  ;;  %v838_v55 = vpop.permute.xlu0 %837 }
 0x347   : > { %7488 = vst [vmem:[#allocation65_spill] sm:$0xff] %v5195_v40  ;;  %v859_v63 = vmul.f32 %v5198_v50, %v838_v55  ;;  %v874_v60 = vsel %vm873_vm1, %v865_v24, -inf  ;;  %v5210_v55 = vld [vmem:[%s4644_s16 + $0x20] sm:$0xff] }
 0x348   : > { %875 = vmax.xlane.f32.xlu0 %v874_v60 }
 0x349   : > { %v867_v62 = vmul.f32 0.35355338, %v859_v63 }
 0x34a   : > { %v5202_v20 = vpop.permute.xlu1 %799  ;;  %v842_v42 = vpop.permute.xlu0 %841 }
 0x34b   : > { %7489 = vst [vmem:[#allocation66_spill] sm:$0xff] %v5202_v20  ;;  %v880_v11 = vsel %vm873_vm1, %v867_v62, -inf  ;;  %v861_v48 = vmul.f32 %v5210_v55, %v842_v42 }
 0x34c   : > { %881 = vmax.xlane.f32.xlu0 %v880_v11 }
 0x34d   : > { %v869_v45 = vmul.f32 0.35355338, %v861_v48 }
 0x34e   : > { %v836_v27 = vpop.permute.xlu1 %835  ;;  %v846_v63 = vpop.permute.xlu0 %845 }
 0x34f   : > { %v858_v40 = vmul.f32 %v5206_v59, %v836_v27  ;;  %v886_v47 = vsel %vm873_vm1, %v869_v45, -inf }
 0x351   : > { %v866_v58 = vmul.f32 0.35355338, %v858_v40  ;;  %v863_v40 = vmul.f32 %v5219_v53, %v846_v63 }
 0x352   : > { %v840_v60 = vpop.permute.xlu1 %839 }
 0x353   : > { %v860_v20 = vmul.f32 %v5214_v19, %v840_v60  ;;  %v877_v11 = vsel %vm873_vm1, %v866_v58, -inf  ;;  %v871_v60 = vmul.f32 0.35355338, %v863_v40 }
 0x354   : > { %878 = vmax.xlane.f32.xlu1 %v877_v11  ;;  %v5229_v11 = vld [vmem:[%s4644_s16 + $0x38] sm:$0xff] }
 0x355   : > { %v868_v2 = vmul.f32 0.35355338, %v860_v20  ;;  %v892_v12 = vsel %vm873_vm1, %v871_v60, -inf }
 0x356   : > { %v844_v27 = vpop.permute.xlu1 %843 }
 0x357   : > { %v862_v42 = vmul.f32 %v5223_v56, %v844_v27  ;;  %v883_v14 = vsel %vm873_vm1, %v868_v2, -inf }
 0x358   : > { %884 = vmax.xlane.f32.xlu0 %v883_v14 }
 0x359   : > { %v870_v28 = vmul.f32 0.35355338, %v862_v42 }
 0x35a   : > { %v848_v22 = vpop.permute.xlu1 %847 }
 0x35b   : > { %v864_v48 = vmul.f32 %v5229_v11, %v848_v22  ;;  %v889_v20 = vsel %vm873_vm1, %v870_v28, -inf }
 0x35c   : > { %890 = vmax.xlane.f32.xlu1 %v889_v20  ;;  %887 = vmax.xlane.f32.xlu0 %v886_v47 }
 0x35d   : > { %v872_v63 = vmul.f32 0.35355338, %v864_v48 }
 0x35f   : > { %v895_v27 = vsel %vm873_vm1, %v872_v63, -inf }
 0x360   : > { %896 = vmax.xlane.f32.xlu1 %v895_v27  ;;  %893 = vmax.xlane.f32.xlu0 %v892_v12 }
 0x3d1   : > { %v876_v14 = vpop.xlane.xlu0 %875 }
 0x3d2   : > { %v898_v40 = vsub.f32 %v865_v24, %v876_v14 }
 0x3d4   : > { %v906_v42 = vmul.f32 1.442695, %v898_v40 }
 0x3d5   : > { %v882_v31 = vpop.xlane.xlu0 %881 }
 0x3d6   : > { %4047 = vpow2.f32 %v906_v42  ;;  %v900_v1 = vsub.f32 %v867_v62, %v882_v31 }
 0x3d8   : > { %v910_v26 = vmul.f32 1.442695, %v900_v1 }
 0x3dd   : > { %v879_v21 = vpop.xlane.xlu1 %878 }
 0x3de   : > { %v899_v4 = vsub.f32 %v866_v58, %v879_v21 }
 0x3e0   : > { %v908_v22 = vmul.f32 1.442695, %v899_v4 }
 0x3e1   : > { %v885_v38 = vpop.xlane.xlu0 %884 }
 0x3e2   : > { %4049 = vpow2.f32 %v908_v22  ;;  %v901_v47 = vsub.f32 %v868_v2, %v885_v38 }
 0x3e3   : > { %v5235_v48 = vpop.eup %4047  ;;  %4051 = vpow2.f32 %v910_v26 }
 0x3e4   : > { %7490 = vst [vmem:[#allocation67_spill] sm:$0xff] %v5235_v48  ;;  %930 = vrot.lane.b32.xlu0 %v5235_v48, %s4601_s23  ;;  %v912_v24 = vmul.f32 1.442695, %v901_v47 }
 0x3e5   : > { %v891_v12 = vpop.xlane.xlu1 %890  ;;  %v888_v20 = vpop.xlane.xlu0 %887 }
 0x3e6   : > { %v903_v27 = vsub.f32 %v870_v28, %v891_v12  ;;  %v902_v14 = vsub.f32 %v869_v45, %v888_v20  ;;  %4053 = vpow2.f32 %v912_v24 }
 0x3e8   : > { %v914_v40 = vmul.f32 1.442695, %v902_v14  ;;  %v916_v4 = vmul.f32 1.442695, %v903_v27 }
 0x3e9   : > { %v897_v31 = vpop.xlane.xlu1 %896  ;;  %v894_v58 = vpop.xlane.xlu0 %893 }
 0x3ea   : > { %v905_v1 = vsub.f32 %v872_v63, %v897_v31  ;;  %v904_v21 = vsub.f32 %v871_v60, %v894_v58  ;;  %4055 = vpow2.f32 %v914_v40 }
 0x3eb   : > { %4057 = vpow2.f32 %v916_v4 }
 0x3ec   : > { %v918_v38 = vmul.f32 1.442695, %v904_v21  ;;  %v920_v2 = vmul.f32 1.442695, %v905_v1 }
 0x3ee   : > { %4059 = vpow2.f32 %v918_v38 }
 0x3ef   : > { %v5239_v62 = vpop.eup %4049  ;;  %4061 = vpow2.f32 %v920_v2 }
 0x3f0   : > { %7491 = vst [vmem:[#allocation68_spill] sm:$0xff] %v5239_v62  ;;  %932 = vrot.lane.b32.xlu1 %v5239_v62, %s4601_s23  ;;  %v5243_v26 = vpop.eup %4051 }
 0x3f1   : > { %7492 = vst [vmem:[#allocation69_spill] sm:$0xff] %v5243_v26 }
 0x3f3   : > { %v5247_v45 = vpop.eup %4053 }
 0x3f4   : > { %934 = vrot.lane.b32.xlu1 %v5243_v26, %s4601_s23  ;;  %7493 = vst [vmem:[#allocation70_spill] sm:$0xff] %v5247_v45  ;;  %v5363_v26 = vld [vmem:[%s4644_s16 + $0x70] sm:$0xff] }
 0x3f7   : > { %v5249_v28 = vpop.eup %4055 }
 0x3f8   : > { %7494 = vst [vmem:[#allocation71_spill] sm:$0xff] %v5249_v28  ;;  %936 = vrot.lane.b32.xlu1 %v5247_v45, %s4601_s23  ;;  %938 = vrot.lane.b32.xlu0 %v5249_v28, %s4601_s23  ;;  %v5255_v60 = vpop.eup %4057 }
 0x3f9   : > { %7495 = vst [vmem:[#allocation72_spill] sm:$0xff] %v5255_v60 }
 0x3fb   : > { %v5257_v63 = vpop.eup %4059 }
 0x3fc   : > { %7496 = vst [vmem:[#allocation73_spill] sm:$0xff] %v5257_v63  ;;  %940 = vrot.lane.b32.xlu1 %v5255_v60, %s4601_s23  ;;  %942 = vrot.lane.b32.xlu0 %v5257_v63, %s4601_s23  ;;  %v5263_v42 = vpop.eup %4061  ;;  %v5349_v63 = vld [vmem:[%s4644_s16 + $0x48] sm:$0xff] }
 0x3fd   : > { %7497 = vst [vmem:[#allocation74_spill] sm:$0xff] %v5263_v42 }
 0x400   : > { %944 = vrot.lane.b32.xlu1 %v5263_v42, %s4601_s23 }
 0x456   : > { %v931_v22 = vpop.permute.xlu0 %930 }
 0x457   : > { %v954_v47 = vsel %vm205_vm0, %v931_v22, 0.0 }
 0x458   : > { %955 = vadd.xlane.f32.xlu0 %v954_v47  ;;  %v3876_v47 = vld [vmem:[%s4649_s20 + $0x138] sm:$0xff] }
 0x462   : > { %v933_v12 = vpop.permute.xlu1 %932 }
 0x463   : > { %v957_v20 = vsel %vm205_vm0, %v933_v12, 0.0 }
 0x464   : > { %958 = vadd.xlane.f32.xlu1 %v957_v20 }
 0x466   : > { %v935_v24 = vpop.permute.xlu1 %934 }
 0x467   : > { %v960_v27 = vsel %vm205_vm0, %v935_v24, 0.0 }
 0x468   : > { %961 = vadd.xlane.f32.xlu0 %v960_v27 }
 0x46a   : > { %v937_v14 = vpop.permute.xlu1 %936  ;;  %v939_v40 = vpop.permute.xlu0 %938 }
 0x46b   : > { %v963_v31 = vsel %vm205_vm0, %v937_v14, 0.0  ;;  %v966_v1 = vsel %vm205_vm0, %v939_v40, 0.0 }
 0x46c   : > { %964 = vadd.xlane.f32.xlu0 %v963_v31 }
 0x46e   : > { %v941_v58 = vpop.permute.xlu1 %940  ;;  %v943_v21 = vpop.permute.xlu0 %942 }
 0x46f   : > { %v969_v4 = vsel %vm205_vm0, %v941_v58, 0.0  ;;  %v972_v22 = vsel %vm205_vm0, %v943_v21, 0.0 }
 0x470   : > { %970 = vadd.xlane.f32.xlu1 %v969_v4  ;;  %967 = vadd.xlane.f32.xlu0 %v966_v1 }
 0x472   : > { %v945_v38 = vpop.permute.xlu1 %944 }
 0x473   : > { %v975_v2 = vsel %vm205_vm0, %v945_v38, 0.0 }
 0x474   : > { %976 = vadd.xlane.f32.xlu1 %v975_v2  ;;  %973 = vadd.xlane.f32.xlu0 %v972_v22 }
 0x485   : > { %996 = vrot.lane.b32.xlu1 %v5206_v59, %s4602_s24  ;;  %v3869_v59 = vld [vmem:[%s4649_s20 + $0x100] sm:$0xff] }
 0x489   : > { %998 = vrot.lane.b32.xlu1 %v5198_v50, %s4602_s24  ;;  %v3871_v50 = vld [vmem:[%s4649_s20 + $0x110] sm:$0xff] }
 0x48a   : > { %994 = vrot.lane.b32.xlu0 %v5192_v52, %s4602_s24  ;;  %v3870_v52 = vld [vmem:[%s4649_s20 + $0x108] sm:$0xff] }
 0x48d   : > { %1000 = vrot.lane.b32.xlu1 %v5214_v19, %s4602_s24  ;;  %v3872_v19 = vld [vmem:[%s4649_s20 + $0x118] sm:$0xff] }
 0x48e   : > { %1002 = vrot.lane.b32.xlu0 %v5210_v55, %s4602_s24  ;;  %v3873_v55 = vld [vmem:[%s4649_s20 + $0x120] sm:$0xff] }
 0x491   : > { %1004 = vrot.lane.b32.xlu1 %v5223_v56, %s4602_s24  ;;  %v3874_v56 = vld [vmem:[%s4649_s20 + $0x128] sm:$0xff] }
 0x492   : > { %1006 = vrot.lane.b32.xlu0 %v5219_v53, %s4602_s24  ;;  %v3875_v53 = vld [vmem:[%s4649_s20 + $0x130] sm:$0xff] }
 0x495   : > { %1008 = vrot.lane.b32.xlu1 %v5229_v11, %s4602_s24 }
 0x496   : > { %1043 = vrot.lane.b32.xlu0 %v3869_v59, %s4600_s22 }
 0x499   : > { %1045 = vrot.lane.b32.xlu1 %v3870_v52, %s4600_s22  ;;  %v5338_v52 = vld [vmem:[%s4644_s16 + $0x40] sm:$0xff] }
 0x49a   : > { %1047 = vrot.lane.b32.xlu0 %v3871_v50, %s4600_s22 }
 0x49d   : > { %1049 = vrot.lane.b32.xlu1 %v3872_v19, %s4600_s22 }
 0x49e   : > { %1051 = vrot.lane.b32.xlu0 %v3873_v55, %s4600_s22 }
 0x4a1   : > { %1053 = vrot.lane.b32.xlu1 %v3874_v56, %s4600_s22 }
 0x4a2   : > { %1055 = vrot.lane.b32.xlu0 %v3875_v53, %s4600_s22  ;;  %v5344_v53 = vld [vmem:[%s4644_s16 + $0x50] sm:$0xff] }
 0x4a5   : > { %1057 = vrot.lane.b32.xlu1 %v3876_v47, %s4600_s22 }
 0x4e1   : > { %v5307_v11 = vpop.xlane.xlu0 %955 }
 0x4e2   : > { %7498 = vst [vmem:[#allocation75_spill] sm:$0xff] %v5307_v11 }
 0x4ed   : > { %v5311_v20 = vpop.xlane.xlu1 %958 }
 0x4ee   : > { %7500 = vst [vmem:[#allocation77_spill] sm:$0xff] %v5311_v20 }
 0x4f1   : > { %v5309_v12 = vpop.xlane.xlu0 %961 }
 0x4f2   : > { %7499 = vst [vmem:[#allocation76_spill] sm:$0xff] %v5309_v12 }
 0x4f5   : > { %v5313_v24 = vpop.xlane.xlu0 %964 }
 0x4f6   : > { %7501 = vst [vmem:[#allocation78_spill] sm:$0xff] %v5313_v24 }
 0x4f9   : > { %v5315_v27 = vpop.xlane.xlu1 %970  ;;  %v5317_v14 = vpop.xlane.xlu0 %967 }
 0x4fa   : > { %7502 = vst [vmem:[#allocation79_spill] sm:$0xff] %v5315_v27  ;;  %7503 = vst [vmem:[#allocation80_spill] sm:$0xff] %v5317_v14 }
 0x4fd   : > { %v5319_v40 = vpop.xlane.xlu1 %976  ;;  %v5321_v31 = vpop.xlane.xlu0 %973 }
 0x4fe   : > { %7504 = vst [vmem:[#allocation81_spill] sm:$0xff] %v5319_v40  ;;  %7505 = vst [vmem:[#allocation82_spill] sm:$0xff] %v5321_v31 }
 0x501   : > { %v5323_v58 = vpop.permute.xlu1 %996  ;;  %v5325_v4 = vpop.permute.xlu0 %994 }
 0x502   : > { %7506 = vst [vmem:[#allocation83_spill] sm:$0xff] %v5323_v58  ;;  %7507 = vst [vmem:[#allocation84_spill] sm:$0xff] %v5325_v4  ;;  %v5367_v58 = vld [vmem:[%s4644_s16 + $0x68] sm:$0xff] }
 0x505   : > { %v5327_v1 = vpop.permute.xlu1 %998  ;;  %v5329_v21 = vpop.permute.xlu0 %1002 }
 0x506   : > { %7508 = vst [vmem:[#allocation85_spill] sm:$0xff] %v5327_v1  ;;  %7509 = vst [vmem:[#allocation86_spill] sm:$0xff] %v5329_v21  ;;  %v5354_v21 = vld [vmem:[%s4644_s16 + $0x60] sm:$0xff] }
 0x509   : > { %v5331_v38 = vpop.permute.xlu1 %1000  ;;  %v5333_v2 = vpop.permute.xlu0 %1006 }
 0x50a   : > { %7510 = vst [vmem:[#allocation87_spill] sm:$0xff] %v5331_v38  ;;  %7511 = vst [vmem:[#allocation88_spill] sm:$0xff] %v5333_v2 }
 0x50d   : > { %v5335_v22 = vpop.permute.xlu1 %1004  ;;  %v1044_v59 = vpop.permute.xlu0 %1043 }
 0x50e   : > { %7512 = vst [vmem:[#allocation89_spill] sm:$0xff] %v5335_v22  ;;  %v1067_v50 = vmul.f32 %v5338_v52, %v1044_v59 }
 0x510   : > { %v1075_v19 = vmul.f32 0.35355338, %v1067_v50 }
 0x511   : > { %v5341_v55 = vpop.permute.xlu1 %1008  ;;  %v1048_v56 = vpop.permute.xlu0 %1047 }
 0x512   : > { %7513 = vst [vmem:[#allocation90_spill] sm:$0xff] %v5341_v55  ;;  %v1069_v47 = vmul.f32 %v5344_v53, %v1048_v56  ;;  %v1083_v42 = vsel %vm873_vm1, %v1075_v19, -inf }
 0x513   : > { %1084 = vmax.xlane.f32.xlu0 %v1083_v42  ;;  %v5358_v42 = vld [vmem:[%s4644_s16 + $0x58] sm:$0xff] }
 0x514   : > { %v1077_v2 = vmul.f32 0.35355338, %v1069_v47 }
 0x515   : > { %v1046_v22 = vpop.permute.xlu1 %1045  ;;  %v1052_v60 = vpop.permute.xlu0 %1051 }
 0x516   : > { %v1068_v59 = vmul.f32 %v5349_v63, %v1046_v22  ;;  %v1089_v50 = vsel %vm873_vm1, %v1077_v2, -inf  ;;  %v1071_v56 = vmul.f32 %v5354_v21, %v1052_v60 }
 0x517   : > { %1090 = vmax.xlane.f32.xlu0 %v1089_v50 }
 0x518   : > { %v1076_v55 = vmul.f32 0.35355338, %v1068_v59  ;;  %v1079_v1 = vmul.f32 0.35355338, %v1071_v56 }
 0x519   : > { %v1050_v38 = vpop.permute.xlu1 %1049  ;;  %v1056_v45 = vpop.permute.xlu0 %1055 }
 0x51a   : > { %v1070_v47 = vmul.f32 %v5358_v42, %v1050_v38  ;;  %v1086_v28 = vsel %vm873_vm1, %v1076_v55, -inf  ;;  %v1073_v59 = vmul.f32 %v5363_v26, %v1056_v45  ;;  %v1095_v48 = vsel %vm873_vm1, %v1079_v1, -inf }
 0x51b   : > { %1087 = vmax.xlane.f32.xlu1 %v1086_v28  ;;  %v5373_v28 = vld [vmem:[%s4644_s16 + $0x78] sm:$0xff] }
 0x51c   : > { %v1078_v22 = vmul.f32 0.35355338, %v1070_v47  ;;  %v1081_v38 = vmul.f32 0.35355338, %v1073_v59 }
 0x51d   : > { %v1054_v50 = vpop.permute.xlu1 %1053 }
 0x51e   : > { %v1072_v60 = vmul.f32 %v5367_v58, %v1054_v50  ;;  %v1092_v4 = vsel %vm873_vm1, %v1078_v22, -inf  ;;  %v1101_v31 = vsel %vm873_vm1, %v1081_v38, -inf }
 0x51f   : > { %1093 = vmax.xlane.f32.xlu0 %v1092_v4 }
 0x520   : > { %v1080_v62 = vmul.f32 0.35355338, %v1072_v60 }
 0x521   : > { %v1058_v40 = vpop.permute.xlu1 %1057 }
 0x522   : > { %v1074_v56 = vmul.f32 %v5373_v28, %v1058_v40  ;;  %v1098_v47 = vsel %vm873_vm1, %v1080_v62, -inf }
 0x523   : > { %1099 = vmax.xlane.f32.xlu1 %v1098_v47  ;;  %1096 = vmax.xlane.f32.xlu0 %v1095_v48 }
 0x524   : > { %v1082_v45 = vmul.f32 0.35355338, %v1074_v56 }
 0x526   : > { %v1104_v50 = vsel %vm873_vm1, %v1082_v45, -inf }
 0x527   : > { %1105 = vmax.xlane.f32.xlu1 %v1104_v50  ;;  %1102 = vmax.xlane.f32.xlu0 %v1101_v31 }
 0x59c   : > { %v1085_v4 = vpop.xlane.xlu0 %1084 }
 0x59d   : > { %v1107_v59 = vsub.f32 %v1075_v19, %v1085_v4 }
 0x59f   : > { %v1115_v60 = vmul.f32 1.442695, %v1107_v59 }
 0x5a0   : > { %v1091_v27 = vpop.xlane.xlu0 %1090 }
 0x5a1   : > { %4063 = vpow2.f32 %v1115_v60  ;;  %v1109_v24 = vsub.f32 %v1077_v2, %v1091_v27 }
 0x5a3   : > { %v1119_v11 = vmul.f32 1.442695, %v1109_v24 }
 0x5a4   : > { %v1088_v14 = vpop.xlane.xlu1 %1087 }
 0x5a5   : > { %v1108_v12 = vsub.f32 %v1076_v55, %v1088_v14 }
 0x5a7   : > { %v1117_v40 = vmul.f32 1.442695, %v1108_v12 }
 0x5a8   : > { %v1094_v20 = vpop.xlane.xlu0 %1093 }
 0x5a9   : > { %4065 = vpow2.f32 %v1117_v40  ;;  %v1110_v48 = vsub.f32 %v1078_v22, %v1094_v20 }
 0x5aa   : > { %4067 = vpow2.f32 %v1119_v11 }
 0x5ab   : > { %v1121_v15 = vmul.f32 1.442695, %v1110_v48 }
 0x5ac   : > { %v1100_v56 = vpop.xlane.xlu1 %1099  ;;  %v1097_v47 = vpop.xlane.xlu0 %1096 }
 0x5ad   : > { %v1112_v0 = vsub.f32 %v1080_v62, %v1100_v56  ;;  %v1111_v50 = vsub.f32 %v1079_v1, %v1097_v47  ;;  %4069 = vpow2.f32 %v1121_v15 }
 0x5ae   : > { %v5379_v31 = vpop.eup %4063 }
 0x5af   : > { %7514 = vst [vmem:[#allocation91_spill] sm:$0xff] %v5379_v31  ;;  %v1123_v19 = vmul.f32 1.442695, %v1111_v50  ;;  %1139 = vrot.lane.b32.xlu0 %v5379_v31, %s4601_s23  ;;  %v1125_v12 = vmul.f32 1.442695, %v1112_v0 }
 0x5b0   : > { %v1106_v4 = vpop.xlane.xlu1 %1105  ;;  %v1103_v27 = vpop.xlane.xlu0 %1102 }
 0x5b1   : > { %v1114_v14 = vsub.f32 %v1082_v45, %v1106_v4  ;;  %v1113_v24 = vsub.f32 %v1081_v38, %v1103_v27  ;;  %4071 = vpow2.f32 %v1123_v19 }
 0x5b2   : > { %4073 = vpow2.f32 %v1125_v12 }
 0x5b3   : > { %v1127_v20 = vmul.f32 1.442695, %v1113_v24  ;;  %v1129_v2 = vmul.f32 1.442695, %v1114_v14 }
 0x5b5   : > { %4075 = vpow2.f32 %v1127_v20 }
 0x5b6   : > { %v5383_v11 = vpop.eup %4065  ;;  %4077 = vpow2.f32 %v1129_v2  ;;  %v3884_v2 = vld [vmem:[%s4649_s20 + $0x238] sm:$0xff] }
 0x5b7   : > { %7515 = vst [vmem:[#allocation92_spill] sm:$0xff] %v5383_v11  ;;  %1141 = vrot.lane.b32.xlu1 %v5383_v11, %s4601_s23  ;;  %v5387_v62 = vpop.eup %4067 }
 0x5b8   : > { %7516 = vst [vmem:[#allocation93_spill] sm:$0xff] %v5387_v62 }
 0x5ba   : > { %v5391_v15 = vpop.eup %4069 }
 0x5bb   : > { %1143 = vrot.lane.b32.xlu1 %v5387_v62, %s4601_s23  ;;  %7517 = vst [vmem:[#allocation94_spill] sm:$0xff] %v5391_v15 }
 0x5be   : > { %v5393_v0 = vpop.eup %4071 }
 0x5bf   : > { %7518 = vst [vmem:[#allocation95_spill] sm:$0xff] %v5393_v0  ;;  %1145 = vrot.lane.b32.xlu1 %v5391_v15, %s4601_s23  ;;  %1147 = vrot.lane.b32.xlu0 %v5393_v0, %s4601_s23  ;;  %v5399_v1 = vpop.eup %4073  ;;  %v5507_v0 = vld [vmem:[%s4644_s16 + $0xb0] sm:$0xff] }
 0x5c0   : > { %7519 = vst [vmem:[#allocation96_spill] sm:$0xff] %v5399_v1 }
 0x5c2   : > { %v5401_v55 = vpop.eup %4075 }
 0x5c3   : > { %7520 = vst [vmem:[#allocation97_spill] sm:$0xff] %v5401_v55  ;;  %1149 = vrot.lane.b32.xlu1 %v5399_v1, %s4601_s23  ;;  %1151 = vrot.lane.b32.xlu0 %v5401_v55, %s4601_s23  ;;  %v5407_v22 = vpop.eup %4077  ;;  %v5498_v1 = vld [vmem:[%s4644_s16 + $0xa0] sm:$0xff] }
 0x5c4   : > { %7521 = vst [vmem:[#allocation98_spill] sm:$0xff] %v5407_v22 }
 0x5c7   : > { %1153 = vrot.lane.b32.xlu1 %v5407_v22, %s4601_s23 }
 0x621   : > { %v1140_v38 = vpop.permute.xlu0 %1139 }
 0x622   : > { %v1163_v45 = vsel %vm205_vm0, %v1140_v38, 0.0 }
 0x623   : > { %1164 = vadd.xlane.f32.xlu0 %v1163_v45 }
 0x629   : > { %v1142_v59 = vpop.permute.xlu1 %1141 }
 0x62a   : > { %v1166_v60 = vsel %vm205_vm0, %v1142_v59, 0.0 }
 0x62b   : > { %1167 = vadd.xlane.f32.xlu1 %v1166_v60 }
 0x62d   : > { %v1144_v40 = vpop.permute.xlu1 %1143 }
 0x62e   : > { %v1169_v48 = vsel %vm205_vm0, %v1144_v40, 0.0 }
 0x62f   : > { %1170 = vadd.xlane.f32.xlu0 %v1169_v48 }
 0x631   : > { %v1146_v56 = vpop.permute.xlu1 %1145  ;;  %v1148_v47 = vpop.permute.xlu0 %1147 }
 0x632   : > { %v1172_v50 = vsel %vm205_vm0, %v1146_v56, 0.0  ;;  %v1175_v27 = vsel %vm205_vm0, %v1148_v47, 0.0 }
 0x633   : > { %1173 = vadd.xlane.f32.xlu0 %v1172_v50 }
 0x635   : > { %v1150_v19 = vpop.permute.xlu1 %1149  ;;  %v1152_v12 = vpop.permute.xlu0 %1151 }
 0x636   : > { %v1178_v4 = vsel %vm205_vm0, %v1150_v19, 0.0  ;;  %v1181_v20 = vsel %vm205_vm0, %v1152_v12, 0.0 }
 0x637   : > { %1179 = vadd.xlane.f32.xlu1 %v1178_v4  ;;  %1176 = vadd.xlane.f32.xlu0 %v1175_v27 }
 0x639   : > { %v1154_v14 = vpop.permute.xlu1 %1153 }
 0x63a   : > { %v1184_v24 = vsel %vm205_vm0, %v1154_v14, 0.0 }
 0x63b   : > { %1185 = vadd.xlane.f32.xlu1 %v1184_v24  ;;  %1182 = vadd.xlane.f32.xlu0 %v1181_v20  ;;  %v5482_v20 = vld [vmem:[%s4644_s16 + $0x80] sm:$0xff] }
 0x64c   : > { %1205 = vrot.lane.b32.xlu1 %v5349_v63, %s4602_s24  ;;  %v3877_v63 = vld [vmem:[%s4649_s20 + $0x200] sm:$0xff] }
 0x650   : > { %1207 = vrot.lane.b32.xlu1 %v5344_v53, %s4602_s24  ;;  %v3879_v53 = vld [vmem:[%s4649_s20 + $0x210] sm:$0xff] }
 0x651   : > { %1203 = vrot.lane.b32.xlu0 %v5338_v52, %s4602_s24  ;;  %v3878_v52 = vld [vmem:[%s4649_s20 + $0x208] sm:$0xff] }
 0x654   : > { %1209 = vrot.lane.b32.xlu1 %v5358_v42, %s4602_s24  ;;  %v3881_v42 = vld [vmem:[%s4649_s20 + $0x220] sm:$0xff] }
 0x655   : > { %1211 = vrot.lane.b32.xlu0 %v5354_v21, %s4602_s24  ;;  %v3880_v21 = vld [vmem:[%s4649_s20 + $0x218] sm:$0xff] }
 0x658   : > { %1213 = vrot.lane.b32.xlu1 %v5367_v58, %s4602_s24  ;;  %v3882_v58 = vld [vmem:[%s4649_s20 + $0x228] sm:$0xff] }
 0x659   : > { %1215 = vrot.lane.b32.xlu0 %v5363_v26, %s4602_s24  ;;  %v3883_v26 = vld [vmem:[%s4649_s20 + $0x230] sm:$0xff] }
 0x65c   : > { %1217 = vrot.lane.b32.xlu1 %v5373_v28, %s4602_s24 }
 0x65d   : > { %1252 = vrot.lane.b32.xlu0 %v3877_v63, %s4600_s22 }
 0x660   : > { %1254 = vrot.lane.b32.xlu1 %v3878_v52, %s4600_s22 }
 0x661   : > { %1256 = vrot.lane.b32.xlu0 %v3879_v53, %s4600_s22 }
 0x664   : > { %1258 = vrot.lane.b32.xlu1 %v3880_v21, %s4600_s22 }
 0x665   : > { %1260 = vrot.lane.b32.xlu0 %v3881_v42, %s4600_s22  ;;  %v5488_v42 = vld [vmem:[%s4644_s16 + $0x90] sm:$0xff] }
 0x668   : > { %1262 = vrot.lane.b32.xlu1 %v3882_v58, %s4600_s22 }
 0x669   : > { %1264 = vrot.lane.b32.xlu0 %v3883_v26, %s4600_s22 }
 0x66c   : > { %1266 = vrot.lane.b32.xlu1 %v3884_v2, %s4600_s22 }
 0x6ac   : > { %v5451_v28 = vpop.xlane.xlu0 %1164 }
 0x6ad   : > { %7522 = vst [vmem:[#allocation99_spill] sm:$0xff] %v5451_v28 }
 0x6b4   : > { %v5455_v45 = vpop.xlane.xlu1 %1167 }
 0x6b5   : > { %7524 = vst [vmem:[#allocation101_spill] sm:$0xff] %v5455_v45 }
 0x6b8   : > { %v5453_v38 = vpop.xlane.xlu0 %1170 }
 0x6b9   : > { %7523 = vst [vmem:[#allocation100_spill] sm:$0xff] %v5453_v38 }
 0x6bc   : > { %v5457_v59 = vpop.xlane.xlu0 %1173 }
 0x6bd   : > { %7525 = vst [vmem:[#allocation102_spill] sm:$0xff] %v5457_v59 }
 0x6c0   : > { %v5459_v60 = vpop.xlane.xlu1 %1179  ;;  %v5461_v40 = vpop.xlane.xlu0 %1176 }
 0x6c1   : > { %7526 = vst [vmem:[#allocation103_spill] sm:$0xff] %v5459_v60  ;;  %7527 = vst [vmem:[#allocation104_spill] sm:$0xff] %v5461_v40 }
 0x6c4   : > { %v5463_v48 = vpop.xlane.xlu1 %1185  ;;  %v5465_v56 = vpop.xlane.xlu0 %1182 }
 0x6c5   : > { %7528 = vst [vmem:[#allocation105_spill] sm:$0xff] %v5463_v48  ;;  %7529 = vst [vmem:[#allocation106_spill] sm:$0xff] %v5465_v56 }
 0x6c8   : > { %v5467_v47 = vpop.permute.xlu1 %1205  ;;  %v5469_v50 = vpop.permute.xlu0 %1203 }
 0x6c9   : > { %7530 = vst [vmem:[#allocation107_spill] sm:$0xff] %v5467_v47  ;;  %7531 = vst [vmem:[#allocation108_spill] sm:$0xff] %v5469_v50 }
 0x6cc   : > { %v5471_v19 = vpop.permute.xlu1 %1207  ;;  %v5473_v4 = vpop.permute.xlu0 %1211 }
 0x6cd   : > { %7532 = vst [vmem:[#allocation109_spill] sm:$0xff] %v5471_v19  ;;  %7533 = vst [vmem:[#allocation110_spill] sm:$0xff] %v5473_v4  ;;  %v5511_v19 = vld [vmem:[%s4644_s16 + $0xa8] sm:$0xff] }
 0x6d0   : > { %v5475_v27 = vpop.permute.xlu1 %1209  ;;  %v5477_v12 = vpop.permute.xlu0 %1215 }
 0x6d1   : > { %7534 = vst [vmem:[#allocation111_spill] sm:$0xff] %v5475_v27  ;;  %7535 = vst [vmem:[#allocation112_spill] sm:$0xff] %v5477_v12 }
 0x6d4   : > { %v5479_v14 = vpop.permute.xlu1 %1213  ;;  %v1253_v24 = vpop.permute.xlu0 %1252 }
 0x6d5   : > { %7536 = vst [vmem:[#allocation113_spill] sm:$0xff] %v5479_v14  ;;  %v1276_v63 = vmul.f32 %v5482_v20, %v1253_v24  ;;  %v5493_v14 = vld [vmem:[%s4644_s16 + $0x88] sm:$0xff] }
 0x6d7   : > { %v1284_v52 = vmul.f32 0.35355338, %v1276_v63 }
 0x6d8   : > { %v5485_v53 = vpop.permute.xlu1 %1217  ;;  %v1257_v21 = vpop.permute.xlu0 %1256 }
 0x6d9   : > { %7537 = vst [vmem:[#allocation114_spill] sm:$0xff] %v5485_v53  ;;  %v1278_v58 = vmul.f32 %v5488_v42, %v1257_v21  ;;  %v1292_v26 = vsel %vm873_vm1, %v1284_v52, -inf }
 0x6da   : > { %1293 = vmax.xlane.f32.xlu0 %v1292_v26  ;;  %v5502_v26 = vld [vmem:[%s4644_s16 + $0x98] sm:$0xff] }
 0x6db   : > { %v1286_v2 = vmul.f32 0.35355338, %v1278_v58 }
 0x6dc   : > { %v1255_v22 = vpop.permute.xlu1 %1254  ;;  %v1261_v12 = vpop.permute.xlu0 %1260 }
 0x6dd   : > { %v1277_v24 = vmul.f32 %v5493_v14, %v1255_v22  ;;  %v1298_v63 = vsel %vm873_vm1, %v1286_v2, -inf  ;;  %v1280_v21 = vmul.f32 %v5498_v1, %v1261_v12 }
 0x6de   : > { %1299 = vmax.xlane.f32.xlu0 %v1298_v63 }
 0x6df   : > { %v1285_v53 = vmul.f32 0.35355338, %v1277_v24  ;;  %v1288_v15 = vmul.f32 0.35355338, %v1280_v21 }
 0x6e0   : > { %v1259_v55 = vpop.permute.xlu1 %1258  ;;  %v1265_v4 = vpop.permute.xlu0 %1264 }
 0x6e1   : > { %v1279_v58 = vmul.f32 %v5502_v26, %v1259_v55  ;;  %v1295_v27 = vsel %vm873_vm1, %v1285_v53, -inf  ;;  %v1282_v24 = vmul.f32 %v5507_v0, %v1265_v4  ;;  %v1304_v50 = vsel %vm873_vm1, %v1288_v15, -inf }
 0x6e2   : > { %1296 = vmax.xlane.f32.xlu1 %v1295_v27  ;;  %v5517_v27 = vld [vmem:[%s4644_s16 + $0xb8] sm:$0xff] }
 0x6e3   : > { %v1287_v22 = vmul.f32 0.35355338, %v1279_v58  ;;  %v1290_v55 = vmul.f32 0.35355338, %v1282_v24 }
 0x6e4   : > { %v1263_v63 = vpop.permute.xlu1 %1262 }
 0x6e5   : > { %v1281_v12 = vmul.f32 %v5511_v19, %v1263_v63  ;;  %v1301_v62 = vsel %vm873_vm1, %v1287_v22, -inf  ;;  %v1310_v31 = vsel %vm873_vm1, %v1290_v55, -inf }
 0x6e6   : > { %1302 = vmax.xlane.f32.xlu0 %v1301_v62 }
 0x6e7   : > { %v1289_v47 = vmul.f32 0.35355338, %v1281_v12 }
 0x6e8   : > { %v1267_v11 = vpop.permute.xlu1 %1266 }
 0x6e9   : > { %v1283_v21 = vmul.f32 %v5517_v27, %v1267_v11  ;;  %v1307_v58 = vsel %vm873_vm1, %v1289_v47, -inf }
 0x6ea   : > { %1308 = vmax.xlane.f32.xlu1 %v1307_v58  ;;  %1305 = vmax.xlane.f32.xlu0 %v1304_v50 }
 0x6eb   : > { %v1291_v4 = vmul.f32 0.35355338, %v1283_v21 }
 0x6ed   : > { %v1313_v63 = vsel %vm873_vm1, %v1291_v4, -inf }
 0x6ee   : > { %1314 = vmax.xlane.f32.xlu1 %v1313_v63  ;;  %1311 = vmax.xlane.f32.xlu0 %v1310_v31 }
 0x763   : > { %v1294_v62 = vpop.xlane.xlu0 %1293 }
 0x764   : > { %v1316_v24 = vsub.f32 %v1284_v52, %v1294_v62 }
 0x766   : > { %v1324_v12 = vmul.f32 1.442695, %v1316_v24 }
 0x767   : > { %v1300_v48 = vpop.xlane.xlu0 %1299 }
 0x768   : > { %4079 = vpow2.f32 %v1324_v12  ;;  %v1318_v60 = vsub.f32 %v1286_v2, %v1300_v48 }
 0x76a   : > { %v1328_v38 = vmul.f32 1.442695, %v1318_v60 }
 0x76b   : > { %v1297_v56 = vpop.xlane.xlu1 %1296 }
 0x76c   : > { %v1317_v40 = vsub.f32 %v1285_v53, %v1297_v56 }
 0x76e   : > { %v1326_v11 = vmul.f32 1.442695, %v1317_v40 }
 0x76f   : > { %v1303_v59 = vpop.xlane.xlu0 %1302 }
 0x770   : > { %4081 = vpow2.f32 %v1326_v11  ;;  %v1319_v50 = vsub.f32 %v1287_v22, %v1303_v59 }
 0x771   : > { %4083 = vpow2.f32 %v1328_v38 }
 0x772   : > { %v1330_v45 = vmul.f32 1.442695, %v1319_v50 }
 0x773   : > { %v1309_v21 = vpop.xlane.xlu1 %1308  ;;  %v1306_v58 = vpop.xlane.xlu0 %1305 }
 0x774   : > { %v1321_v28 = vsub.f32 %v1289_v47, %v1309_v21  ;;  %v1320_v63 = vsub.f32 %v1288_v15, %v1306_v58  ;;  %4085 = vpow2.f32 %v1330_v45 }
 0x775   : > { %v5523_v31 = vpop.eup %4079 }
 0x776   : > { %7538 = vst [vmem:[#allocation115_spill] sm:$0xff] %v5523_v31  ;;  %v1332_v52 = vmul.f32 1.442695, %v1320_v63  ;;  %1348 = vrot.lane.b32.xlu0 %v5523_v31, %s4601_s23  ;;  %v1334_v40 = vmul.f32 1.442695, %v1321_v28 }
 0x777   : > { %v1315_v62 = vpop.xlane.xlu1 %1314  ;;  %v1312_v48 = vpop.xlane.xlu0 %1311 }
 0x778   : > { %v1323_v56 = vsub.f32 %v1291_v4, %v1315_v62  ;;  %v1322_v60 = vsub.f32 %v1290_v55, %v1312_v48  ;;  %4087 = vpow2.f32 %v1332_v52 }
 0x779   : > { %4089 = vpow2.f32 %v1334_v40 }
 0x77a   : > { %v1336_v59 = vmul.f32 1.442695, %v1322_v60  ;;  %v1338_v53 = vmul.f32 1.442695, %v1323_v56 }
 0x77c   : > { %4091 = vpow2.f32 %v1336_v59 }
 0x77d   : > { %v5527_v38 = vpop.eup %4081  ;;  %4093 = vpow2.f32 %v1338_v53  ;;  %v3892_v53 = vld [vmem:[%s4649_s20 + $0x338] sm:$0xff] }
 0x77e   : > { %7539 = vst [vmem:[#allocation116_spill] sm:$0xff] %v5527_v38  ;;  %1350 = vrot.lane.b32.xlu1 %v5527_v38, %s4601_s23  ;;  %v5531_v15 = vpop.eup %4083 }
 0x77f   : > { %7540 = vst [vmem:[#allocation117_spill] sm:$0xff] %v5531_v15 }
 0x781   : > { %v5535_v45 = vpop.eup %4085 }
 0x782   : > { %1352 = vrot.lane.b32.xlu1 %v5531_v15, %s4601_s23  ;;  %7541 = vst [vmem:[#allocation118_spill] sm:$0xff] %v5535_v45 }
 0x785   : > { %v5537_v28 = vpop.eup %4087 }
 0x786   : > { %7542 = vst [vmem:[#allocation119_spill] sm:$0xff] %v5537_v28  ;;  %1354 = vrot.lane.b32.xlu1 %v5535_v45, %s4601_s23  ;;  %1356 = vrot.lane.b32.xlu0 %v5537_v28, %s4601_s23  ;;  %v5543_v47 = vpop.eup %4089  ;;  %v5651_v28 = vld [vmem:[%s4644_s16 + $0xf0] sm:$0xff] }
 0x787   : > { %7543 = vst [vmem:[#allocation120_spill] sm:$0xff] %v5543_v47 }
 0x789   : > { %v5545_v2 = vpop.eup %4091 }
 0x78a   : > { %7544 = vst [vmem:[#allocation121_spill] sm:$0xff] %v5545_v2  ;;  %1358 = vrot.lane.b32.xlu1 %v5543_v47, %s4601_s23  ;;  %1360 = vrot.lane.b32.xlu0 %v5545_v2, %s4601_s23  ;;  %v5551_v22 = vpop.eup %4093  ;;  %v5642_v47 = vld [vmem:[%s4644_s16 + $0xe0] sm:$0xff] }
 0x78b   : > { %7545 = vst [vmem:[#allocation122_spill] sm:$0xff] %v5551_v22 }
 0x78e   : > { %1362 = vrot.lane.b32.xlu1 %v5551_v22, %s4601_s23 }
 0x7e8   : > { %v1349_v55 = vpop.permute.xlu0 %1348 }
 0x7e9   : > { %v1372_v4 = vsel %vm205_vm0, %v1349_v55, 0.0 }
 0x7ea   : > { %1373 = vadd.xlane.f32.xlu0 %v1372_v4 }
 0x7f0   : > { %v1351_v24 = vpop.permute.xlu1 %1350 }
 0x7f1   : > { %v1375_v12 = vsel %vm205_vm0, %v1351_v24, 0.0 }
 0x7f2   : > { %1376 = vadd.xlane.f32.xlu1 %v1375_v12 }
 0x7f4   : > { %v1353_v11 = vpop.permute.xlu1 %1352 }
 0x7f5   : > { %v1378_v50 = vsel %vm205_vm0, %v1353_v11, 0.0 }
 0x7f6   : > { %1379 = vadd.xlane.f32.xlu0 %v1378_v50 }
 0x7f8   : > { %v1355_v21 = vpop.permute.xlu1 %1354  ;;  %v1357_v58 = vpop.permute.xlu0 %1356 }
 0x7f9   : > { %v1381_v63 = vsel %vm205_vm0, %v1355_v21, 0.0  ;;  %v1384_v48 = vsel %vm205_vm0, %v1357_v58, 0.0 }
 0x7fa   : > { %1382 = vadd.xlane.f32.xlu0 %v1381_v63 }
 0x7fc   : > { %v1359_v52 = vpop.permute.xlu1 %1358  ;;  %v1361_v40 = vpop.permute.xlu0 %1360 }
 0x7fd   : > { %v1387_v62 = vsel %vm205_vm0, %v1359_v52, 0.0  ;;  %v1390_v59 = vsel %vm205_vm0, %v1361_v40, 0.0 }
 0x7fe   : > { %1388 = vadd.xlane.f32.xlu1 %v1387_v62  ;;  %1385 = vadd.xlane.f32.xlu0 %v1384_v48 }
 0x800   : > { %v1363_v56 = vpop.permute.xlu1 %1362 }
 0x801   : > { %v1393_v60 = vsel %vm205_vm0, %v1363_v56, 0.0 }
 0x802   : > { %1394 = vadd.xlane.f32.xlu1 %v1393_v60  ;;  %1391 = vadd.xlane.f32.xlu0 %v1390_v59  ;;  %v5626_v59 = vld [vmem:[%s4644_s16 + $0xc0] sm:$0xff] }
 0x813   : > { %1414 = vrot.lane.b32.xlu1 %v5493_v14, %s4602_s24  ;;  %v3885_v14 = vld [vmem:[%s4649_s20 + $0x300] sm:$0xff] }
 0x817   : > { %1416 = vrot.lane.b32.xlu1 %v5488_v42, %s4602_s24  ;;  %v3887_v42 = vld [vmem:[%s4649_s20 + $0x310] sm:$0xff] }
 0x818   : > { %1412 = vrot.lane.b32.xlu0 %v5482_v20, %s4602_s24  ;;  %v3886_v20 = vld [vmem:[%s4649_s20 + $0x308] sm:$0xff] }
 0x81b   : > { %1418 = vrot.lane.b32.xlu1 %v5502_v26, %s4602_s24  ;;  %v3889_v26 = vld [vmem:[%s4649_s20 + $0x320] sm:$0xff] }
 0x81c   : > { %1420 = vrot.lane.b32.xlu0 %v5498_v1, %s4602_s24  ;;  %v3888_v1 = vld [vmem:[%s4649_s20 + $0x318] sm:$0xff] }
 0x81f   : > { %1422 = vrot.lane.b32.xlu1 %v5511_v19, %s4602_s24  ;;  %v3890_v19 = vld [vmem:[%s4649_s20 + $0x328] sm:$0xff] }
 0x820   : > { %1424 = vrot.lane.b32.xlu0 %v5507_v0, %s4602_s24  ;;  %v3891_v0 = vld [vmem:[%s4649_s20 + $0x330] sm:$0xff] }
 0x823   : > { %1426 = vrot.lane.b32.xlu1 %v5517_v27, %s4602_s24 }
 0x824   : > { %1461 = vrot.lane.b32.xlu0 %v3885_v14, %s4600_s22 }
 0x827   : > { %1463 = vrot.lane.b32.xlu1 %v3886_v20, %s4600_s22 }
 0x828   : > { %1465 = vrot.lane.b32.xlu0 %v3887_v42, %s4600_s22 }
 0x82b   : > { %1467 = vrot.lane.b32.xlu1 %v3888_v1, %s4600_s22 }
 0x82c   : > { %1469 = vrot.lane.b32.xlu0 %v3889_v26, %s4600_s22  ;;  %v5632_v26 = vld [vmem:[%s4644_s16 + $0xd0] sm:$0xff] }
 0x82f   : > { %1471 = vrot.lane.b32.xlu1 %v3890_v19, %s4600_s22 }
 0x830   : > { %1473 = vrot.lane.b32.xlu0 %v3891_v0, %s4600_s22 }
 0x833   : > { %1475 = vrot.lane.b32.xlu1 %v3892_v53, %s4600_s22 }
 0x873   : > { %v5595_v27 = vpop.xlane.xlu0 %1373 }
 0x874   : > { %7546 = vst [vmem:[#allocation123_spill] sm:$0xff] %v5595_v27 }
 0x87b   : > { %v5599_v4 = vpop.xlane.xlu1 %1376 }
 0x87c   : > { %7548 = vst [vmem:[#allocation125_spill] sm:$0xff] %v5599_v4 }
 0x87f   : > { %v5597_v55 = vpop.xlane.xlu0 %1379 }
 0x880   : > { %7547 = vst [vmem:[#allocation124_spill] sm:$0xff] %v5597_v55 }
 0x883   : > { %v5601_v24 = vpop.xlane.xlu0 %1382 }
 0x884   : > { %7549 = vst [vmem:[#allocation126_spill] sm:$0xff] %v5601_v24 }
 0x887   : > { %v5603_v12 = vpop.xlane.xlu1 %1388  ;;  %v5605_v11 = vpop.xlane.xlu0 %1385 }
 0x888   : > { %7550 = vst [vmem:[#allocation127_spill] sm:$0xff] %v5603_v12  ;;  %7551 = vst [vmem:[#allocation128_spill] sm:$0xff] %v5605_v11 }
 0x88b   : > { %v5607_v50 = vpop.xlane.xlu1 %1394  ;;  %v5609_v21 = vpop.xlane.xlu0 %1391 }
 0x88c   : > { %7552 = vst [vmem:[#allocation129_spill] sm:$0xff] %v5607_v50  ;;  %7553 = vst [vmem:[#allocation130_spill] sm:$0xff] %v5609_v21 }
 0x88f   : > { %v5611_v58 = vpop.permute.xlu1 %1414  ;;  %v5613_v63 = vpop.permute.xlu0 %1412 }
 0x890   : > { %7554 = vst [vmem:[#allocation131_spill] sm:$0xff] %v5611_v58  ;;  %7555 = vst [vmem:[#allocation132_spill] sm:$0xff] %v5613_v63 }
 0x893   : > { %v5615_v52 = vpop.permute.xlu1 %1416  ;;  %v5617_v62 = vpop.permute.xlu0 %1420 }
 0x894   : > { %7556 = vst [vmem:[#allocation133_spill] sm:$0xff] %v5615_v52  ;;  %7557 = vst [vmem:[#allocation134_spill] sm:$0xff] %v5617_v62  ;;  %v5655_v52 = vld [vmem:[%s4644_s16 + $0xe8] sm:$0xff] }
 0x897   : > { %v5619_v48 = vpop.permute.xlu1 %1418  ;;  %v5621_v40 = vpop.permute.xlu0 %1424 }
 0x898   : > { %7558 = vst [vmem:[#allocation135_spill] sm:$0xff] %v5619_v48  ;;  %7559 = vst [vmem:[#allocation136_spill] sm:$0xff] %v5621_v40 }
 0x89b   : > { %v5623_v56 = vpop.permute.xlu1 %1422  ;;  %v1462_v60 = vpop.permute.xlu0 %1461 }
 0x89c   : > { %7560 = vst [vmem:[#allocation137_spill] sm:$0xff] %v5623_v56  ;;  %v1485_v14 = vmul.f32 %v5626_v59, %v1462_v60  ;;  %v5637_v56 = vld [vmem:[%s4644_s16 + $0xc8] sm:$0xff] }
 0x89e   : > { %v1493_v20 = vmul.f32 0.35355338, %v1485_v14 }
 0x89f   : > { %v5629_v42 = vpop.permute.xlu1 %1426  ;;  %v1466_v1 = vpop.permute.xlu0 %1465 }
 0x8a0   : > { %7561 = vst [vmem:[#allocation138_spill] sm:$0xff] %v5629_v42  ;;  %v1487_v19 = vmul.f32 %v5632_v26, %v1466_v1  ;;  %v1501_v0 = vsel %vm873_vm1, %v1493_v20, -inf }
 0x8a1   : > { %1502 = vmax.xlane.f32.xlu0 %v1501_v0  ;;  %v5646_v0 = vld [vmem:[%s4644_s16 + $0xd8] sm:$0xff] }
 0x8a2   : > { %v1495_v53 = vmul.f32 0.35355338, %v1487_v19 }
 0x8a3   : > { %v1464_v22 = vpop.permute.xlu1 %1463  ;;  %v1470_v40 = vpop.permute.xlu0 %1469 }
 0x8a4   : > { %v1486_v60 = vmul.f32 %v5637_v56, %v1464_v22  ;;  %v1507_v14 = vsel %vm873_vm1, %v1495_v53, -inf  ;;  %v1489_v1 = vmul.f32 %v5642_v47, %v1470_v40 }
 0x8a5   : > { %1508 = vmax.xlane.f32.xlu0 %v1507_v14 }
 0x8a6   : > { %v1494_v42 = vmul.f32 0.35355338, %v1486_v60  ;;  %v1497_v45 = vmul.f32 0.35355338, %v1489_v1 }
 0x8a7   : > { %v1468_v2 = vpop.permute.xlu1 %1467  ;;  %v1474_v62 = vpop.permute.xlu0 %1473 }
 0x8a8   : > { %v1488_v19 = vmul.f32 %v5646_v0, %v1468_v2  ;;  %v1504_v48 = vsel %vm873_vm1, %v1494_v42, -inf  ;;  %v1491_v60 = vmul.f32 %v5651_v28, %v1474_v62  ;;  %v1513_v63 = vsel %vm873_vm1, %v1497_v45, -inf }
 0x8a9   : > { %1505 = vmax.xlane.f32.xlu1 %v1504_v48  ;;  %v5661_v48 = vld [vmem:[%s4644_s16 + $0xf8] sm:$0xff] }
 0x8aa   : > { %v1496_v22 = vmul.f32 0.35355338, %v1488_v19  ;;  %v1499_v2 = vmul.f32 0.35355338, %v1491_v60 }
 0x8ab   : > { %v1472_v14 = vpop.permute.xlu1 %1471 }
 0x8ac   : > { %v1490_v40 = vmul.f32 %v5655_v52, %v1472_v14  ;;  %v1510_v15 = vsel %vm873_vm1, %v1496_v22, -inf  ;;  %v1519_v31 = vsel %vm873_vm1, %v1499_v2, -inf }
 0x8ad   : > { %1511 = vmax.xlane.f32.xlu0 %v1510_v15 }
 0x8ae   : > { %v1498_v58 = vmul.f32 0.35355338, %v1490_v40 }
 0x8af   : > { %v1476_v38 = vpop.permute.xlu1 %1475 }
 0x8b0   : > { %v1492_v1 = vmul.f32 %v5661_v48, %v1476_v38  ;;  %v1516_v19 = vsel %vm873_vm1, %v1498_v58, -inf }
 0x8b1   : > { %1517 = vmax.xlane.f32.xlu1 %v1516_v19  ;;  %1514 = vmax.xlane.f32.xlu0 %v1513_v63 }
 0x8b2   : > { %v1500_v62 = vmul.f32 0.35355338, %v1492_v1 }
 0x8b4   : > { %v1522_v14 = vsel %vm873_vm1, %v1500_v62, -inf  ;;  %vm3740_vm1 = vcmask 982016  }
 0x8b5   : > { %1523 = vmax.xlane.f32.xlu1 %v1522_v14  ;;  %1520 = vmax.xlane.f32.xlu0 %v1519_v31 }
 0x92a   : > { %v1503_v15 = vpop.xlane.xlu0 %1502 }
 0x92b   : > { %v1525_v60 = vsub.f32 %v1493_v20, %v1503_v15 }
 0x92d   : > { %v1533_v40 = vmul.f32 1.442695, %v1525_v60 }
 0x92e   : > { %v1509_v50 = vpop.xlane.xlu0 %1508 }
 0x92f   : > { %4095 = vpow2.f32 %v1533_v40  ;;  %v1527_v12 = vsub.f32 %v1495_v53, %v1509_v50 }
 0x931   : > { %v1537_v55 = vmul.f32 1.442695, %v1527_v12 }
 0x932   : > { %v1506_v21 = vpop.xlane.xlu1 %1505 }
 0x933   : > { %v1526_v11 = vsub.f32 %v1494_v42, %v1506_v21 }
 0x935   : > { %v1535_v38 = vmul.f32 1.442695, %v1526_v11 }
 0x936   : > { %v1512_v24 = vpop.xlane.xlu0 %1511 }
 0x937   : > { %4097 = vpow2.f32 %v1535_v38  ;;  %v1528_v63 = vsub.f32 %v1496_v22, %v1512_v24 }
 0x938   : > { %4099 = vpow2.f32 %v1537_v55 }
 0x939   : > { %v1539_v4 = vmul.f32 1.442695, %v1528_v63 }
 0x93a   : > { %v1518_v1 = vpop.xlane.xlu1 %1517  ;;  %v1515_v19 = vpop.xlane.xlu0 %1514 }
 0x93b   : > { %v1530_v27 = vsub.f32 %v1498_v58, %v1518_v1  ;;  %v1529_v14 = vsub.f32 %v1497_v45, %v1515_v19  ;;  %4101 = vpow2.f32 %v1539_v4 }
 0x93c   : > { %v5667_v31 = vpop.eup %4095 }
 0x93d   : > { %7562 = vst [vmem:[#allocation139_spill] sm:$0xff] %v5667_v31  ;;  %v1541_v20 = vmul.f32 1.442695, %v1529_v14  ;;  %1557 = vrot.lane.b32.xlu0 %v5667_v31, %s4601_s23  ;;  %v1543_v11 = vmul.f32 1.442695, %v1530_v27 }
 0x93e   : > { %v1524_v15 = vpop.xlane.xlu1 %1523  ;;  %v1521_v50 = vpop.xlane.xlu0 %1520 }
 0x93f   : > { %v1532_v21 = vsub.f32 %v1500_v62, %v1524_v15  ;;  %v1531_v12 = vsub.f32 %v1499_v2, %v1521_v50  ;;  %4103 = vpow2.f32 %v1541_v20 }
 0x940   : > { %4105 = vpow2.f32 %v1543_v11 }
 0x941   : > { %v1545_v24 = vmul.f32 1.442695, %v1531_v12  ;;  %v1547_v42 = vmul.f32 1.442695, %v1532_v21 }
 0x943   : > { %4107 = vpow2.f32 %v1545_v24 }
 0x944   : > { %v5671_v55 = vpop.eup %4097  ;;  %4109 = vpow2.f32 %v1547_v42 }
 0x945   : > { %7563 = vst [vmem:[#allocation140_spill] sm:$0xff] %v5671_v55  ;;  %1559 = vrot.lane.b32.xlu1 %v5671_v55, %s4601_s23  ;;  %v5675_v45 = vpop.eup %4099 }
 0x946   : > { %7564 = vst [vmem:[#allocation141_spill] sm:$0xff] %v5675_v45 }
 0x948   : > { %v5679_v4 = vpop.eup %4101 }
 0x949   : > { %1561 = vrot.lane.b32.xlu1 %v5675_v45, %s4601_s23  ;;  %7565 = vst [vmem:[#allocation142_spill] sm:$0xff] %v5679_v4 }
 0x94c   : > { %v5681_v27 = vpop.eup %4103 }
 0x94d   : > { %7566 = vst [vmem:[#allocation143_spill] sm:$0xff] %v5681_v27  ;;  %1563 = vrot.lane.b32.xlu1 %v5679_v4, %s4601_s23  ;;  %1565 = vrot.lane.b32.xlu0 %v5681_v27, %s4601_s23  ;;  %v5687_v58 = vpop.eup %4105  ;;  %v4532_v4 = vld [vmem:[%s4644_s16 + $0x30] sm:$0xff] }
 0x94e   : > { %7567 = vst [vmem:[#allocation144_spill] sm:$0xff] %v5687_v58 }
 0x950   : > { %v5689_v53 = vpop.eup %4107 }
 0x951   : > { %7568 = vst [vmem:[#allocation145_spill] sm:$0xff] %v5689_v53  ;;  %1567 = vrot.lane.b32.xlu1 %v5687_v58, %s4601_s23  ;;  %1569 = vrot.lane.b32.xlu0 %v5689_v53, %s4601_s23  ;;  %v5695_v22 = vpop.eup %4109 }
 0x952   : > { %7569 = vst [vmem:[#allocation146_spill] sm:$0xff] %v5695_v22 }
 0x955   : > { %1571 = vrot.lane.b32.xlu1 %v5695_v22, %s4601_s23 }
 0x9af   : > { %v1558_v2 = vpop.permute.xlu0 %1557 }
 0x9b0   : > { %v1581_v62 = vsel %vm205_vm0, %v1558_v2, 0.0 }
 0x9b1   : > { %1582 = vadd.xlane.f32.xlu0 %v1581_v62 }
 0x9b7   : > { %v1560_v60 = vpop.permute.xlu1 %1559 }
 0x9b8   : > { %v1584_v40 = vsel %vm205_vm0, %v1560_v60, 0.0 }
 0x9b9   : > { %1585 = vadd.xlane.f32.xlu1 %v1584_v40 }
 0x9bb   : > { %v1562_v38 = vpop.permute.xlu1 %1561 }
 0x9bc   : > { %v1587_v63 = vsel %vm205_vm0, %v1562_v38, 0.0 }
 0x9bd   : > { %1588 = vadd.xlane.f32.xlu0 %v1587_v63 }
 0x9bf   : > { %v1564_v1 = vpop.permute.xlu1 %1563  ;;  %v1566_v19 = vpop.permute.xlu0 %1565 }
 0x9c0   : > { %v1590_v14 = vsel %vm205_vm0, %v1564_v1, 0.0  ;;  %v1593_v50 = vsel %vm205_vm0, %v1566_v19, 0.0 }
 0x9c1   : > { %1591 = vadd.xlane.f32.xlu0 %v1590_v14 }
 0x9c3   : > { %v1568_v20 = vpop.permute.xlu1 %1567  ;;  %v1570_v11 = vpop.permute.xlu0 %1569 }
 0x9c4   : > { %v1596_v15 = vsel %vm205_vm0, %v1568_v20, 0.0  ;;  %v1599_v24 = vsel %vm205_vm0, %v1570_v11, 0.0 }
 0x9c5   : > { %1597 = vadd.xlane.f32.xlu1 %v1596_v15  ;;  %1594 = vadd.xlane.f32.xlu0 %v1593_v50 }
 0x9c7   : > { %v1572_v21 = vpop.permute.xlu1 %1571 }
 0x9c8   : > { %v1602_v12 = vsel %vm205_vm0, %v1572_v21, 0.0 }
 0x9c9   : > { %1603 = vadd.xlane.f32.xlu1 %v1602_v12  ;;  %1600 = vadd.xlane.f32.xlu0 %v1599_v24  ;;  %v4527_v24 = vld [vmem:[%s4644_s16] sm:$0xff] }
 0x9da   : > { %1623 = vrot.lane.b32.xlu1 %v5637_v56, %s4602_s24  ;;  %v3893_v56 = vld [vmem:[%s4649_s20 + $0x40] sm:$0xff] }
 0x9de   : > { %1625 = vrot.lane.b32.xlu1 %v5632_v26, %s4602_s24  ;;  %v3895_v26 = vld [vmem:[%s4649_s20 + $0x50] sm:$0xff] }
 0x9df   : > { %1621 = vrot.lane.b32.xlu0 %v5626_v59, %s4602_s24  ;;  %v3894_v59 = vld [vmem:[%s4649_s20 + $0x48] sm:$0xff] }
 0x9e2   : > { %1627 = vrot.lane.b32.xlu1 %v5646_v0, %s4602_s24  ;;  %v3897_v0 = vld [vmem:[%s4649_s20 + $0x60] sm:$0xff] }
 0x9e3   : > { %1629 = vrot.lane.b32.xlu0 %v5642_v47, %s4602_s24  ;;  %v3896_v47 = vld [vmem:[%s4649_s20 + $0x58] sm:$0xff] }
 0x9e6   : > { %1631 = vrot.lane.b32.xlu1 %v5655_v52, %s4602_s24  ;;  %v3898_v52 = vld [vmem:[%s4649_s20 + $0x68] sm:$0xff] }
 0x9e7   : > { %1633 = vrot.lane.b32.xlu0 %v5651_v28, %s4602_s24  ;;  %v3899_v28 = vld [vmem:[%s4649_s20 + $0x70] sm:$0xff] }
 0x9ea   : > { %1635 = vrot.lane.b32.xlu1 %v5661_v48, %s4602_s24  ;;  %v3900_v48 = vld [vmem:[%s4649_s20 + $0x78] sm:$0xff] }
 0x9eb   : > { %1670 = vrot.lane.b32.xlu0 %v3893_v56, %s4603_s25 }
 0x9ee   : > { %1672 = vrot.lane.b32.xlu1 %v3894_v59, %s4603_s25 }
 0x9ef   : > { %1674 = vrot.lane.b32.xlu0 %v3895_v26, %s4603_s25 }
 0x9f2   : > { %1676 = vrot.lane.b32.xlu1 %v3896_v47, %s4603_s25 }
 0x9f3   : > { %1678 = vrot.lane.b32.xlu0 %v3897_v0, %s4603_s25  ;;  %v4528_v0 = vld [vmem:[%s4644_s16 + $0x10] sm:$0xff] }
 0x9f6   : > { %1680 = vrot.lane.b32.xlu1 %v3898_v52, %s4603_s25 }
 0x9f7   : > { %1682 = vrot.lane.b32.xlu0 %v3899_v28, %s4603_s25 }
 0x9fa   : > { %1684 = vrot.lane.b32.xlu1 %v3900_v48, %s4603_s25 }
 0xa3a   : > { %v5739_v42 = vpop.xlane.xlu0 %1582 }
 0xa42   : > { %v5743_v62 = vpop.xlane.xlu1 %1585 }
 0xa46   : > { %v5741_v2 = vpop.xlane.xlu0 %1588 }
 0xa4a   : > { %v5745_v60 = vpop.xlane.xlu0 %1591 }
 0xa4e   : > { %v5747_v40 = vpop.xlane.xlu1 %1597  ;;  %v5749_v38 = vpop.xlane.xlu0 %1594 }
 0xa52   : > { %v5751_v63 = vpop.xlane.xlu1 %1603  ;;  %v5753_v1 = vpop.xlane.xlu0 %1600 }
 0xa53   : > { %7570 = vst [vmem:[#allocation147_spill] sm:$0xff] %v5751_v63 }
 0xa56   : > { %v5755_v19 = vpop.permute.xlu1 %1623  ;;  %v5757_v14 = vpop.permute.xlu0 %1621 }
 0xa57   : > { %7571 = vst [vmem:[#allocation148_spill] sm:$0xff] %v5755_v19  ;;  %7572 = vst [vmem:[#allocation149_spill] sm:$0xff] %v5757_v14 }
 0xa5a   : > { %v5759_v20 = vpop.permute.xlu1 %1625  ;;  %v5761_v15 = vpop.permute.xlu0 %1629 }
 0xa5b   : > { %7573 = vst [vmem:[#allocation150_spill] sm:$0xff] %v5759_v20  ;;  %7574 = vst [vmem:[#allocation151_spill] sm:$0xff] %v5761_v15 }
 0xa5e   : > { %v5763_v50 = vpop.permute.xlu1 %1627  ;;  %v5765_v11 = vpop.permute.xlu0 %1633 }
 0xa5f   : > { %7575 = vst [vmem:[#allocation152_spill] sm:$0xff] %v5763_v50  ;;  %7576 = vst [vmem:[#allocation153_spill] sm:$0xff] %v5765_v11  ;;  %v4531_v50 = vld [vmem:[%s4644_s16 + $0x18] sm:$0xff] }
 0xa62   : > { %v5767_v21 = vpop.permute.xlu1 %1631  ;;  %v1671_v12 = vpop.permute.xlu0 %1670 }
 0xa63   : > { %7577 = vst [vmem:[#allocation154_spill] sm:$0xff] %v5767_v21  ;;  %v1694_v56 = vmul.f32 %v4527_v24, %v1671_v12  ;;  %v4529_v21 = vld [vmem:[%s4644_s16 + $0x8] sm:$0xff] }
 0xa65   : > { %v1702_v59 = vmul.f32 0.35355338, %v1694_v56  ;;  %v4530_v56 = vld [vmem:[%s4644_s16 + $0x20] sm:$0xff] }
 0xa66   : > { %v5770_v26 = vpop.permute.xlu1 %1635  ;;  %v1675_v47 = vpop.permute.xlu0 %1674 }
 0xa67   : > { %7578 = vst [vmem:[#allocation155_spill] sm:$0xff] %v5770_v26  ;;  %v1696_v52 = vmul.f32 %v4528_v0, %v1675_v47  ;;  %v1711_v28 = vsel %vm1710_vm2, %v1702_v59, -inf }
 0xa68   : > { %1712 = vmax.xlane.f32.xlu0 %v1711_v28 }
 0xa69   : > { %v1704_v48 = vmul.f32 0.35355338, %v1696_v52 }
 0xa6a   : > { %v1673_v22 = vpop.permute.xlu1 %1672  ;;  %v1679_v11 = vpop.permute.xlu0 %1678 }
 0xa6b   : > { %v1695_v58 = vmul.f32 %v4529_v21, %v1673_v22  ;;  %v1717_v12 = vsel %vm1710_vm2, %v1704_v48, -inf  ;;  %v1698_v26 = vmul.f32 %v4530_v56, %v1679_v11  ;;  %v4533_v21 = vld [vmem:[%s4644_s16 + $0x28] sm:$0xff] }
 0xa6c   : > { %1718 = vmax.xlane.f32.xlu0 %v1717_v12 }
 0xa6d   : > { %v1703_v24 = vmul.f32 0.35355338, %v1695_v58  ;;  %v1706_v28 = vmul.f32 0.35355338, %v1698_v26 }
 0xa6e   : > { %v1677_v53 = vpop.permute.xlu1 %1676  ;;  %v1683_v15 = vpop.permute.xlu0 %1682 }
 0xa6f   : > { %v1697_v47 = vmul.f32 %v4531_v50, %v1677_v53  ;;  %v1714_v0 = vsel %vm1710_vm2, %v1703_v24, -inf  ;;  %v1700_v27 = vmul.f32 %v4532_v4, %v1683_v15  ;;  %v1723_v56 = vsel %vm1710_vm2, %v1706_v28, -inf  ;;  %v4534_v53 = vld [vmem:[%s4644_s16 + $0x38] sm:$0xff] }
 0xa70   : > { %1715 = vmax.xlane.f32.xlu1 %v1714_v0 }
 0xa71   : > { %v1705_v52 = vmul.f32 0.35355338, %v1697_v47  ;;  %v1708_v11 = vmul.f32 0.35355338, %v1700_v27 }
 0xa72   : > { %v1681_v22 = vpop.permute.xlu1 %1680 }
 0xa73   : > { %v1699_v20 = vmul.f32 %v4533_v21, %v1681_v22  ;;  %v1720_v12 = vsel %vm1710_vm2, %v1705_v52, -inf  ;;  %v1729_v4 = vsel %vm1710_vm2, %v1708_v11, -inf }
 0xa74   : > { %1721 = vmax.xlane.f32.xlu0 %v1720_v12 }
 0xa75   : > { %v1707_v58 = vmul.f32 0.35355338, %v1699_v20 }
 0xa76   : > { %v1685_v45 = vpop.permute.xlu1 %1684 }
 0xa77   : > { %v1701_v50 = vmul.f32 %v4534_v53, %v1685_v45  ;;  %v1726_v19 = vsel %vm1710_vm2, %v1707_v58, -inf }
 0xa78   : > { %1727 = vmax.xlane.f32.xlu1 %v1726_v19  ;;  %1724 = vmax.xlane.f32.xlu0 %v1723_v56 }
 0xa79   : > { %v1709_v26 = vmul.f32 0.35355338, %v1701_v50 }
 0xa7b   : > { %v1732_v15 = vsel %vm1710_vm2, %v1709_v26, -inf }
 0xa7c   : > { %1733 = vmax.xlane.f32.xlu1 %v1732_v15  ;;  %1730 = vmax.xlane.f32.xlu0 %v1729_v4 }
 0xaf1   : > { %v1713_v47 = vpop.xlane.xlu0 %1712 }
 0xaf2   : > { %v1735_v0 = vsub.f32 %v1702_v59, %v1713_v47 }
 0xaf4   : > { %v1743_v20 = vmul.f32 1.442695, %v1735_v0 }
 0xaf5   : > { %v1719_v27 = vpop.xlane.xlu0 %1718 }
 0xaf6   : > { %4111 = vpow2.f32 %v1743_v20  ;;  %v1737_v21 = vsub.f32 %v1704_v48, %v1719_v27 }
 0xaf8   : > { %v1747_v14 = vmul.f32 1.442695, %v1737_v21 }
 0xaf9   : > { %v1716_v22 = vpop.xlane.xlu1 %1715 }
 0xafa   : > { %v1736_v12 = vsub.f32 %v1703_v24, %v1716_v22 }
 0xafc   : > { %v1745_v45 = vmul.f32 1.442695, %v1736_v12 }
 0xafd   : > { %v1722_v53 = vpop.xlane.xlu0 %1721 }
 0xafe   : > { %4113 = vpow2.f32 %v1745_v45  ;;  %v1738_v19 = vsub.f32 %v1705_v52, %v1722_v53 }
 0xaff   : > { %4115 = vpow2.f32 %v1747_v14 }
 0xb00   : > { %v1749_v55 = vmul.f32 1.442695, %v1738_v19 }
 0xb01   : > { %v1728_v56 = vpop.xlane.xlu1 %1727  ;;  %v1725_v50 = vpop.xlane.xlu0 %1724 }
 0xb02   : > { %v1740_v31 = vsub.f32 %v1707_v58, %v1728_v56  ;;  %v1739_v15 = vsub.f32 %v1706_v28, %v1725_v50  ;;  %4117 = vpow2.f32 %v1749_v55 }
 0xb03   : > { %v5787_v4 = vpop.eup %4111 }
 0xb04   : > { %7579 = vst [vmem:[#allocation156_spill] sm:$0xff] %v5787_v4  ;;  %v1751_v59 = vmul.f32 1.442695, %v1739_v15  ;;  %1767 = vrot.lane.b32.xlu0 %v5787_v4, %s4604_s26  ;;  %v1753_v47 = vmul.f32 1.442695, %v1740_v31  ;;  %v4540_v4 = vld [vmem:[%s4644_s16 + $0x70] sm:$0xff] }
 0xb05   : > { %v1734_v48 = vpop.xlane.xlu1 %1733  ;;  %v1731_v24 = vpop.xlane.xlu0 %1730 }
 0xb06   : > { %v1742_v0 = vsub.f32 %v1709_v26, %v1734_v48  ;;  %v1741_v20 = vsub.f32 %v1708_v11, %v1731_v24  ;;  %4119 = vpow2.f32 %v1751_v59 }
 0xb07   : > { %4121 = vpow2.f32 %v1753_v47 }
 0xb08   : > { %v1755_v52 = vmul.f32 1.442695, %v1741_v20  ;;  %v1757_v14 = vmul.f32 1.442695, %v1742_v0 }
 0xb0a   : > { %4123 = vpow2.f32 %v1755_v52 }
 0xb0b   : > { %v5791_v27 = vpop.eup %4113  ;;  %4125 = vpow2.f32 %v1757_v14  ;;  %v3902_v14 = vld [vmem:[%s4649_s20 + $0x148] sm:$0xff] }
 0xb0c   : > { %7580 = vst [vmem:[#allocation157_spill] sm:$0xff] %v5791_v27  ;;  %1769 = vrot.lane.b32.xlu1 %v5791_v27, %s4604_s26  ;;  %v5795_v28 = vpop.eup %4115  ;;  %v4538_v27 = vld [vmem:[%s4644_s16 + $0x60] sm:$0xff] }
 0xb0d   : > { %7581 = vst [vmem:[#allocation158_spill] sm:$0xff] %v5795_v28 }
 0xb0f   : > { %v5799_v55 = vpop.eup %4117 }
 0xb10   : > { %1771 = vrot.lane.b32.xlu1 %v5795_v28, %s4604_s26  ;;  %7582 = vst [vmem:[#allocation159_spill] sm:$0xff] %v5799_v55 }
 0xb13   : > { %v5801_v31 = vpop.eup %4119 }
 0xb14   : > { %7583 = vst [vmem:[#allocation160_spill] sm:$0xff] %v5801_v31  ;;  %1773 = vrot.lane.b32.xlu1 %v5799_v55, %s4604_s26  ;;  %1775 = vrot.lane.b32.xlu0 %v5801_v31, %s4604_s26  ;;  %v5807_v58 = vpop.eup %4121 }
 0xb15   : > { %7584 = vst [vmem:[#allocation161_spill] sm:$0xff] %v5807_v58 }
 0xb17   : > { %v5809_v11 = vpop.eup %4123 }
 0xb18   : > { %7585 = vst [vmem:[#allocation162_spill] sm:$0xff] %v5809_v11  ;;  %1777 = vrot.lane.b32.xlu1 %v5807_v58, %s4604_s26  ;;  %1779 = vrot.lane.b32.xlu0 %v5809_v11, %s4604_s26  ;;  %v5815_v26 = vpop.eup %4125  ;;  %v4537_v11 = vld [vmem:[%s4644_s16 + $0x50] sm:$0xff] }
 0xb19   : > { %7586 = vst [vmem:[#allocation163_spill] sm:$0xff] %v5815_v26 }
 0xb1c   : > { %1781 = vrot.lane.b32.xlu1 %v5815_v26, %s4604_s26 }
 0xb76   : > { %v1768_v22 = vpop.permute.xlu0 %1767 }
 0xb77   : > { %v1791_v21 = vsel %vm205_vm0, %v1768_v22, 0.0  ;;  %v3903_v22 = vld [vmem:[%s4649_s20 + $0x150] sm:$0xff] }
 0xb78   : > { %1792 = vadd.xlane.f32.xlu0 %v1791_v21  ;;  %v3901_v21 = vld [vmem:[%s4649_s20 + $0x140] sm:$0xff] }
 0xb7e   : > { %v1770_v12 = vpop.permute.xlu1 %1769 }
 0xb7f   : > { %v1794_v45 = vsel %vm205_vm0, %v1770_v12, 0.0  ;;  %v3904_v12 = vld [vmem:[%s4649_s20 + $0x158] sm:$0xff] }
 0xb80   : > { %1795 = vadd.xlane.f32.xlu1 %v1794_v45  ;;  %v3905_v45 = vld [vmem:[%s4649_s20 + $0x160] sm:$0xff] }
 0xb82   : > { %v1772_v53 = vpop.permute.xlu1 %1771 }
 0xb83   : > { %v1797_v19 = vsel %vm205_vm0, %v1772_v53, 0.0  ;;  %v3906_v53 = vld [vmem:[%s4649_s20 + $0x168] sm:$0xff] }
 0xb84   : > { %1798 = vadd.xlane.f32.xlu0 %v1797_v19  ;;  %v3907_v19 = vld [vmem:[%s4649_s20 + $0x170] sm:$0xff] }
 0xb86   : > { %v1774_v56 = vpop.permute.xlu1 %1773  ;;  %v1776_v50 = vpop.permute.xlu0 %1775 }
 0xb87   : > { %v1800_v15 = vsel %vm205_vm0, %v1774_v56, 0.0  ;;  %v1803_v24 = vsel %vm205_vm0, %v1776_v50, 0.0  ;;  %v3908_v56 = vld [vmem:[%s4649_s20 + $0x178] sm:$0xff] }
 0xb88   : > { %1801 = vadd.xlane.f32.xlu0 %v1800_v15 }
 0xb8a   : > { %v1778_v59 = vpop.permute.xlu1 %1777  ;;  %v1780_v47 = vpop.permute.xlu0 %1779 }
 0xb8b   : > { %v1806_v48 = vsel %vm205_vm0, %v1778_v59, 0.0  ;;  %v1809_v52 = vsel %vm205_vm0, %v1780_v47, 0.0 }
 0xb8c   : > { %1807 = vadd.xlane.f32.xlu1 %v1806_v48  ;;  %1804 = vadd.xlane.f32.xlu0 %v1803_v24 }
 0xb8e   : > { %v1782_v0 = vpop.permute.xlu1 %1781 }
 0xb8f   : > { %v1812_v20 = vsel %vm205_vm0, %v1782_v0, 0.0 }
 0xb90   : > { %1813 = vadd.xlane.f32.xlu1 %v1812_v20  ;;  %1810 = vadd.xlane.f32.xlu0 %v1809_v52 }
 0xba1   : > { %1858 = vrot.lane.b32.xlu1 %v3902_v14, %s4603_s25 }
 0xba5   : > { %1860 = vrot.lane.b32.xlu1 %v3903_v22, %s4603_s25  ;;  %v4535_v22 = vld [vmem:[%s4644_s16 + $0x48] sm:$0xff] }
 0xba6   : > { %1856 = vrot.lane.b32.xlu0 %v3901_v21, %s4603_s25 }
 0xba9   : > { %1862 = vrot.lane.b32.xlu1 %v3904_v12, %s4603_s25  ;;  %v4536_v12 = vld [vmem:[%s4644_s16 + $0x40] sm:$0xff] }
 0xbaa   : > { %1864 = vrot.lane.b32.xlu0 %v3905_v45, %s4603_s25 }
 0xbad   : > { %1866 = vrot.lane.b32.xlu1 %v3906_v53, %s4603_s25 }
 0xbae   : > { %1868 = vrot.lane.b32.xlu0 %v3907_v19, %s4603_s25 }
 0xbb1   : > { %1870 = vrot.lane.b32.xlu1 %v3908_v56, %s4603_s25 }
 0xc01   : > { %v5843_v50 = vpop.xlane.xlu0 %1792 }
 0xc02   : > { %7587 = vst [vmem:[#allocation164_spill] sm:$0xff] %v5843_v50 }
 0xc09   : > { %v5847_v59 = vpop.xlane.xlu1 %1795 }
 0xc0a   : > { %7589 = vst [vmem:[#allocation166_spill] sm:$0xff] %v5847_v59 }
 0xc0d   : > { %v5845_v15 = vpop.xlane.xlu0 %1798 }
 0xc0e   : > { %7588 = vst [vmem:[#allocation165_spill] sm:$0xff] %v5845_v15 }
 0xc11   : > { %v5849_v48 = vpop.xlane.xlu0 %1801 }
 0xc12   : > { %7590 = vst [vmem:[#allocation167_spill] sm:$0xff] %v5849_v48 }
 0xc15   : > { %v5851_v24 = vpop.xlane.xlu1 %1807  ;;  %v5853_v47 = vpop.xlane.xlu0 %1804 }
 0xc16   : > { %7591 = vst [vmem:[#allocation168_spill] sm:$0xff] %v5851_v24  ;;  %7592 = vst [vmem:[#allocation169_spill] sm:$0xff] %v5853_v47  ;;  %v4541_v24 = vld [vmem:[%s4644_s16 + $0x68] sm:$0xff] }
 0xc19   : > { %v5855_v0 = vpop.xlane.xlu1 %1813  ;;  %v5857_v20 = vpop.xlane.xlu0 %1810 }
 0xc1a   : > { %7593 = vst [vmem:[#allocation170_spill] sm:$0xff] %v5855_v0  ;;  %7594 = vst [vmem:[#allocation171_spill] sm:$0xff] %v5857_v20 }
 0xc1d   : > { %v1859_v52 = vpop.permute.xlu1 %1858  ;;  %v1857_v14 = vpop.permute.xlu0 %1856 }
 0xc1e   : > { %v1881_v21 = vmul.f32 %v4535_v22, %v1859_v52  ;;  %v1880_v45 = vmul.f32 %v4536_v12, %v1857_v14  ;;  %v4539_v12 = vld [vmem:[%s4644_s16 + $0x58] sm:$0xff] }
 0xc20   : > { %v1889_v53 = vmul.f32 0.35355338, %v1881_v21  ;;  %v1888_v19 = vmul.f32 0.35355338, %v1880_v45 }
 0xc21   : > { %v1861_v56 = vpop.permute.xlu1 %1860  ;;  %v1865_v26 = vpop.permute.xlu0 %1864 }
 0xc22   : > { %v1882_v58 = vmul.f32 %v4537_v11, %v1861_v56  ;;  %v1899_v31 = vsel %vm1710_vm2, %v1889_v53, -inf  ;;  %v1896_v55 = vsel %vm1710_vm2, %v1888_v19, -inf  ;;  %v1884_v52 = vmul.f32 %v4538_v27, %v1865_v26 }
 0xc23   : > { %1900 = vmax.xlane.f32.xlu1 %v1899_v31  ;;  %1897 = vmax.xlane.f32.xlu0 %v1896_v55 }
 0xc24   : > { %v1890_v28 = vmul.f32 0.35355338, %v1882_v58  ;;  %v1892_v56 = vmul.f32 0.35355338, %v1884_v52 }
 0xc25   : > { %v1863_v22 = vpop.permute.xlu1 %1862  ;;  %v1869_v14 = vpop.permute.xlu0 %1868 }
 0xc26   : > { %v1883_v21 = vmul.f32 %v4539_v12, %v1863_v22  ;;  %v1902_v45 = vsel %vm1710_vm2, %v1890_v28, -inf  ;;  %v1886_v0 = vmul.f32 %v4540_v4, %v1869_v14  ;;  %v1908_v26 = vsel %vm1710_vm2, %v1892_v56, -inf  ;;  %v4542_v22 = vld [vmem:[%s4644_s16 + $0x78] sm:$0xff] }
 0xc27   : > { %1903 = vmax.xlane.f32.xlu0 %v1902_v45 }
 0xc28   : > { %v1891_v11 = vmul.f32 0.35355338, %v1883_v21  ;;  %v1894_v27 = vmul.f32 0.35355338, %v1886_v0 }
 0xc29   : > { %v1867_v20 = vpop.permute.xlu1 %1866 }
 0xc2a   : > { %v1885_v31 = vmul.f32 %v4541_v24, %v1867_v20  ;;  %v1905_v55 = vsel %vm1710_vm2, %v1891_v11, -inf  ;;  %v1914_v4 = vsel %vm1710_vm2, %v1894_v27, -inf }
 0xc2b   : > { %1906 = vmax.xlane.f32.xlu0 %v1905_v55 }
 0xc2c   : > { %v1893_v58 = vmul.f32 0.35355338, %v1885_v31 }
 0xc2d   : > { %v1871_v47 = vpop.permute.xlu1 %1870 }
 0xc2e   : > { %v1887_v12 = vmul.f32 %v4542_v22, %v1871_v47  ;;  %v1911_v48 = vsel %vm1710_vm2, %v1893_v58, -inf }
 0xc2f   : > { %1912 = vmax.xlane.f32.xlu1 %v1911_v48  ;;  %1909 = vmax.xlane.f32.xlu0 %v1908_v26 }
 0xc30   : > { %v1895_v52 = vmul.f32 0.35355338, %v1887_v12 }
 0xc32   : > { %v1917_v14 = vsel %vm1710_vm2, %v1895_v52, -inf }
 0xc33   : > { %1918 = vmax.xlane.f32.xlu1 %v1917_v14  ;;  %1915 = vmax.xlane.f32.xlu0 %v1914_v4 }
 0xcac   : > { %v1901_v24 = vpop.xlane.xlu1 %1900  ;;  %v1898_v20 = vpop.xlane.xlu0 %1897 }
 0xcad   : > { %v1921_v21 = vsub.f32 %v1889_v53, %v1901_v24  ;;  %v1920_v0 = vsub.f32 %v1888_v19, %v1898_v20 }
 0xcaf   : > { %v1930_v45 = vmul.f32 1.442695, %v1921_v21  ;;  %v1928_v31 = vmul.f32 1.442695, %v1920_v0 }
 0xcb0   : > { %v1904_v55 = vpop.xlane.xlu0 %1903 }
 0xcb1   : > { %4127 = vpow2.f32 %v1930_v45  ;;  %v1922_v47 = vsub.f32 %v1890_v28, %v1904_v55 }
 0xcb2   : > { %4129 = vpow2.f32 %v1928_v31 }
 0xcb3   : > { %v1932_v22 = vmul.f32 1.442695, %v1922_v47 }
 0xcb4   : > { %v1907_v48 = vpop.xlane.xlu0 %1906 }
 0xcb5   : > { %4131 = vpow2.f32 %v1932_v22  ;;  %v1923_v26 = vsub.f32 %v1891_v11, %v1907_v48 }
 0xcb7   : > { %v1934_v12 = vmul.f32 1.442695, %v1923_v26 }
 0xcb8   : > { %v1913_v15 = vpop.xlane.xlu1 %1912  ;;  %v1910_v59 = vpop.xlane.xlu0 %1909 }
 0xcb9   : > { %4133 = vpow2.f32 %v1934_v12  ;;  %v1925_v14 = vsub.f32 %v1893_v58, %v1913_v15  ;;  %v1924_v4 = vsub.f32 %v1892_v56, %v1910_v59 }
 0xcbb   : > { %v1938_v50 = vmul.f32 1.442695, %v1925_v14  ;;  %v1936_v63 = vmul.f32 1.442695, %v1924_v4 }
 0xcbc   : > { %v1919_v53 = vpop.xlane.xlu1 %1918  ;;  %v1916_v19 = vpop.xlane.xlu0 %1915 }
 0xcbd   : > { %4135 = vpow2.f32 %v1938_v50  ;;  %v1927_v24 = vsub.f32 %v1895_v52, %v1919_v53  ;;  %v1926_v20 = vsub.f32 %v1894_v27, %v1916_v19 }
 0xcbe   : > { %v5875_v21 = vpop.eup %4127  ;;  %4137 = vpow2.f32 %v1936_v63 }
 0xcbf   : > { %7595 = vst [vmem:[#allocation172_spill] sm:$0xff] %v5875_v21  ;;  %v5877_v28 = vpop.eup %4129  ;;  %v1942_v0 = vmul.f32 1.442695, %v1927_v24  ;;  %v1940_v11 = vmul.f32 1.442695, %v1926_v20  ;;  %1954 = vrot.lane.b32.xlu1 %v5875_v21, %s4604_s26  ;;  %v4547_v21 = vld [vmem:[%s4644_s16 + $0x98] sm:$0xff] }
 0xcc0   : > { %7596 = vst [vmem:[#allocation173_spill] sm:$0xff] %v5877_v28  ;;  %1952 = vrot.lane.b32.xlu0 %v5877_v28, %s4604_s26  ;;  %v4548_v28 = vld [vmem:[%s4644_s16 + $0xb0] sm:$0xff] }
 0xcc1   : > { %4139 = vpow2.f32 %v1942_v0  ;;  %v3910_v0 = vld [vmem:[%s4649_s20 + $0x248] sm:$0xff] }
 0xcc2   : > { %v5883_v15 = vpop.eup %4131  ;;  %4141 = vpow2.f32 %v1940_v11  ;;  %v3911_v11 = vld [vmem:[%s4649_s20 + $0x250] sm:$0xff] }
 0xcc3   : > { %7597 = vst [vmem:[#allocation174_spill] sm:$0xff] %v5883_v15  ;;  %1956 = vrot.lane.b32.xlu1 %v5883_v15, %s4604_s26 }
 0xcc6   : > { %v5887_v50 = vpop.eup %4133 }
 0xcc7   : > { %7598 = vst [vmem:[#allocation175_spill] sm:$0xff] %v5887_v50  ;;  %1958 = vrot.lane.b32.xlu1 %v5887_v50, %s4604_s26 }
 0xcca   : > { %v5891_v63 = vpop.eup %4135 }
 0xccb   : > { %7599 = vst [vmem:[#allocation176_spill] sm:$0xff] %v5891_v63  ;;  %v5893_v59 = vpop.eup %4137  ;;  %1962 = vrot.lane.b32.xlu1 %v5891_v63, %s4604_s26 }
 0xccc   : > { %7600 = vst [vmem:[#allocation177_spill] sm:$0xff] %v5893_v59  ;;  %1960 = vrot.lane.b32.xlu0 %v5893_v59, %s4604_s26 }
 0xcce   : > { %v5899_v56 = vpop.eup %4139 }
 0xccf   : > { %7601 = vst [vmem:[#allocation178_spill] sm:$0xff] %v5899_v56  ;;  %v5901_v58 = vpop.eup %4141  ;;  %1966 = vrot.lane.b32.xlu1 %v5899_v56, %s4604_s26 }
 0xcd0   : > { %7602 = vst [vmem:[#allocation179_spill] sm:$0xff] %v5901_v58  ;;  %1964 = vrot.lane.b32.xlu0 %v5901_v58, %s4604_s26 }
 0xd31   : > { %v1955_v27 = vpop.permute.xlu1 %1954 }
 0xd32   : > { %v1953_v52 = vpop.permute.xlu0 %1952  ;;  %v1979_v45 = vsel %vm205_vm0, %v1955_v27, 0.0  ;;  %v3909_v27 = vld [vmem:[%s4649_s20 + $0x240] sm:$0xff] }
 0xd33   : > { %1980 = vadd.xlane.f32.xlu1 %v1979_v45  ;;  %v1976_v31 = vsel %vm205_vm0, %v1953_v52, 0.0  ;;  %v3912_v52 = vld [vmem:[%s4649_s20 + $0x258] sm:$0xff]  ;;  %v3913_v45 = vld [vmem:[%s4649_s20 + $0x260] sm:$0xff] }
 0xd34   : > { %1977 = vadd.xlane.f32.xlu0 %v1976_v31  ;;  %v3914_v31 = vld [vmem:[%s4649_s20 + $0x268] sm:$0xff] }
 0xd35   : > { %v1957_v55 = vpop.permute.xlu1 %1956 }
 0xd36   : > { %v1982_v47 = vsel %vm205_vm0, %v1957_v55, 0.0  ;;  %v3915_v55 = vld [vmem:[%s4649_s20 + $0x270] sm:$0xff] }
 0xd38   : > { %1983 = vadd.xlane.f32.xlu0 %v1982_v47  ;;  %v3916_v47 = vld [vmem:[%s4649_s20 + $0x278] sm:$0xff] }
 0xd39   : > { %v1959_v22 = vpop.permute.xlu1 %1958 }
 0xd3a   : > { %v1985_v48 = vsel %vm205_vm0, %v1959_v22, 0.0 }
 0xd3c   : > { %1986 = vadd.xlane.f32.xlu0 %v1985_v48 }
 0xd3d   : > { %v1963_v26 = vpop.permute.xlu1 %1962 }
 0xd3e   : > { %v1961_v12 = vpop.permute.xlu0 %1960  ;;  %v1991_v14 = vsel %vm205_vm0, %v1963_v26, 0.0 }
 0xd3f   : > { %1992 = vadd.xlane.f32.xlu1 %v1991_v14  ;;  %v1988_v4 = vsel %vm205_vm0, %v1961_v12, 0.0 }
 0xd40   : > { %1989 = vadd.xlane.f32.xlu0 %v1988_v4 }
 0xd41   : > { %v1967_v53 = vpop.permute.xlu1 %1966 }
 0xd42   : > { %v1965_v19 = vpop.permute.xlu0 %1964  ;;  %v1997_v24 = vsel %vm205_vm0, %v1967_v53, 0.0 }
 0xd43   : > { %1998 = vadd.xlane.f32.xlu1 %v1997_v24  ;;  %v1994_v20 = vsel %vm205_vm0, %v1965_v19, 0.0 }
 0xd44   : > { %1995 = vadd.xlane.f32.xlu0 %v1994_v20  ;;  %v4543_v20 = vld [vmem:[%s4644_s16 + $0x88] sm:$0xff] }
 0xd54   : > { %2043 = vrot.lane.b32.xlu1 %v3910_v0, %s4603_s25 }
 0xd58   : > { %2045 = vrot.lane.b32.xlu1 %v3911_v11, %s4603_s25 }
 0xd5a   : > { %2041 = vrot.lane.b32.xlu0 %v3909_v27, %s4603_s25  ;;  %v4544_v27 = vld [vmem:[%s4644_s16 + $0x80] sm:$0xff] }
 0xd5c   : > { %2047 = vrot.lane.b32.xlu1 %v3912_v52, %s4603_s25 }
 0xd5e   : > { %2049 = vrot.lane.b32.xlu0 %v3913_v45, %s4603_s25 }
 0xd60   : > { %2051 = vrot.lane.b32.xlu1 %v3914_v31, %s4603_s25 }
 0xd62   : > { %2053 = vrot.lane.b32.xlu0 %v3915_v55, %s4603_s25 }
 0xd64   : > { %2055 = vrot.lane.b32.xlu1 %v3916_v47, %s4603_s25  ;;  %v4545_v47 = vld [vmem:[%s4644_s16 + $0x90] sm:$0xff] }
 0xdbc   : > { %v5935_v26 = vpop.xlane.xlu1 %1980 }
 0xdbd   : > { %v5931_v22 = vpop.xlane.xlu0 %1977  ;;  %7605 = vst [vmem:[#allocation182_spill] sm:$0xff] %v5935_v26 }
 0xdbe   : > { %7603 = vst [vmem:[#allocation180_spill] sm:$0xff] %v5931_v22 }
 0xdc1   : > { %v5933_v48 = vpop.xlane.xlu0 %1983 }
 0xdc2   : > { %7604 = vst [vmem:[#allocation181_spill] sm:$0xff] %v5933_v48 }
 0xdc5   : > { %v5937_v12 = vpop.xlane.xlu0 %1986 }
 0xdc6   : > { %7606 = vst [vmem:[#allocation183_spill] sm:$0xff] %v5937_v12 }
 0xdc8   : > { %v5939_v14 = vpop.xlane.xlu1 %1992 }
 0xdc9   : > { %7607 = vst [vmem:[#allocation184_spill] sm:$0xff] %v5939_v14  ;;  %v5941_v4 = vpop.xlane.xlu0 %1989 }
 0xdca   : > { %7608 = vst [vmem:[#allocation185_spill] sm:$0xff] %v5941_v4 }
 0xdcc   : > { %v5943_v53 = vpop.xlane.xlu1 %1998 }
 0xdcd   : > { %7609 = vst [vmem:[#allocation186_spill] sm:$0xff] %v5943_v53  ;;  %v5945_v19 = vpop.xlane.xlu0 %1995  ;;  %v4549_v53 = vld [vmem:[%s4644_s16 + $0xa8] sm:$0xff] }
 0xdce   : > { %7610 = vst [vmem:[#allocation187_spill] sm:$0xff] %v5945_v19 }
 0xdd0   : > { %v2044_v24 = vpop.permute.xlu1 %2043 }
 0xdd1   : > { %v2066_v0 = vmul.f32 %v4543_v20, %v2044_v24  ;;  %v2042_v11 = vpop.permute.xlu0 %2041  ;;  %v4546_v20 = vld [vmem:[%s4644_s16 + $0xa0] sm:$0xff] }
 0xdd2   : > { %v2065_v52 = vmul.f32 %v4544_v27, %v2042_v11 }
 0xdd3   : > { %v2074_v45 = vmul.f32 0.35355338, %v2066_v0 }
 0xdd4   : > { %v2073_v31 = vmul.f32 0.35355338, %v2065_v52  ;;  %v2046_v55 = vpop.permute.xlu1 %2045 }
 0xdd5   : > { %v2067_v56 = vmul.f32 %v4545_v47, %v2046_v55  ;;  %v2084_v58 = vsel %vm1710_vm2, %v2074_v45, -inf  ;;  %v2050_v63 = vpop.permute.xlu0 %2049 }
 0xdd6   : > { %2085 = vmax.xlane.f32.xlu1 %v2084_v58  ;;  %v2081_v59 = vsel %vm1710_vm2, %v2073_v31, -inf  ;;  %v2069_v15 = vmul.f32 %v4546_v20, %v2050_v63 }
 0xdd7   : > { %v2075_v50 = vmul.f32 0.35355338, %v2067_v56  ;;  %2082 = vmax.xlane.f32.xlu0 %v2081_v59 }
 0xdd8   : > { %v2048_v24 = vpop.permute.xlu1 %2047  ;;  %v2077_v47 = vmul.f32 0.35355338, %v2069_v15 }
 0xdd9   : > { %v2068_v11 = vmul.f32 %v4547_v21, %v2048_v24  ;;  %v2087_v0 = vsel %vm1710_vm2, %v2075_v50, -inf  ;;  %v2054_v27 = vpop.permute.xlu0 %2053  ;;  %v4550_v24 = vld [vmem:[%s4644_s16 + $0xb8] sm:$0xff] }
 0xdda   : > { %v2071_v58 = vmul.f32 %v4548_v28, %v2054_v27  ;;  %v2093_v21 = vsel %vm1710_vm2, %v2077_v47, -inf }
 0xddb   : > { %v2076_v52 = vmul.f32 0.35355338, %v2068_v11  ;;  %2088 = vmax.xlane.f32.xlu0 %v2087_v0 }
 0xddc   : > { %v2052_v55 = vpop.permute.xlu1 %2051  ;;  %v2079_v63 = vmul.f32 0.35355338, %v2071_v58 }
 0xddd   : > { %v2070_v19 = vmul.f32 %v4549_v53, %v2052_v55  ;;  %v2090_v56 = vsel %vm1710_vm2, %v2076_v52, -inf }
 0xdde   : > { %v2099_v15 = vsel %vm1710_vm2, %v2079_v63, -inf }
 0xddf   : > { %v2078_v59 = vmul.f32 0.35355338, %v2070_v19  ;;  %2091 = vmax.xlane.f32.xlu0 %v2090_v56 }
 0xde0   : > { %v2056_v14 = vpop.permute.xlu1 %2055 }
 0xde1   : > { %v2072_v20 = vmul.f32 %v4550_v24, %v2056_v14  ;;  %v2096_v4 = vsel %vm1710_vm2, %v2078_v59, -inf }
 0xde2   : > { %2097 = vmax.xlane.f32.xlu1 %v2096_v4 }
 0xde3   : > { %v2080_v11 = vmul.f32 0.35355338, %v2072_v20  ;;  %2094 = vmax.xlane.f32.xlu0 %v2093_v21 }
 0xde5   : > { %v2102_v28 = vsel %vm1710_vm2, %v2080_v11, -inf }
 0xde6   : > { %2103 = vmax.xlane.f32.xlu1 %v2102_v28 }
 0xde7   : > { %2100 = vmax.xlane.f32.xlu0 %v2099_v15 }
 0xe5f   : > { %v2086_v53 = vpop.xlane.xlu1 %2085 }
 0xe60   : > { %v2106_v19 = vsub.f32 %v2074_v45, %v2086_v53  ;;  %v2083_v0 = vpop.xlane.xlu0 %2082 }
 0xe61   : > { %v2105_v27 = vsub.f32 %v2073_v31, %v2083_v0 }
 0xe62   : > { %v2115_v55 = vmul.f32 1.442695, %v2106_v19 }
 0xe63   : > { %v2113_v58 = vmul.f32 1.442695, %v2105_v27 }
 0xe64   : > { %4143 = vpow2.f32 %v2115_v55  ;;  %v2089_v56 = vpop.xlane.xlu0 %2088 }
 0xe65   : > { %4145 = vpow2.f32 %v2113_v58  ;;  %v2107_v14 = vsub.f32 %v2075_v50, %v2089_v56 }
 0xe67   : > { %v2117_v24 = vmul.f32 1.442695, %v2107_v14 }
 0xe68   : > { %v2092_v4 = vpop.xlane.xlu0 %2091 }
 0xe69   : > { %4147 = vpow2.f32 %v2117_v24  ;;  %v2108_v21 = vsub.f32 %v2076_v52, %v2092_v4 }
 0xe6b   : > { %v2119_v20 = vmul.f32 1.442695, %v2108_v21  ;;  %v2098_v12 = vpop.xlane.xlu1 %2097 }
 0xe6c   : > { %v2110_v48 = vsub.f32 %v2078_v59, %v2098_v12  ;;  %v2095_v26 = vpop.xlane.xlu0 %2094 }
 0xe6d   : > { %4149 = vpow2.f32 %v2119_v20  ;;  %v2109_v15 = vsub.f32 %v2077_v47, %v2095_v26 }
 0xe6e   : > { %v2123_v28 = vmul.f32 1.442695, %v2110_v48 }
 0xe6f   : > { %v2121_v45 = vmul.f32 1.442695, %v2109_v15  ;;  %v2104_v53 = vpop.xlane.xlu1 %2103 }
 0xe70   : > { %4151 = vpow2.f32 %v2123_v28  ;;  %v2112_v31 = vsub.f32 %v2080_v11, %v2104_v53  ;;  %v2101_v19 = vpop.xlane.xlu0 %2100 }
 0xe71   : > { %v5963_v0 = vpop.eup %4143  ;;  %4153 = vpow2.f32 %v2121_v45  ;;  %v2111_v50 = vsub.f32 %v2079_v63, %v2101_v19 }
 0xe72   : > { %7611 = vst [vmem:[#allocation188_spill] sm:$0xff] %v5963_v0  ;;  %v5965_v27 = vpop.eup %4145  ;;  %v2127_v55 = vmul.f32 1.442695, %v2112_v31  ;;  %2139 = vrot.lane.b32.xlu1 %v5963_v0, %s4604_s26  ;;  %v4554_v0 = vld [vmem:[%s4644_s16 + $0xe0] sm:$0xff] }
 0xe73   : > { %7612 = vst [vmem:[#allocation189_spill] sm:$0xff] %v5965_v27  ;;  %v2125_v12 = vmul.f32 1.442695, %v2111_v50  ;;  %2137 = vrot.lane.b32.xlu0 %v5965_v27, %s4604_s26  ;;  %v4556_v27 = vld [vmem:[%s4644_s16 + $0xf0] sm:$0xff] }
 0xe74   : > { %4155 = vpow2.f32 %v2127_v55 }
 0xe75   : > { %4157 = vpow2.f32 %v2125_v12  ;;  %v3918_v12 = vld [vmem:[%s4649_s20 + $0x348] sm:$0xff] }
 0xe76   : > { %v5971_v48 = vpop.eup %4147 }
 0xe77   : > { %7613 = vst [vmem:[#allocation190_spill] sm:$0xff] %v5971_v48  ;;  %2141 = vrot.lane.b32.xlu1 %v5971_v48, %s4604_s26 }
 0xe7a   : > { %v5975_v26 = vpop.eup %4149 }
 0xe7b   : > { %7614 = vst [vmem:[#allocation191_spill] sm:$0xff] %v5975_v26  ;;  %2143 = vrot.lane.b32.xlu1 %v5975_v26, %s4604_s26 }
 0xe7d   : > { %v5979_v52 = vpop.eup %4151 }
 0xe7e   : > { %7615 = vst [vmem:[#allocation192_spill] sm:$0xff] %v5979_v52  ;;  %v5981_v47 = vpop.eup %4153 }
 0xe7f   : > { %7616 = vst [vmem:[#allocation193_spill] sm:$0xff] %v5981_v47  ;;  %2147 = vrot.lane.b32.xlu1 %v5979_v52, %s4604_s26  ;;  %2145 = vrot.lane.b32.xlu0 %v5981_v47, %s4604_s26 }
 0xe81   : > { %v5987_v59 = vpop.eup %4155 }
 0xe82   : > { %7617 = vst [vmem:[#allocation194_spill] sm:$0xff] %v5987_v59  ;;  %v5989_v63 = vpop.eup %4157 }
 0xe83   : > { %7618 = vst [vmem:[#allocation195_spill] sm:$0xff] %v5989_v63  ;;  %2151 = vrot.lane.b32.xlu1 %v5987_v59, %s4604_s26  ;;  %2149 = vrot.lane.b32.xlu0 %v5989_v63, %s4604_s26  ;;  %v4553_v63 = vld [vmem:[%s4644_s16 + $0xd0] sm:$0xff] }
 0xee4   : > { %v2140_v11 = vpop.permute.xlu1 %2139 }
 0xee5   : > { %v2138_v58 = vpop.permute.xlu0 %2137  ;;  %v2164_v56 = vsel %vm205_vm0, %v2140_v11, 0.0  ;;  %v3919_v11 = vld [vmem:[%s4649_s20 + $0x350] sm:$0xff] }
 0xee6   : > { %2165 = vadd.xlane.f32.xlu1 %v2164_v56  ;;  %v2161_v14 = vsel %vm205_vm0, %v2138_v58, 0.0  ;;  %v3917_v58 = vld [vmem:[%s4649_s20 + $0x340] sm:$0xff]  ;;  %v3920_v56 = vld [vmem:[%s4649_s20 + $0x358] sm:$0xff] }
 0xee7   : > { %2162 = vadd.xlane.f32.xlu0 %v2161_v14  ;;  %v3921_v14 = vld [vmem:[%s4649_s20 + $0x360] sm:$0xff] }
 0xee9   : > { %v2142_v24 = vpop.permute.xlu1 %2141 }
 0xeea   : > { %v2167_v4 = vsel %vm205_vm0, %v2142_v24, 0.0  ;;  %v3922_v24 = vld [vmem:[%s4649_s20 + $0x368] sm:$0xff] }
 0xeeb   : > { %2168 = vadd.xlane.f32.xlu0 %v2167_v4  ;;  %v3923_v4 = vld [vmem:[%s4649_s20 + $0x370] sm:$0xff] }
 0xeed   : > { %v2144_v21 = vpop.permute.xlu1 %2143 }
 0xeee   : > { %v2170_v20 = vsel %vm205_vm0, %v2144_v21, 0.0  ;;  %v3924_v21 = vld [vmem:[%s4649_s20 + $0x378] sm:$0xff] }
 0xeef   : > { %2171 = vadd.xlane.f32.xlu0 %v2170_v20 }
 0xef1   : > { %v2148_v15 = vpop.permute.xlu1 %2147  ;;  %v2146_v28 = vpop.permute.xlu0 %2145 }
 0xef2   : > { %v2176_v45 = vsel %vm205_vm0, %v2148_v15, 0.0  ;;  %v2173_v53 = vsel %vm205_vm0, %v2146_v28, 0.0 }
 0xef3   : > { %2177 = vadd.xlane.f32.xlu1 %v2176_v45  ;;  %2174 = vadd.xlane.f32.xlu0 %v2173_v53 }
 0xef5   : > { %v2152_v31 = vpop.permute.xlu1 %2151  ;;  %v2150_v19 = vpop.permute.xlu0 %2149 }
 0xef6   : > { %v2182_v50 = vsel %vm205_vm0, %v2152_v31, 0.0  ;;  %v2179_v55 = vsel %vm205_vm0, %v2150_v19, 0.0 }
 0xef7   : > { %2183 = vadd.xlane.f32.xlu1 %v2182_v50  ;;  %2180 = vadd.xlane.f32.xlu0 %v2179_v55 }
 0xf08   : > { %2228 = vrot.lane.b32.xlu1 %v3918_v12, %s4603_s25 }
 0xf0c   : > { %2230 = vrot.lane.b32.xlu1 %v3919_v11, %s4603_s25  ;;  %v4551_v11 = vld [vmem:[%s4644_s16 + $0xc8] sm:$0xff] }
 0xf0d   : > { %2226 = vrot.lane.b32.xlu0 %v3917_v58, %s4603_s25 }
 0xf10   : > { %2232 = vrot.lane.b32.xlu1 %v3920_v56, %s4603_s25  ;;  %v4552_v56 = vld [vmem:[%s4644_s16 + $0xc0] sm:$0xff] }
 0xf11   : > { %2234 = vrot.lane.b32.xlu0 %v3921_v14, %s4603_s25 }
 0xf14   : > { %2236 = vrot.lane.b32.xlu1 %v3922_v24, %s4603_s25 }
 0xf15   : > { %2238 = vrot.lane.b32.xlu0 %v3923_v4, %s4603_s25 }
 0xf18   : > { %2240 = vrot.lane.b32.xlu1 %v3924_v21, %s4603_s25 }
 0xf6f   : > { %v6023_v28 = vpop.xlane.xlu1 %2165 }
 0xf70   : > { %v6019_v20 = vpop.xlane.xlu0 %2162  ;;  %7621 = vst [vmem:[#allocation198_spill] sm:$0xff] %v6023_v28 }
 0xf71   : > { %7619 = vst [vmem:[#allocation196_spill] sm:$0xff] %v6019_v20 }
 0xf74   : > { %v6021_v15 = vpop.xlane.xlu0 %2168 }
 0xf75   : > { %7620 = vst [vmem:[#allocation197_spill] sm:$0xff] %v6021_v15 }
 0xf78   : > { %v6025_v45 = vpop.xlane.xlu0 %2171 }
 0xf79   : > { %7622 = vst [vmem:[#allocation199_spill] sm:$0xff] %v6025_v45 }
 0xf7c   : > { %v6027_v53 = vpop.xlane.xlu1 %2177  ;;  %v6029_v31 = vpop.xlane.xlu0 %2174 }
 0xf7d   : > { %7623 = vst [vmem:[#allocation200_spill] sm:$0xff] %v6027_v53  ;;  %7624 = vst [vmem:[#allocation201_spill] sm:$0xff] %v6029_v31  ;;  %v4557_v53 = vld [vmem:[%s4644_s16 + $0xe8] sm:$0xff] }
 0xf80   : > { %v6031_v19 = vpop.xlane.xlu1 %2183  ;;  %v6033_v50 = vpop.xlane.xlu0 %2180 }
 0xf81   : > { %7625 = vst [vmem:[#allocation202_spill] sm:$0xff] %v6031_v19  ;;  %7626 = vst [vmem:[#allocation203_spill] sm:$0xff] %v6033_v50 }
 0xf84   : > { %v2229_v55 = vpop.permute.xlu1 %2228  ;;  %v2227_v12 = vpop.permute.xlu0 %2226 }
 0xf85   : > { %v2251_v58 = vmul.f32 %v4551_v11, %v2229_v55  ;;  %v2250_v14 = vmul.f32 %v4552_v56, %v2227_v12  ;;  %v4555_v56 = vld [vmem:[%s4644_s16 + $0xd8] sm:$0xff] }
 0xf87   : > { %v2259_v24 = vmul.f32 0.35355338, %v2251_v58  ;;  %v2258_v4 = vmul.f32 0.35355338, %v2250_v14 }
 0xf88   : > { %v2231_v21 = vpop.permute.xlu1 %2230  ;;  %v2235_v59 = vpop.permute.xlu0 %2234 }
 0xf89   : > { %v2252_v52 = vmul.f32 %v4553_v63, %v2231_v21  ;;  %v2269_v47 = vsel %vm1710_vm2, %v2259_v24, -inf  ;;  %v2266_v26 = vsel %vm1710_vm2, %v2258_v4, -inf  ;;  %v2254_v55 = vmul.f32 %v4554_v0, %v2235_v59 }
 0xf8a   : > { %2270 = vmax.xlane.f32.xlu1 %v2269_v47  ;;  %2267 = vmax.xlane.f32.xlu0 %v2266_v26 }
 0xf8b   : > { %v2260_v48 = vmul.f32 0.35355338, %v2252_v52  ;;  %v2262_v21 = vmul.f32 0.35355338, %v2254_v55 }
 0xf8c   : > { %v2233_v11 = vpop.permute.xlu1 %2232  ;;  %v2239_v12 = vpop.permute.xlu0 %2238 }
 0xf8d   : > { %v2253_v58 = vmul.f32 %v4555_v56, %v2233_v11  ;;  %v2272_v14 = vsel %vm1710_vm2, %v2260_v48, -inf  ;;  %v2256_v19 = vmul.f32 %v4556_v27, %v2239_v12  ;;  %v2278_v59 = vsel %vm1710_vm2, %v2262_v21, -inf  ;;  %v4558_v11 = vld [vmem:[%s4644_s16 + $0xf8] sm:$0xff] }
 0xf8e   : > { %2273 = vmax.xlane.f32.xlu0 %v2272_v14 }
 0xf8f   : > { %v2261_v63 = vmul.f32 0.35355338, %v2253_v58  ;;  %v2264_v0 = vmul.f32 0.35355338, %v2256_v19 }
 0xf90   : > { %v2237_v50 = vpop.permute.xlu1 %2236 }
 0xf91   : > { %v2255_v47 = vmul.f32 %v4557_v53, %v2237_v50  ;;  %v2275_v26 = vsel %vm1710_vm2, %v2261_v63, -inf  ;;  %v2284_v27 = vsel %vm1710_vm2, %v2264_v0, -inf }
 0xf92   : > { %2276 = vmax.xlane.f32.xlu0 %v2275_v26 }
 0xf93   : > { %v2263_v52 = vmul.f32 0.35355338, %v2255_v47 }
 0xf94   : > { %v2241_v31 = vpop.permute.xlu1 %2240 }
 0xf95   : > { %v2257_v56 = vmul.f32 %v4558_v11, %v2241_v31  ;;  %v2281_v45 = vsel %vm1710_vm2, %v2263_v52, -inf }
 0xf96   : > { %2282 = vmax.xlane.f32.xlu1 %v2281_v45  ;;  %2279 = vmax.xlane.f32.xlu0 %v2278_v59 }
 0xf97   : > { %v2265_v55 = vmul.f32 0.35355338, %v2257_v56 }
 0xf99   : > { %v2287_v12 = vsel %vm1710_vm2, %v2265_v55, -inf }
 0xf9a   : > { %2288 = vmax.xlane.f32.xlu1 %v2287_v12  ;;  %2285 = vmax.xlane.f32.xlu0 %v2284_v27 }
0x1013   : > { %v2271_v53 = vpop.xlane.xlu1 %2270  ;;  %v2268_v50 = vpop.xlane.xlu0 %2267 }
0x1014   : > { %v2291_v58 = vsub.f32 %v2259_v24, %v2271_v53  ;;  %v2290_v19 = vsub.f32 %v2258_v4, %v2268_v50 }
0x1016   : > { %v2300_v14 = vmul.f32 1.442695, %v2291_v58  ;;  %v2298_v47 = vmul.f32 1.442695, %v2290_v19 }
0x1017   : > { %v2274_v26 = vpop.xlane.xlu0 %2273 }
0x1018   : > { %4159 = vpow2.f32 %v2300_v14  ;;  %v2292_v31 = vsub.f32 %v2260_v48, %v2274_v26 }
0x1019   : > { %4161 = vpow2.f32 %v2298_v47 }
0x101a   : > { %v2302_v11 = vmul.f32 1.442695, %v2292_v31 }
0x101b   : > { %v2277_v45 = vpop.xlane.xlu0 %2276 }
0x101c   : > { %4163 = vpow2.f32 %v2302_v11  ;;  %v2293_v59 = vsub.f32 %v2261_v63, %v2277_v45 }
0x101e   : > { %v2304_v56 = vmul.f32 1.442695, %v2293_v59 }
0x101f   : > { %v2283_v15 = vpop.xlane.xlu1 %2282  ;;  %v2280_v28 = vpop.xlane.xlu0 %2279 }
0x1020   : > { %4165 = vpow2.f32 %v2304_v56  ;;  %v2295_v12 = vsub.f32 %v2263_v52, %v2283_v15  ;;  %v2294_v27 = vsub.f32 %v2262_v21, %v2280_v28 }
0x1022   : > { %v2308_v20 = vmul.f32 1.442695, %v2295_v12  ;;  %v2306_v22 = vmul.f32 1.442695, %v2294_v27 }
0x1023   : > { %v2289_v24 = vpop.xlane.xlu1 %2288  ;;  %v2286_v4 = vpop.xlane.xlu0 %2285 }
0x1024   : > { %4167 = vpow2.f32 %v2308_v20  ;;  %v2297_v53 = vsub.f32 %v2265_v55, %v2289_v24  ;;  %v2296_v50 = vsub.f32 %v2264_v0, %v2286_v4 }
0x1025   : > { %v6051_v58 = vpop.eup %4159  ;;  %4169 = vpow2.f32 %v2306_v22 }
0x1026   : > { %7627 = vst [vmem:[#allocation204_spill] sm:$0xff] %v6051_v58  ;;  %v6053_v48 = vpop.eup %4161  ;;  %v2312_v19 = vmul.f32 1.442695, %v2297_v53  ;;  %v2310_v63 = vmul.f32 1.442695, %v2296_v50  ;;  %2324 = vrot.lane.b32.xlu1 %v6051_v58, %s4604_s26 }
0x1027   : > { %7628 = vst [vmem:[#allocation205_spill] sm:$0xff] %v6053_v48  ;;  %2322 = vrot.lane.b32.xlu0 %v6053_v48, %s4604_s26  ;;  %v4564_v48 = vld [vmem:[%s4644_s16 + $0x30] sm:$0xff] }
0x1028   : > { %4171 = vpow2.f32 %v2312_v19  ;;  %v3926_v19 = vld [vmem:[%s4649_s20 + $0x88] sm:$0xff] }
0x1029   : > { %v6059_v15 = vpop.eup %4163  ;;  %4173 = vpow2.f32 %v2310_v63  ;;  %v3927_v63 = vld [vmem:[%s4649_s20 + $0x90] sm:$0xff] }
0x102a   : > { %7629 = vst [vmem:[#allocation206_spill] sm:$0xff] %v6059_v15  ;;  %2326 = vrot.lane.b32.xlu1 %v6059_v15, %s4604_s26 }
0x102d   : > { %v6063_v20 = vpop.eup %4165 }
0x102e   : > { %7630 = vst [vmem:[#allocation207_spill] sm:$0xff] %v6063_v20  ;;  %2328 = vrot.lane.b32.xlu1 %v6063_v20, %s4604_s26  ;;  %v4562_v20 = vld [vmem:[%s4644_s16 + $0x20] sm:$0xff] }
0x1031   : > { %v6067_v22 = vpop.eup %4167 }
0x1032   : > { %7631 = vst [vmem:[#allocation208_spill] sm:$0xff] %v6067_v22  ;;  %v6069_v28 = vpop.eup %4169  ;;  %2332 = vrot.lane.b32.xlu1 %v6067_v22, %s4604_s26 }
0x1033   : > { %7632 = vst [vmem:[#allocation209_spill] sm:$0xff] %v6069_v28  ;;  %2330 = vrot.lane.b32.xlu0 %v6069_v28, %s4604_s26 }
0x1035   : > { %v6075_v21 = vpop.eup %4171 }
0x1036   : > { %7633 = vst [vmem:[#allocation210_spill] sm:$0xff] %v6075_v21  ;;  %v6077_v52 = vpop.eup %4173  ;;  %2336 = vrot.lane.b32.xlu1 %v6075_v21, %s4604_s26 }
0x1037   : > { %7634 = vst [vmem:[#allocation211_spill] sm:$0xff] %v6077_v52  ;;  %2334 = vrot.lane.b32.xlu0 %v6077_v52, %s4604_s26 }
0x1098   : > { %v2325_v0 = vpop.permute.xlu1 %2324 }
0x1099   : > { %v2323_v55 = vpop.permute.xlu0 %2322  ;;  %v2349_v14 = vsel %vm205_vm0, %v2325_v0, 0.0  ;;  %v3925_v0 = vld [vmem:[%s4649_s20 + $0x80] sm:$0xff] }
0x109a   : > { %2350 = vadd.xlane.f32.xlu1 %v2349_v14  ;;  %v2346_v47 = vsel %vm205_vm0, %v2323_v55, 0.0  ;;  %v3928_v55 = vld [vmem:[%s4649_s20 + $0x98] sm:$0xff]  ;;  %v3929_v14 = vld [vmem:[%s4649_s20 + $0xa0] sm:$0xff] }
0x109b   : > { %2347 = vadd.xlane.f32.xlu0 %v2346_v47  ;;  %v3930_v47 = vld [vmem:[%s4649_s20 + $0xa8] sm:$0xff] }
0x109c   : > { %v2327_v26 = vpop.permute.xlu1 %2326 }
0x109d   : > { %v2352_v31 = vsel %vm205_vm0, %v2327_v26, 0.0  ;;  %v3931_v26 = vld [vmem:[%s4649_s20 + $0xb0] sm:$0xff] }
0x109f   : > { %2353 = vadd.xlane.f32.xlu0 %v2352_v31  ;;  %v3932_v31 = vld [vmem:[%s4649_s20 + $0xb8] sm:$0xff] }
0x10a0   : > { %v2329_v11 = vpop.permute.xlu1 %2328 }
0x10a1   : > { %v2355_v45 = vsel %vm205_vm0, %v2329_v11, 0.0 }
0x10a3   : > { %2356 = vadd.xlane.f32.xlu0 %v2355_v45 }
0x10a4   : > { %v2333_v59 = vpop.permute.xlu1 %2332 }
0x10a5   : > { %v2331_v56 = vpop.permute.xlu0 %2330  ;;  %v2361_v12 = vsel %vm205_vm0, %v2333_v59, 0.0 }
0x10a6   : > { %2362 = vadd.xlane.f32.xlu1 %v2361_v12  ;;  %v2358_v27 = vsel %vm205_vm0, %v2331_v56, 0.0 }
0x10a7   : > { %2359 = vadd.xlane.f32.xlu0 %v2358_v27 }
0x10a8   : > { %v2337_v24 = vpop.permute.xlu1 %2336 }
0x10a9   : > { %v2335_v4 = vpop.permute.xlu0 %2334  ;;  %v2367_v53 = vsel %vm205_vm0, %v2337_v24, 0.0 }
0x10aa   : > { %2368 = vadd.xlane.f32.xlu1 %v2367_v53  ;;  %v2364_v50 = vsel %vm205_vm0, %v2335_v4, 0.0 }
0x10ab   : > { %2365 = vadd.xlane.f32.xlu0 %v2364_v50  ;;  %v4559_v50 = vld [vmem:[%s4644_s16 + $0x8] sm:$0xff] }
0x10bb   : > { %2413 = vrot.lane.b32.xlu1 %v3926_v19, %s4605_s27 }
0x10bf   : > { %2415 = vrot.lane.b32.xlu1 %v3927_v63, %s4605_s27 }
0x10c1   : > { %2411 = vrot.lane.b32.xlu0 %v3925_v0, %s4605_s27  ;;  %v4560_v0 = vld [vmem:[%s4644_s16] sm:$0xff] }
0x10c3   : > { %2417 = vrot.lane.b32.xlu1 %v3928_v55, %s4605_s27 }
0x10c5   : > { %2419 = vrot.lane.b32.xlu0 %v3929_v14, %s4605_s27 }
0x10c7   : > { %2421 = vrot.lane.b32.xlu1 %v3930_v47, %s4605_s27 }
0x10c9   : > { %2423 = vrot.lane.b32.xlu0 %v3931_v26, %s4605_s27 }
0x10cb   : > { %2425 = vrot.lane.b32.xlu1 %v3932_v31, %s4605_s27  ;;  %v4561_v31 = vld [vmem:[%s4644_s16 + $0x10] sm:$0xff] }
0x1123   : > { %v6111_v59 = vpop.xlane.xlu1 %2350 }
0x1124   : > { %v6107_v11 = vpop.xlane.xlu0 %2347  ;;  %7637 = vst [vmem:[#allocation214_spill] sm:$0xff] %v6111_v59 }
0x1125   : > { %7635 = vst [vmem:[#allocation212_spill] sm:$0xff] %v6107_v11 }
0x1128   : > { %v6109_v45 = vpop.xlane.xlu0 %2353 }
0x1129   : > { %7636 = vst [vmem:[#allocation213_spill] sm:$0xff] %v6109_v45 }
0x112c   : > { %v6113_v56 = vpop.xlane.xlu0 %2356 }
0x112d   : > { %7638 = vst [vmem:[#allocation215_spill] sm:$0xff] %v6113_v56 }
0x112f   : > { %v6115_v12 = vpop.xlane.xlu1 %2362 }
0x1130   : > { %7639 = vst [vmem:[#allocation216_spill] sm:$0xff] %v6115_v12  ;;  %v6117_v27 = vpop.xlane.xlu0 %2359 }
0x1131   : > { %7640 = vst [vmem:[#allocation217_spill] sm:$0xff] %v6117_v27 }
0x1133   : > { %v6119_v24 = vpop.xlane.xlu1 %2368 }
0x1134   : > { %7641 = vst [vmem:[#allocation218_spill] sm:$0xff] %v6119_v24  ;;  %v6121_v4 = vpop.xlane.xlu0 %2365  ;;  %v4565_v24 = vld [vmem:[%s4644_s16 + $0x28] sm:$0xff] }
0x1135   : > { %7642 = vst [vmem:[#allocation219_spill] sm:$0xff] %v6121_v4 }
0x1137   : > { %v2414_v53 = vpop.permute.xlu1 %2413 }
0x1138   : > { %v2436_v19 = vmul.f32 %v4559_v50, %v2414_v53  ;;  %v2412_v63 = vpop.permute.xlu0 %2411 }
0x1139   : > { %v2435_v55 = vmul.f32 %v4560_v0, %v2412_v63  ;;  %v4563_v0 = vld [vmem:[%s4644_s16 + $0x18] sm:$0xff] }
0x113a   : > { %v2444_v14 = vmul.f32 0.35355338, %v2436_v19 }
0x113b   : > { %v2443_v47 = vmul.f32 0.35355338, %v2435_v55  ;;  %v2416_v26 = vpop.permute.xlu1 %2415 }
0x113c   : > { %v2437_v21 = vmul.f32 %v4561_v31, %v2416_v26  ;;  %v2455_v52 = vsel %vm2451_vm3, %v2444_v14, -inf  ;;  %v2420_v22 = vpop.permute.xlu0 %2419 }
0x113d   : > { %2456 = vmax.xlane.f32.xlu1 %v2455_v52  ;;  %v2452_v28 = vsel %vm2451_vm3, %v2443_v47, -inf  ;;  %v2439_v63 = vmul.f32 %v4562_v20, %v2420_v22 }
0x113e   : > { %v2445_v53 = vmul.f32 0.35355338, %v2437_v21  ;;  %2453 = vmax.xlane.f32.xlu0 %v2452_v28 }
0x113f   : > { %v2418_v50 = vpop.permute.xlu1 %2417  ;;  %v2447_v58 = vmul.f32 0.35355338, %v2439_v63 }
0x1140   : > { %v2438_v15 = vmul.f32 %v4563_v0, %v2418_v50  ;;  %v2458_v19 = vsel %vm2451_vm3, %v2445_v53, -inf  ;;  %v2424_v55 = vpop.permute.xlu0 %2423  ;;  %v4566_v50 = vld [vmem:[%s4644_s16 + $0x38] sm:$0xff] }
0x1141   : > { %v2441_v52 = vmul.f32 %v4564_v48, %v2424_v55  ;;  %v2464_v22 = vsel %vm2451_vm3, %v2447_v58, -inf }
0x1142   : > { %v2446_v26 = vmul.f32 0.35355338, %v2438_v15  ;;  %2459 = vmax.xlane.f32.xlu0 %v2458_v19 }
0x1143   : > { %v2422_v31 = vpop.permute.xlu1 %2421  ;;  %v2449_v20 = vmul.f32 0.35355338, %v2441_v52 }
0x1144   : > { %v2440_v4 = vmul.f32 %v4565_v24, %v2422_v31  ;;  %v2461_v21 = vsel %vm2451_vm3, %v2446_v26, -inf }
0x1145   : > { %v2470_v63 = vsel %vm2451_vm3, %v2449_v20, -inf }
0x1146   : > { %v2448_v28 = vmul.f32 0.35355338, %v2440_v4  ;;  %2462 = vmax.xlane.f32.xlu0 %v2461_v21 }
0x1147   : > { %v2426_v12 = vpop.permute.xlu1 %2425 }
0x1148   : > { %v2442_v0 = vmul.f32 %v4566_v50, %v2426_v12  ;;  %v2467_v27 = vsel %vm2451_vm3, %v2448_v28, -inf }
0x1149   : > { %2468 = vmax.xlane.f32.xlu1 %v2467_v27 }
0x114a   : > { %v2450_v15 = vmul.f32 0.35355338, %v2442_v0  ;;  %2465 = vmax.xlane.f32.xlu0 %v2464_v22 }
0x114c   : > { %v2473_v48 = vsel %vm2451_vm3, %v2450_v15, -inf }
0x114d   : > { %2474 = vmax.xlane.f32.xlu1 %v2473_v48 }
0x114e   : > { %2471 = vmax.xlane.f32.xlu0 %v2470_v63 }
0x11c6   : > { %v2457_v24 = vpop.xlane.xlu1 %2456 }
0x11c7   : > { %v2477_v4 = vsub.f32 %v2444_v14, %v2457_v24  ;;  %v2454_v19 = vpop.xlane.xlu0 %2453 }
0x11c8   : > { %v2476_v55 = vsub.f32 %v2443_v47, %v2454_v19 }
0x11c9   : > { %v2486_v31 = vmul.f32 1.442695, %v2477_v4 }
0x11ca   : > { %v2484_v52 = vmul.f32 1.442695, %v2476_v55 }
0x11cb   : > { %4175 = vpow2.f32 %v2486_v31  ;;  %v2460_v21 = vpop.xlane.xlu0 %2459 }
0x11cc   : > { %4177 = vpow2.f32 %v2484_v52  ;;  %v2478_v12 = vsub.f32 %v2445_v53, %v2460_v21 }
0x11ce   : > { %v2488_v50 = vmul.f32 1.442695, %v2478_v12 }
0x11cf   : > { %v2463_v27 = vpop.xlane.xlu0 %2462 }
0x11d0   : > { %4179 = vpow2.f32 %v2488_v50  ;;  %v2479_v22 = vsub.f32 %v2446_v26, %v2463_v27 }
0x11d2   : > { %v2490_v0 = vmul.f32 1.442695, %v2479_v22  ;;  %v2469_v56 = vpop.xlane.xlu1 %2468 }
0x11d3   : > { %v2481_v45 = vsub.f32 %v2448_v28, %v2469_v56  ;;  %v2466_v59 = vpop.xlane.xlu0 %2465 }
0x11d4   : > { %4181 = vpow2.f32 %v2490_v0  ;;  %v2480_v63 = vsub.f32 %v2447_v58, %v2466_v59 }
0x11d5   : > { %v2494_v48 = vmul.f32 1.442695, %v2481_v45 }
0x11d6   : > { %v2492_v14 = vmul.f32 1.442695, %v2480_v63  ;;  %v2475_v24 = vpop.xlane.xlu1 %2474 }
0x11d7   : > { %4183 = vpow2.f32 %v2494_v48  ;;  %v2483_v47 = vsub.f32 %v2450_v15, %v2475_v24  ;;  %v2472_v4 = vpop.xlane.xlu0 %2471 }
0x11d8   : > { %v6139_v19 = vpop.eup %4175  ;;  %4185 = vpow2.f32 %v2492_v14  ;;  %v2482_v53 = vsub.f32 %v2449_v20, %v2472_v4 }
0x11d9   : > { %7643 = vst [vmem:[#allocation220_spill] sm:$0xff] %v6139_v19  ;;  %v6141_v55 = vpop.eup %4177  ;;  %v2498_v31 = vmul.f32 1.442695, %v2483_v47  ;;  %2510 = vrot.lane.b32.xlu1 %v6139_v19, %s4602_s24  ;;  %v4570_v19 = vld [vmem:[%s4644_s16 + $0x60] sm:$0xff] }
0x11da   : > { %7644 = vst [vmem:[#allocation221_spill] sm:$0xff] %v6141_v55  ;;  %v2496_v56 = vmul.f32 1.442695, %v2482_v53  ;;  %2508 = vrot.lane.b32.xlu0 %v6141_v55, %s4602_s24  ;;  %v4572_v55 = vld [vmem:[%s4644_s16 + $0x70] sm:$0xff] }
0x11db   : > { %4187 = vpow2.f32 %v2498_v31 }
0x11dc   : > { %4189 = vpow2.f32 %v2496_v56  ;;  %v3934_v56 = vld [vmem:[%s4649_s20 + $0x188] sm:$0xff] }
0x11dd   : > { %v6147_v58 = vpop.eup %4179 }
0x11de   : > { %7645 = vst [vmem:[#allocation222_spill] sm:$0xff] %v6147_v58  ;;  %2512 = vrot.lane.b32.xlu1 %v6147_v58, %s4602_s24 }
0x11e1   : > { %v6151_v45 = vpop.eup %4181 }
0x11e2   : > { %7646 = vst [vmem:[#allocation223_spill] sm:$0xff] %v6151_v45  ;;  %2514 = vrot.lane.b32.xlu1 %v6151_v45, %s4602_s24 }
0x11e4   : > { %v6155_v59 = vpop.eup %4183 }
0x11e5   : > { %7647 = vst [vmem:[#allocation224_spill] sm:$0xff] %v6155_v59  ;;  %v6157_v26 = vpop.eup %4185 }
0x11e6   : > { %7648 = vst [vmem:[#allocation225_spill] sm:$0xff] %v6157_v26  ;;  %2518 = vrot.lane.b32.xlu1 %v6155_v59, %s4602_s24  ;;  %2516 = vrot.lane.b32.xlu0 %v6157_v26, %s4602_s24 }
0x11e8   : > { %v6163_v28 = vpop.eup %4187 }
0x11e9   : > { %7649 = vst [vmem:[#allocation226_spill] sm:$0xff] %v6163_v28  ;;  %v6165_v20 = vpop.eup %4189 }
0x11ea   : > { %7650 = vst [vmem:[#allocation227_spill] sm:$0xff] %v6165_v20  ;;  %2522 = vrot.lane.b32.xlu1 %v6163_v28, %s4602_s24  ;;  %2520 = vrot.lane.b32.xlu0 %v6165_v20, %s4602_s24  ;;  %v4569_v28 = vld [vmem:[%s4644_s16 + $0x50] sm:$0xff] }
0x124b   : > { %v2511_v15 = vpop.permute.xlu1 %2510 }
0x124c   : > { %v2509_v52 = vpop.permute.xlu0 %2508  ;;  %v2535_v21 = vsel %vm205_vm0, %v2511_v15, 0.0  ;;  %v3935_v15 = vld [vmem:[%s4649_s20 + $0x190] sm:$0xff] }
0x124d   : > { %2536 = vadd.xlane.f32.xlu1 %v2535_v21  ;;  %v2532_v12 = vsel %vm205_vm0, %v2509_v52, 0.0  ;;  %v3933_v52 = vld [vmem:[%s4649_s20 + $0x180] sm:$0xff]  ;;  %v3936_v21 = vld [vmem:[%s4649_s20 + $0x198] sm:$0xff] }
0x124e   : > { %2533 = vadd.xlane.f32.xlu0 %v2532_v12  ;;  %v3937_v12 = vld [vmem:[%s4649_s20 + $0x1a0] sm:$0xff] }
0x1250   : > { %v2513_v50 = vpop.permute.xlu1 %2512 }
0x1251   : > { %v2538_v27 = vsel %vm205_vm0, %v2513_v50, 0.0  ;;  %v3938_v50 = vld [vmem:[%s4649_s20 + $0x1a8] sm:$0xff] }
0x1252   : > { %2539 = vadd.xlane.f32.xlu0 %v2538_v27  ;;  %v3939_v27 = vld [vmem:[%s4649_s20 + $0x1b0] sm:$0xff] }
0x1254   : > { %v2515_v22 = vpop.permute.xlu1 %2514 }
0x1255   : > { %v2541_v0 = vsel %vm205_vm0, %v2515_v22, 0.0  ;;  %v3940_v22 = vld [vmem:[%s4649_s20 + $0x1b8] sm:$0xff] }
0x1256   : > { %2542 = vadd.xlane.f32.xlu0 %v2541_v0 }
0x1258   : > { %v2519_v63 = vpop.permute.xlu1 %2518  ;;  %v2517_v48 = vpop.permute.xlu0 %2516 }
0x1259   : > { %v2547_v14 = vsel %vm205_vm0, %v2519_v63, 0.0  ;;  %v2544_v24 = vsel %vm205_vm0, %v2517_v48, 0.0 }
0x125a   : > { %2548 = vadd.xlane.f32.xlu1 %v2547_v14  ;;  %2545 = vadd.xlane.f32.xlu0 %v2544_v24 }
0x125c   : > { %v2523_v47 = vpop.permute.xlu1 %2522  ;;  %v2521_v4 = vpop.permute.xlu0 %2520 }
0x125d   : > { %v2553_v53 = vsel %vm205_vm0, %v2523_v47, 0.0  ;;  %v2550_v31 = vsel %vm205_vm0, %v2521_v4, 0.0 }
0x125e   : > { %2554 = vadd.xlane.f32.xlu1 %v2553_v53  ;;  %2551 = vadd.xlane.f32.xlu0 %v2550_v31 }
0x126f   : > { %2599 = vrot.lane.b32.xlu1 %v3934_v56, %s4605_s27 }
0x1273   : > { %2601 = vrot.lane.b32.xlu1 %v3935_v15, %s4605_s27  ;;  %v4567_v15 = vld [vmem:[%s4644_s16 + $0x48] sm:$0xff] }
0x1274   : > { %2597 = vrot.lane.b32.xlu0 %v3933_v52, %s4605_s27 }
0x1277   : > { %2603 = vrot.lane.b32.xlu1 %v3936_v21, %s4605_s27  ;;  %v4568_v21 = vld [vmem:[%s4644_s16 + $0x40] sm:$0xff] }
0x1278   : > { %2605 = vrot.lane.b32.xlu0 %v3937_v12, %s4605_s27 }
0x127b   : > { %2607 = vrot.lane.b32.xlu1 %v3938_v50, %s4605_s27 }
0x127c   : > { %2609 = vrot.lane.b32.xlu0 %v3939_v27, %s4605_s27 }
0x127f   : > { %2611 = vrot.lane.b32.xlu1 %v3940_v22, %s4605_s27 }
0x12d6   : > { %v6199_v48 = vpop.xlane.xlu1 %2536 }
0x12d7   : > { %v6195_v0 = vpop.xlane.xlu0 %2533  ;;  %7653 = vst [vmem:[#allocation230_spill] sm:$0xff] %v6199_v48 }
0x12d8   : > { %7651 = vst [vmem:[#allocation228_spill] sm:$0xff] %v6195_v0 }
0x12db   : > { %v6197_v63 = vpop.xlane.xlu0 %2539 }
0x12dc   : > { %7652 = vst [vmem:[#allocation229_spill] sm:$0xff] %v6197_v63 }
0x12df   : > { %v6201_v14 = vpop.xlane.xlu0 %2542 }
0x12e0   : > { %7654 = vst [vmem:[#allocation231_spill] sm:$0xff] %v6201_v14 }
0x12e3   : > { %v6203_v24 = vpop.xlane.xlu1 %2548  ;;  %v6205_v47 = vpop.xlane.xlu0 %2545 }
0x12e4   : > { %7655 = vst [vmem:[#allocation232_spill] sm:$0xff] %v6203_v24  ;;  %7656 = vst [vmem:[#allocation233_spill] sm:$0xff] %v6205_v47  ;;  %v4573_v24 = vld [vmem:[%s4644_s16 + $0x68] sm:$0xff] }
0x12e7   : > { %v6207_v4 = vpop.xlane.xlu1 %2554  ;;  %v6209_v53 = vpop.xlane.xlu0 %2551 }
0x12e8   : > { %7657 = vst [vmem:[#allocation234_spill] sm:$0xff] %v6207_v4  ;;  %7658 = vst [vmem:[#allocation235_spill] sm:$0xff] %v6209_v53 }
0x12eb   : > { %v2600_v31 = vpop.permute.xlu1 %2599  ;;  %v2598_v56 = vpop.permute.xlu0 %2597 }
0x12ec   : > { %v2622_v52 = vmul.f32 %v4567_v15, %v2600_v31  ;;  %v2621_v12 = vmul.f32 %v4568_v21, %v2598_v56  ;;  %v4571_v21 = vld [vmem:[%s4644_s16 + $0x58] sm:$0xff] }
0x12ee   : > { %v2630_v50 = vmul.f32 0.35355338, %v2622_v52  ;;  %v2629_v27 = vmul.f32 0.35355338, %v2621_v12 }
0x12ef   : > { %v2602_v22 = vpop.permute.xlu1 %2601  ;;  %v2606_v20 = vpop.permute.xlu0 %2605 }
0x12f0   : > { %v2623_v59 = vmul.f32 %v4569_v28, %v2602_v22  ;;  %v2640_v26 = vsel %vm2451_vm3, %v2630_v50, -inf  ;;  %v2637_v45 = vsel %vm2451_vm3, %v2629_v27, -inf  ;;  %v2625_v31 = vmul.f32 %v4570_v19, %v2606_v20 }
0x12f1   : > { %2641 = vmax.xlane.f32.xlu1 %v2640_v26  ;;  %2638 = vmax.xlane.f32.xlu0 %v2637_v45 }
0x12f2   : > { %v2631_v58 = vmul.f32 0.35355338, %v2623_v59  ;;  %v2633_v22 = vmul.f32 0.35355338, %v2625_v31 }
0x12f3   : > { %v2604_v15 = vpop.permute.xlu1 %2603  ;;  %v2610_v56 = vpop.permute.xlu0 %2609 }
0x12f4   : > { %v2624_v52 = vmul.f32 %v4571_v21, %v2604_v15  ;;  %v2643_v12 = vsel %vm2451_vm3, %v2631_v58, -inf  ;;  %v2627_v53 = vmul.f32 %v4572_v55, %v2610_v56  ;;  %v2649_v20 = vsel %vm2451_vm3, %v2633_v22, -inf  ;;  %v4574_v15 = vld [vmem:[%s4644_s16 + $0x78] sm:$0xff] }
0x12f5   : > { %2644 = vmax.xlane.f32.xlu0 %v2643_v12 }
0x12f6   : > { %v2632_v28 = vmul.f32 0.35355338, %v2624_v52  ;;  %v2635_v19 = vmul.f32 0.35355338, %v2627_v53 }
0x12f7   : > { %v2608_v4 = vpop.permute.xlu1 %2607 }
0x12f8   : > { %v2626_v26 = vmul.f32 %v4573_v24, %v2608_v4  ;;  %v2646_v45 = vsel %vm2451_vm3, %v2632_v28, -inf  ;;  %v2655_v55 = vsel %vm2451_vm3, %v2635_v19, -inf }
0x12f9   : > { %2647 = vmax.xlane.f32.xlu0 %v2646_v45 }
0x12fa   : > { %v2634_v59 = vmul.f32 0.35355338, %v2626_v26 }
0x12fb   : > { %v2612_v47 = vpop.permute.xlu1 %2611 }
0x12fc   : > { %v2628_v21 = vmul.f32 %v4574_v15, %v2612_v47  ;;  %v2652_v14 = vsel %vm2451_vm3, %v2634_v59, -inf }
0x12fd   : > { %2653 = vmax.xlane.f32.xlu1 %v2652_v14  ;;  %2650 = vmax.xlane.f32.xlu0 %v2649_v20 }
0x12fe   : > { %v2636_v31 = vmul.f32 0.35355338, %v2628_v21 }
0x1300   : > { %v2658_v56 = vsel %vm2451_vm3, %v2636_v31, -inf }
0x1301   : > { %2659 = vmax.xlane.f32.xlu1 %v2658_v56  ;;  %2656 = vmax.xlane.f32.xlu0 %v2655_v55 }
0x137a   : > { %v2642_v24 = vpop.xlane.xlu1 %2641  ;;  %v2639_v4 = vpop.xlane.xlu0 %2638 }
0x137b   : > { %v2662_v52 = vsub.f32 %v2630_v50, %v2642_v24  ;;  %v2661_v53 = vsub.f32 %v2629_v27, %v2639_v4 }
0x137d   : > { %v2671_v12 = vmul.f32 1.442695, %v2662_v52  ;;  %v2669_v26 = vmul.f32 1.442695, %v2661_v53 }
0x137e   : > { %v2645_v45 = vpop.xlane.xlu0 %2644 }
0x137f   : > { %4191 = vpow2.f32 %v2671_v12  ;;  %v2663_v47 = vsub.f32 %v2631_v58, %v2645_v45 }
0x1380   : > { %4193 = vpow2.f32 %v2669_v26 }
0x1381   : > { %v2673_v15 = vmul.f32 1.442695, %v2663_v47 }
0x1382   : > { %v2648_v14 = vpop.xlane.xlu0 %2647 }
0x1383   : > { %4195 = vpow2.f32 %v2673_v15  ;;  %v2664_v20 = vsub.f32 %v2632_v28, %v2648_v14 }
0x1385   : > { %v2675_v21 = vmul.f32 1.442695, %v2664_v20 }
0x1386   : > { %v2654_v63 = vpop.xlane.xlu1 %2653  ;;  %v2651_v48 = vpop.xlane.xlu0 %2650 }
0x1387   : > { %4197 = vpow2.f32 %v2675_v21  ;;  %v2666_v56 = vsub.f32 %v2634_v59, %v2654_v63  ;;  %v2665_v55 = vsub.f32 %v2633_v22, %v2651_v48 }
0x1389   : > { %v2679_v0 = vmul.f32 1.442695, %v2666_v56  ;;  %v2677_v11 = vmul.f32 1.442695, %v2665_v55 }
0x138a   : > { %v2660_v50 = vpop.xlane.xlu1 %2659  ;;  %v2657_v27 = vpop.xlane.xlu0 %2656 }
0x138b   : > { %4199 = vpow2.f32 %v2679_v0  ;;  %v2668_v24 = vsub.f32 %v2636_v31, %v2660_v50  ;;  %v2667_v4 = vsub.f32 %v2635_v19, %v2657_v27 }
0x138c   : > { %v6227_v52 = vpop.eup %4191  ;;  %4201 = vpow2.f32 %v2677_v11 }
0x138d   : > { %7659 = vst [vmem:[#allocation236_spill] sm:$0xff] %v6227_v52  ;;  %v6229_v58 = vpop.eup %4193  ;;  %v2683_v53 = vmul.f32 1.442695, %v2668_v24  ;;  %v2681_v28 = vmul.f32 1.442695, %v2667_v4  ;;  %2695 = vrot.lane.b32.xlu1 %v6227_v52, %s4602_s24  ;;  %v4579_v52 = vld [vmem:[%s4644_s16 + $0x98] sm:$0xff] }
0x138e   : > { %7660 = vst [vmem:[#allocation237_spill] sm:$0xff] %v6229_v58  ;;  %2693 = vrot.lane.b32.xlu0 %v6229_v58, %s4602_s24  ;;  %v4580_v58 = vld [vmem:[%s4644_s16 + $0xb0] sm:$0xff] }
0x138f   : > { %4203 = vpow2.f32 %v2683_v53  ;;  %v3942_v53 = vld [vmem:[%s4649_s20 + $0x288] sm:$0xff] }
0x1390   : > { %v6235_v63 = vpop.eup %4195  ;;  %4205 = vpow2.f32 %v2681_v28  ;;  %v3943_v28 = vld [vmem:[%s4649_s20 + $0x290] sm:$0xff] }
0x1391   : > { %7661 = vst [vmem:[#allocation238_spill] sm:$0xff] %v6235_v63  ;;  %2697 = vrot.lane.b32.xlu1 %v6235_v63, %s4602_s24 }
0x1394   : > { %v6239_v0 = vpop.eup %4197 }
0x1395   : > { %7662 = vst [vmem:[#allocation239_spill] sm:$0xff] %v6239_v0  ;;  %2699 = vrot.lane.b32.xlu1 %v6239_v0, %s4602_s24 }
0x1398   : > { %v6243_v11 = vpop.eup %4199 }
0x1399   : > { %7663 = vst [vmem:[#allocation240_spill] sm:$0xff] %v6243_v11  ;;  %v6245_v48 = vpop.eup %4201  ;;  %2703 = vrot.lane.b32.xlu1 %v6243_v11, %s4602_s24 }
0x139a   : > { %7664 = vst [vmem:[#allocation241_spill] sm:$0xff] %v6245_v48  ;;  %2701 = vrot.lane.b32.xlu0 %v6245_v48, %s4602_s24 }
0x139c   : > { %v6251_v22 = vpop.eup %4203 }
0x139d   : > { %7665 = vst [vmem:[#allocation242_spill] sm:$0xff] %v6251_v22  ;;  %v6253_v59 = vpop.eup %4205  ;;  %2707 = vrot.lane.b32.xlu1 %v6251_v22, %s4602_s24 }
0x139e   : > { %7666 = vst [vmem:[#allocation243_spill] sm:$0xff] %v6253_v59  ;;  %2705 = vrot.lane.b32.xlu0 %v6253_v59, %s4602_s24 }
0x13ff   : > { %v2696_v19 = vpop.permute.xlu1 %2695 }
0x1400   : > { %v2694_v31 = vpop.permute.xlu0 %2693  ;;  %v2720_v12 = vsel %vm205_vm0, %v2696_v19, 0.0  ;;  %v3941_v19 = vld [vmem:[%s4649_s20 + $0x280] sm:$0xff] }
0x1401   : > { %2721 = vadd.xlane.f32.xlu1 %v2720_v12  ;;  %v2717_v26 = vsel %vm205_vm0, %v2694_v31, 0.0  ;;  %v3944_v31 = vld [vmem:[%s4649_s20 + $0x298] sm:$0xff]  ;;  %v3945_v12 = vld [vmem:[%s4649_s20 + $0x2a0] sm:$0xff] }
0x1402   : > { %2718 = vadd.xlane.f32.xlu0 %v2717_v26  ;;  %v3946_v26 = vld [vmem:[%s4649_s20 + $0x2a8] sm:$0xff] }
0x1403   : > { %v2698_v45 = vpop.permute.xlu1 %2697 }
0x1404   : > { %v2723_v47 = vsel %vm205_vm0, %v2698_v45, 0.0  ;;  %v3947_v45 = vld [vmem:[%s4649_s20 + $0x2b0] sm:$0xff] }
0x1406   : > { %2724 = vadd.xlane.f32.xlu0 %v2723_v47  ;;  %v3948_v47 = vld [vmem:[%s4649_s20 + $0x2b8] sm:$0xff] }
0x1407   : > { %v2700_v15 = vpop.permute.xlu1 %2699 }
0x1408   : > { %v2726_v14 = vsel %vm205_vm0, %v2700_v15, 0.0 }
0x140a   : > { %2727 = vadd.xlane.f32.xlu0 %v2726_v14 }
0x140b   : > { %v2704_v20 = vpop.permute.xlu1 %2703 }
0x140c   : > { %v2702_v21 = vpop.permute.xlu0 %2701  ;;  %v2732_v56 = vsel %vm205_vm0, %v2704_v20, 0.0 }
0x140d   : > { %2733 = vadd.xlane.f32.xlu1 %v2732_v56  ;;  %v2729_v55 = vsel %vm205_vm0, %v2702_v21, 0.0 }
0x140e   : > { %2730 = vadd.xlane.f32.xlu0 %v2729_v55 }
0x140f   : > { %v2708_v50 = vpop.permute.xlu1 %2707 }
0x1410   : > { %v2706_v27 = vpop.permute.xlu0 %2705  ;;  %v2738_v24 = vsel %vm205_vm0, %v2708_v50, 0.0 }
0x1411   : > { %2739 = vadd.xlane.f32.xlu1 %v2738_v24  ;;  %v2735_v4 = vsel %vm205_vm0, %v2706_v27, 0.0 }
0x1412   : > { %2736 = vadd.xlane.f32.xlu0 %v2735_v4  ;;  %v4575_v4 = vld [vmem:[%s4644_s16 + $0x88] sm:$0xff] }
0x1422   : > { %2784 = vrot.lane.b32.xlu1 %v3942_v53, %s4605_s27 }
0x1426   : > { %2786 = vrot.lane.b32.xlu1 %v3943_v28, %s4605_s27 }
0x1428   : > { %2782 = vrot.lane.b32.xlu0 %v3941_v19, %s4605_s27  ;;  %v4576_v19 = vld [vmem:[%s4644_s16 + $0x80] sm:$0xff] }
0x142a   : > { %2788 = vrot.lane.b32.xlu1 %v3944_v31, %s4605_s27 }
0x142c   : > { %2790 = vrot.lane.b32.xlu0 %v3945_v12, %s4605_s27 }
0x142e   : > { %2792 = vrot.lane.b32.xlu1 %v3946_v26, %s4605_s27 }
0x1430   : > { %2794 = vrot.lane.b32.xlu0 %v3947_v45, %s4605_s27 }
0x1432   : > { %2796 = vrot.lane.b32.xlu1 %v3948_v47, %s4605_s27  ;;  %v4577_v47 = vld [vmem:[%s4644_s16 + $0x90] sm:$0xff] }
0x148a   : > { %v6287_v20 = vpop.xlane.xlu1 %2721 }
0x148b   : > { %v6283_v15 = vpop.xlane.xlu0 %2718  ;;  %7669 = vst [vmem:[#allocation246_spill] sm:$0xff] %v6287_v20 }
0x148c   : > { %7667 = vst [vmem:[#allocation244_spill] sm:$0xff] %v6283_v15 }
0x148f   : > { %v6285_v14 = vpop.xlane.xlu0 %2724 }
0x1490   : > { %7668 = vst [vmem:[#allocation245_spill] sm:$0xff] %v6285_v14 }
0x1493   : > { %v6289_v21 = vpop.xlane.xlu0 %2727 }
0x1494   : > { %7670 = vst [vmem:[#allocation247_spill] sm:$0xff] %v6289_v21 }
0x1496   : > { %v6291_v56 = vpop.xlane.xlu1 %2733 }
0x1497   : > { %7671 = vst [vmem:[#allocation248_spill] sm:$0xff] %v6291_v56  ;;  %v6293_v55 = vpop.xlane.xlu0 %2730 }
0x1498   : > { %7672 = vst [vmem:[#allocation249_spill] sm:$0xff] %v6293_v55 }
0x149a   : > { %v6295_v50 = vpop.xlane.xlu1 %2739 }
0x149b   : > { %7673 = vst [vmem:[#allocation250_spill] sm:$0xff] %v6295_v50  ;;  %v6297_v27 = vpop.xlane.xlu0 %2736  ;;  %v4581_v50 = vld [vmem:[%s4644_s16 + $0xa8] sm:$0xff] }
0x149c   : > { %7674 = vst [vmem:[#allocation251_spill] sm:$0xff] %v6297_v27 }
0x149e   : > { %v2785_v24 = vpop.permute.xlu1 %2784 }
0x149f   : > { %v2807_v53 = vmul.f32 %v4575_v4, %v2785_v24  ;;  %v2783_v28 = vpop.permute.xlu0 %2782  ;;  %v4578_v4 = vld [vmem:[%s4644_s16 + $0xa0] sm:$0xff] }
0x14a0   : > { %v2806_v31 = vmul.f32 %v4576_v19, %v2783_v28 }
0x14a1   : > { %v2815_v12 = vmul.f32 0.35355338, %v2807_v53 }
0x14a2   : > { %v2814_v26 = vmul.f32 0.35355338, %v2806_v31  ;;  %v2787_v45 = vpop.permute.xlu1 %2786 }
0x14a3   : > { %v2808_v22 = vmul.f32 %v4577_v47, %v2787_v45  ;;  %v2825_v59 = vsel %vm2451_vm3, %v2815_v12, -inf  ;;  %v2791_v11 = vpop.permute.xlu0 %2790 }
0x14a4   : > { %2826 = vmax.xlane.f32.xlu1 %v2825_v59  ;;  %v2822_v48 = vsel %vm2451_vm3, %v2814_v26, -inf  ;;  %v2810_v63 = vmul.f32 %v4578_v4, %v2791_v11 }
0x14a5   : > { %v2816_v0 = vmul.f32 0.35355338, %v2808_v22  ;;  %2823 = vmax.xlane.f32.xlu0 %v2822_v48 }
0x14a6   : > { %v2789_v24 = vpop.permute.xlu1 %2788  ;;  %v2818_v47 = vmul.f32 0.35355338, %v2810_v63 }
0x14a7   : > { %v2809_v28 = vmul.f32 %v4579_v52, %v2789_v24  ;;  %v2828_v53 = vsel %vm2451_vm3, %v2816_v0, -inf  ;;  %v2795_v19 = vpop.permute.xlu0 %2794  ;;  %v4582_v24 = vld [vmem:[%s4644_s16 + $0xb8] sm:$0xff] }
0x14a8   : > { %v2812_v59 = vmul.f32 %v4580_v58, %v2795_v19  ;;  %v2834_v52 = vsel %vm2451_vm3, %v2818_v47, -inf }
0x14a9   : > { %v2817_v31 = vmul.f32 0.35355338, %v2809_v28  ;;  %2829 = vmax.xlane.f32.xlu0 %v2828_v53 }
0x14aa   : > { %v2793_v45 = vpop.permute.xlu1 %2792  ;;  %v2820_v11 = vmul.f32 0.35355338, %v2812_v59 }
0x14ab   : > { %v2811_v27 = vmul.f32 %v4581_v50, %v2793_v45  ;;  %v2831_v22 = vsel %vm2451_vm3, %v2817_v31, -inf }
0x14ac   : > { %v2840_v63 = vsel %vm2451_vm3, %v2820_v11, -inf }
0x14ad   : > { %v2819_v48 = vmul.f32 0.35355338, %v2811_v27  ;;  %2832 = vmax.xlane.f32.xlu0 %v2831_v22 }
0x14ae   : > { %v2797_v56 = vpop.permute.xlu1 %2796 }
0x14af   : > { %v2813_v4 = vmul.f32 %v4582_v24, %v2797_v56  ;;  %v2837_v55 = vsel %vm2451_vm3, %v2819_v48, -inf }
0x14b0   : > { %2838 = vmax.xlane.f32.xlu1 %v2837_v55 }
0x14b1   : > { %v2821_v28 = vmul.f32 0.35355338, %v2813_v4  ;;  %2835 = vmax.xlane.f32.xlu0 %v2834_v52 }
0x14b3   : > { %v2843_v58 = vsel %vm2451_vm3, %v2821_v28, -inf }
0x14b4   : > { %2844 = vmax.xlane.f32.xlu1 %v2843_v58 }
0x14b5   : > { %2841 = vmax.xlane.f32.xlu0 %v2840_v63 }
0x152d   : > { %v2827_v50 = vpop.xlane.xlu1 %2826 }
0x152e   : > { %v2847_v27 = vsub.f32 %v2815_v12, %v2827_v50  ;;  %v2824_v53 = vpop.xlane.xlu0 %2823 }
0x152f   : > { %v2846_v19 = vsub.f32 %v2814_v26, %v2824_v53 }
0x1530   : > { %v2856_v45 = vmul.f32 1.442695, %v2847_v27 }
0x1531   : > { %v2854_v59 = vmul.f32 1.442695, %v2846_v19 }
0x1532   : > { %4207 = vpow2.f32 %v2856_v45  ;;  %v2830_v22 = vpop.xlane.xlu0 %2829 }
0x1533   : > { %4209 = vpow2.f32 %v2854_v59  ;;  %v2848_v56 = vsub.f32 %v2816_v0, %v2830_v22 }
0x1535   : > { %v2858_v24 = vmul.f32 1.442695, %v2848_v56 }
0x1536   : > { %v2833_v55 = vpop.xlane.xlu0 %2832 }
0x1537   : > { %4211 = vpow2.f32 %v2858_v24  ;;  %v2849_v52 = vsub.f32 %v2817_v31, %v2833_v55 }
0x1539   : > { %v2860_v4 = vmul.f32 1.442695, %v2849_v52  ;;  %v2839_v21 = vpop.xlane.xlu1 %2838 }
0x153a   : > { %v2851_v14 = vsub.f32 %v2819_v48, %v2839_v21  ;;  %v2836_v20 = vpop.xlane.xlu0 %2835 }
0x153b   : > { %4213 = vpow2.f32 %v2860_v4  ;;  %v2850_v63 = vsub.f32 %v2818_v47, %v2836_v20 }
0x153c   : > { %v2864_v58 = vmul.f32 1.442695, %v2851_v14 }
0x153d   : > { %v2862_v12 = vmul.f32 1.442695, %v2850_v63  ;;  %v2845_v50 = vpop.xlane.xlu1 %2844 }
0x153e   : > { %4215 = vpow2.f32 %v2864_v58  ;;  %v2853_v26 = vsub.f32 %v2821_v28, %v2845_v50  ;;  %v2842_v27 = vpop.xlane.xlu0 %2841 }
0x153f   : > { %v6315_v53 = vpop.eup %4207  ;;  %4217 = vpow2.f32 %v2862_v12  ;;  %v2852_v0 = vsub.f32 %v2820_v11, %v2842_v27 }
0x1540   : > { %7675 = vst [vmem:[#allocation252_spill] sm:$0xff] %v6315_v53  ;;  %v6317_v19 = vpop.eup %4209  ;;  %v2868_v45 = vmul.f32 1.442695, %v2853_v26  ;;  %2880 = vrot.lane.b32.xlu1 %v6315_v53, %s4602_s24  ;;  %v4586_v53 = vld [vmem:[%s4644_s16 + $0xe0] sm:$0xff] }
0x1541   : > { %7676 = vst [vmem:[#allocation253_spill] sm:$0xff] %v6317_v19  ;;  %v2866_v21 = vmul.f32 1.442695, %v2852_v0  ;;  %2878 = vrot.lane.b32.xlu0 %v6317_v19, %s4602_s24  ;;  %v4588_v19 = vld [vmem:[%s4644_s16 + $0xf0] sm:$0xff] }
0x1542   : > { %4219 = vpow2.f32 %v2868_v45 }
0x1543   : > { %4221 = vpow2.f32 %v2866_v21  ;;  %v3950_v21 = vld [vmem:[%s4649_s20 + $0x388] sm:$0xff] }
0x1544   : > { %v6323_v14 = vpop.eup %4211 }
0x1545   : > { %7677 = vst [vmem:[#allocation254_spill] sm:$0xff] %v6323_v14  ;;  %2882 = vrot.lane.b32.xlu1 %v6323_v14, %s4602_s24 }
0x1548   : > { %v6327_v20 = vpop.eup %4213 }
0x1549   : > { %7678 = vst [vmem:[#allocation255_spill] sm:$0xff] %v6327_v20  ;;  %2884 = vrot.lane.b32.xlu1 %v6327_v20, %s4602_s24 }
0x154b   : > { %v6331_v31 = vpop.eup %4215 }
0x154c   : > { %7679 = vst [vmem:[#allocation256_spill] sm:$0xff] %v6331_v31  ;;  %v6333_v47 = vpop.eup %4217 }
0x154d   : > { %7680 = vst [vmem:[#allocation257_spill] sm:$0xff] %v6333_v47  ;;  %2888 = vrot.lane.b32.xlu1 %v6331_v31, %s4602_s24  ;;  %2886 = vrot.lane.b32.xlu0 %v6333_v47, %s4602_s24 }
0x154f   : > { %v6339_v48 = vpop.eup %4219 }
0x1550   : > { %7681 = vst [vmem:[#allocation258_spill] sm:$0xff] %v6339_v48  ;;  %v6341_v11 = vpop.eup %4221 }
0x1551   : > { %7682 = vst [vmem:[#allocation259_spill] sm:$0xff] %v6341_v11  ;;  %2892 = vrot.lane.b32.xlu1 %v6339_v48, %s4602_s24  ;;  %2890 = vrot.lane.b32.xlu0 %v6341_v11, %s4602_s24  ;;  %v4585_v11 = vld [vmem:[%s4644_s16 + $0xd0] sm:$0xff] }
0x15b2   : > { %v2881_v28 = vpop.permute.xlu1 %2880 }
0x15b3   : > { %v2879_v59 = vpop.permute.xlu0 %2878  ;;  %v2905_v22 = vsel %vm205_vm0, %v2881_v28, 0.0  ;;  %v3951_v28 = vld [vmem:[%s4649_s20 + $0x390] sm:$0xff] }
0x15b4   : > { %2906 = vadd.xlane.f32.xlu1 %v2905_v22  ;;  %v2902_v56 = vsel %vm205_vm0, %v2879_v59, 0.0  ;;  %v3949_v59 = vld [vmem:[%s4649_s20 + $0x380] sm:$0xff]  ;;  %v3952_v22 = vld [vmem:[%s4649_s20 + $0x398] sm:$0xff] }
0x15b5   : > { %2903 = vadd.xlane.f32.xlu0 %v2902_v56  ;;  %v3953_v56 = vld [vmem:[%s4649_s20 + $0x3a0] sm:$0xff] }
0x15b7   : > { %v2883_v24 = vpop.permute.xlu1 %2882 }
0x15b8   : > { %v2908_v55 = vsel %vm205_vm0, %v2883_v24, 0.0  ;;  %v3954_v24 = vld [vmem:[%s4649_s20 + $0x3a8] sm:$0xff] }
0x15b9   : > { %2909 = vadd.xlane.f32.xlu0 %v2908_v55  ;;  %v3955_v55 = vld [vmem:[%s4649_s20 + $0x3b0] sm:$0xff] }
0x15bb   : > { %v2885_v52 = vpop.permute.xlu1 %2884 }
0x15bc   : > { %v2911_v4 = vsel %vm205_vm0, %v2885_v52, 0.0  ;;  %v3956_v52 = vld [vmem:[%s4649_s20 + $0x3b8] sm:$0xff] }
0x15bd   : > { %2912 = vadd.xlane.f32.xlu0 %v2911_v4 }
0x15bf   : > { %v2889_v63 = vpop.permute.xlu1 %2888  ;;  %v2887_v58 = vpop.permute.xlu0 %2886 }
0x15c0   : > { %v2917_v12 = vsel %vm205_vm0, %v2889_v63, 0.0  ;;  %v2914_v50 = vsel %vm205_vm0, %v2887_v58, 0.0 }
0x15c1   : > { %2918 = vadd.xlane.f32.xlu1 %v2917_v12  ;;  %2915 = vadd.xlane.f32.xlu0 %v2914_v50 }
0x15c3   : > { %v2893_v26 = vpop.permute.xlu1 %2892  ;;  %v2891_v27 = vpop.permute.xlu0 %2890 }
0x15c4   : > { %v2923_v0 = vsel %vm205_vm0, %v2893_v26, 0.0  ;;  %v2920_v45 = vsel %vm205_vm0, %v2891_v27, 0.0 }
0x15c5   : > { %2924 = vadd.xlane.f32.xlu1 %v2923_v0  ;;  %2921 = vadd.xlane.f32.xlu0 %v2920_v45 }
0x15d6   : > { %2969 = vrot.lane.b32.xlu1 %v3950_v21, %s4605_s27 }
0x15da   : > { %2971 = vrot.lane.b32.xlu1 %v3951_v28, %s4605_s27  ;;  %v4583_v28 = vld [vmem:[%s4644_s16 + $0xc8] sm:$0xff] }
0x15db   : > { %2967 = vrot.lane.b32.xlu0 %v3949_v59, %s4605_s27 }
0x15de   : > { %2973 = vrot.lane.b32.xlu1 %v3952_v22, %s4605_s27  ;;  %v4584_v22 = vld [vmem:[%s4644_s16 + $0xc0] sm:$0xff] }
0x15df   : > { %2975 = vrot.lane.b32.xlu0 %v3953_v56, %s4605_s27 }
0x15e2   : > { %2977 = vrot.lane.b32.xlu1 %v3954_v24, %s4605_s27 }
0x15e3   : > { %2979 = vrot.lane.b32.xlu0 %v3955_v55, %s4605_s27 }
0x15e6   : > { %2981 = vrot.lane.b32.xlu1 %v3956_v52, %s4605_s27 }
0x163d   : > { %v6375_v58 = vpop.xlane.xlu1 %2906 }
0x163e   : > { %v6371_v4 = vpop.xlane.xlu0 %2903  ;;  %7685 = vst [vmem:[#allocation262_spill] sm:$0xff] %v6375_v58 }
0x163f   : > { %7683 = vst [vmem:[#allocation260_spill] sm:$0xff] %v6371_v4 }
0x1642   : > { %v6373_v63 = vpop.xlane.xlu0 %2909 }
0x1643   : > { %7684 = vst [vmem:[#allocation261_spill] sm:$0xff] %v6373_v63 }
0x1646   : > { %v6377_v12 = vpop.xlane.xlu0 %2912 }
0x1647   : > { %7686 = vst [vmem:[#allocation263_spill] sm:$0xff] %v6377_v12 }
0x164a   : > { %v6379_v50 = vpop.xlane.xlu1 %2918  ;;  %v6381_v26 = vpop.xlane.xlu0 %2915 }
0x164b   : > { %7687 = vst [vmem:[#allocation264_spill] sm:$0xff] %v6379_v50  ;;  %7688 = vst [vmem:[#allocation265_spill] sm:$0xff] %v6381_v26  ;;  %v4589_v50 = vld [vmem:[%s4644_s16 + $0xe8] sm:$0xff] }
0x164e   : > { %v6383_v27 = vpop.xlane.xlu1 %2924  ;;  %v6385_v0 = vpop.xlane.xlu0 %2921 }
0x164f   : > { %7689 = vst [vmem:[#allocation266_spill] sm:$0xff] %v6383_v27  ;;  %7690 = vst [vmem:[#allocation267_spill] sm:$0xff] %v6385_v0 }
0x1652   : > { %v2970_v45 = vpop.permute.xlu1 %2969  ;;  %v2968_v21 = vpop.permute.xlu0 %2967 }
0x1653   : > { %v2992_v59 = vmul.f32 %v4583_v28, %v2970_v45  ;;  %v2991_v56 = vmul.f32 %v4584_v22, %v2968_v21  ;;  %v4587_v22 = vld [vmem:[%s4644_s16 + $0xd8] sm:$0xff] }
0x1655   : > { %v3000_v24 = vmul.f32 0.35355338, %v2992_v59  ;;  %v2999_v55 = vmul.f32 0.35355338, %v2991_v56 }
0x1656   : > { %v2972_v52 = vpop.permute.xlu1 %2971  ;;  %v2976_v48 = vpop.permute.xlu0 %2975 }
0x1657   : > { %v2993_v31 = vmul.f32 %v4585_v11, %v2972_v52  ;;  %v3010_v47 = vsel %vm2451_vm3, %v3000_v24, -inf  ;;  %v3007_v20 = vsel %vm2451_vm3, %v2999_v55, -inf  ;;  %v2995_v45 = vmul.f32 %v4586_v53, %v2976_v48 }
0x1658   : > { %3011 = vmax.xlane.f32.xlu1 %v3010_v47  ;;  %3008 = vmax.xlane.f32.xlu0 %v3007_v20 }
0x1659   : > { %v3001_v14 = vmul.f32 0.35355338, %v2993_v31  ;;  %v3003_v52 = vmul.f32 0.35355338, %v2995_v45 }
0x165a   : > { %v2974_v28 = vpop.permute.xlu1 %2973  ;;  %v2980_v21 = vpop.permute.xlu0 %2979 }
0x165b   : > { %v2994_v59 = vmul.f32 %v4587_v22, %v2974_v28  ;;  %v3013_v56 = vsel %vm2451_vm3, %v3001_v14, -inf  ;;  %v2997_v27 = vmul.f32 %v4588_v19, %v2980_v21  ;;  %v3019_v48 = vsel %vm2451_vm3, %v3003_v52, -inf  ;;  %v4590_v28 = vld [vmem:[%s4644_s16 + $0xf8] sm:$0xff] }
0x165c   : > { %3014 = vmax.xlane.f32.xlu0 %v3013_v56 }
0x165d   : > { %v3002_v11 = vmul.f32 0.35355338, %v2994_v59  ;;  %v3005_v53 = vmul.f32 0.35355338, %v2997_v27 }
0x165e   : > { %v2978_v0 = vpop.permute.xlu1 %2977 }
0x165f   : > { %v2996_v47 = vmul.f32 %v4589_v50, %v2978_v0  ;;  %v3016_v20 = vsel %vm2451_vm3, %v3002_v11, -inf  ;;  %v3025_v19 = vsel %vm2451_vm3, %v3005_v53, -inf }
0x1660   : > { %3017 = vmax.xlane.f32.xlu0 %v3016_v20 }
0x1661   : > { %v3004_v31 = vmul.f32 0.35355338, %v2996_v47 }
0x1662   : > { %v2982_v26 = vpop.permute.xlu1 %2981 }
0x1663   : > { %v2998_v22 = vmul.f32 %v4590_v28, %v2982_v26  ;;  %v3022_v12 = vsel %vm2451_vm3, %v3004_v31, -inf }
0x1664   : > { %3023 = vmax.xlane.f32.xlu1 %v3022_v12  ;;  %3020 = vmax.xlane.f32.xlu0 %v3019_v48 }
0x1665   : > { %v3006_v45 = vmul.f32 0.35355338, %v2998_v22 }
0x1667   : > { %v3028_v21 = vsel %vm2451_vm3, %v3006_v45, -inf }
0x1668   : > { %3029 = vmax.xlane.f32.xlu1 %v3028_v21  ;;  %3026 = vmax.xlane.f32.xlu0 %v3025_v19 }
0x16e1   : > { %v3012_v50 = vpop.xlane.xlu1 %3011  ;;  %v3009_v0 = vpop.xlane.xlu0 %3008 }
0x16e2   : > { %v3032_v59 = vsub.f32 %v3000_v24, %v3012_v50  ;;  %v3031_v27 = vsub.f32 %v2999_v55, %v3009_v0 }
0x16e4   : > { %v3041_v56 = vmul.f32 1.442695, %v3032_v59  ;;  %v3039_v47 = vmul.f32 1.442695, %v3031_v27 }
0x16e5   : > { %v3015_v20 = vpop.xlane.xlu0 %3014 }
0x16e6   : > { %4223 = vpow2.f32 %v3041_v56  ;;  %v3033_v26 = vsub.f32 %v3001_v14, %v3015_v20 }
0x16e7   : > { %4225 = vpow2.f32 %v3039_v47 }
0x16e8   : > { %v3043_v28 = vmul.f32 1.442695, %v3033_v26 }
0x16e9   : > { %v3018_v12 = vpop.xlane.xlu0 %3017 }
0x16ea   : > { %4227 = vpow2.f32 %v3043_v28  ;;  %v3034_v48 = vsub.f32 %v3002_v11, %v3018_v12 }
0x16ec   : > { %v3045_v22 = vmul.f32 1.442695, %v3034_v48 }
0x16ed   : > { %v3024_v63 = vpop.xlane.xlu1 %3023  ;;  %v3021_v58 = vpop.xlane.xlu0 %3020 }
0x16ee   : > { %4229 = vpow2.f32 %v3045_v22  ;;  %v3036_v21 = vsub.f32 %v3004_v31, %v3024_v63  ;;  %v3035_v19 = vsub.f32 %v3003_v52, %v3021_v58 }
0x16f0   : > { %v3049_v4 = vmul.f32 1.442695, %v3036_v21  ;;  %v3047_v15 = vmul.f32 1.442695, %v3035_v19 }
0x16f1   : > { %v3030_v24 = vpop.xlane.xlu1 %3029  ;;  %v3027_v55 = vpop.xlane.xlu0 %3026 }
0x16f2   : > { %4231 = vpow2.f32 %v3049_v4  ;;  %v3038_v50 = vsub.f32 %v3006_v45, %v3030_v24  ;;  %v3037_v0 = vsub.f32 %v3005_v53, %v3027_v55 }
0x16f3   : > { %v6403_v59 = vpop.eup %4223  ;;  %4233 = vpow2.f32 %v3047_v15 }
0x16f4   : > { %7691 = vst [vmem:[#allocation268_spill] sm:$0xff] %v6403_v59  ;;  %v6405_v14 = vpop.eup %4225  ;;  %v3053_v27 = vmul.f32 1.442695, %v3038_v50  ;;  %v3051_v11 = vmul.f32 1.442695, %v3037_v0  ;;  %3065 = vrot.lane.b32.xlu1 %v6403_v59, %s4602_s24 }
0x16f5   : > { %7692 = vst [vmem:[#allocation269_spill] sm:$0xff] %v6405_v14  ;;  %3063 = vrot.lane.b32.xlu0 %v6405_v14, %s4602_s24 }
0x16f6   : > { %4235 = vpow2.f32 %v3053_v27 }
0x16f7   : > { %v6411_v63 = vpop.eup %4227  ;;  %4237 = vpow2.f32 %v3051_v11 }
0x16f8   : > { %7693 = vst [vmem:[#allocation270_spill] sm:$0xff] %v6411_v63  ;;  %3067 = vrot.lane.b32.xlu1 %v6411_v63, %s4602_s24  ;;  %4239 = vrcp.f32 %v4955_v7 }
0x16f9   : > { %4241 = vrcp.f32 %v4953_v33 }
0x16fa   : > { %4243 = vrcp.f32 %v4949_v30 }
0x16fb   : > { %v6415_v4 = vpop.eup %4229  ;;  %4245 = vrcp.f32 %v4957_v8 }
0x16fc   : > { %7694 = vst [vmem:[#allocation271_spill] sm:$0xff] %v6415_v4  ;;  %3069 = vrot.lane.b32.xlu1 %v6415_v4, %s4602_s24  ;;  %4247 = vrcp.f32 %v4959_v16  ;;  %v7871_v4 = vld [vmem:[#allocation200_spill] sm:$0xff] }
0x16fd   : > { %4249 = vrcp.f32 %v4961_v39 }
0x16fe   : > { %4251 = vrcp.f32 %v4963_v41 }
0x16ff   : > { %v6419_v15 = vpop.eup %4231  ;;  %4253 = vrcp.f32 %v4965_v29 }
0x1700   : > { %7695 = vst [vmem:[#allocation272_spill] sm:$0xff] %v6419_v15  ;;  %v6421_v58 = vpop.eup %4233  ;;  %3073 = vrot.lane.b32.xlu1 %v6419_v15, %s4602_s24  ;;  %4255 = vrcp.f32 %v5069_v35 }
0x1701   : > { %7696 = vst [vmem:[#allocation273_spill] sm:$0xff] %v6421_v58  ;;  %3071 = vrot.lane.b32.xlu0 %v6421_v58, %s4602_s24  ;;  %4257 = vrcp.f32 %v5067_v51 }
0x1702   : > { %4259 = vrcp.f32 %v5073_v44 }
0x1703   : > { %v6427_v52 = vpop.eup %4235  ;;  %4261 = vrcp.f32 %v5071_v23 }
0x1704   : > { %7697 = vst [vmem:[#allocation274_spill] sm:$0xff] %v6427_v52  ;;  %v6429_v31 = vpop.eup %4237  ;;  %3077 = vrot.lane.b32.xlu1 %v6427_v52, %s4602_s24  ;;  %4263 = vrcp.f32 %v5077_v25  ;;  %v7700_v25 = vld [vmem:[#allocation28_spill] sm:$0xff] }
0x1705   : > { %7698 = vst [vmem:[#allocation275_spill] sm:$0xff] %v6429_v31  ;;  %3075 = vrot.lane.b32.xlu0 %v6429_v31, %s4602_s24  ;;  %v4240_v7 = vpop.eup %4239  ;;  %4265 = vrcp.f32 %v5075_v61  ;;  %v7699_v61 = vld [vmem:[#allocation51_spill] sm:$0xff] }
0x1706   : > { %v448_v33 = vmul.f32 %v4240_v7, %v4835_v13  ;;  %v4242_v27 = vpop.eup %4241  ;;  %4267 = vrcp.f32 %v5081_v6  ;;  %v7701_v6 = vld [vmem:[#allocation27_spill] sm:$0xff]  ;;  %v7711_v7 = vld [vmem:[#allocation30_spill] sm:$0xff] }
0x1707   : > { %v4244_v11 = vpop.eup %4243  ;;  %v449_v8 = vmul.f32 %v4242_v27, %v4831_v34  ;;  %4269 = vrcp.f32 %v5079_v46  ;;  %v7712_v27 = vld [vmem:[#allocation55_spill] sm:$0xff] }
0x1708   : > { %v488_v30 = vmul.f32 %v4919_v36, %v448_v33  ;;  %v4246_v16 = vpop.eup %4245  ;;  %v447_v39 = vmul.f32 %v4244_v11, %v4827_v32  ;;  %4271 = vrcp.f32 %v7699_v61 }
0x1709   : > { %v4248_v41 = vpop.eup %4247  ;;  %v489_v13 = vmul.f32 %v4921_v37, %v449_v8  ;;  %v450_v29 = vmul.f32 %v4246_v16, %v4843_v17  ;;  %v7714_v16 = vld [vmem:[#allocation56_spill] sm:$0xff] }
0x170a   : > { %v487_v34 = vmul.f32 %v4923_v49, %v447_v39  ;;  %v451_v36 = vmul.f32 %v4248_v41, %v4850_v18  ;;  %v7715_v39 = vld [vmem:[#allocation38_spill] sm:$0xff] }
0x170b   : > { %v490_v32 = vmul.f32 %v4925_v54, %v450_v29 }
0x170c   : > { %v491_v17 = vmul.f32 %v4927_v57, %v451_v36  ;;  %v7718_v36 = vld [vmem:[#allocation57_spill] sm:$0xff] }
0x1766   : > { %v3066_v53 = vpop.permute.xlu1 %3065 }
0x1767   : > { %v3064_v45 = vpop.permute.xlu0 %3063  ;;  %v3090_v56 = vsel %vm205_vm0, %v3066_v53, 0.0  ;;  %v4250_v53 = vpop.eup %4249 }
0x1768   : > { %3091 = vadd.xlane.f32.xlu1 %v3090_v56  ;;  %v3087_v47 = vsel %vm205_vm0, %v3064_v45, 0.0  ;;  %v4252_v51 = vpop.eup %4251  ;;  %v452_v37 = vmul.f32 %v4250_v53, %v4856_v43  ;;  %v7702_v45 = vld [vmem:[#allocation53_spill] sm:$0xff]  ;;  %v7717_v53 = vld [vmem:[#allocation31_spill] sm:$0xff] }
0x1769   : > { %3088 = vadd.xlane.f32.xlu0 %v3087_v47  ;;  %v4254_v35 = vpop.eup %4253  ;;  %v453_v49 = vmul.f32 %v4252_v51, %v4872_v3  ;;  %4273 = vrcp.f32 %v7702_v45  ;;  %v7726_v45 = vld [vmem:[#allocation75_spill] sm:$0xff] }
0x176a   : > { %v3068_v20 = vpop.permute.xlu1 %3067  ;;  %v4256_v23 = vpop.eup %4255  ;;  %v492_v18 = vmul.f32 %v4929_v5, %v452_v37  ;;  %v454_v54 = vmul.f32 %v4254_v35, %v4878_v9  ;;  %v7703_v5 = vld [vmem:[#allocation18_spill] sm:$0xff]  ;;  %v7719_v37 = vld [vmem:[#allocation41_spill] sm:$0xff] }
0x176b   : > { %v3093_v26 = vsel %vm205_vm0, %v3068_v20, 0.0  ;;  %v4258_v44 = vpop.eup %4257  ;;  %v493_v43 = vmul.f32 %v4931_v10, %v453_v49  ;;  %v608_v3 = vmul.f32 %v4256_v23, %v7701_v6  ;;  %v7704_v20 = vld [vmem:[#allocation36_spill] sm:$0xff]  ;;  %v7705_v10 = vld [vmem:[#allocation35_spill] sm:$0xff]  ;;  %v7725_v6 = vld [vmem:[#allocation45_spill] sm:$0xff] }
0x176c   : > { %v609_v57 = vmul.f32 %v4258_v44, %v7700_v25  ;;  %v494_v56 = vmul.f32 %v7703_v5, %v454_v54  ;;  %v4260_v9 = vpop.eup %4259  ;;  %v7720_v49 = vld [vmem:[#allocation40_spill] sm:$0xff]  ;;  %v7722_v44 = vld [vmem:[#allocation58_spill] sm:$0xff]  ;;  %v7724_v25 = vld [vmem:[#allocation43_spill] sm:$0xff] }
0x176d   : > { %3094 = vadd.xlane.f32.xlu0 %v3093_v26  ;;  %v4262_v47 = vpop.eup %4261  ;;  %v648_v46 = vmul.f32 %v7704_v20, %v608_v3  ;;  %v7728_v20 = vld [vmem:[#allocation77_spill] sm:$0xff] }
0x176e   : > { %v3070_v28 = vpop.permute.xlu1 %3069  ;;  %v4264_v26 = vpop.eup %4263  ;;  %v611_v33 = vmul.f32 %v4262_v47, %v7711_v7 }
0x176f   : > { %v3096_v12 = vsel %vm205_vm0, %v3070_v28, 0.0  ;;  %v649_v28 = vmul.f32 %v7705_v10, %v609_v57 }
0x1771   : > { %3097 = vadd.xlane.f32.xlu0 %v3096_v12  ;;  %v7706_v12 = vld [vmem:[#allocation29_spill] sm:$0xff] }
0x1772   : > { %v3074_v48 = vpop.permute.xlu1 %3073 }
0x1773   : > { %v3072_v22 = vpop.permute.xlu0 %3071  ;;  %v3102_v21 = vsel %vm205_vm0, %v3074_v48, 0.0  ;;  %v610_v48 = vmul.f32 %v4260_v9, %v7706_v12  ;;  %v7727_v9 = vld [vmem:[#allocation59_spill] sm:$0xff] }
0x1774   : > { %3103 = vadd.xlane.f32.xlu1 %v3102_v21  ;;  %v3099_v19 = vsel %vm205_vm0, %v3072_v22, 0.0  ;;  %v7707_v22 = vld [vmem:[#allocation52_spill] sm:$0xff]  ;;  %v7708_v21 = vld [vmem:[#allocation54_spill] sm:$0xff] }
0x1775   : > { %3100 = vadd.xlane.f32.xlu0 %v3099_v19  ;;  %4275 = vrcp.f32 %v7707_v22  ;;  %v4266_v19 = vpop.eup %4265  ;;  %v7732_v22 = vld [vmem:[#allocation78_spill] sm:$0xff] }
0x1776   : > { %v3078_v24 = vpop.permute.xlu1 %3077  ;;  %4277 = vrcp.f32 %v7708_v21  ;;  %v4268_v11 = vpop.eup %4267 }
0x1777   : > { %v3076_v55 = vpop.permute.xlu0 %3075  ;;  %v3108_v50 = vsel %vm205_vm0, %v3078_v24, 0.0  ;;  %v7709_v24 = vld [vmem:[#allocation37_spill] sm:$0xff]  ;;  %4279 = vrcp.f32 %v7712_v27  ;;  %v4270_v51 = vpop.eup %4269 }
0x1778   : > { %3109 = vadd.xlane.f32.xlu1 %v3108_v50  ;;  %v3105_v0 = vsel %vm205_vm0, %v3076_v55, 0.0  ;;  %v650_v55 = vmul.f32 %v7709_v24, %v610_v48  ;;  %v7710_v50 = vld [vmem:[#allocation32_spill] sm:$0xff]  ;;  %4281 = vrcp.f32 %v7714_v16  ;;  %v7739_v16 = vld [vmem:[#allocation61_spill] sm:$0xff] }
0x1779   : > { %3106 = vadd.xlane.f32.xlu0 %v3105_v0  ;;  %v612_v0 = vmul.f32 %v4264_v26, %v7710_v50  ;;  %4283 = vrcp.f32 %v7718_v36  ;;  %v7729_v26 = vld [vmem:[#allocation60_spill] sm:$0xff] }
0x177a   : > { %4285 = vrcp.f32 %v7722_v44  ;;  %v7731_v48 = vld [vmem:[#allocation76_spill] sm:$0xff]  ;;  %v7747_v44 = vld [vmem:[#allocation66_spill] sm:$0xff] }
0x177b   : > { %v652_v41 = vmul.f32 %v7715_v39, %v612_v0  ;;  %4287 = vrcp.f32 %v7726_v45  ;;  %v7735_v0 = vld [vmem:[#allocation46_spill] sm:$0xff]  ;;  %v7750_v45 = vld [vmem:[#allocation68_spill] sm:$0xff] }
0x177c   : > { %4289 = vrcp.f32 %v7728_v20 }
0x177d   : > { %4291 = vrcp.f32 %v7731_v48  ;;  %v7756_v48 = vld [vmem:[#allocation102_spill] sm:$0xff] }
0x177e   : > { %4293 = vrcp.f32 %v7732_v22 }
0x1789   : > { %3145 = vrot.lane.b32.xlu1 %v488_v30, %s4600_s22  ;;  %v7713_v30 = vld [vmem:[#allocation39_spill] sm:$0xff] }
0x178a   : > { %v651_v8 = vmul.f32 %v7713_v30, %v611_v33  ;;  %v7736_v33 = vld [vmem:[#allocation80_spill] sm:$0xff] }
0x178b   : > { %4295 = vrcp.f32 %v7736_v33 }
0x178d   : > { %3147 = vrot.lane.b32.xlu1 %v489_v13, %s4600_s22  ;;  %v7716_v13 = vld [vmem:[#allocation34_spill] sm:$0xff] }
0x178e   : > { %v614_v29 = vmul.f32 %v4268_v11, %v7716_v13  ;;  %v7737_v11 = vld [vmem:[#allocation64_spill] sm:$0xff] }
0x178f   : > { %3143 = vrot.lane.b32.xlu0 %v487_v34, %s4600_s22  ;;  %v613_v34 = vmul.f32 %v4266_v19, %v7717_v53  ;;  %v7733_v19 = vld [vmem:[#allocation47_spill] sm:$0xff] }
0x1790   : > { %v654_v23 = vmul.f32 %v7720_v49, %v614_v29  ;;  %v7741_v29 = vld [vmem:[#allocation48_spill] sm:$0xff]  ;;  %v7745_v49 = vld [vmem:[#allocation50_spill] sm:$0xff] }
0x1791   : > { %3149 = vrot.lane.b32.xlu1 %v490_v32, %s4600_s22  ;;  %v4272_v32 = vpop.eup %4271  ;;  %v653_v35 = vmul.f32 %v7719_v37, %v613_v34  ;;  %v7742_v34 = vld [vmem:[#allocation82_spill] sm:$0xff] }
0x1792   : > { %v769_v57 = vmul.f32 %v4272_v32, %v7724_v25 }
0x1793   : > { %3151 = vrot.lane.b32.xlu0 %v491_v17, %s4600_s22  ;;  %v4274_v17 = vpop.eup %4273 }
0x1794   : > { %v770_v3 = vmul.f32 %v4274_v17, %v7725_v6  ;;  %v4276_v5 = vpop.eup %4275  ;;  %v809_v47 = vmul.f32 %v7727_v9, %v769_v57  ;;  %v7749_v57 = vld [vmem:[#allocation99_spill] sm:$0xff] }
0x1795   : > { %3153 = vrot.lane.b32.xlu1 %v492_v18, %s4600_s22  ;;  %v7721_v18 = vld [vmem:[#allocation33_spill] sm:$0xff] }
0x1796   : > { %v615_v54 = vmul.f32 %v4270_v51, %v7721_v18  ;;  %v810_v10 = vmul.f32 %v7729_v26, %v770_v3  ;;  %v7743_v51 = vld [vmem:[#allocation65_spill] sm:$0xff] }
0x1797   : > { %3155 = vrot.lane.b32.xlu0 %v493_v43, %s4600_s22  ;;  %v7723_v43 = vld [vmem:[#allocation42_spill] sm:$0xff]  ;;  %v7746_v18 = vld [vmem:[#allocation81_spill] sm:$0xff] }
0x1798   : > { %v655_v61 = vmul.f32 %v7723_v43, %v615_v54 }
0x1799   : > { %3157 = vrot.lane.b32.xlu1 %v494_v56, %s4600_s22  ;;  %v4278_v56 = vpop.eup %4277 }
0x179a   : > { %v772_v7 = vmul.f32 %v4278_v56, %v7735_v0  ;;  %v7751_v56 = vld [vmem:[#allocation84_spill] sm:$0xff] }
0x179b   : > { %3175 = vrot.lane.b32.xlu0 %v648_v46, %s4603_s25  ;;  %v4280_v46 = vpop.eup %4279 }
0x179c   : > { %v4282_v21 = vpop.eup %4281  ;;  %v773_v24 = vmul.f32 %v4280_v46, %v7733_v19  ;;  %v812_v30 = vmul.f32 %v7737_v11, %v772_v7  ;;  %v7753_v46 = vld [vmem:[#allocation83_spill] sm:$0xff]  ;;  %v7760_v7 = vld [vmem:[#allocation104_spill] sm:$0xff] }
0x179d   : > { %3177 = vrot.lane.b32.xlu1 %v649_v28, %s4603_s25  ;;  %v7730_v28 = vld [vmem:[#allocation44_spill] sm:$0xff]  ;;  %v4284_v27 = vpop.eup %4283  ;;  %v774_v53 = vmul.f32 %v4282_v21, %v7741_v29  ;;  %v7757_v21 = vld [vmem:[#allocation85_spill] sm:$0xff] }
0x179e   : > { %v771_v12 = vmul.f32 %v4276_v5, %v7730_v28  ;;  %v813_v39 = vmul.f32 %v7739_v16, %v773_v24  ;;  %v4286_v36 = vpop.eup %4285  ;;  %v7758_v24 = vld [vmem:[#allocation71_spill] sm:$0xff] }
0x179f   : > { %3179 = vrot.lane.b32.xlu0 %v650_v55, %s4603_s25  ;;  %v7734_v55 = vld [vmem:[#allocation62_spill] sm:$0xff]  ;;  %v814_v32 = vmul.f32 %v7743_v51, %v774_v53  ;;  %v4288_v37 = vpop.eup %4287 }
0x17a0   : > { %v811_v50 = vmul.f32 %v7734_v55, %v771_v12  ;;  %v4290_v54 = vpop.eup %4289  ;;  %v7755_v12 = vld [vmem:[#allocation100_spill] sm:$0xff]  ;;  %v7766_v53 = vld [vmem:[#allocation106_spill] sm:$0xff] }
0x17a1   : > { %3181 = vrot.lane.b32.xlu1 %v651_v8, %s4603_s25  ;;  %v7738_v8 = vld [vmem:[#allocation79_spill] sm:$0xff]  ;;  %v4292_v6 = vpop.eup %4291  ;;  %v987_v5 = vmul.f32 %v4290_v54, %v7750_v45  ;;  %v7771_v54 = vld [vmem:[#allocation90_spill] sm:$0xff] }
0x17a2   : > { %4297 = vrcp.f32 %v7738_v8  ;;  %v4294_v3 = vpop.eup %4293  ;;  %v7763_v8 = vld [vmem:[#allocation86_spill] sm:$0xff] }
0x17a3   : > { %3183 = vrot.lane.b32.xlu0 %v652_v41, %s4603_s25  ;;  %v7740_v41 = vld [vmem:[#allocation49_spill] sm:$0xff]  ;;  %4299 = vrcp.f32 %v7742_v34  ;;  %v4296_v20 = vpop.eup %4295  ;;  %v1019_v26 = vmul.f32 %v7753_v46, %v987_v5  ;;  %v7775_v5 = vld [vmem:[#allocation108_spill] sm:$0xff] }
0x17a4   : > { %v775_v13 = vmul.f32 %v4284_v27, %v7740_v41  ;;  %4301 = vrcp.f32 %v7746_v18  ;;  %v990_v55 = vmul.f32 %v4296_v20, %v7758_v24  ;;  %v7761_v27 = vld [vmem:[#allocation87_spill] sm:$0xff]  ;;  %v7781_v24 = vld [vmem:[#allocation109_spill] sm:$0xff] }
0x17a5   : > { %3185 = vrot.lane.b32.xlu1 %v653_v35, %s4603_s25  ;;  %v7744_v35 = vld [vmem:[#allocation63_spill] sm:$0xff]  ;;  %4303 = vrcp.f32 %v7749_v57 }
0x17a6   : > { %v815_v17 = vmul.f32 %v7744_v35, %v775_v13  ;;  %v1022_v16 = vmul.f32 %v7763_v8, %v990_v55  ;;  %v7765_v13 = vld [vmem:[#allocation72_spill] sm:$0xff] }
0x17a7   : > { %3187 = vrot.lane.b32.xlu0 %v654_v23, %s4603_s25  ;;  %v776_v23 = vmul.f32 %v4286_v36, %v7745_v49  ;;  %v7767_v36 = vld [vmem:[#allocation89_spill] sm:$0xff] }
0x17a9   : > { %3189 = vrot.lane.b32.xlu1 %v655_v61, %s4603_s25  ;;  %v816_v43 = vmul.f32 %v7747_v44, %v776_v23  ;;  %v7748_v61 = vld [vmem:[#allocation67_spill] sm:$0xff]  ;;  %v7770_v23 = vld [vmem:[#allocation105_spill] sm:$0xff] }
0x17aa   : > { %v986_v25 = vmul.f32 %v4288_v37, %v7748_v61  ;;  %v7768_v37 = vld [vmem:[#allocation88_spill] sm:$0xff] }
0x17ab   : > { %3207 = vrot.lane.b32.xlu0 %v809_v47, %s4605_s27  ;;  %v7752_v47 = vld [vmem:[#allocation101_spill] sm:$0xff] }
0x17ac   : > { %v1018_v9 = vmul.f32 %v7751_v56, %v986_v25  ;;  %4305 = vrcp.f32 %v7752_v47  ;;  %v7773_v25 = vld [vmem:[#allocation123_spill] sm:$0xff]  ;;  %v7776_v47 = vld [vmem:[#allocation125_spill] sm:$0xff] }
0x17ad   : > { %3209 = vrot.lane.b32.xlu1 %v810_v10, %s4605_s27  ;;  %v7754_v10 = vld [vmem:[#allocation69_spill] sm:$0xff]  ;;  %4307 = vrcp.f32 %v7755_v12 }
0x17ae   : > { %v988_v28 = vmul.f32 %v4292_v6, %v7754_v10  ;;  %4309 = vrcp.f32 %v7756_v48  ;;  %v7779_v48 = vld [vmem:[#allocation124_spill] sm:$0xff] }
0x17af   : > { %3211 = vrot.lane.b32.xlu0 %v811_v50, %s4605_s27  ;;  %v4298_v22 = vpop.eup %4297  ;;  %v7759_v50 = vld [vmem:[#allocation70_spill] sm:$0xff]  ;;  %4311 = vrcp.f32 %v7760_v7 }
0x17b0   : > { %v1020_v19 = vmul.f32 %v7757_v21, %v988_v28  ;;  %v989_v0 = vmul.f32 %v4294_v3, %v7759_v50  ;;  %v4300_v33 = vpop.eup %4299  ;;  %v991_v29 = vmul.f32 %v4298_v22, %v7765_v13  ;;  %v7774_v3 = vld [vmem:[#allocation92_spill] sm:$0xff]  ;;  %v7778_v28 = vld [vmem:[#allocation93_spill] sm:$0xff]  ;;  %v7780_v22 = vld [vmem:[#allocation126_spill] sm:$0xff] }
0x17b1   : > { %3213 = vrot.lane.b32.xlu1 %v812_v30, %s4605_s27  ;;  %v7762_v30 = vld [vmem:[#allocation103_spill] sm:$0xff]  ;;  %v4302_v34 = vpop.eup %4301  ;;  %v7783_v7 = vld [vmem:[#allocation94_spill] sm:$0xff] }
0x17b2   : > { %v1021_v11 = vmul.f32 %v7761_v27, %v989_v0  ;;  %4313 = vrcp.f32 %v7762_v30  ;;  %v1023_v51 = vmul.f32 %v7767_v36, %v991_v29  ;;  %v7782_v50 = vld [vmem:[#allocation95_spill] sm:$0xff]  ;;  %v7787_v13 = vld [vmem:[#allocation110_spill] sm:$0xff] }
0x17b3   : > { %3215 = vrot.lane.b32.xlu0 %v813_v39, %s4605_s27  ;;  %v7764_v39 = vld [vmem:[#allocation73_spill] sm:$0xff]  ;;  %4315 = vrcp.f32 %v7766_v53 }
0x17b4   : > { %v992_v41 = vmul.f32 %v4300_v33, %v7764_v39  ;;  %4317 = vrcp.f32 %v7770_v23  ;;  %v7788_v53 = vld [vmem:[#allocation97_spill] sm:$0xff] }
0x17b5   : > { %3217 = vrot.lane.b32.xlu1 %v814_v32, %s4605_s27  ;;  %v4304_v32 = vpop.eup %4303  ;;  %4319 = vrcp.f32 %v7773_v25 }
0x17b6   : > { %v1024_v35 = vmul.f32 %v7768_v37, %v992_v41  ;;  %4321 = vrcp.f32 %v7776_v47  ;;  %v7786_v41 = vld [vmem:[#allocation127_spill] sm:$0xff] }
0x17b7   : > { %3219 = vrot.lane.b32.xlu0 %v815_v17, %s4605_s27  ;;  %v7769_v17 = vld [vmem:[#allocation74_spill] sm:$0xff]  ;;  %4323 = vrcp.f32 %v7779_v48  ;;  %v7798_v48 = vld [vmem:[#allocation132_spill] sm:$0xff] }
0x17b8   : > { %v993_v49 = vmul.f32 %v4302_v34, %v7769_v17  ;;  %4325 = vrcp.f32 %v7780_v22 }
0x17b9   : > { %3221 = vrot.lane.b32.xlu1 %v816_v43, %s4605_s27  ;;  %v4306_v18 = vpop.eup %4305  ;;  %v7772_v43 = vld [vmem:[#allocation91_spill] sm:$0xff] }
0x17ba   : > { %v1025_v44 = vmul.f32 %v7771_v54, %v993_v49  ;;  %v1195_v61 = vmul.f32 %v4304_v32, %v7772_v43  ;;  %v4308_v57 = vpop.eup %4307  ;;  %v1196_v45 = vmul.f32 %v4306_v18, %v7774_v3  ;;  %v7791_v49 = vld [vmem:[#allocation113_spill] sm:$0xff]  ;;  %v7795_v3 = vld [vmem:[#allocation114_spill] sm:$0xff] }
0x17bb   : > { %3239 = vrot.lane.b32.xlu0 %v1018_v9, %s4605_s27  ;;  %v4310_v6 = vpop.eup %4309  ;;  %v1197_v12 = vmul.f32 %v4308_v57, %v7778_v28  ;;  %v7794_v57 = vld [vmem:[#allocation129_spill] sm:$0xff]  ;;  %v7797_v28 = vld [vmem:[#allocation116_spill] sm:$0xff] }
0x17bc   : > { %v1227_v9 = vmul.f32 %v7775_v5, %v1195_v61  ;;  %v4312_v20 = vpop.eup %4311  ;;  %v1198_v33 = vmul.f32 %v4310_v6, %v7783_v7  ;;  %v7793_v61 = vld [vmem:[#allocation98_spill] sm:$0xff] }
0x17bd   : > { %3241 = vrot.lane.b32.xlu1 %v1019_v26, %s4605_s27  ;;  %v7777_v26 = vld [vmem:[#allocation107_spill] sm:$0xff]  ;;  %v1229_v55 = vmul.f32 %v7781_v24, %v1197_v12  ;;  %v1199_v0 = vmul.f32 %v4312_v20, %v7782_v50 }
0x17be   : > { %v1228_v10 = vmul.f32 %v7777_v26, %v1196_v45 }
0x17bf   : > { %3243 = vrot.lane.b32.xlu0 %v1020_v19, %s4605_s27  ;;  %v4314_v19 = vpop.eup %4313  ;;  %v1231_v29 = vmul.f32 %v7787_v13, %v1199_v0  ;;  %v7800_v0 = vld [vmem:[#allocation117_spill] sm:$0xff] }
0x17c0   : > { %v4316_v30 = vpop.eup %4315 }
0x17c1   : > { %3245 = vrot.lane.b32.xlu1 %v1021_v11, %s4605_s27  ;;  %v7784_v11 = vld [vmem:[#allocation128_spill] sm:$0xff]  ;;  %v1201_v34 = vmul.f32 %v4316_v30, %v7788_v53  ;;  %v4318_v17 = vpop.eup %4317  ;;  %v7802_v30 = vld [vmem:[#allocation119_spill] sm:$0xff] }
0x17c2   : > { %4327 = vrcp.f32 %v7784_v11  ;;  %v4320_v18 = vpop.eup %4319  ;;  %v1202_v25 = vmul.f32 %v4318_v17, %v7793_v61  ;;  %v7804_v53 = vld [vmem:[#allocation135_spill] sm:$0xff] }
0x17c3   : > { %3247 = vrot.lane.b32.xlu0 %v1022_v16, %s4605_s27  ;;  %v7785_v16 = vld [vmem:[#allocation111_spill] sm:$0xff]  ;;  %4329 = vrcp.f32 %v7786_v41  ;;  %v4322_v6 = vpop.eup %4321 }
0x17c4   : > { %v1230_v39 = vmul.f32 %v7785_v16, %v1198_v33  ;;  %v1234_v45 = vmul.f32 %v7795_v3, %v1202_v25  ;;  %v4324_v20 = vpop.eup %4323  ;;  %v1405_v12 = vmul.f32 %v4322_v6, %v7797_v28  ;;  %v7801_v33 = vld [vmem:[#allocation133_spill] sm:$0xff]  ;;  %v7809_v61 = vld [vmem:[#allocation147_spill] sm:$0xff]  ;;  %v7810_v25 = vld [vmem:[#allocation136_spill] sm:$0xff] }
0x17c5   : > { %3249 = vrot.lane.b32.xlu1 %v1023_v51, %s4605_s27  ;;  %v7789_v51 = vld [vmem:[#allocation96_spill] sm:$0xff]  ;;  %v1406_v7 = vmul.f32 %v4324_v20, %v7800_v0  ;;  %v7814_v20 = vld [vmem:[#allocation139_spill] sm:$0xff]  ;;  %v7815_v28 = vld [vmem:[#allocation166_spill] sm:$0xff] }
0x17c6   : > { %v1200_v32 = vmul.f32 %v4314_v19, %v7789_v51  ;;  %v7806_v51 = vld [vmem:[#allocation121_spill] sm:$0xff] }
0x17c7   : > { %3251 = vrot.lane.b32.xlu0 %v1024_v35, %s4605_s27  ;;  %v7790_v35 = vld [vmem:[#allocation130_spill] sm:$0xff]  ;;  %v1438_v11 = vmul.f32 %v7801_v33, %v1406_v7  ;;  %v7817_v0 = vld [vmem:[#allocation149_spill] sm:$0xff] }
0x17c8   : > { %4331 = vrcp.f32 %v7790_v35  ;;  %v1232_v23 = vmul.f32 %v7791_v49, %v1200_v32  ;;  %v7807_v35 = vld [vmem:[#allocation120_spill] sm:$0xff] }
0x17c9   : > { %3253 = vrot.lane.b32.xlu1 %v1025_v44, %s4605_s27  ;;  %v7792_v44 = vld [vmem:[#allocation112_spill] sm:$0xff]  ;;  %4333 = vrcp.f32 %v7794_v57  ;;  %v7811_v57 = vld [vmem:[#allocation122_spill] sm:$0xff] }
0x17ca   : > { %v1233_v43 = vmul.f32 %v7792_v44, %v1201_v34  ;;  %4335 = vrcp.f32 %v5739_v42 }
0x17cb   : > { %3271 = vrot.lane.b32.xlu0 %v1227_v9, %s4606_s28  ;;  %v7796_v9 = vld [vmem:[#allocation115_spill] sm:$0xff]  ;;  %4337 = vrcp.f32 %v5743_v62  ;;  %v7803_v62 = vld [vmem:[#allocation118_spill] sm:$0xff] }
0x17cc   : > { %v1404_v47 = vmul.f32 %v4320_v18, %v7796_v9  ;;  %4339 = vrcp.f32 %v5741_v2  ;;  %v7805_v2 = vld [vmem:[#allocation134_spill] sm:$0xff] }
0x17cd   : > { %3273 = vrot.lane.b32.xlu1 %v1228_v10, %s4606_s28  ;;  %v4326_v10 = vpop.eup %4325  ;;  %4341 = vrcp.f32 %v5745_v60 }
0x17ce   : > { %v1436_v22 = vmul.f32 %v7798_v48, %v1404_v47  ;;  %v1407_v41 = vmul.f32 %v4326_v10, %v7803_v62  ;;  %4343 = vrcp.f32 %v5749_v38  ;;  %v7820_v62 = vld [vmem:[#allocation141_spill] sm:$0xff] }
0x17cf   : > { %3275 = vrot.lane.b32.xlu0 %v1229_v55, %s4606_s28  ;;  %v4328_v19 = vpop.eup %4327  ;;  %v7799_v55 = vld [vmem:[#allocation131_spill] sm:$0xff]  ;;  %4345 = vrcp.f32 %v5747_v40 }
0x17d0   : > { %v1437_v50 = vmul.f32 %v7799_v55, %v1405_v12  ;;  %v4330_v42 = vpop.eup %4329  ;;  %v1439_v34 = vmul.f32 %v7804_v53, %v1407_v41  ;;  %4347 = vrcp.f32 %v5753_v1  ;;  %v7813_v1 = vld [vmem:[#allocation138_spill] sm:$0xff] }
0x17d1   : > { %3277 = vrot.lane.b32.xlu1 %v1230_v39, %s4606_s28  ;;  %v1408_v39 = vmul.f32 %v4328_v19, %v7802_v30  ;;  %v1409_v17 = vmul.f32 %v4330_v42, %v7807_v35  ;;  %4349 = vrcp.f32 %v7809_v61  ;;  %v7816_v19 = vld [vmem:[#allocation140_spill] sm:$0xff]  ;;  %v7818_v42 = vld [vmem:[#allocation165_spill] sm:$0xff] }
0x17d2   : > { %v7819_v30 = vld [vmem:[#allocation148_spill] sm:$0xff] }
0x17d3   : > { %3279 = vrot.lane.b32.xlu0 %v1231_v29, %s4606_s28  ;;  %v1440_v60 = vmul.f32 %v7805_v2, %v1408_v39  ;;  %v7826_v61 = vld [vmem:[#allocation152_spill] sm:$0xff] }
0x17d5   : > { %3281 = vrot.lane.b32.xlu1 %v1232_v23, %s4606_s28  ;;  %v4332_v29 = vpop.eup %4331  ;;  %v7808_v23 = vld [vmem:[#allocation137_spill] sm:$0xff] }
0x17d6   : > { %v1410_v32 = vmul.f32 %v4332_v29, %v7806_v51  ;;  %v4334_v38 = vpop.eup %4333  ;;  %v1441_v18 = vmul.f32 %v7808_v23, %v1409_v17  ;;  %v7821_v29 = vld [vmem:[#allocation167_spill] sm:$0xff]  ;;  %v7824_v17 = vld [vmem:[#allocation142_spill] sm:$0xff] }
0x17d7   : > { %3283 = vrot.lane.b32.xlu0 %v1233_v43, %s4606_s28  ;;  %v4336_v43 = vpop.eup %4335  ;;  %v1411_v6 = vmul.f32 %v4334_v38, %v7811_v57  ;;  %v7827_v57 = vld [vmem:[#allocation168_spill] sm:$0xff] }
0x17d8   : > { %v1442_v40 = vmul.f32 %v7810_v25, %v1410_v32  ;;  %v4338_v9 = vpop.eup %4337  ;;  %v1613_v10 = vmul.f32 %v4336_v43, %v7814_v20  ;;  %v7823_v32 = vld [vmem:[#allocation143_spill] sm:$0xff] }
0x17d9   : > { %3285 = vrot.lane.b32.xlu1 %v1234_v45, %s4606_s28  ;;  %v7812_v45 = vld [vmem:[#allocation164_spill] sm:$0xff]  ;;  %v1443_v47 = vmul.f32 %v7813_v1, %v1411_v6  ;;  %v4340_v12 = vpop.eup %4339 }
0x17da   : > { %4351 = vrcp.f32 %v7812_v45  ;;  %v1645_v7 = vmul.f32 %v7817_v0, %v1613_v10  ;;  %v1615_v41 = vmul.f32 %v4340_v12, %v7820_v62  ;;  %v7828_v45 = vld [vmem:[#allocation151_spill] sm:$0xff]  ;;  %v7830_v10 = vld [vmem:[#allocation144_spill] sm:$0xff] }
0x17db   : > { %3303 = vrot.lane.b32.xlu0 %v1436_v22, %s4607_s29  ;;  %4353 = vrcp.f32 %v7815_v28  ;;  %v4342_v22 = vpop.eup %4341  ;;  %v7831_v12 = vld [vmem:[#allocation171_spill] sm:$0xff] }
0x17dc   : > { %4355 = vrcp.f32 %v7818_v42  ;;  %v1616_v38 = vmul.f32 %v4342_v22, %v7824_v17  ;;  %v7834_v42 = vld [vmem:[#allocation170_spill] sm:$0xff] }
0x17dd   : > { %3305 = vrot.lane.b32.xlu1 %v1437_v50, %s4607_s29  ;;  %v1614_v50 = vmul.f32 %v4338_v9, %v7816_v19  ;;  %4357 = vrcp.f32 %v7821_v29 }
0x17df   : > { %3307 = vrot.lane.b32.xlu0 %v1438_v11, %s4607_s29  ;;  %v4344_v11 = vpop.eup %4343  ;;  %v1646_v39 = vmul.f32 %v7819_v30, %v1614_v50  ;;  %v7833_v50 = vld [vmem:[#allocation154_spill] sm:$0xff] }
0x17e0   : > { %v1617_v35 = vmul.f32 %v4344_v11, %v7823_v32 }
0x17e1   : > { %3309 = vrot.lane.b32.xlu1 %v1439_v34, %s4607_s29  ;;  %v4346_v34 = vpop.eup %4345 }
0x17e2   : > { %v4348_v43 = vpop.eup %4347  ;;  %v1649_v9 = vmul.f32 %v7828_v45, %v1617_v35  ;;  %v1618_v28 = vmul.f32 %v4346_v34, %v7830_v10  ;;  %v7838_v34 = vld [vmem:[#allocation156_spill] sm:$0xff]  ;;  %v7845_v10 = vld [vmem:[#allocation158_spill] sm:$0xff] }
0x17e3   : > { %3311 = vrot.lane.b32.xlu0 %v1440_v60, %s4607_s29  ;;  %v7822_v60 = vld [vmem:[#allocation150_spill] sm:$0xff]  ;;  %v4350_v6 = vpop.eup %4349 }
0x17e4   : > { %v1647_v51 = vmul.f32 %v7822_v60, %v1615_v41  ;;  %v7836_v41 = vld [vmem:[#allocation146_spill] sm:$0xff] }
0x17e5   : > { %3313 = vrot.lane.b32.xlu1 %v1441_v18, %s4607_s29  ;;  %v7825_v18 = vld [vmem:[#allocation169_spill] sm:$0xff]  ;;  %v1620_v29 = vmul.f32 %v4350_v6, %v7836_v41 }
0x17e6   : > { %4359 = vrcp.f32 %v7825_v18 }
0x17e7   : > { %3315 = vrot.lane.b32.xlu0 %v1442_v40, %s4607_s29  ;;  %v1648_v40 = vmul.f32 %v7826_v61, %v1616_v38  ;;  %4361 = vrcp.f32 %v7827_v57  ;;  %v4352_v22 = vpop.eup %4351  ;;  %v7840_v38 = vld [vmem:[#allocation155_spill] sm:$0xff] }
0x17e8   : > { %4363 = vrcp.f32 %v7831_v12  ;;  %v4354_v11 = vpop.eup %4353  ;;  %v1823_v32 = vmul.f32 %v4352_v22, %v7838_v34  ;;  %v1652_v18 = vmul.f32 %v7840_v38, %v1620_v29  ;;  %v7849_v29 = vld [vmem:[#allocation185_spill] sm:$0xff] }
0x17e9   : > { %3317 = vrot.lane.b32.xlu1 %v1443_v47, %s4607_s29  ;;  %v7829_v47 = vld [vmem:[#allocation145_spill] sm:$0xff]  ;;  %4365 = vrcp.f32 %v7834_v42  ;;  %v4356_v35 = vpop.eup %4355 }
0x17ea   : > { %v1619_v20 = vmul.f32 %v4348_v43, %v7829_v47  ;;  %v7841_v43 = vld [vmem:[#allocation182_spill] sm:$0xff]  ;;  %v7843_v47 = vld [vmem:[#allocation181_spill] sm:$0xff] }
0x17eb   : > { %3335 = vrot.lane.b32.xlu0 %v1645_v7, %s4608_s30  ;;  %v1650_v7 = vmul.f32 %v7833_v50, %v1618_v28  ;;  %v1825_v28 = vmul.f32 %v4356_v35, %v7845_v10  ;;  %v7855_v10 = vld [vmem:[#allocation187_spill] sm:$0xff] }
0x17ed   : > { %3337 = vrot.lane.b32.xlu1 %v1646_v39, %s4608_s30  ;;  %v7835_v39 = vld [vmem:[#allocation153_spill] sm:$0xff]  ;;  %v1833_v34 = vmul.f32 %v1825_v28, %v7757_v21 }
0x17ee   : > { %v1651_v62 = vmul.f32 %v7835_v39, %v1619_v20  ;;  %v1831_v20 = vmul.f32 %v1823_v32, %v7751_v56  ;;  %v7851_v32 = vld [vmem:[#allocation160_spill] sm:$0xff] }
0x17ef   : > { %3339 = vrot.lane.b32.xlu0 %v1647_v51, %s4608_s30  ;;  %v7837_v51 = vld [vmem:[#allocation180_spill] sm:$0xff] }
0x17f0   : > { %4367 = vrcp.f32 %v7837_v51 }
0x17f1   : > { %3341 = vrot.lane.b32.xlu1 %v1648_v40, %s4608_s30  ;;  %4369 = vrcp.f32 %v7841_v43  ;;  %v7842_v40 = vld [vmem:[#allocation157_spill] sm:$0xff]  ;;  %v6683_v6 = vpop.xlane.xlu1 %3091 }
0x17f2   : > { %v6666_v19 = vpop.xlane.xlu0 %3088  ;;  %v1824_v57 = vmul.f32 %v4354_v11, %v7842_v40  ;;  %4371 = vrcp.f32 %v7843_v47  ;;  %7844 = vst [vmem:[#allocation27_spill] sm:$0xff] %v6683_v6  ;;  %v7848_v11 = vld [vmem:[#allocation159_spill] sm:$0xff]  ;;  %v7853_v40 = vld [vmem:[#allocation184_spill] sm:$0xff]  ;;  %v7919_v6 = vld [vmem:[#allocation246_spill] sm:$0xff] }
0x17f3   : > { %7832 = vst [vmem:[#allocation51_spill] sm:$0xff] %v6666_v19  ;;  %3343 = vrot.lane.b32.xlu0 %v1649_v9, %s4608_s30  ;;  %v4358_v9 = vpop.eup %4357 }
0x17f4   : > { %v4360_v12 = vpop.eup %4359  ;;  %v1832_v42 = vmul.f32 %v1824_v57, %v7753_v46 }
0x17f5   : > { %3345 = vrot.lane.b32.xlu1 %v1650_v7, %s4608_s30  ;;  %v7847_v7 = vld [vmem:[#allocation183_spill] sm:$0xff]  ;;  %v4362_v41 = vpop.eup %4361  ;;  %v1827_v35 = vmul.f32 %v4360_v12, %v7851_v32  ;;  %v7857_v12 = vld [vmem:[#allocation162_spill] sm:$0xff] }
0x17f6   : > { %v6676_v17 = vpop.xlane.xlu0 %3094  ;;  %4373 = vrcp.f32 %v7847_v7  ;;  %v7859_v32 = vld [vmem:[#allocation186_spill] sm:$0xff] }
0x17f7   : > { %7839 = vst [vmem:[#allocation28_spill] sm:$0xff] %v6676_v17  ;;  %3347 = vrot.lane.b32.xlu0 %v1651_v62, %s4608_s30  ;;  %v1826_v62 = vmul.f32 %v4358_v9, %v7848_v11  ;;  %4375 = vrcp.f32 %v7849_v29  ;;  %v7854_v9 = vld [vmem:[#allocation161_spill] sm:$0xff]  ;;  %v1835_v28 = vmul.f32 %v1827_v35, %v7763_v8  ;;  %v7913_v17 = vld [vmem:[#allocation235_spill] sm:$0xff] }
0x17f8   : > { %4377 = vrcp.f32 %v7853_v40  ;;  %v1828_v47 = vmul.f32 %v4362_v41, %v7854_v9  ;;  %v7860_v41 = vld [vmem:[#allocation163_spill] sm:$0xff]  ;;  %v7861_v9 = vld [vmem:[#allocation196_spill] sm:$0xff] }
0x17f9   : > { %3349 = vrot.lane.b32.xlu1 %v1652_v18, %s4608_s30  ;;  %v4364_v18 = vpop.eup %4363  ;;  %v1834_v57 = vmul.f32 %v1826_v62, %v7761_v27  ;;  %4379 = vrcp.f32 %v7855_v10 }
0x17fa   : > { %v6688_v22 = vpop.xlane.xlu0 %3097  ;;  %4381 = vrcp.f32 %v7859_v32  ;;  %v1836_v62 = vmul.f32 %v1828_v47, %v7767_v36  ;;  %v7863_v32 = vld [vmem:[#allocation198_spill] sm:$0xff] }
0x17fb   : > { %7846 = vst [vmem:[#allocation53_spill] sm:$0xff] %v6688_v22  ;;  %3367 = vrot.lane.b32.xlu0 %v1831_v20, %s4608_s30  ;;  %v4366_v20 = vpop.eup %4365  ;;  %4383 = vrcp.f32 %v7861_v9  ;;  %v7865_v9 = vld [vmem:[#allocation197_spill] sm:$0xff]  ;;  %v7887_v22 = vld [vmem:[#allocation216_spill] sm:$0xff] }
0x17fc   : > { %4385 = vrcp.f32 %v7863_v32  ;;  %v7867_v32 = vld [vmem:[#allocation199_spill] sm:$0xff] }
0x17fd   : > { %3369 = vrot.lane.b32.xlu1 %v1832_v42, %s4608_s30  ;;  %v6696_v51 = vpop.xlane.xlu1 %3103  ;;  %v1829_v42 = vmul.f32 %v4364_v18, %v7857_v12  ;;  %v4368_v11 = vpop.eup %4367  ;;  %v7862_v18 = vld [vmem:[#allocation173_spill] sm:$0xff]  ;;  %4387 = vrcp.f32 %v7865_v9 }
0x17fe   : > { %7850 = vst [vmem:[#allocation18_spill] sm:$0xff] %v6696_v51  ;;  %v6700_v43 = vpop.xlane.xlu0 %3100  ;;  %v4370_v40 = vpop.eup %4369  ;;  %v2008_v10 = vmul.f32 %v4368_v11, %v7862_v18  ;;  %v7866_v11 = vld [vmem:[#allocation174_spill] sm:$0xff]  ;;  %4389 = vrcp.f32 %v7867_v32  ;;  %v7870_v9 = vld [vmem:[#allocation177_spill] sm:$0xff] }
0x17ff   : > { %7852 = vst [vmem:[#allocation36_spill] sm:$0xff] %v6700_v43  ;;  %3371 = vrot.lane.b32.xlu0 %v1833_v34, %s4608_s30  ;;  %v1830_v34 = vmul.f32 %v4366_v20, %v7860_v41  ;;  %v1837_v35 = vmul.f32 %v1829_v42, %v7768_v37  ;;  %v4372_v12 = vpop.eup %4371  ;;  %v7864_v20 = vld [vmem:[#allocation172_spill] sm:$0xff] }
0x1800   : > { %v2016_v42 = vmul.f32 %v2008_v10, %v7775_v5  ;;  %v2010_v18 = vmul.f32 %v4372_v12, %v7866_v11 }
0x1801   : > { %3373 = vrot.lane.b32.xlu1 %v1834_v57, %s4608_s30  ;;  %v6708_v7 = vpop.xlane.xlu1 %3109  ;;  %v1838_v47 = vmul.f32 %v1830_v34, %v7771_v54 }
0x1802   : > { %7856 = vst [vmem:[#allocation35_spill] sm:$0xff] %v6708_v7  ;;  %v6712_v29 = vpop.xlane.xlu0 %3106  ;;  %v2018_v12 = vmul.f32 %v2010_v18, %v7781_v24  ;;  %v7874_v18 = vld [vmem:[#allocation179_spill] sm:$0xff] }
0x1803   : > { %7858 = vst [vmem:[#allocation29_spill] sm:$0xff] %v6712_v29  ;;  %3375 = vrot.lane.b32.xlu0 %v1835_v28, %s4608_s30  ;;  %v2009_v28 = vmul.f32 %v4370_v40, %v7864_v20  ;;  %v4374_v41 = vpop.eup %4373  ;;  %v7868_v40 = vld [vmem:[#allocation175_spill] sm:$0xff] }
0x1804   : > { %v4376_v31 = vpop.eup %4375 }
0x1805   : > { %3377 = vrot.lane.b32.xlu1 %v1836_v62, %s4608_s30  ;;  %v6720_v57 = vpop.permute.xlu1 %3145  ;;  %v2017_v34 = vmul.f32 %v2009_v28, %v7777_v26  ;;  %v4378_v20 = vpop.eup %4377  ;;  %v2012_v11 = vmul.f32 %v4376_v31, %v7870_v9 }
0x1806   : > { %v6724_v52 = vpop.permute.xlu0 %3143  ;;  %v4380_v58 = vpop.eup %4379 }
0x1807   : > { %3379 = vrot.lane.b32.xlu0 %v1837_v35, %s4608_s30  ;;  %v2011_v35 = vmul.f32 %v4374_v41, %v7868_v40  ;;  %v7872_v41 = vld [vmem:[#allocation176_spill] sm:$0xff]  ;;  %v4382_v40 = vpop.eup %4381  ;;  %v2020_v31 = vmul.f32 %v2012_v11, %v7787_v13  ;;  %v2014_v9 = vmul.f32 %v4380_v58, %v7874_v18  ;;  %v7878_v11 = vld [vmem:[#allocation189_spill] sm:$0xff] }
0x1808   : > { %v4384_v63 = vpop.eup %4383  ;;  %v7925_v13 = vld [vmem:[#allocation24_spill] sm:$0xff] }
0x1809   : > { %3381 = vrot.lane.b32.xlu1 %v1838_v47, %s4608_s30  ;;  %v6732_v62 = vpop.permute.xlu1 %3147  ;;  %v7869_v47 = vld [vmem:[#allocation201_spill] sm:$0xff]  ;;  %v2019_v28 = vmul.f32 %v2011_v35, %v7785_v16  ;;  %v2022_v58 = vmul.f32 %v2014_v9, %v7792_v44  ;;  %v2193_v18 = vmul.f32 %v4384_v63, %v7878_v11  ;;  %v7882_v9 = vld [vmem:[#allocation190_spill] sm:$0xff] }
0x180a   : > { %v6736_v15 = vpop.permute.xlu0 %3151  ;;  %4391 = vrcp.f32 %v7869_v47  ;;  %v7873_v47 = vld [vmem:[#allocation203_spill] sm:$0xff] }
0x180b   : > { %3399 = vrot.lane.b32.xlu0 %v2016_v42, %s4609_s3  ;;  %4393 = vrcp.f32 %v7871_v4  ;;  %v2013_v42 = vmul.f32 %v4378_v20, %v7872_v41  ;;  %v7875_v4 = vld [vmem:[#allocation202_spill] sm:$0xff]  ;;  %v4386_v41 = vpop.eup %4385  ;;  %v2201_v63 = vmul.f32 %v2193_v18, %v7798_v48 }
0x180c   : > { %4395 = vrcp.f32 %v7873_v47  ;;  %v7876_v20 = vld [vmem:[#allocation178_spill] sm:$0xff]  ;;  %v7877_v47 = vld [vmem:[#allocation212_spill] sm:$0xff]  ;;  %v4388_v14 = vpop.eup %4387 }
0x180d   : > { %3401 = vrot.lane.b32.xlu1 %v2017_v34, %s4609_s3  ;;  %v6744_v10 = vpop.permute.xlu1 %3149  ;;  %4397 = vrcp.f32 %v7875_v4  ;;  %v2021_v35 = vmul.f32 %v2013_v42, %v7791_v49  ;;  %v7879_v4 = vld [vmem:[#allocation214_spill] sm:$0xff]  ;;  %v2195_v11 = vmul.f32 %v4388_v14, %v7882_v9  ;;  %v7923_v49 = vld [vmem:[#allocation3_spill] sm:$0xff] }
0x180e   : > { %v6748_v32 = vpop.permute.xlu0 %3155  ;;  %4399 = vrcp.f32 %v7877_v47  ;;  %v7881_v47 = vld [vmem:[#allocation213_spill] sm:$0xff] }
0x180f   : > { %3403 = vrot.lane.b32.xlu0 %v2018_v12, %s4609_s3  ;;  %v2015_v12 = vmul.f32 %v4382_v40, %v7876_v20  ;;  %4401 = vrcp.f32 %v7879_v4  ;;  %v7880_v40 = vld [vmem:[#allocation188_spill] sm:$0xff]  ;;  %v4390_v20 = vpop.eup %4389  ;;  %v7883_v4 = vld [vmem:[#allocation215_spill] sm:$0xff]  ;;  %v2203_v14 = vmul.f32 %v2195_v11, %v7801_v33 }
0x1810   : > { %4403 = vrcp.f32 %v7881_v47  ;;  %v7886_v47 = vld [vmem:[#allocation193_spill] sm:$0xff] }
0x1811   : > { %3405 = vrot.lane.b32.xlu1 %v2019_v28, %s4609_s3  ;;  %v6756_v34 = vpop.permute.xlu1 %3153  ;;  %v2023_v42 = vmul.f32 %v2015_v12, %v7795_v3  ;;  %4405 = vrcp.f32 %v7883_v4 }
0x1812   : > { %v6760_v59 = vpop.permute.xlu0 %3175 }
0x1813   : > { %3407 = vrot.lane.b32.xlu0 %v2020_v31, %s4609_s3  ;;  %v2194_v31 = vmul.f32 %v4386_v41, %v7880_v40  ;;  %v7884_v41 = vld [vmem:[#allocation191_spill] sm:$0xff] }
0x1815   : > { %3409 = vrot.lane.b32.xlu1 %v2021_v35, %s4609_s3  ;;  %v6768_v28 = vpop.permute.xlu1 %3157  ;;  %v2202_v12 = vmul.f32 %v2194_v31, %v7799_v55  ;;  %v7892_v55 = vld [vmem:[#allocation20_spill] sm:$0xff] }
0x1816   : > { %v6772_v7 = vpop.permute.xlu0 %3179 }
0x1817   : > { %3411 = vrot.lane.b32.xlu0 %v2022_v58, %s4609_s3  ;;  %v4392_v29 = vpop.eup %4391  ;;  %v2196_v58 = vmul.f32 %v4390_v20, %v7884_v41  ;;  %v7888_v20 = vld [vmem:[#allocation192_spill] sm:$0xff] }
0x1818   : > { %v4394_v40 = vpop.eup %4393  ;;  %v2197_v9 = vmul.f32 %v4392_v29, %v7886_v47  ;;  %v7891_v47 = vld [vmem:[#allocation195_spill] sm:$0xff] }
0x1819   : > { %3413 = vrot.lane.b32.xlu1 %v2023_v42, %s4609_s3  ;;  %v6780_v35 = vpop.permute.xlu1 %3177  ;;  %v7885_v42 = vld [vmem:[#allocation217_spill] sm:$0xff]  ;;  %v4396_v43 = vpop.eup %4395  ;;  %v2204_v31 = vmul.f32 %v2196_v58, %v7804_v53  ;;  %v7893_v58 = vld [vmem:[#allocation218_spill] sm:$0xff]  ;;  %v7896_v53 = vld [vmem:[#allocation228_spill] sm:$0xff] }
0x181a   : > { %v6784_v51 = vpop.permute.xlu0 %3183  ;;  %4407 = vrcp.f32 %v7885_v42  ;;  %v4398_v41 = vpop.eup %4397  ;;  %v7889_v42 = vld [vmem:[#allocation19_spill] sm:$0xff]  ;;  %v2205_v29 = vmul.f32 %v2197_v9, %v7805_v2  ;;  %v2199_v33 = vmul.f32 %v4396_v43, %v7891_v47  ;;  %v7897_v9 = vld [vmem:[#allocation205_spill] sm:$0xff] }
0x181b   : > { %3431 = vrot.lane.b32.xlu0 %v2201_v63, %s4610_s4  ;;  %4409 = vrcp.f32 %v7887_v22  ;;  %v2198_v63 = vmul.f32 %v4394_v40, %v7888_v20  ;;  %v4400_v22 = vpop.eup %4399  ;;  %v7894_v20 = vld [vmem:[#allocation194_spill] sm:$0xff]  ;;  %v7898_v2 = vld [vmem:[#allocation25_spill] sm:$0xff] }
0x181c   : > { %4411 = vrcp.f32 %v7889_v42  ;;  %v2200_v42 = vmul.f32 %v4398_v41, %v7894_v20  ;;  %v2378_v47 = vmul.f32 %v4400_v22, %v7897_v9  ;;  %v7903_v22 = vld [vmem:[#allocation206_spill] sm:$0xff] }
0x181d   : > { %3433 = vrot.lane.b32.xlu1 %v2202_v12, %s4610_s4  ;;  %v6792_v18 = vpop.permute.xlu1 %3181  ;;  %v7890_v12 = vld [vmem:[#allocation219_spill] sm:$0xff]  ;;  %v2206_v40 = vmul.f32 %v2198_v63, %v7808_v23  ;;  %v7899_v63 = vld [vmem:[#allocation230_spill] sm:$0xff] }
0x181e   : > { %v6796_v4 = vpop.permute.xlu0 %3187  ;;  %4413 = vrcp.f32 %v7890_v12  ;;  %v7895_v12 = vld [vmem:[#allocation21_spill] sm:$0xff]  ;;  %v2208_v41 = vmul.f32 %v2200_v42, %v7813_v1  ;;  %v7902_v23 = vld [vmem:[#allocation22_spill] sm:$0xff]  ;;  %v7905_v42 = vld [vmem:[#allocation231_spill] sm:$0xff] }
0x181f   : > { %3435 = vrot.lane.b32.xlu0 %v2203_v14, %s4610_s4  ;;  %4415 = vrcp.f32 %v7892_v55  ;;  %v2207_v55 = vmul.f32 %v2199_v33, %v7810_v25  ;;  %v7904_v25 = vld [vmem:[#allocation23_spill] sm:$0xff] }
0x1820   : > { %4417 = vrcp.f32 %v7893_v58 }
0x1821   : > { %3437 = vrot.lane.b32.xlu1 %v2204_v31, %s4610_s4  ;;  %v6805_v11 = vpop.permute.xlu1 %3185  ;;  %v4402_v31 = vpop.eup %4401  ;;  %4419 = vrcp.f32 %v7895_v12  ;;  %v7901_v12 = vld [vmem:[#allocation229_spill] sm:$0xff] }
0x1822   : > { %v6810_v14 = vpop.permute.xlu0 %3207  ;;  %4421 = vrcp.f32 %v7896_v53  ;;  %v4404_v58 = vpop.eup %4403  ;;  %v7900_v53 = vld [vmem:[#allocation204_spill] sm:$0xff] }
0x1823   : > { %3439 = vrot.lane.b32.xlu0 %v2205_v29, %s4610_s4  ;;  %4423 = vrcp.f32 %v7898_v2  ;;  %v2379_v20 = vmul.f32 %v4402_v31, %v7900_v53  ;;  %v2386_v2 = vmul.f32 %v2378_v47, %v7817_v0  ;;  %v2380_v9 = vmul.f32 %v4404_v58, %v7903_v22  ;;  %v7908_v47 = vld [vmem:[#allocation233_spill] sm:$0xff] }
0x1824   : > { %4425 = vrcp.f32 %v7899_v63  ;;  %v7909_v22 = vld [vmem:[#allocation209_spill] sm:$0xff] }
0x1825   : > { %3441 = vrot.lane.b32.xlu1 %v2206_v40, %s4610_s4  ;;  %v6819_v43 = vpop.permute.xlu1 %3189  ;;  %v4406_v40 = vpop.eup %4405  ;;  %4427 = vrcp.f32 %v7901_v12  ;;  %v2387_v31 = vmul.f32 %v2379_v20, %v7819_v30  ;;  %v7907_v12 = vld [vmem:[#allocation26_spill] sm:$0xff] }
0x1826   : > { %v6824_v29 = vpop.permute.xlu0 %3211  ;;  %4429 = vrcp.f32 %v7902_v23  ;;  %v7906_v23 = vld [vmem:[#allocation207_spill] sm:$0xff] }
0x1827   : > { %3443 = vrot.lane.b32.xlu0 %v2207_v55, %s4610_s4  ;;  %v4408_v63 = vpop.eup %4407  ;;  %4431 = vrcp.f32 %v7904_v25  ;;  %v2381_v53 = vmul.f32 %v4406_v40, %v7906_v23  ;;  %v2388_v25 = vmul.f32 %v2380_v9, %v7822_v60 }
0x1828   : > { %4433 = vrcp.f32 %v7905_v42  ;;  %v2382_v42 = vmul.f32 %v4408_v63, %v7909_v22  ;;  %v7915_v22 = vld [vmem:[#allocation211_spill] sm:$0xff] }
0x1829   : > { %3445 = vrot.lane.b32.xlu1 %v2208_v41, %s4610_s4  ;;  %v6833_v33 = vpop.permute.xlu1 %3209  ;;  %v4410_v41 = vpop.eup %4409  ;;  %4435 = vrcp.f32 %v7907_v12  ;;  %v2389_v23 = vmul.f32 %v2381_v53, %v7826_v61  ;;  %v7911_v12 = vld [vmem:[#allocation208_spill] sm:$0xff] }
0x182a   : > { %v6838_v55 = vpop.permute.xlu0 %3215  ;;  %v4412_v1 = vpop.eup %4411  ;;  %4437 = vrcp.f32 %v7908_v47  ;;  %v2383_v47 = vmul.f32 %v4410_v41, %v7911_v12  ;;  %v2390_v63 = vmul.f32 %v2382_v42, %v7828_v45  ;;  %v7916_v12 = vld [vmem:[#allocation210_spill] sm:$0xff]  ;;  %v7918_v42 = vld [vmem:[#allocation221_spill] sm:$0xff] }
0x182b   : > { %3463 = vrot.lane.b32.xlu0 %v2386_v2, %s4599_s21  ;;  %v4414_v0 = vpop.eup %4413  ;;  %v7910_v2 = vld [vmem:[#allocation232_spill] sm:$0xff] }
0x182c   : > { %4439 = vrcp.f32 %v7910_v2  ;;  %v4416_v40 = vpop.eup %4415  ;;  %v2384_v2 = vmul.f32 %v4414_v0, %v7915_v22  ;;  %v2391_v41 = vmul.f32 %v2383_v47, %v7833_v50  ;;  %v7921_v47 = vld [vmem:[#allocation2_spill] sm:$0xff] }
0x182d   : > { %3465 = vrot.lane.b32.xlu1 %v2387_v31, %s4599_s21  ;;  %v6847_v58 = vpop.permute.xlu1 %3213  ;;  %v4418_v30 = vpop.eup %4417  ;;  %v7912_v31 = vld [vmem:[#allocation234_spill] sm:$0xff]  ;;  %v286_v50 = vmul.f32 %v4412_v1, %v7921_v47  ;;  %v7927_v1 = vld [vmem:[#allocation245_spill] sm:$0xff] }
0x182e   : > { %v6852_v20 = vpop.permute.xlu0 %3219  ;;  %4441 = vrcp.f32 %v7912_v31  ;;  %v4420_v48 = vpop.eup %4419  ;;  %v2385_v31 = vmul.f32 %v4418_v30, %v7916_v12  ;;  %v2392_v0 = vmul.f32 %v2384_v2, %v7835_v39  ;;  %v7922_v30 = vld [vmem:[#allocation8_spill] sm:$0xff] }
0x182f   : > { %3467 = vrot.lane.b32.xlu0 %v2388_v25, %s4599_s21  ;;  %4443 = vrcp.f32 %v7913_v17  ;;  %v4422_v60 = vpop.eup %4421  ;;  %v7917_v17 = vld [vmem:[#allocation244_spill] sm:$0xff] }
0x1830   : > { %v4424_v53 = vpop.eup %4423  ;;  %4445 = vrcp.f32 %v7917_v17  ;;  %v2564_v22 = vmul.f32 %v4422_v60, %v7918_v42  ;;  %v2393_v2 = vmul.f32 %v2385_v31, %v7840_v38  ;;  %v7924_v39 = vld [vmem:[#allocation220_spill] sm:$0xff]  ;;  %v7929_v31 = vld [vmem:[#allocation10_spill] sm:$0xff] }
0x1831   : > { %3469 = vrot.lane.b32.xlu1 %v2389_v23, %s4599_s21  ;;  %v6860_v9 = vpop.permute.xlu1 %3217  ;;  %v4426_v61 = vpop.eup %4425  ;;  %4447 = vrcp.f32 %v7919_v6  ;;  %v292_v12 = vmul.f32 %v4424_v53, %v7922_v30  ;;  %v7926_v6 = vld [vmem:[#allocation222_spill] sm:$0xff] }
0x1832   : > { %7914 = vst [vmem:[#allocation52_spill] sm:$0xff] %v6860_v9  ;;  %v6864_v25 = vpop.permute.xlu0 %3239  ;;  %v4428_v23 = vpop.eup %4427  ;;  %v2565_v60 = vmul.f32 %v4426_v61, %v7924_v39  ;;  %4449 = vrcp.f32 %v7925_v13  ;;  %v7930_v61 = vld [vmem:[#allocation11_spill] sm:$0xff] }
0x1833   : > { %3471 = vrot.lane.b32.xlu0 %v2390_v63, %s4599_s21  ;;  %v4430_v45 = vpop.eup %4429  ;;  %v7920_v63 = vld [vmem:[#allocation4_spill] sm:$0xff]  ;;  %4451 = vrcp.f32 %v7927_v1  ;;  %v326_v39 = vmul.f32 %v7930_v61, %v286_v50  ;;  %v7931_v13 = vld [vmem:[#allocation15_spill] sm:$0xff]  ;;  %v7935_v50 = vld [vmem:[#allocation9_spill] sm:$0xff] }
0x1834   : > { %v287_v44 = vmul.f32 %v4416_v40, %v7920_v63  ;;  %v4432_v17 = vpop.eup %4431  ;;  %v2566_v40 = vmul.f32 %v4428_v23, %v7926_v6  ;;  %v332_v30 = vmul.f32 %v7931_v13, %v292_v12  ;;  %v7932_v1 = vld [vmem:[#allocation12_spill] sm:$0xff]  ;;  %v7936_v13 = vld [vmem:[#allocation249_spill] sm:$0xff] }
0x1835   : > { %3473 = vrot.lane.b32.xlu1 %v2391_v41, %s4599_s21  ;;  %v6871_v3 = vpop.permute.xlu1 %3221  ;;  %v288_v41 = vmul.f32 %v4420_v48, %v7923_v49  ;;  %v4434_v42 = vpop.eup %4433  ;;  %v2572_v49 = vmul.f32 %v2564_v22, %v7751_v56  ;;  %v2573_v56 = vmul.f32 %v2565_v60, %v7753_v46  ;;  %v7934_v22 = vld [vmem:[#allocation223_spill] sm:$0xff] }
0x1836   : > { %v6879_v19 = vpop.permute.xlu0 %3243  ;;  %v4436_v63 = vpop.eup %4435  ;;  %v6894_v47 = vmul.f32 %v7929_v31, %v287_v44  ;;  %v3621_v44 = vsel %vm205_vm0, %v332_v30, %v6748_v32  ;;  %v2574_v12 = vmul.f32 %v2566_v40, %v7757_v21  ;;  %v7938_v32 = vld [vmem:[#allocation6_spill] sm:$0xff]  ;;  %v7939_v40 = vld [vmem:[#allocation224_spill] sm:$0xff] }
0x1837   : > { %3475 = vrot.lane.b32.xlu0 %v2392_v0, %s4599_s21  ;;  %v4438_v48 = vpop.eup %4437  ;;  %v7928_v0 = vld [vmem:[#allocation247_spill] sm:$0xff]  ;;  %v328_v38 = vmul.f32 %v7932_v1, %v288_v41  ;;  %v293_v31 = vmul.f32 %v4436_v63, %v7935_v50  ;;  %v7937_v41 = vld [vmem:[#allocation225_spill] sm:$0xff]  ;;  %v7940_v1 = vld [vmem:[#allocation248_spill] sm:$0xff] }
0x1838   : > { %4453 = vrcp.f32 %v7928_v0  ;;  %v2567_v0 = vmul.f32 %v4434_v42, %v7934_v22  ;;  %v2568_v60 = vmul.f32 %v4438_v48, %v7937_v41  ;;  %v7942_v22 = vld [vmem:[#allocation226_spill] sm:$0xff]  ;;  %v7943_v50 = vld [vmem:[#allocation251_spill] sm:$0xff] }
0x1839   : > { %3477 = vrot.lane.b32.xlu1 %v2393_v2, %s4599_s21  ;;  %v6889_v53 = vpop.permute.xlu1 %3241  ;;  %v4440_v6 = vpop.eup %4439  ;;  %v7933_v2 = vld [vmem:[#allocation5_spill] sm:$0xff]  ;;  %4455 = vrcp.f32 %v7936_v13 }
0x183a   : > { %v6898_v23 = vpop.permute.xlu0 %3247  ;;  %v289_v9 = vmul.f32 %v4430_v45, %v7933_v2  ;;  %v3630_v45 = vsel %vm3623_vm4, %v3621_v44, %v6796_v4  ;;  %v2569_v30 = vmul.f32 %v4440_v6, %v7939_v40  ;;  %4457 = vrcp.f32 %v7940_v1 }
0x183b   : > { %3495 = vrot.lane.b32.xlu0 %v2572_v49, %s4599_s21  ;;  %v4442_v61 = vpop.eup %4441  ;;  %v290_v49 = vmul.f32 %v4432_v17, %v7938_v32  ;;  %v3639_v63 = vsel %vm3632_vm5, %v3630_v45, %v6852_v20  ;;  %v3615_v4 = vsel %vm205_vm0, %v326_v39, %v6724_v52  ;;  %v2575_v48 = vmul.f32 %v2567_v0, %v7761_v27  ;;  %v7941_v20 = vld [vmem:[#allocation17_spill] sm:$0xff]  ;;  %v7944_v0 = vld [vmem:[#allocation227_spill] sm:$0xff] }
0x183c   : > { %v4444_v42 = vpop.eup %4443  ;;  %v3624_v17 = vsel %vm3623_vm4, %v3615_v4, %v6760_v59  ;;  %v2571_v6 = vmul.f32 %v4442_v61, %v7942_v22  ;;  %4459 = vrcp.f32 %v7943_v50  ;;  %v2576_v27 = vmul.f32 %v2568_v60, %v7763_v8  ;;  %v7945_v59 = vld [vmem:[#allocation13_spill] sm:$0xff] }
0x183d   : > { %3497 = vrot.lane.b32.xlu1 %v2573_v56, %s4599_s21  ;;  %v6913_v46 = vpop.permute.xlu1 %3245  ;;  %v333_v56 = vmul.f32 %v7941_v20, %v293_v31  ;;  %v4446_v44 = vpop.eup %4445  ;;  %v3633_v52 = vsel %vm3632_vm5, %v3624_v17, %v6810_v14  ;;  %v330_v13 = vmul.f32 %v7945_v59, %v290_v49  ;;  %v7946_v31 = vld [vmem:[#allocation14_spill] sm:$0xff]  ;;  %v2577_v32 = vmul.f32 %v2569_v30, %v7767_v36  ;;  %v7953_v50 = vld [vmem:[#allocation261_spill] sm:$0xff] }
0x183e   : > { %v3252_v21 = vpop.permute.xlu0 %3251  ;;  %v329_v45 = vmul.f32 %v7946_v31, %v289_v9  ;;  %v3642_v61 = vsel %vm3641_vm6, %v3633_v52, %v6864_v25  ;;  %v7947_v14 = vld [vmem:[#allocation250_spill] sm:$0xff]  ;;  %v2579_v25 = vmul.f32 %v2571_v6, %v7771_v54  ;;  %v3616_v54 = vsel %vm205_vm0, %v6894_v47, %v6720_v57  ;;  %v7956_v31 = vld [vmem:[#allocation263_spill] sm:$0xff] }
0x183f   : > { %v6924_v2 = vsel %vm3641_vm6, %v3639_v63, %v3252_v21  ;;  %3499 = vrot.lane.b32.xlu0 %v2574_v12, %s4599_s21  ;;  %v2570_v12 = vmul.f32 %v4444_v42, %v7944_v0  ;;  %v4448_v63 = vpop.eup %4447  ;;  %4461 = vrcp.f32 %v7947_v14  ;;  %v3617_v21 = vsel %vm205_vm0, %v328_v38, %v6732_v62  ;;  %v7948_v42 = vld [vmem:[#allocation237_spill] sm:$0xff]  ;;  %v7949_v38 = vld [vmem:[#allocation260_spill] sm:$0xff]  ;;  %v7951_v20 = vld [vmem:[#allocation262_spill] sm:$0xff] }
0x1840   : > { %v3622_v8 = vsel %vm205_vm0, %v333_v56, %v6768_v28  ;;  %v3626_v9 = vsel %vm3623_vm4, %v3617_v21, %v6772_v7  ;;  %v2749_v49 = vmul.f32 %v4446_v44, %v7948_v42  ;;  %v4450_v40 = vpop.eup %4449  ;;  %4463 = vrcp.f32 %v7949_v38 }
0x1841   : > { %3501 = vrot.lane.b32.xlu1 %v2575_v48, %s4599_s21  ;;  %v6936_v39 = vpop.permute.xlu1 %3249  ;;  %v3631_v36 = vsel %vm3623_vm4, %v3622_v8, %v6819_v43  ;;  %v3635_v62 = vsel %vm3632_vm5, %v3626_v9, %v6824_v29  ;;  %v2578_v7 = vmul.f32 %v2570_v12, %v7768_v37  ;;  %v4452_v1 = vpop.eup %4451  ;;  %v7950_v48 = vld [vmem:[#allocation236_spill] sm:$0xff]  ;;  %4465 = vrcp.f32 %v7951_v20  ;;  %v7959_v8 = vld [vmem:[#allocation241_spill] sm:$0xff] }
0x1842   : > { %v3272_v41 = vpop.permute.xlu0 %3271  ;;  %v3640_v28 = vsel %vm3632_vm5, %v3631_v36, %v6871_v3  ;;  %v3644_v43 = vsel %vm3641_vm6, %v3635_v62, %v6879_v19  ;;  %v2750_v17 = vmul.f32 %v4448_v63, %v7950_v48  ;;  %v3619_v37 = vsel %vm205_vm0, %v330_v13, %v6736_v15  ;;  %v7952_v19 = vld [vmem:[#allocation7_spill] sm:$0xff]  ;;  %v7958_v63 = vld [vmem:[#allocation265_spill] sm:$0xff] }
0x1843   : > { %v6951_v60 = vsel %vm3650_vm7, %v3642_v61, %v3272_v41  ;;  %3503 = vrot.lane.b32.xlu0 %v2576_v27, %s4599_s21  ;;  %v3625_v56 = vsel %vm3623_vm4, %v3616_v54, %v6780_v35  ;;  %v291_v47 = vmul.f32 %v4450_v40, %v7952_v19  ;;  %v3628_v22 = vsel %vm3623_vm4, %v3619_v37, %v6784_v51  ;;  %v7954_v27 = vld [vmem:[#allocation238_spill] sm:$0xff]  ;;  %v7967_v20 = vld [vmem:[#allocation113_spill] sm:$0xff] }
0x1844   : > { %v3634_v6 = vsel %vm3632_vm5, %v3625_v56, %v6833_v33  ;;  %v2757_v44 = vmul.f32 %v2749_v49, %v7775_v5  ;;  %4467 = vrcp.f32 %v7953_v50  ;;  %v3637_v15 = vsel %vm3632_vm5, %v3628_v22, %v6838_v55  ;;  %v7955_v55 = vld [vmem:[#allocation239_spill] sm:$0xff]  ;;  %v7960_v49 = vld [vmem:[#allocation264_spill] sm:$0xff]  ;;  %v7968_v37 = vld [vmem:[#allocation242_spill] sm:$0xff] }
0x1845   : > { %3505 = vrot.lane.b32.xlu1 %v2577_v32, %s4599_s21  ;;  %v3254_v30 = vpop.permute.xlu1 %3253  ;;  %v4454_v3 = vpop.eup %4453  ;;  %v3643_v35 = vsel %vm3641_vm6, %v3634_v6, %v6889_v53  ;;  %v2751_v0 = vmul.f32 %v4452_v1, %v7954_v27  ;;  %v3618_v51 = vsel %vm205_vm0, %v329_v45, %v6744_v10  ;;  %v3646_v5 = vsel %vm3641_vm6, %v3637_v15, %v6898_v23  ;;  %v7957_v45 = vld [vmem:[#allocation16_spill] sm:$0xff]  ;;  %v7971_v50 = vld [vmem:[#allocation253_spill] sm:$0xff]  ;;  %v7972_v27 = vld [vmem:[#allocation27_spill] sm:$0xff] }
0x1846   : > { %v6973_v4 = vsel %vm3641_vm6, %v3640_v28, %v3254_v30  ;;  %v3276_v29 = vpop.permute.xlu0 %3275  ;;  %v4456_v12 = vpop.eup %4455  ;;  %v2752_v13 = vmul.f32 %v4454_v3, %v7955_v55  ;;  %4469 = vrcp.f32 %v7956_v31  ;;  %v3627_v53 = vsel %vm3623_vm4, %v3618_v51, %v6792_v18  ;;  %v7962_v28 = vld [vmem:[#allocation52_spill] sm:$0xff]  ;;  %v7963_v30 = vld [vmem:[#allocation267_spill] sm:$0xff] }
0x1847   : > { %v6982_v57 = vsel %vm3650_vm7, %v3644_v43, %v3276_v29  ;;  %3507 = vrot.lane.b32.xlu0 %v2578_v7, %s4599_s21  ;;  %v2758_v10 = vmul.f32 %v2750_v17, %v7777_v26  ;;  %v4458_v23 = vpop.eup %4457  ;;  %v331_v41 = vmul.f32 %v7957_v45, %v291_v47  ;;  %v3636_v32 = vsel %vm3632_vm5, %v3627_v53, %v6847_v58  ;;  %v7964_v7 = vld [vmem:[#allocation110_spill] sm:$0xff]  ;;  %v7969_v47 = vld [vmem:[#allocation51_spill] sm:$0xff]  ;;  %v7970_v6 = vld [vmem:[#allocation112_spill] sm:$0xff] }
0x1848   : > { %4471 = vrcp.f32 %v7958_v63  ;;  %v3645_v14 = vsel %vm3641_vm6, %v3636_v32, %v6913_v46  ;;  %v2759_v21 = vmul.f32 %v2751_v0, %v7781_v24  ;;  %v2753_v9 = vmul.f32 %v4456_v12, %v7959_v8  ;;  %v7961_v24 = vld [vmem:[#allocation240_spill] sm:$0xff]  ;;  %v7966_v17 = vld [vmem:[#allocation266_spill] sm:$0xff]  ;;  %v7978_v32 = vld [vmem:[#allocation53_spill] sm:$0xff] }
0x1849   : > { %3509 = vrot.lane.b32.xlu1 %v2579_v25, %s4599_s21  ;;  %v3274_v52 = vpop.permute.xlu1 %3273  ;;  %v4460_v36 = vpop.eup %4459  ;;  %v3620_v26 = vsel %vm205_vm0, %v331_v41, %v6756_v34  ;;  %v2760_v58 = vmul.f32 %v2752_v13, %v7785_v16  ;;  %4473 = vrcp.f32 %v7960_v49  ;;  %v2754_v38 = vmul.f32 %v4458_v23, %v7961_v24  ;;  %v7973_v12 = vld [vmem:[#allocation114_spill] sm:$0xff]  ;;  %v7975_v13 = vld [vmem:[#allocation28_spill] sm:$0xff] }
0x184a   : > { %v7003_v33 = vsel %vm3650_vm7, %v3643_v35, %v3274_v52  ;;  %v3280_v59 = vpop.permute.xlu0 %3279  ;;  %v3629_v46 = vsel %vm3623_vm4, %v3620_v26, %v6805_v11  ;;  %4475 = vrcp.f32 %v7963_v30  ;;  %v2761_v1 = vmul.f32 %v2753_v9, %v7964_v7  ;;  %v7976_v53 = vld [vmem:[#allocation132_spill] sm:$0xff]  ;;  %v7987_v7 = vld [vmem:[#allocation29_spill] sm:$0xff] }
0x184b   : > { %v7010_v61 = vsel %vm3650_vm7, %v3646_v5, %v3280_v59  ;;  %3527 = vrot.lane.b32.xlu0 %v2757_v44, %s4611_s5  ;;  %v3638_v34 = vsel %vm3632_vm5, %v3629_v46, %v7962_v28  ;;  %4477 = vrcp.f32 %v7966_v17  ;;  %v7974_v5 = vld [vmem:[#allocation252_spill] sm:$0xff]  ;;  %v7985_v28 = vld [vmem:[#allocation135_spill] sm:$0xff]  ;;  %vm3731_vm0 = vcmask 916480  }
0x184c   : > { %v4462_v62 = vpop.eup %4461  ;;  %v3647_v16 = vsel %vm3641_vm6, %v3638_v34, %v6936_v39  ;;  %v2762_v39 = vmul.f32 %v2754_v38, %v7967_v20  ;;  %4479 = vrcp.f32 %v7969_v47  ;;  %v7984_v38 = vld [vmem:[#allocation18_spill] sm:$0xff]  ;;  %v7986_v30 = vld [vmem:[#allocation256_spill] sm:$0xff]  ;;  %v7990_v20 = vld [vmem:[#allocation35_spill] sm:$0xff] }
0x184d   : > { %3529 = vrot.lane.b32.xlu1 %v2758_v10, %s4611_s5  ;;  %v3278_v18 = vpop.permute.xlu1 %3277  ;;  %v4464_v43 = vpop.eup %4463  ;;  %v2756_v56 = vmul.f32 %v4462_v62, %v7968_v37  ;;  %4481 = vrcp.f32 %v7972_v27  ;;  %v7977_v10 = vld [vmem:[#allocation254_spill] sm:$0xff]  ;;  %v7991_v37 = vld [vmem:[#allocation137_spill] sm:$0xff] }
0x184e   : > { %v3654_v25 = vsel %vm3650_vm7, %v3645_v14, %v3278_v18  ;;  %v3284_v42 = vpop.permute.xlu0 %3283  ;;  %v4466_v19 = vpop.eup %4465  ;;  %v2934_v15 = vmul.f32 %v4464_v43, %v7971_v50  ;;  %4483 = vrcp.f32 %v7975_v13  ;;  %v7979_v14 = vld [vmem:[#allocation131_spill] sm:$0xff] }
0x184f   : > { %v3657_v40 = vsel %vm3650_vm7, %v6924_v2, %v3284_v42  ;;  %3531 = vrot.lane.b32.xlu0 %v2759_v21, %s4611_s5  ;;  %v7965_v2 = vld [vmem:[#allocation243_spill] sm:$0xff]  ;;  %v2764_v51 = vmul.f32 %v2756_v56, %v7973_v12  ;;  %v2935_v59 = vmul.f32 %v4466_v19, %v7974_v5  ;;  %4485 = vrcp.f32 %v7978_v32  ;;  %v7992_v19 = vld [vmem:[#allocation258_spill] sm:$0xff]  ;;  %v7996_v5 = vld [vmem:[#allocation268_spill] sm:$0xff] }
0x1850   : > { %v2755_v54 = vmul.f32 %v4460_v36, %v7965_v2  ;;  %v7980_v21 = vld [vmem:[#allocation255_spill] sm:$0xff]  ;;  %v7981_v36 = vld [vmem:[#allocation36_spill] sm:$0xff]  ;;  %v7988_v2 = vld [vmem:[#allocation134_spill] sm:$0xff] }
0x1851   : > { %3533 = vrot.lane.b32.xlu1 %v2760_v58, %s4611_s5  ;;  %v3282_v11 = vpop.permute.xlu1 %3281  ;;  %v4468_v35 = vpop.eup %4467  ;;  %v2943_v18 = vmul.f32 %v2935_v59, %v7979_v14  ;;  %4487 = vrcp.f32 %v7981_v36  ;;  %v7983_v58 = vld [vmem:[#allocation257_spill] sm:$0xff]  ;;  %v7995_v12 = vld [vmem:[#allocation138_spill] sm:$0xff]  ;;  %v8000_v14 = vld [vmem:[#allocation271_spill] sm:$0xff] }
0x1852   : > { %v3656_v29 = vsel %vm3650_vm7, %v3647_v16, %v3282_v11  ;;  %v3304_v48 = vpop.permute.xlu0 %3303  ;;  %v2763_v44 = vmul.f32 %v2755_v54, %v7970_v6  ;;  %v2936_v23 = vmul.f32 %v4468_v35, %v7977_v10  ;;  %4489 = vrcp.f32 %v7984_v38  ;;  %v7989_v54 = vld [vmem:[#allocation259_spill] sm:$0xff] }
0x1853   : > { %v3660_v3 = vsel %vm3659_vm8, %v6951_v60, %v3304_v48  ;;  %3535 = vrot.lane.b32.xlu0 %v2761_v1, %s4611_s5  ;;  %v4470_v55 = vpop.eup %4469  ;;  %4491 = vrcp.f32 %v7987_v7 }
0x1854   : > { %v2937_v8 = vmul.f32 %v4470_v55, %v7980_v21  ;;  %4493 = vrcp.f32 %v7990_v20 }
0x1855   : > { %3537 = vrot.lane.b32.xlu1 %v2762_v39, %s4611_s5  ;;  %v3286_v22 = vpop.permute.xlu1 %3285  ;;  %v4472_v45 = vpop.eup %4471 }
0x1856   : > { %v3658_v60 = vsel %vm3650_vm7, %v6973_v4, %v3286_v22  ;;  %v3308_v52 = vpop.permute.xlu0 %3307  ;;  %v2942_v4 = vmul.f32 %v2934_v15, %v7976_v53  ;;  %v4474_v9 = vpop.eup %4473  ;;  %v2938_v49 = vmul.f32 %v4472_v45, %v7983_v58  ;;  %v2945_v34 = vmul.f32 %v2937_v8, %v7985_v28  ;;  %v7994_v15 = vld [vmem:[#allocation269_spill] sm:$0xff] }
0x1857   : > { %v3662_v0 = vsel %vm3659_vm8, %v6982_v57, %v3308_v52  ;;  %3539 = vrot.lane.b32.xlu0 %v2763_v44, %s4611_s5  ;;  %v4476_v46 = vpop.eup %4475  ;;  %v2939_v16 = vmul.f32 %v4474_v9, %v7986_v30  ;;  %v7993_v44 = vld [vmem:[#allocation136_spill] sm:$0xff]  ;;  %v8001_v9 = vld [vmem:[#allocation150_spill] sm:$0xff]  ;;  %v8005_v30 = vld [vmem:[#allocation151_spill] sm:$0xff] }
0x1858   : > { %v4478_v11 = vpop.eup %4477  ;;  %v2940_v43 = vmul.f32 %v4476_v46, %v7989_v54  ;;  %v8008_v54 = vld [vmem:[#allocation274_spill] sm:$0xff] }
0x1859   : > { %3541 = vrot.lane.b32.xlu1 %v2764_v51, %s4611_s5  ;;  %v3306_v31 = vpop.permute.xlu1 %3305  ;;  %v4480_v48 = vpop.eup %4479  ;;  %v2947_v56 = vmul.f32 %v2939_v16, %v7991_v37  ;;  %v2941_v47 = vmul.f32 %v4478_v11, %v7992_v19  ;;  %v8006_v11 = vld [vmem:[#allocation275_spill] sm:$0xff] }
0x185a   : > { %v3661_v57 = vsel %vm3659_vm8, %v7003_v33, %v3306_v31  ;;  %v3312_v41 = vpop.permute.xlu0 %3311  ;;  %v7982_v33 = vld [vmem:[#allocation133_spill] sm:$0xff]  ;;  %v4482_v22 = vpop.eup %4481  ;;  %v2948_v50 = vmul.f32 %v2940_v43, %v7993_v44  ;;  %v3119_v35 = vmul.f32 %v4480_v48, %v7994_v15 }
0x185b   : > { %v3664_v63 = vsel %vm3659_vm8, %v7010_v61, %v3312_v41  ;;  %3559 = vrot.lane.b32.xlu0 %v2942_v4, %s4612_s6  ;;  %v2944_v42 = vmul.f32 %v2936_v23, %v7982_v33  ;;  %v2949_v51 = vmul.f32 %v2941_v47, %v7995_v12  ;;  %v3120_v59 = vmul.f32 %v4482_v22, %v7996_v5  ;;  %v7997_v31 = vld [vmem:[#allocation149_spill] sm:$0xff]  ;;  %v7998_v4 = vld [vmem:[#allocation270_spill] sm:$0xff]  ;;  %v7999_v41 = vld [vmem:[#allocation148_spill] sm:$0xff] }
0x185c   : > { %v3127_v53 = vmul.f32 %v3119_v35, %v7997_v31 }
0x185d   : > { %3561 = vrot.lane.b32.xlu1 %v2943_v18, %s4612_s6  ;;  %v3310_v26 = vpop.permute.xlu1 %3309  ;;  %v3128_v32 = vmul.f32 %v3120_v59, %v7999_v41 }
0x185e   : > { %v3663_v61 = vsel %vm3659_vm8, %v3654_v25, %v3310_v26  ;;  %v3316_v24 = vpop.permute.xlu0 %3315  ;;  %v2946_v25 = vmul.f32 %v2938_v49, %v7988_v2  ;;  %v8002_v26 = vld [vmem:[#allocation273_spill] sm:$0xff]  ;;  %v8003_v49 = vld [vmem:[#allocation152_spill] sm:$0xff]  ;;  %v8007_v2 = vld [vmem:[#allocation154_spill] sm:$0xff] }
0x185f   : > { %v3666_v62 = vsel %vm3659_vm8, %v3657_v40, %v3316_v24  ;;  %3563 = vrot.lane.b32.xlu0 %v2944_v42, %s4612_s6  ;;  %v8004_v24 = vld [vmem:[#allocation272_spill] sm:$0xff] }
0x1861   : > { %3565 = vrot.lane.b32.xlu1 %v2945_v34, %s4612_s6  ;;  %v3314_v1 = vpop.permute.xlu1 %3313 }
0x1862   : > { %v3665_v40 = vsel %vm3659_vm8, %v3656_v29, %v3314_v1  ;;  %v3336_v17 = vpop.permute.xlu0 %3335  ;;  %v4484_v29 = vpop.eup %4483 }
0x1863   : > { %v3669_v39 = vsel %vm3668_vm9, %v3660_v3, %v3336_v17  ;;  %3567 = vrot.lane.b32.xlu0 %v2946_v25, %s4612_s6  ;;  %v4486_v55 = vpop.eup %4485  ;;  %v3121_v10 = vmul.f32 %v4484_v29, %v7998_v4  ;;  %v8009_v17 = vld [vmem:[#allocation153_spill] sm:$0xff] }
0x1864   : > { %v4488_v23 = vpop.eup %4487  ;;  %v3122_v18 = vmul.f32 %v4486_v55, %v8000_v14 }
0x1865   : > { %3569 = vrot.lane.b32.xlu1 %v2947_v56, %s4612_s6  ;;  %v3318_v6 = vpop.permute.xlu1 %3317  ;;  %v4490_v21 = vpop.eup %4489  ;;  %v3129_v36 = vmul.f32 %v3121_v10, %v8001_v9  ;;  %v3123_v33 = vmul.f32 %v4488_v23, %v8002_v26 }
0x1866   : > { %v3667_v52 = vsel %vm3659_vm8, %v3658_v60, %v3318_v6  ;;  %v3340_v27 = vpop.permute.xlu0 %3339  ;;  %v4492_v42 = vpop.eup %4491  ;;  %v3130_v46 = vmul.f32 %v3122_v18, %v8003_v49  ;;  %v3124_v38 = vmul.f32 %v4490_v21, %v8004_v24 }
0x1867   : > { %v3671_v3 = vsel %vm3668_vm9, %v3662_v0, %v3340_v27  ;;  %3571 = vrot.lane.b32.xlu0 %v2948_v50, %s4612_s6  ;;  %v4494_v28 = vpop.eup %4493  ;;  %v3131_v16 = vmul.f32 %v3123_v33, %v8005_v30  ;;  %v3125_v7 = vmul.f32 %v4492_v42, %v8006_v11 }
0x1868   : > { %v3132_v25 = vmul.f32 %v3124_v38, %v8007_v2  ;;  %v3126_v43 = vmul.f32 %v4494_v28, %v8008_v54 }
0x1869   : > { %3573 = vrot.lane.b32.xlu1 %v2949_v51, %s4612_s6  ;;  %v3338_v13 = vpop.permute.xlu1 %3337  ;;  %v3133_v20 = vmul.f32 %v3125_v7, %v8009_v17 }
0x186a   : > { %v3670_v60 = vsel %vm3668_vm9, %v3661_v57, %v3338_v13  ;;  %v3344_v45 = vpop.permute.xlu0 %3343 }
0x186b   : > { %v3673_v0 = vsel %vm3668_vm9, %v3664_v63, %v3344_v45  ;;  %3591 = vrot.lane.b32.xlu0 %v3127_v53, %s4613_s7 }
0x186d   : > { %3593 = vrot.lane.b32.xlu1 %v3128_v32, %s4613_s7  ;;  %v3342_v8 = vpop.permute.xlu1 %3341 }
0x186e   : > { %v3672_v57 = vsel %vm3668_vm9, %v3663_v61, %v3342_v8  ;;  %v3348_v58 = vpop.permute.xlu0 %3347 }
0x186f   : > { %v3675_v63 = vsel %vm3668_vm9, %v3666_v62, %v3348_v58  ;;  %3595 = vrot.lane.b32.xlu0 %v3129_v36, %s4613_s7 }
0x1871   : > { %v3346_v34 = vpop.permute.xlu1 %3345  ;;  %3597 = vrot.lane.b32.xlu1 %v3130_v46, %s4613_s7 }
0x1872   : > { %v3674_v61 = vsel %vm3668_vm9, %v3665_v40, %v3346_v34  ;;  %v3368_v1 = vpop.permute.xlu0 %3367  ;;  %v8010_v40 = vld [vmem:[#allocation155_spill] sm:$0xff] }
0x1873   : > { %v3678_v62 = vsel %vm3677_vm10, %v3669_v39, %v3368_v1  ;;  %3599 = vrot.lane.b32.xlu0 %v3131_v16, %s4613_s7  ;;  %v3134_v39 = vmul.f32 %v3126_v43, %v8010_v40 }
0x1875   : > { %v3350_v48 = vpop.permute.xlu1 %3349  ;;  %3601 = vrot.lane.b32.xlu1 %v3132_v25, %s4613_s7 }
0x1876   : > { %v3676_v37 = vsel %vm3668_vm9, %v3667_v52, %v3350_v48  ;;  %v3372_v56 = vpop.permute.xlu0 %3371 }
0x1877   : > { %v3680_v19 = vsel %vm3677_vm10, %v3671_v3, %v3372_v56  ;;  %3603 = vrot.lane.b32.xlu0 %v3133_v20, %s4613_s7 }
0x1879   : > { %v3370_v47 = vpop.permute.xlu1 %3369  ;;  %3605 = vrot.lane.b32.xlu1 %v3134_v39, %s4613_s7 }
0x187a   : > { %v3679_v22 = vsel %vm3677_vm10, %v3670_v60, %v3370_v47  ;;  %v3376_v6 = vpop.permute.xlu0 %3375 }
0x187b   : > { %v3682_v44 = vsel %vm3677_vm10, %v3673_v0, %v3376_v6 }
0x187d   : > { %v3374_v50 = vpop.permute.xlu1 %3373 }
0x187e   : > { %v3681_v15 = vsel %vm3677_vm10, %v3672_v57, %v3374_v50  ;;  %v3380_v35 = vpop.permute.xlu0 %3379 }
0x187f   : > { %v3684_v29 = vsel %vm3677_vm10, %v3675_v63, %v3380_v35 }
0x1881   : > { %v3378_v52 = vpop.permute.xlu1 %3377 }
0x1882   : > { %v3683_v27 = vsel %vm3677_vm10, %v3674_v61, %v3378_v52  ;;  %v3400_v3 = vpop.permute.xlu0 %3399 }
0x1883   : > { %v3687_v12 = vsel %vm3686_vm11, %v3678_v62, %v3400_v3 }
0x1885   : > { %v3382_v51 = vpop.permute.xlu1 %3381 }
0x1886   : > { %v3685_v5 = vsel %vm3677_vm10, %v3676_v37, %v3382_v51  ;;  %v3404_v59 = vpop.permute.xlu0 %3403 }
0x1887   : > { %v3689_v55 = vsel %vm3686_vm11, %v3680_v19, %v3404_v59 }
0x1889   : > { %v3402_v13 = vpop.permute.xlu1 %3401 }
0x188a   : > { %v3688_v31 = vsel %vm3686_vm11, %v3679_v22, %v3402_v13  ;;  %v3408_v53 = vpop.permute.xlu0 %3407 }
0x188b   : > { %v3691_v4 = vsel %vm3686_vm11, %v3682_v44, %v3408_v53 }
0x188d   : > { %v3406_v10 = vpop.permute.xlu1 %3405 }
0x188e   : > { %v3690_v23 = vsel %vm3686_vm11, %v3681_v15, %v3406_v10  ;;  %v3412_v60 = vpop.permute.xlu0 %3411 }
0x188f   : > { %v3693_v45 = vsel %vm3686_vm11, %v3684_v29, %v3412_v60 }
0x1891   : > { %v3410_v0 = vpop.permute.xlu1 %3409 }
0x1892   : > { %v3692_v41 = vsel %vm3686_vm11, %v3683_v27, %v3410_v0  ;;  %v3432_v32 = vpop.permute.xlu0 %3431 }
0x1893   : > { %v3696_v14 = vsel %vm3695_vm12, %v3687_v12, %v3432_v32 }
0x1895   : > { %v3414_v18 = vpop.permute.xlu1 %3413 }
0x1896   : > { %v3694_v21 = vsel %vm3686_vm11, %v3685_v5, %v3414_v18  ;;  %v3436_v8 = vpop.permute.xlu0 %3435 }
0x1897   : > { %v3698_v9 = vsel %vm3695_vm12, %v3689_v55, %v3436_v8 }
0x1899   : > { %v3434_v36 = vpop.permute.xlu1 %3433 }
0x189a   : > { %v7149_v26 = vsel %vm3695_vm12, %v3688_v31, %v3434_v36  ;;  %v3440_v33 = vpop.permute.xlu0 %3439 }
0x189b   : > { %v7152_v42 = vsel %vm3695_vm12, %v3691_v4, %v3440_v33 }
0x189d   : > { %v3438_v57 = vpop.permute.xlu1 %3437 }
0x189e   : > { %v7155_v58 = vsel %vm3695_vm12, %v3690_v23, %v3438_v57  ;;  %v3444_v63 = vpop.permute.xlu0 %3443 }
0x189f   : > { %v7158_v49 = vsel %vm3695_vm12, %v3693_v45, %v3444_v63 }
0x18a1   : > { %v3442_v46 = vpop.permute.xlu1 %3441 }
0x18a2   : > { %v7161_v24 = vsel %vm3695_vm12, %v3692_v41, %v3442_v46  ;;  %v3464_v38 = vpop.permute.xlu0 %3463 }
0x18a3   : > { %v3705_v3 = vsel %vm3704_vm13, %v3696_v14, %v3464_v38 }
0x18a5   : > { %v3446_v28 = vpop.permute.xlu1 %3445 }
0x18a6   : > { %v7164_v34 = vsel %vm3695_vm12, %v3694_v21, %v3446_v28  ;;  %v3468_v30 = vpop.permute.xlu0 %3467 }
0x18a7   : > { %v3707_v13 = vsel %vm3704_vm13, %v3698_v9, %v3468_v30 }
0x18a9   : > { %v3466_v16 = vpop.permute.xlu1 %3465 }
0x18aa   : > { %v3472_v11 = vpop.permute.xlu0 %3471  ;;  %v3706_v23 = vsel %vm3704_vm13, %v7149_v26, %v3466_v16 }
0x18ab   : > { %v3709_v0 = vsel %vm3704_vm13, %v7152_v42, %v3472_v11 }
0x18ad   : > { %v3470_v7 = vpop.permute.xlu1 %3469 }
0x18ae   : > { %v7166_v61 = vpop.permute.xlu0 %3475  ;;  %v3708_v36 = vsel %vm3704_vm13, %v7155_v58, %v3470_v7 }
0x18af   : > { %v3711_v57 = vsel %vm3704_vm13, %v7158_v49, %v7166_v61 }
0x18b1   : > { %v7168_v1 = vpop.permute.xlu1 %3473 }
0x18b2   : > { %v3496_v62 = vpop.permute.xlu0 %3495  ;;  %v3710_v49 = vsel %vm3704_vm13, %v7161_v24, %v7168_v1 }
0x18b3   : > { %v3714_v12 = vsel %vm3713_vm14, %v3705_v3, %v3496_v62 }
0x18b5   : > { %v7170_v2 = vpop.permute.xlu1 %3477 }
0x18b6   : > { %v3500_v25 = vpop.permute.xlu0 %3499  ;;  %v3712_v24 = vsel %vm3704_vm13, %v7164_v34, %v7170_v2 }
0x18b7   : > { %v3716_v53 = vsel %vm3713_vm14, %v3707_v13, %v3500_v25 }
0x18b9   : > { %v3498_v54 = vpop.permute.xlu1 %3497 }
0x18ba   : > { %v3504_v43 = vpop.permute.xlu0 %3503  ;;  %v3715_v41 = vsel %vm3713_vm14, %v3706_v23, %v3498_v54 }
0x18bb   : > { %v3718_v14 = vsel %vm3713_vm14, %v3709_v0, %v3504_v43 }
0x18bd   : > { %v3502_v48 = vpop.permute.xlu1 %3501 }
0x18be   : > { %v3508_v17 = vpop.permute.xlu0 %3507  ;;  %v3717_v63 = vsel %vm3713_vm14, %v3708_v36, %v3502_v48 }
0x18bf   : > { %v3720_v38 = vsel %vm3713_vm14, %v3711_v57, %v3508_v17 }
0x18c1   : > { %v7172_v20 = vpop.permute.xlu1 %3505 }
0x18c2   : > { %v3528_v37 = vpop.permute.xlu0 %3527  ;;  %v3719_v62 = vsel %vm3713_vm14, %v3710_v49, %v7172_v20 }
0x18c3   : > { %v3723_v51 = vsel %vm3722_vm15, %v3714_v12, %v3528_v37 }
0x18c5   : > { %v7174_v56 = vpop.permute.xlu1 %3509 }
0x18c6   : > { %v3532_v19 = vpop.permute.xlu0 %3531  ;;  %v3721_v17 = vsel %vm3713_vm14, %v3712_v24, %v7174_v56 }
0x18c7   : > { %v3725_v4 = vsel %vm3722_vm15, %v3716_v53, %v3532_v19 }
0x18c9   : > { %v3530_v40 = vpop.permute.xlu1 %3529 }
0x18ca   : > { %v3536_v39 = vpop.permute.xlu0 %3535  ;;  %v3724_v18 = vsel %vm3722_vm15, %v3715_v41, %v3530_v40 }
0x18cb   : > { %v3727_v21 = vsel %vm3722_vm15, %v3718_v14, %v3536_v39 }
0x18cd   : > { %v3534_v47 = vpop.permute.xlu1 %3533 }
0x18ce   : > { %v3540_v22 = vpop.permute.xlu0 %3539  ;;  %v3726_v58 = vsel %vm3722_vm15, %v3717_v63, %v3534_v47 }
0x18cf   : > { %v3729_v28 = vsel %vm3722_vm15, %v3720_v38, %v3540_v22 }
0x18d1   : > { %v7176_v6 = vpop.permute.xlu1 %3537 }
0x18d2   : > { %v3560_v44 = vpop.permute.xlu0 %3559  ;;  %v3728_v54 = vsel %vm3722_vm15, %v3719_v62, %v7176_v6 }
0x18d3   : > { %v3732_v59 = vsel %vm3731_vm0, %v3723_v51, %v3560_v44 }
0x18d5   : > { %v7179_v50 = vpop.permute.xlu1 %3541 }
0x18d6   : > { %v3564_v15 = vpop.permute.xlu0 %3563  ;;  %v3730_v20 = vsel %vm3722_vm15, %v3721_v17, %v7179_v50 }
0x18d7   : > { %v3734_v60 = vsel %vm3731_vm0, %v3725_v4, %v3564_v15 }
0x18d9   : > { %v3562_v35 = vpop.permute.xlu1 %3561 }
0x18da   : > { %v3568_v29 = vpop.permute.xlu0 %3567  ;;  %v3733_v8 = vsel %vm3731_vm0, %v3724_v18, %v3562_v35 }
0x18db   : > { %v3736_v26 = vsel %vm3731_vm0, %v3727_v21, %v3568_v29 }
0x18dd   : > { %v3566_v52 = vpop.permute.xlu1 %3565 }
0x18de   : > { %v3572_v27 = vpop.permute.xlu0 %3571  ;;  %v3735_v30 = vsel %vm3731_vm0, %v3726_v58, %v3566_v52 }
0x18df   : > { %v3738_v11 = vsel %vm3731_vm0, %v3729_v28, %v3572_v27 }
0x18e1   : > { %v3570_v5 = vpop.permute.xlu1 %3569 }
0x18e2   : > { %v3592_v55 = vpop.permute.xlu0 %3591  ;;  %v3737_v43 = vsel %vm3731_vm0, %v3728_v54, %v3570_v5 }
0x18e3   : > { %v3741_v31 = vsel %vm3740_vm1, %v3732_v59, %v3592_v55 }
0x18e4   : > { %3749 = vst [vmem:[%s7187_s13] sm:$0xff] %v3741_v31 }
0x18e5   : > { %v3574_v10 = vpop.permute.xlu1 %3573 }
0x18e6   : > { %v3596_v45 = vpop.permute.xlu0 %3595  ;;  %v3739_v37 = vsel %vm3731_vm0, %v3730_v20, %v3574_v10 }
0x18e7   : > { %v3743_v32 = vsel %vm3740_vm1, %v3734_v60, %v3596_v45 }
0x18e8   : > { %3751 = vst [vmem:[%s7187_s13 + $0x10] sm:$0xff] %v3743_v32 }
0x18e9   : > { %v3594_v9 = vpop.permute.xlu1 %3593 }
0x18ea   : > { %v3742_v33 = vsel %vm3740_vm1, %v3733_v8, %v3594_v9  ;;  %v3600_v42 = vpop.permute.xlu0 %3599 }
0x18eb   : > { %3750 = vst [vmem:[%s7187_s13 + $0x8] sm:$0xff] %v3742_v33  ;;  %v3745_v46 = vsel %vm3740_vm1, %v3736_v26, %v3600_v42 }
0x18ec   : > { %3753 = vst [vmem:[%s7187_s13 + $0x20] sm:$0xff] %v3745_v46 }
0x18ed   : > { %v3598_v16 = vpop.permute.xlu1 %3597 }
0x18ee   : > { %v3744_v7 = vsel %vm3740_vm1, %v3735_v30, %v3598_v16  ;;  %v3604_v61 = vpop.permute.xlu0 %3603 }
0x18ef   : > { %3752 = vst [vmem:[%s7187_s13 + $0x18] sm:$0xff] %v3744_v7  ;;  %v3747_v25 = vsel %vm3740_vm1, %v3738_v11, %v3604_v61 }
0x18f0   : > { %3755 = vst [vmem:[%s7187_s13 + $0x30] sm:$0xff] %v3747_v25 }
0x18f1   : > { %v3602_v48 = vpop.permute.xlu1 %3601 }
0x18f2   : > { %v3746_v1 = vsel %vm3740_vm1, %v3737_v43, %v3602_v48 }
0x18f3   : > { %3754 = vst [vmem:[%s7187_s13 + $0x28] sm:$0xff] %v3746_v1 }
0x18f5   : > { %v3606_v19 = vpop.permute.xlu1 %3605 }
0x18f6   : > { %v3748_v40 = vsel %vm3740_vm1, %v3739_v37, %v3606_v19 }
0x18f7   : > { %3756 = vst [vmem:[%s7187_s13 + $0x38] sm:$0xff] %v3748_v40 }
0x18f8 PF: > { %s12_s9 = sadd.s32 1, %s4597_s9  }
0x18f9   : > { %p9_p6 = scmp.ge.s32.totalorder %s12_s9, 4  }
0x18fb   :  { %11 = sbr.rel (!%p9_p6) target bundleno = 1 (0x1), region = 76 }

</bundles_post_ra>
